<compile_context>
chip_gen: v7x
topology: tpu7x:2x2x1
jax: 0.10.0
libtpu: 0.0.40
codegen_flags: <defaults>
</compile_context>

<pallas_src>
import numpy as np

import jax
import jax.numpy as jnp
from jax.experimental import pallas as pl
from jax.experimental.pallas import tpu as pltpu


# ----------------------------------------------------------------------------
# helpers
# ----------------------------------------------------------------------------
_TM_CAP = 512          # inner lane-chunk size (multiple of 128, bounds vreg/VMEM pressure)


def _cdiv(a, b):
    return -(-a // b)


def _round_up(a, b):
    return _cdiv(a, b) * b


def _geom(n, h, w):
    """Canonical 'padded interior' flat geometry for resolution (h, w)."""
    hp, wp = h + 2, w + 2              # pad=1 border baked into the layout
    lgeom = n * hp * wp
    tm = min(_round_up(lgeom, 128), _TM_CAP)
    nt = _cdiv(lgeom, tm)
    lres = _round_up(nt * tm + 2 * wp + 2, 128)   # covers max tap read + write
    return hp, wp, lgeom, tm, nt, lres


def _vmem_full(a):
    """Full-array VMEM block (resident once, no per-step DMA)."""
    nd = a.ndim
    return pl.BlockSpec(a.shape, lambda i: (0,) * nd)


def _interior_mask(n, h, w, lres):
    """f32 (1, lres) mask: 1 on valid interior positions of the padded layout."""
    hp, wp = h + 2, w + 2
    m2 = np.zeros((hp, wp), np.float32)
    m2[1:h + 1, 1:w + 1] = 1.0
    m = np.tile(m2.reshape(-1), n)
    m = np.pad(m, (0, lres - n * hp * wp))
    return jnp.asarray(m.reshape(1, lres))


# ----------------------------------------------------------------------------
# Kernel 1: fused chain of stride-1 3x3 conv stages (plain and residual).
#   Every stage: h = conv3x3(x) + b1 ; [ReLU] ; optionally y = w2 @ h + b2
#   (1x1 conv) ; optionally y += x (skip) ; optionally ReLU ; mask border.
#   The activation ping-pongs between two VMEM scratch buffers; only the
#   final stage's result is written to HBM (bf16).
# ----------------------------------------------------------------------------
def _make_chain_kernel(cfgs, tm, nt, wp):
    nstages = len(cfgs)

    def kernel(*refs):
        x_ref, mask_ref = refs[0], refs[1]
        pos = 2
        wrefs = []
        for cfg in cfgs:
            k = 4 if cfg["has2"] else 2
            wrefs.append(refs[pos:pos + k])
            pos += k
        o_ref = refs[pos]
        bufs = (refs[pos + 1], refs[pos + 2])

        for s, cfg in enumerate(cfgs):
            in_ref = x_ref if s == 0 else bufs[(s - 1) % 2]
            out_ref = o_ref if s == nstages - 1 else bufs[s % 2]
            # Border / tail of the output buffer must be exactly zero for the
            # next stage's taps (and for the consumer of the HBM output).
            out_ref[...] = jnp.zeros(out_ref.shape, out_ref.dtype)

            w1 = wrefs[s][0][...]                      # (c1p, 9*cinp) f32
            b1 = wrefs[s][1][...]                      # (c1p, 1)      f32
            if cfg["has2"]:
                w2 = wrefs[s][2][...]                  # (c2p, c1p)    f32
                b2 = wrefs[s][3][...]                  # (c2p, 1)      f32
            cinp, coutp = cfg["cinp"], cfg["coutp"]

            for j in range(nt):                        # static inner M loop
                base = j * tm
                # Merge the 9 taps into one (9*cinp, tm) operand -> single dot.
                xs = jnp.concatenate(
                    [in_ref[0:cinp, pl.ds(base + ky * wp + kx, tm)]
                     .astype(jnp.float32)
                     for ky in range(3) for kx in range(3)], axis=0)
                h = jnp.dot(w1, xs, preferred_element_type=jnp.float32) + b1
                if cfg["relu1"]:
                    h = jnp.maximum(h, 0.0)
                if cfg["has2"]:
                    y = jnp.dot(w2, h, preferred_element_type=jnp.float32) + b2
                else:
                    y = h
                if cfg["skip"]:
                    y = y + in_ref[0:coutp,
                                   pl.ds(wp + 1 + base, tm)].astype(jnp.float32)
                if cfg["relu_out"]:
                    y = jnp.maximum(y, 0.0)
                m = mask_ref[:, pl.ds(wp + 1 + base, tm)]
                y = jnp.where(m > 0.5, y, 0.0)         # zero the garbage border
                out_ref[0:coutp, pl.ds(wp + 1 + base, tm)] = y.astype(out_ref.dtype)

    return kernel


def _chain_call(act, stages):
    """stages: list of (arrays_dict, flags_dict). One pallas_call for all."""
    data = act["data"]
    n, hh, ww = act["n"], act["h"], act["w"]
    hp, wp, lgeom, tm, nt, lres = _geom(n, hh, ww)
    assert data.shape[1] == lres
    mask = _interior_mask(n, hh, ww, lres)

    cfgs, args, in_specs = [], [data, mask], [_vmem_full(data), _vmem_full(mask)]
    maxcp = data.shape[0]
    for arrays, flags in stages:
        w1, b1 = arrays["w1"], arrays["b1"]
        c1p = w1.shape[0]
        cinp = w1.shape[1] // 9
        has2 = "w2" in arrays
        args += [w1, b1]
        in_specs += [_vmem_full(w1), _vmem_full(b1)]
        if has2:
            w2, b2 = arrays["w2"], arrays["b2"]
            coutp = w2.shape[0]
            args += [w2, b2]
            in_specs += [_vmem_full(w2), _vmem_full(b2)]
        else:
            coutp = c1p
        cfgs.append(dict(cinp=cinp, c1p=c1p, coutp=coutp, has2=has2,
                         relu1=flags["relu1"], skip=flags["skip"],
                         relu_out=flags["relu_out"]))
        maxcp = max(maxcp, c1p, coutp)
    assert data.shape[0] >= cfgs[0]["cinp"]

    kernel = _make_chain_kernel(cfgs, tm, nt, wp)
    out = pl.pallas_call(
        kernel,
        out_shape=jax.ShapeDtypeStruct((cfgs[-1]["coutp"], lres), jnp.bfloat16),
        grid=(1,),
        in_specs=in_specs,
        out_specs=pl.BlockSpec((cfgs[-1]["coutp"], lres), lambda i: (0, 0)),
        scratch_shapes=[pltpu.VMEM((maxcp, lres), jnp.bfloat16),
                        pltpu.VMEM((maxcp, lres), jnp.bfloat16)],
        compiler_params=pltpu.CompilerParams(dimension_semantics=("arbitrary",)),
    )(*args)
    return {"data": out, "n": n, "h": hh, "w": ww}


# ----------------------------------------------------------------------------
# Kernel 2: 4x4 stride-2 conv (+ folded BN + ReLU) on the 2x2 phase-decomposed
# padded activation.  Output is top-left aligned on the phase-grid geometry;
# the wrapper relayouts it into the padded-interior layout of the new
# (halved) resolution.
# ----------------------------------------------------------------------------
def _make_s2_kernel(cinp, wg, tm, nt):
    def kernel(x_ref, w_ref, b_ref, o_ref):
        wmat = w_ref[...]                              # (c1p, 16*cinp) f32
        bias = b_ref[...]                              # (c1p, 1)       f32
        for j in range(nt):
            base = j * tm
            xs = jnp.concatenate(
                [x_ref[(ky % 2) * 2 + (kx % 2), :,
                       pl.ds(base + (ky // 2) * wg + (kx // 2), tm)]
                 .astype(jnp.float32)
                 for ky in range(4) for kx in range(4)], axis=0)
            h = jnp.dot(wmat, xs, preferred_element_type=jnp.float32) + bias
            h = jnp.maximum(h, 0.0)
            o_ref[:, pl.ds(base, tm)] = h.astype(o_ref.dtype)
    return kernel


def _downsample_conv(act, p):
    data = act["data"]
    n, hh, ww = act["n"], act["h"], act["w"]
    assert hh % 2 == 0 and ww % 2 == 0
    hp, wp = hh + 2, ww + 2
    cinp = data.shape[0]
    lgeom = n * hp * wp
    grid4 = data[:, :lgeom].reshape(cinp, n, hp, wp)

    hg, wg = hp // 2, wp // 2
    lph = n * hg * wg
    xph = jnp.stack([grid4[:, :, py::2, px::2] for py in (0, 1) for px in (0, 1)],
                    axis=0).reshape(4, cinp, lph)
    tm = min(_round_up(lph, 128), _TM_CAP)
    nt = _cdiv(lph, tm)
    lin = _round_up(nt * tm + wg + 2, 128)
    xph = jnp.pad(xph, ((0, 0), (0, 0), (0, lin - lph)))

    w4, b4 = p["w4"], p["b4"]
    c1p = w4.shape[0]
    out = pl.pallas_call(
        _make_s2_kernel(cinp, wg, tm, nt),
        out_shape=jax.ShapeDtypeStruct((c1p, nt * tm), jnp.bfloat16),
        grid=(1,),
        in_specs=[_vmem_full(xph), _vmem_full(w4), _vmem_full(b4)],
        out_specs=pl.BlockSpec((c1p, nt * tm), lambda i: (0, 0)),
        compiler_params=pltpu.CompilerParams(dimension_semantics=("arbitrary",)),
    )(xph, w4, b4)

    oh, ow = hh // 2, ww // 2
    y = out[:, :lph].reshape(c1p, n, hg, wg)[:, :, :oh, :ow]
    y = jnp.pad(y, ((0, 0), (0, 0), (1, 1), (1, 1)))           # new zero border
    _, _, lg2, _, _, lres2 = _geom(n, oh, ow)
    y = jnp.pad(y.reshape(c1p, lg2), ((0, 0), (0, lres2 - lg2)))
    return {"data": y, "n": n, "h": oh, "w": ow}


# ----------------------------------------------------------------------------
# Activation layout in/out of the kernel pipeline
# ----------------------------------------------------------------------------
def _to_act(x_nchw):
    n, c, h, w = x_nchw.shape
    cp = _round_up(c, 16)
    _, _, lgeom, _, _, lres = _geom(n, h, w)
    xt = jnp.transpose(x_nchw, (1, 0, 2, 3)).astype(jnp.float32)
    xt = jnp.pad(xt, ((0, cp - c), (0, 0), (1, 1), (1, 1)))
    xt = jnp.pad(xt.reshape(cp, lgeom), ((0, 0), (0, lres - lgeom)))
    return {"data": xt.astype(jnp.bfloat16), "n": n, "h": h, "w": w}


def _from_act(act, cout):
    n, h, w = act["n"], act["h"], act["w"]
    hp, wp = h + 2, w + 2
    d = act["data"][:cout, :n * hp * wp].reshape(cout, n, hp, wp)
    d = d[:, :, 1:h + 1, 1:w + 1]
    return jnp.transpose(d, (1, 0, 2, 3)).astype(jnp.float32)


# ----------------------------------------------------------------------------
# Parameter preparation: BN fold + transpose + pad + pack, done ONCE.
# ----------------------------------------------------------------------------
def _fold_bn(w, b, bn):
    if bn is None:
        return w, b
    gamma, beta, mean, var, eps = bn
    scale = gamma / jnp.sqrt(var + eps)
    return w * scale, beta - mean * scale + b * scale


def _prep_stage3(w, b, bn, w2=None, b2=None):
    kh, kw, cin, cout = w.shape                        # (3, 3, cin, cout) HWIO
    wf, bf = _fold_bn(w, b, bn)
    cinp = _round_up(cin, 16)
    coutp = _round_up(cout, 16)
    wm = jnp.transpose(wf, (3, 0, 1, 2)).reshape(cout, kh * kw, cin)
    wm = jnp.pad(wm, ((0, coutp - cout), (0, 0), (0, cinp - cin)))
    st = {"w1": wm.reshape(coutp, kh * kw * cinp).astype(jnp.float32),
          "b1": jnp.pad(bf, (0, coutp - cout)).reshape(coutp, 1).astype(jnp.float32)}
    if w2 is not None:                                 # residual 1x1 conv
        c2 = w2.shape[3]
        c2p = _round_up(c2, 16)
        w2m = jnp.pad(jnp.transpose(w2[0, 0], (1, 0)),
                      ((0, c2p - c2), (0, coutp - cout)))
        st["w2"] = w2m.astype(jnp.float32)
        st["b2"] = jnp.pad(b2, (0, c2p - c2)).reshape(c2p, 1).astype(jnp.float32)
    return st


def _prep_conv4(w, b, bn):
    kh, kw, cin, cout = w.shape                        # (4, 4, cin, cout)
    wf, bf = _fold_bn(w, b, bn)
    cinp = _round_up(cin, 16)
    coutp = _round_up(cout, 16)
    wm = jnp.transpose(wf, (3, 0, 1, 2)).reshape(cout, kh * kw, cin)
    wm = jnp.pad(wm, ((0, coutp - cout), (0, 0), (0, cinp - cin)))
    return {"w4": wm.reshape(coutp, kh * kw * cinp).astype(jnp.float32),
            "b4": jnp.pad(bf, (0, coutp - cout)).reshape(coutp, 1).astype(jnp.float32)}


def prepare_encoder_params(params, use_bn=True):
    """Fold BN, transpose, pad and cast all weights once (arrays-only pytree)."""
    bn_of = lambda p: p["bn"] if use_bn else None
    st = params["start"]
    prep = {"start": [_prep_stage3(st["w1"], st["b1"], bn_of(st)),
                      _prep_stage3(st["w2"], st["b2"], None)]}
    prep["down"] = []
    for blk in params["down"]:
        d = blk["down"]
        prep["down"].append({
            "s2": _prep_conv4(d["w1"], d["b1"], bn_of(d)),
            "conv2": _prep_stage3(d["w2"], d["b2"], None),
            "res": [_prep_stage3(r["w1"], r["b1"], bn_of(r), w2=r["w2"], b2=r["b2"])
                    for r in blk["res"]],
        })
    prep["res"] = [_prep_stage3(r["w1"], r["b1"], bn_of(r), w2=r["w2"], b2=r["b2"])
                   for r in params["res"]]
    en = params["end"]
    prep["end"] = [_prep_stage3(en["w1"], en["b1"], bn_of(en)),
                   _prep_stage3(en["w2"], en["b2"], None)]
    return prep


# ----------------------------------------------------------------------------
# Encoder forward (5 pallas_calls for the default config)
# ----------------------------------------------------------------------------
def _plain_stages(lst):
    return [(d, dict(relu1=True, skip=False, relu_out=False)) for d in lst]


def _res_stages(lst):
    n = len(lst)
    return [(d, dict(relu1=True, skip=True, relu_out=(i == n - 1)))
            for i, d in enumerate(lst)]


def encoder_forward(x_nchw, prep, out_channels):
    act = _to_act(x_nchw)
    act = _chain_call(act, _plain_stages(prep["start"]))            # ChangeChannels start
    tail = _res_stages(prep["res"]) + _plain_stages(prep["end"])    # bottleneck + end
    ndown = len(prep["down"])
    if ndown == 0:
        act = _chain_call(act, tail)
    for i, blk in enumerate(prep["down"]):
        act = _downsample_conv(act, blk["s2"])                      # 4x4 s2 + BN + ReLU
        stages = _plain_stages([blk["conv2"]]) + _res_stages(blk["res"])
        if i == ndown - 1:
            stages = stages + tail
        act = _chain_call(act, stages)
    return _from_act(act, out_channels)


# ----------------------------------------------------------------------------
# Deterministic parameter construction (PyTorch-style uniform fan-in init)
# ----------------------------------------------------------------------------
def _conv_init(key, kh, kw, cin, cout):
    k1, k2 = jax.random.split(key)
    bound = 1.0 / (kh * kw * cin) ** 0.5
    w = jax.random.uniform(k1, (kh, kw, cin, cout), jnp.float32, -bound, bound)
    b = jax.random.uniform(k2, (cout,), jnp.float32, -bound, bound)
    return w, b


def _bn_init(cout, eps=1e-5):
    return (jnp.ones((cout,), jnp.float32), jnp.zeros((cout,), jnp.float32),
            jnp.zeros((cout,), jnp.float32), jnp.ones((cout,), jnp.float32), eps)


def _block_params(key, cin, cout, k1_size, k2_size):
    ka, kb = jax.random.split(key)
    w1, b1 = _conv_init(ka, k1_size, k1_size, cin, cout)
    w2, b2 = _conv_init(kb, k2_size, k2_size, cout, cout)
    return {"w1": w1, "b1": b1, "w2": w2, "b2": b2, "bn": _bn_init(cout)}


def make_encoder_params(key, in_channels, out_channels, num_x2downsamples=2,
                        num_resids_downsample=2, num_resids_bottleneck=2,
                        hidden_channels=None):
    base = out_channels if hidden_channels is None else hidden_channels
    ch = base // (2 ** num_x2downsamples)
    keys = jax.random.split(key, 3 + num_x2downsamples)

    params = {"start": _block_params(keys[0], in_channels, ch, 3, 3)}
    down = []
    for i in range(num_x2downsamples):
        cin, ch = ch, ch * 2
        kd, *kr = jax.random.split(keys[1 + i], 1 + num_resids_downsample)
        down.append({"down": _block_params(kd, cin, ch, 4, 3),
                     "res": [_block_params(k, ch, ch, 3, 1) for k in kr]})
    params["down"] = down
    params["res"] = [_block_params(k, ch, ch, 3, 1)
                     for k in jax.random.split(keys[-2], num_resids_bottleneck)]
    params["end"] = _block_params(keys[-1], ch, out_channels, 3, 3)
    return params


# ----------------------------------------------------------------------------
if __name__ == "__main__":
    key = jax.random.PRNGKey(0)
    pkey, xkey = jax.random.split(key)

    in_channels, out_channels = 3, 16
    params = make_encoder_params(pkey, in_channels, out_channels,
                                 num_x2downsamples=2,
                                 num_resids_downsample=2,
                                 num_resids_bottleneck=2)
    prep = prepare_encoder_params(params, use_bn=True)

    x = jax.random.normal(xkey, (2, in_channels, 16, 16), jnp.float32)

    fwd = jax.jit(lambda xx, pp: encoder_forward(xx, pp, out_channels))
    y = jax.block_until_ready(fwd(x, prep))

    assert y.shape == (2, out_channels, 4, 4), y.shape            # 16 -> 8 -> 4
    assert bool(jnp.all(y >= 0.0))                                # final ReLU
    assert bool(jnp.all(jnp.isfinite(y)))
    print("KERNEL_OK")
</pallas_src>

<mosaic_0001>
module attributes {stable_mosaic.version = 11 : i64} {
  func.func @kernel(%arg0: i32, %arg1: memref<16x1152xbf16, #tpu.memory_space<vmem>>, %arg2: memref<1x1152xf32, #tpu.memory_space<vmem>>, %arg3: memref<16x144xf32, #tpu.memory_space<vmem>>, %arg4: memref<16x1xf32, #tpu.memory_space<vmem>>, %arg5: memref<16x144xf32, #tpu.memory_space<vmem>>, %arg6: memref<16x1xf32, #tpu.memory_space<vmem>>, %arg7: memref<16x1152xbf16, #tpu.memory_space<vmem>>, %arg8: memref<16x1152xbf16, #tpu.memory_space<vmem>>, %arg9: memref<16x1152xbf16, #tpu.memory_space<vmem>>) attributes {dimension_semantics = [#tpu.dimension_semantics<arbitrary>], iteration_bounds = array<i64: 1>, scalar_prefetch = 0 : i64, scratch_operands = 2 : i64, tpu.core_type = #tpu.core_type<tc>, window_params = [{pipeline_mode = #tpu.pipeline_mode<synchronous>, transform_indices = @transform_0, window_bounds = array<i64: 16, 1152>}, {pipeline_mode = #tpu.pipeline_mode<synchronous>, transform_indices = @transform_1, window_bounds = array<i64: 1, 1152>}, {pipeline_mode = #tpu.pipeline_mode<synchronous>, transform_indices = @transform_2, window_bounds = array<i64: 16, 144>}, {pipeline_mode = #tpu.pipeline_mode<synchronous>, transform_indices = @transform_3, window_bounds = array<i64: 16, 1>}, {pipeline_mode = #tpu.pipeline_mode<synchronous>, transform_indices = @transform_4, window_bounds = array<i64: 16, 144>}, {pipeline_mode = #tpu.pipeline_mode<synchronous>, transform_indices = @transform_5, window_bounds = array<i64: 16, 1>}, {pipeline_mode = #tpu.pipeline_mode<synchronous>, transform_indices = @transform_6, window_bounds = array<i64: 16, 1152>}]} {
    %cst = arith.constant 0.000000e+00 : bf16
    %0 = vector.broadcast %cst : bf16 to vector<16x1152xbf16>
    %c0 = arith.constant 0 : index
    %c0_0 = arith.constant 0 : index
    %1 = vector.load %arg8[%c0, %c0_0] : memref<16x1152xbf16, #tpu.memory_space<vmem>>, vector<16x1152xbf16>
    tpu.vector_store %arg8[%c0, %c0_0], %0 {strides = array<i32>} : memref<16x1152xbf16, #tpu.memory_space<vmem>>, vector<16x1152xbf16>,
    %c0_1 = arith.constant 0 : index
    %c0_2 = arith.constant 0 : index
    %2 = vector.load %arg3[%c0_1, %c0_2] : memref<16x144xf32, #tpu.memory_space<vmem>>, vector<16x144xf32>
    %c0_3 = arith.constant 0 : index
    %c0_4 = arith.constant 0 : index
    %3 = vector.load %arg4[%c0_3, %c0_4] : memref<16x1xf32, #tpu.memory_space<vmem>>, vector<16x1xf32>
    %c0_5 = arith.constant 0 : index
    %c0_6 = arith.constant 0 : index
    %4 = vector.load %arg1[%c0_5, %c0_6] : memref<16x1152xbf16, #tpu.memory_space<vmem>>, vector<16x512xbf16>
    %5 = arith.extf %4 : vector<16x512xbf16> to vector<16x512xf32>
    %c0_7 = arith.constant 0 : index
    %c1 = arith.constant 1 : index
    %6 = vector.load %arg1[%c0_7, %c1] : memref<16x1152xbf16, #tpu.memory_space<vmem>>, vector<16x512xbf16>
    %7 = arith.extf %6 : vector<16x512xbf16> to vector<16x512xf32>
    %c0_8 = arith.constant 0 : index
    %c2 = arith.constant 2 : index
    %8 = vector.load %arg1[%c0_8, %c2] : memref<16x1152xbf16, #tpu.memory_space<vmem>>, vector<16x512xbf16>
    %9 = arith.extf %8 : vector<16x512xbf16> to vector<16x512xf32>
    %c0_9 = arith.constant 0 : index
    %c18 = arith.constant 18 : index
    %10 = vector.load %arg1[%c0_9, %c18] : memref<16x1152xbf16, #tpu.memory_space<vmem>>, vector<16x512xbf16>
    %11 = arith.extf %10 : vector<16x512xbf16> to vector<16x512xf32>
    %c0_10 = arith.constant 0 : index
    %c19 = arith.constant 19 : index
    %12 = vector.load %arg1[%c0_10, %c19] : memref<16x1152xbf16, #tpu.memory_space<vmem>>, vector<16x512xbf16>
    %13 = arith.extf %12 : vector<16x512xbf16> to vector<16x512xf32>
    %c0_11 = arith.constant 0 : index
    %c20 = arith.constant 20 : index
    %14 = vector.load %arg1[%c0_11, %c20] : memref<16x1152xbf16, #tpu.memory_space<vmem>>, vector<16x512xbf16>
    %15 = arith.extf %14 : vector<16x512xbf16> to vector<16x512xf32>
    %c0_12 = arith.constant 0 : index
    %c36 = arith.constant 36 : index
    %16 = vector.load %arg1[%c0_12, %c36] : memref<16x1152xbf16, #tpu.memory_space<vmem>>, vector<16x512xbf16>
    %17 = arith.extf %16 : vector<16x512xbf16> to vector<16x512xf32>
    %c0_13 = arith.constant 0 : index
    %c37 = arith.constant 37 : index
    %18 = vector.load %arg1[%c0_13, %c37] : memref<16x1152xbf16, #tpu.memory_space<vmem>>, vector<16x512xbf16>
    %19 = arith.extf %18 : vector<16x512xbf16> to vector<16x512xf32>
    %c0_14 = arith.constant 0 : index
    %c38 = arith.constant 38 : index
    %20 = vector.load %arg1[%c0_14, %c38] : memref<16x1152xbf16, #tpu.memory_space<vmem>>, vector<16x512xbf16>
    %21 = arith.extf %20 : vector<16x512xbf16> to vector<16x512xf32>
    %22 = tpu.concatenate %5, %7, %9, %11, %13, %15, %17, %19, %21 in 0 : vector<16x512xf32>, vector<16x512xf32>, vector<16x512xf32>, vector<16x512xf32>, vector<16x512xf32>, vector<16x512xf32>, vector<16x512xf32>, vector<16x512xf32>, vector<16x512xf32> -> vector<144x512xf32>
    %cst_15 = arith.constant dense<0.000000e+00> : vector<16x512xf32>
    %23 = tpu.matmul %2, %22, %cst_15 {dimension_numbers = #tpu.dot_dimension_numbers<[1], [0], [0], [1], [0, 0, 1, 1], [], []>} : vector<16x144xf32>, vector<144x512xf32>, vector<16x512xf32> -> vector<16x512xf32>
    %24 = vector.broadcast %3 : vector<16x1xf32> to vector<16x512xf32>
    %25 = arith.addf %23, %24 : vector<16x512xf32>
    %cst_16 = arith.constant 0.000000e+00 : f32
    %26 = vector.broadcast %cst_16 : f32 to vector<16x512xf32>
    %27 = arith.maximumf %25, %26 : vector<16x512xf32>
    %c0_17 = arith.constant 0 : index
    %c19_18 = arith.constant 19 : index
    %28 = vector.load %arg2[%c0_17, %c19_18] : memref<1x1152xf32, #tpu.memory_space<vmem>>, vector<1x512xf32>
    %cst_19 = arith.constant 5.000000e-01 : f32
    %29 = vector.broadcast %cst_19 : f32 to vector<1x512xf32>
    %30 = arith.cmpf ogt, %28, %29 : vector<1x512xf32>
    %cst_20 = arith.constant 0.000000e+00 : f32
    %31 = vector.shape_cast %30 : vector<1x512xi1> to vector<1x512xi1>
    %32 = vector.broadcast %31 : vector<1x512xi1> to vector<16x512xi1>
    %33 = vector.broadcast %cst_20 : f32 to vector<16x512xf32>
    %34 = arith.select %32, %27, %33 : vector<16x512xi1>, vector<16x512xf32>
    %35 = arith.truncf %34 : vector<16x512xf32> to vector<16x512xbf16>
    %c0_21 = arith.constant 0 : index
    %c19_22 = arith.constant 19 : index
    %36 = vector.load %arg8[%c0_21, %c19_22] : memref<16x1152xbf16, #tpu.memory_space<vmem>>, vector<16x512xbf16>
    tpu.vector_store %arg8[%c0_21, %c19_22], %35 {strides = array<i32>} : memref<16x1152xbf16, #tpu.memory_space<vmem>>, vector<16x512xbf16>,
    %c0_23 = arith.constant 0 : index
    %c512 = arith.constant 512 : index
    %37 = vector.load %arg1[%c0_23, %c512] : memref<16x1152xbf16, #tpu.memory_space<vmem>>, vector<16x512xbf16>
    %38 = arith.extf %37 : vector<16x512xbf16> to vector<16x512xf32>
    %c0_24 = arith.constant 0 : index
    %c513 = arith.constant 513 : index
    %39 = vector.load %arg1[%c0_24, %c513] : memref<16x1152xbf16, #tpu.memory_space<vmem>>, vector<16x512xbf16>
    %40 = arith.extf %39 : vector<16x512xbf16> to vector<16x512xf32>
    %c0_25 = arith.constant 0 : index
    %c514 = arith.constant 514 : index
    %41 = vector.load %arg1[%c0_25, %c514] : memref<16x1152xbf16, #tpu.memory_space<vmem>>, vector<16x512xbf16>
    %42 = arith.extf %41 : vector<16x512xbf16> to vector<16x512xf32>
    %c0_26 = arith.constant 0 : index
    %c530 = arith.constant 530 : index
    %43 = vector.load %arg1[%c0_26, %c530] : memref<16x1152xbf16, #tpu.memory_space<vmem>>, vector<16x512xbf16>
    %44 = arith.extf %43 : vector<16x512xbf16> to vector<16x512xf32>
    %c0_27 = arith.constant 0 : index
    %c531 = arith.constant 531 : index
    %45 = vector.load %arg1[%c0_27, %c531] : memref<16x1152xbf16, #tpu.memory_space<vmem>>, vector<16x512xbf16>
    %46 = arith.extf %45 : vector<16x512xbf16> to vector<16x512xf32>
    %c0_28 = arith.constant 0 : index
    %c532 = arith.constant 532 : index
    %47 = vector.load %arg1[%c0_28, %c532] : memref<16x1152xbf16, #tpu.memory_space<vmem>>, vector<16x512xbf16>
    %48 = arith.extf %47 : vector<16x512xbf16> to vector<16x512xf32>
    %c0_29 = arith.constant 0 : index
    %c548 = arith.constant 548 : index
    %49 = vector.load %arg1[%c0_29, %c548] : memref<16x1152xbf16, #tpu.memory_space<vmem>>, vector<16x512xbf16>
    %50 = arith.extf %49 : vector<16x512xbf16> to vector<16x512xf32>
    %c0_30 = arith.constant 0 : index
    %c549 = arith.constant 549 : index
    %51 = vector.load %arg1[%c0_30, %c549] : memref<16x1152xbf16, #tpu.memory_space<vmem>>, vector<16x512xbf16>
    %52 = arith.extf %51 : vector<16x512xbf16> to vector<16x512xf32>
    %c0_31 = arith.constant 0 : index
    %c550 = arith.constant 550 : index
    %53 = vector.load %arg1[%c0_31, %c550] : memref<16x1152xbf16, #tpu.memory_space<vmem>>, vector<16x512xbf16>
    %54 = arith.extf %53 : vector<16x512xbf16> to vector<16x512xf32>
    %55 = tpu.concatenate %38, %40, %42, %44, %46, %48, %50, %52, %54 in 0 : vector<16x512xf32>, vector<16x512xf32>, vector<16x512xf32>, vector<16x512xf32>, vector<16x512xf32>, vector<16x512xf32>, vector<16x512xf32>, vector<16x512xf32>, vector<16x512xf32> -> vector<144x512xf32>
    %cst_32 = arith.constant dense<0.000000e+00> : vector<16x512xf32>
    %56 = tpu.matmul %2, %55, %cst_32 {dimension_numbers = #tpu.dot_dimension_numbers<[1], [0], [0], [1], [0, 0, 1, 1], [], []>} : vector<16x144xf32>, vector<144x512xf32>, vector<16x512xf32> -> vector<16x512xf32>
    %57 = vector.broadcast %3 : vector<16x1xf32> to vector<16x512xf32>
    %58 = arith.addf %56, %57 : vector<16x512xf32>
    %cst_33 = arith.constant 0.000000e+00 : f32
    %59 = vector.broadcast %cst_33 : f32 to vector<16x512xf32>
    %60 = arith.maximumf %58, %59 : vector<16x512xf32>
    %c0_34 = arith.constant 0 : index
    %c531_35 = arith.constant 531 : index
    %61 = vector.load %arg2[%c0_34, %c531_35] : memref<1x1152xf32, #tpu.memory_space<vmem>>, vector<1x512xf32>
    %cst_36 = arith.constant 5.000000e-01 : f32
    %62 = vector.broadcast %cst_36 : f32 to vector<1x512xf32>
    %63 = arith.cmpf ogt, %61, %62 : vector<1x512xf32>
    %cst_37 = arith.constant 0.000000e+00 : f32
    %64 = vector.shape_cast %63 : vector<1x512xi1> to vector<1x512xi1>
    %65 = vector.broadcast %64 : vector<1x512xi1> to vector<16x512xi1>
    %66 = vector.broadcast %cst_37 : f32 to vector<16x512xf32>
    %67 = arith.select %65, %60, %66 : vector<16x512xi1>, vector<16x512xf32>
    %68 = arith.truncf %67 : vector<16x512xf32> to vector<16x512xbf16>
    %c0_38 = arith.constant 0 : index
    %c531_39 = arith.constant 531 : index
    %69 = vector.load %arg8[%c0_38, %c531_39] : memref<16x1152xbf16, #tpu.memory_space<vmem>>, vector<16x512xbf16>
    tpu.vector_store %arg8[%c0_38, %c531_39], %68 {strides = array<i32>} : memref<16x1152xbf16, #tpu.memory_space<vmem>>, vector<16x512xbf16>,
    %cst_40 = arith.constant 0.000000e+00 : bf16
    %70 = vector.broadcast %cst_40 : bf16 to vector<16x1152xbf16>
    %c0_41 = arith.constant 0 : index
    %c0_42 = arith.constant 0 : index
    %71 = vector.load %arg7[%c0_41, %c0_42] : memref<16x1152xbf16, #tpu.memory_space<vmem>>, vector<16x1152xbf16>
    tpu.vector_store %arg7[%c0_41, %c0_42], %70 {strides = array<i32>} : memref<16x1152xbf16, #tpu.memory_space<vmem>>, vector<16x1152xbf16>,
    %c0_43 = arith.constant 0 : index
    %c0_44 = arith.constant 0 : index
    %72 = vector.load %arg5[%c0_43, %c0_44] : memref<16x144xf32, #tpu.memory_space<vmem>>, vector<16x144xf32>
    %c0_45 = arith.constant 0 : index
    %c0_46 = arith.constant 0 : index
    %73 = vector.load %arg6[%c0_45, %c0_46] : memref<16x1xf32, #tpu.memory_space<vmem>>, vector<16x1xf32>
    %c0_47 = arith.constant 0 : index
    %c0_48 = arith.constant 0 : index
    %74 = vector.load %arg8[%c0_47, %c0_48] : memref<16x1152xbf16, #tpu.memory_space<vmem>>, vector<16x512xbf16>
    %75 = arith.extf %74 : vector<16x512xbf16> to vector<16x512xf32>
    %c0_49 = arith.constant 0 : index
    %c1_50 = arith.constant 1 : index
    %76 = vector.load %arg8[%c0_49, %c1_50] : memref<16x1152xbf16, #tpu.memory_space<vmem>>, vector<16x512xbf16>
    %77 = arith.extf %76 : vector<16x512xbf16> to vector<16x512xf32>
    %c0_51 = arith.constant 0 : index
    %c2_52 = arith.constant 2 : index
    %78 = vector.load %arg8[%c0_51, %c2_52] : memref<16x1152xbf16, #tpu.memory_space<vmem>>, vector<16x512xbf16>
    %79 = arith.extf %78 : vector<16x512xbf16> to vector<16x512xf32>
    %c0_53 = arith.constant 0 : index
    %c18_54 = arith.constant 18 : index
    %80 = vector.load %arg8[%c0_53, %c18_54] : memref<16x1152xbf16, #tpu.memory_space<vmem>>, vector<16x512xbf16>
    %81 = arith.extf %80 : vector<16x512xbf16> to vector<16x512xf32>
    %c0_55 = arith.constant 0 : index
    %c19_56 = arith.constant 19 : index
    %82 = vector.load %arg8[%c0_55, %c19_56] : memref<16x1152xbf16, #tpu.memory_space<vmem>>, vector<16x512xbf16>
    %83 = arith.extf %82 : vector<16x512xbf16> to vector<16x512xf32>
    %c0_57 = arith.constant 0 : index
    %c20_58 = arith.constant 20 : index
    %84 = vector.load %arg8[%c0_57, %c20_58] : memref<16x1152xbf16, #tpu.memory_space<vmem>>, vector<16x512xbf16>
    %85 = arith.extf %84 : vector<16x512xbf16> to vector<16x512xf32>
    %c0_59 = arith.constant 0 : index
    %c36_60 = arith.constant 36 : index
    %86 = vector.load %arg8[%c0_59, %c36_60] : memref<16x1152xbf16, #tpu.memory_space<vmem>>, vector<16x512xbf16>
    %87 = arith.extf %86 : vector<16x512xbf16> to vector<16x512xf32>
    %c0_61 = arith.constant 0 : index
    %c37_62 = arith.constant 37 : index
    %88 = vector.load %arg8[%c0_61, %c37_62] : memref<16x1152xbf16, #tpu.memory_space<vmem>>, vector<16x512xbf16>
    %89 = arith.extf %88 : vector<16x512xbf16> to vector<16x512xf32>
    %c0_63 = arith.constant 0 : index
    %c38_64 = arith.constant 38 : index
    %90 = vector.load %arg8[%c0_63, %c38_64] : memref<16x1152xbf16, #tpu.memory_space<vmem>>, vector<16x512xbf16>
    %91 = arith.extf %90 : vector<16x512xbf16> to vector<16x512xf32>
    %92 = tpu.concatenate %75, %77, %79, %81, %83, %85, %87, %89, %91 in 0 : vector<16x512xf32>, vector<16x512xf32>, vector<16x512xf32>, vector<16x512xf32>, vector<16x512xf32>, vector<16x512xf32>, vector<16x512xf32>, vector<16x512xf32>, vector<16x512xf32> -> vector<144x512xf32>
    %cst_65 = arith.constant dense<0.000000e+00> : vector<16x512xf32>
    %93 = tpu.matmul %72, %92, %cst_65 {dimension_numbers = #tpu.dot_dimension_numbers<[1], [0], [0], [1], [0, 0, 1, 1], [], []>} : vector<16x144xf32>, vector<144x512xf32>, vector<16x512xf32> -> vector<16x512xf32>
    %94 = vector.broadcast %73 : vector<16x1xf32> to vector<16x512xf32>
    %95 = arith.addf %93, %94 : vector<16x512xf32>
    %cst_66 = arith.constant 0.000000e+00 : f32
    %96 = vector.broadcast %cst_66 : f32 to vector<16x512xf32>
    %97 = arith.maximumf %95, %96 : vector<16x512xf32>
    %c0_67 = arith.constant 0 : index
    %c19_68 = arith.constant 19 : index
    %98 = vector.load %arg2[%c0_67, %c19_68] : memref<1x1152xf32, #tpu.memory_space<vmem>>, vector<1x512xf32>
    %cst_69 = arith.constant 5.000000e-01 : f32
    %99 = vector.broadcast %cst_69 : f32 to vector<1x512xf32>
    %100 = arith.cmpf ogt, %98, %99 : vector<1x512xf32>
    %cst_70 = arith.constant 0.000000e+00 : f32
    %101 = vector.shape_cast %100 : vector<1x512xi1> to vector<1x512xi1>
    %102 = vector.broadcast %101 : vector<1x512xi1> to vector<16x512xi1>
    %103 = vector.broadcast %cst_70 : f32 to vector<16x512xf32>
    %104 = arith.select %102, %97, %103 : vector<16x512xi1>, vector<16x512xf32>
    %105 = arith.truncf %104 : vector<16x512xf32> to vector<16x512xbf16>
    %c0_71 = arith.constant 0 : index
    %c19_72 = arith.constant 19 : index
    %106 = vector.load %arg7[%c0_71, %c19_72] : memref<16x1152xbf16, #tpu.memory_space<vmem>>, vector<16x512xbf16>
    tpu.vector_store %arg7[%c0_71, %c19_72], %105 {strides = array<i32>} : memref<16x1152xbf16, #tpu.memory_space<vmem>>, vector<16x512xbf16>,
    %c0_73 = arith.constant 0 : index
    %c512_74 = arith.constant 512 : index
    %107 = vector.load %arg8[%c0_73, %c512_74] : memref<16x1152xbf16, #tpu.memory_space<vmem>>, vector<16x512xbf16>
    %108 = arith.extf %107 : vector<16x512xbf16> to vector<16x512xf32>
    %c0_75 = arith.constant 0 : index
    %c513_76 = arith.constant 513 : index
    %109 = vector.load %arg8[%c0_75, %c513_76] : memref<16x1152xbf16, #tpu.memory_space<vmem>>, vector<16x512xbf16>
    %110 = arith.extf %109 : vector<16x512xbf16> to vector<16x512xf32>
    %c0_77 = arith.constant 0 : index
    %c514_78 = arith.constant 514 : index
    %111 = vector.load %arg8[%c0_77, %c514_78] : memref<16x1152xbf16, #tpu.memory_space<vmem>>, vector<16x512xbf16>
    %112 = arith.extf %111 : vector<16x512xbf16> to vector<16x512xf32>
    %c0_79 = arith.constant 0 : index
    %c530_80 = arith.constant 530 : index
    %113 = vector.load %arg8[%c0_79, %c530_80] : memref<16x1152xbf16, #tpu.memory_space<vmem>>, vector<16x512xbf16>
    %114 = arith.extf %113 : vector<16x512xbf16> to vector<16x512xf32>
    %c0_81 = arith.constant 0 : index
    %c531_82 = arith.constant 531 : index
    %115 = vector.load %arg8[%c0_81, %c531_82] : memref<16x1152xbf16, #tpu.memory_space<vmem>>, vector<16x512xbf16>
    %116 = arith.extf %115 : vector<16x512xbf16> to vector<16x512xf32>
    %c0_83 = arith.constant 0 : index
    %c532_84 = arith.constant 532 : index
    %117 = vector.load %arg8[%c0_83, %c532_84] : memref<16x1152xbf16, #tpu.memory_space<vmem>>, vector<16x512xbf16>
    %118 = arith.extf %117 : vector<16x512xbf16> to vector<16x512xf32>
    %c0_85 = arith.constant 0 : index
    %c548_86 = arith.constant 548 : index
    %119 = vector.load %arg8[%c0_85, %c548_86] : memref<16x1152xbf16, #tpu.memory_space<vmem>>, vector<16x512xbf16>
    %120 = arith.extf %119 : vector<16x512xbf16> to vector<16x512xf32>
    %c0_87 = arith.constant 0 : index
    %c549_88 = arith.constant 549 : index
    %121 = vector.load %arg8[%c0_87, %c549_88] : memref<16x1152xbf16, #tpu.memory_space<vmem>>, vector<16x512xbf16>
    %122 = arith.extf %121 : vector<16x512xbf16> to vector<16x512xf32>
    %c0_89 = arith.constant 0 : index
    %c550_90 = arith.constant 550 : index
    %123 = vector.load %arg8[%c0_89, %c550_90] : memref<16x1152xbf16, #tpu.memory_space<vmem>>, vector<16x512xbf16>
    %124 = arith.extf %123 : vector<16x512xbf16> to vector<16x512xf32>
    %125 = tpu.concatenate %108, %110, %112, %114, %116, %118, %120, %122, %124 in 0 : vector<16x512xf32>, vector<16x512xf32>, vector<16x512xf32>, vector<16x512xf32>, vector<16x512xf32>, vector<16x512xf32>, vector<16x512xf32>, vector<16x512xf32>, vector<16x512xf32> -> vector<144x512xf32>
    %cst_91 = arith.constant dense<0.000000e+00> : vector<16x512xf32>
    %126 = tpu.matmul %72, %125, %cst_91 {dimension_numbers = #tpu.dot_dimension_numbers<[1], [0], [0], [1], [0, 0, 1, 1], [], []>} : vector<16x144xf32>, vector<144x512xf32>, vector<16x512xf32> -> vector<16x512xf32>
    %127 = vector.broadcast %73 : vector<16x1xf32> to vector<16x512xf32>
    %128 = arith.addf %126, %127 : vector<16x512xf32>
    %cst_92 = arith.constant 0.000000e+00 : f32
    %129 = vector.broadcast %cst_92 : f32 to vector<16x512xf32>
    %130 = arith.maximumf %128, %129 : vector<16x512xf32>
    %c0_93 = arith.constant 0 : index
    %c531_94 = arith.constant 531 : index
    %131 = vector.load %arg2[%c0_93, %c531_94] : memref<1x1152xf32, #tpu.memory_space<vmem>>, vector<1x512xf32>
    %cst_95 = arith.constant 5.000000e-01 : f32
    %132 = vector.broadcast %cst_95 : f32 to vector<1x512xf32>
    %133 = arith.cmpf ogt, %131, %132 : vector<1x512xf32>
    %cst_96 = arith.constant 0.000000e+00 : f32
    %134 = vector.shape_cast %133 : vector<1x512xi1> to vector<1x512xi1>
    %135 = vector.broadcast %134 : vector<1x512xi1> to vector<16x512xi1>
    %136 = vector.broadcast %cst_96 : f32 to vector<16x512xf32>
    %137 = arith.select %135, %130, %136 : vector<16x512xi1>, vector<16x512xf32>
    %138 = arith.truncf %137 : vector<16x512xf32> to vector<16x512xbf16>
    %c0_97 = arith.constant 0 : index
    %c531_98 = arith.constant 531 : index
    %139 = vector.load %arg7[%c0_97, %c531_98] : memref<16x1152xbf16, #tpu.memory_space<vmem>>, vector<16x512xbf16>
    tpu.vector_store %arg7[%c0_97, %c531_98], %138 {strides = array<i32>} : memref<16x1152xbf16, #tpu.memory_space<vmem>>, vector<16x512xbf16>,
    return
  }
  func.func @transform_0(%arg0: i32) -> (i32, i32) {
    %c0_i32 = arith.constant 0 : i32
    %c0_i32_0 = arith.constant 0 : i32
    %c0_i32_1 = arith.constant 0 : i32
    return %c0_i32, %c0_i32_0 : i32, i32
  }
  func.func @transform_1(%arg0: i32) -> (i32, i32) {
    %c0_i32 = arith.constant 0 : i32
    %c0_i32_0 = arith.constant 0 : i32
    %c0_i32_1 = arith.constant 0 : i32
    return %c0_i32, %c0_i32_0 : i32, i32
  }
  func.func @transform_2(%arg0: i32) -> (i32, i32) {
    %c0_i32 = arith.constant 0 : i32
    %c0_i32_0 = arith.constant 0 : i32
    %c0_i32_1 = arith.constant 0 : i32
    return %c0_i32, %c0_i32_0 : i32, i32
  }
  func.func @transform_3(%arg0: i32) -> (i32, i32) {
    %c0_i32 = arith.constant 0 : i32
    %c0_i32_0 = arith.constant 0 : i32
    %c0_i32_1 = arith.constant 0 : i32
    return %c0_i32, %c0_i32_0 : i32, i32
  }
  func.func @transform_4(%arg0: i32) -> (i32, i32) {
    %c0_i32 = arith.constant 0 : i32
    %c0_i32_0 = arith.constant 0 : i32
    %c0_i32_1 = arith.constant 0 : i32
    return %c0_i32, %c0_i32_0 : i32, i32
  }
  func.func @transform_5(%arg0: i32) -> (i32, i32) {
    %c0_i32 = arith.constant 0 : i32
    %c0_i32_0 = arith.constant 0 : i32
    %c0_i32_1 = arith.constant 0 : i32
    return %c0_i32, %c0_i32_0 : i32, i32
  }
  func.func @transform_6(%arg0: i32) -> (i32, i32) {
    %c0_i32 = arith.constant 0 : i32
    %c0_i32_0 = arith.constant 0 : i32
    %c0_i32_1 = arith.constant 0 : i32
    return %c0_i32, %c0_i32_0 : i32, i32
  }
}

module attributes {stable_mosaic.version = 11 : i64} {
  func.func @kernel(%arg0: i32, %arg1: memref<4x16x384xbf16, #tpu.memory_space<vmem>>, %arg2: memref<16x256xf32, #tpu.memory_space<vmem>>, %arg3: memref<16x1xf32, #tpu.memory_space<vmem>>, %arg4: memref<16x256xbf16, #tpu.memory_space<vmem>>) attributes {dimension_semantics = [#tpu.dimension_semantics<arbitrary>], iteration_bounds = array<i64: 1>, scalar_prefetch = 0 : i64, scratch_operands = 0 : i64, tpu.core_type = #tpu.core_type<tc>, window_params = [{pipeline_mode = #tpu.pipeline_mode<synchronous>, transform_indices = @transform_0, window_bounds = array<i64: 4, 16, 384>}, {pipeline_mode = #tpu.pipeline_mode<synchronous>, transform_indices = @transform_1, window_bounds = array<i64: 16, 256>}, {pipeline_mode = #tpu.pipeline_mode<synchronous>, transform_indices = @transform_2, window_bounds = array<i64: 16, 1>}, {pipeline_mode = #tpu.pipeline_mode<synchronous>, transform_indices = @transform_3, window_bounds = array<i64: 16, 256>}]} {
    %c0 = arith.constant 0 : index
    %c0_0 = arith.constant 0 : index
    %0 = vector.load %arg2[%c0, %c0_0] : memref<16x256xf32, #tpu.memory_space<vmem>>, vector<16x256xf32>
    %c0_1 = arith.constant 0 : index
    %c0_2 = arith.constant 0 : index
    %1 = vector.load %arg3[%c0_1, %c0_2] : memref<16x1xf32, #tpu.memory_space<vmem>>, vector<16x1xf32>
    %c0_3 = arith.constant 0 : index
    %c0_4 = arith.constant 0 : index
    %c0_5 = arith.constant 0 : index
    %2 = vector.load %arg1[%c0_3, %c0_4, %c0_5] : memref<4x16x384xbf16, #tpu.memory_space<vmem>>, vector<1x16x256xbf16>
    %3 = vector.shape_cast %2 : vector<1x16x256xbf16> to vector<16x256xbf16>
    %4 = arith.extf %3 : vector<16x256xbf16> to vector<16x256xf32>
    %c1 = arith.constant 1 : index
    %c0_6 = arith.constant 0 : index
    %c0_7 = arith.constant 0 : index
    %5 = vector.load %arg1[%c1, %c0_6, %c0_7] : memref<4x16x384xbf16, #tpu.memory_space<vmem>>, vector<1x16x256xbf16>
    %6 = vector.shape_cast %5 : vector<1x16x256xbf16> to vector<16x256xbf16>
    %7 = arith.extf %6 : vector<16x256xbf16> to vector<16x256xf32>
    %c0_8 = arith.constant 0 : index
    %c0_9 = arith.constant 0 : index
    %c1_10 = arith.constant 1 : index
    %8 = vector.load %arg1[%c0_8, %c0_9, %c1_10] : memref<4x16x384xbf16, #tpu.memory_space<vmem>>, vector<1x16x256xbf16>
    %9 = vector.shape_cast %8 : vector<1x16x256xbf16> to vector<16x256xbf16>
    %10 = arith.extf %9 : vector<16x256xbf16> to vector<16x256xf32>
    %c1_11 = arith.constant 1 : index
    %c0_12 = arith.constant 0 : index
    %c1_13 = arith.constant 1 : index
    %11 = vector.load %arg1[%c1_11, %c0_12, %c1_13] : memref<4x16x384xbf16, #tpu.memory_space<vmem>>, vector<1x16x256xbf16>
    %12 = vector.shape_cast %11 : vector<1x16x256xbf16> to vector<16x256xbf16>
    %13 = arith.extf %12 : vector<16x256xbf16> to vector<16x256xf32>
    %c2 = arith.constant 2 : index
    %c0_14 = arith.constant 0 : index
    %c0_15 = arith.constant 0 : index
    %14 = vector.load %arg1[%c2, %c0_14, %c0_15] : memref<4x16x384xbf16, #tpu.memory_space<vmem>>, vector<1x16x256xbf16>
    %15 = vector.shape_cast %14 : vector<1x16x256xbf16> to vector<16x256xbf16>
    %16 = arith.extf %15 : vector<16x256xbf16> to vector<16x256xf32>
    %c3 = arith.constant 3 : index
    %c0_16 = arith.constant 0 : index
    %c0_17 = arith.constant 0 : index
    %17 = vector.load %arg1[%c3, %c0_16, %c0_17] : memref<4x16x384xbf16, #tpu.memory_space<vmem>>, vector<1x16x256xbf16>
    %18 = vector.shape_cast %17 : vector<1x16x256xbf16> to vector<16x256xbf16>
    %19 = arith.extf %18 : vector<16x256xbf16> to vector<16x256xf32>
    %c2_18 = arith.constant 2 : index
    %c0_19 = arith.constant 0 : index
    %c1_20 = arith.constant 1 : index
    %20 = vector.load %arg1[%c2_18, %c0_19, %c1_20] : memref<4x16x384xbf16, #tpu.memory_space<vmem>>, vector<1x16x256xbf16>
    %21 = vector.shape_cast %20 : vector<1x16x256xbf16> to vector<16x256xbf16>
    %22 = arith.extf %21 : vector<16x256xbf16> to vector<16x256xf32>
    %c3_21 = arith.constant 3 : index
    %c0_22 = arith.constant 0 : index
    %c1_23 = arith.constant 1 : index
    %23 = vector.load %arg1[%c3_21, %c0_22, %c1_23] : memref<4x16x384xbf16, #tpu.memory_space<vmem>>, vector<1x16x256xbf16>
    %24 = vector.shape_cast %23 : vector<1x16x256xbf16> to vector<16x256xbf16>
    %25 = arith.extf %24 : vector<16x256xbf16> to vector<16x256xf32>
    %c0_24 = arith.constant 0 : index
    %c0_25 = arith.constant 0 : index
    %c9 = arith.constant 9 : index
    %26 = vector.load %arg1[%c0_24, %c0_25, %c9] : memref<4x16x384xbf16, #tpu.memory_space<vmem>>, vector<1x16x256xbf16>
    %27 = vector.shape_cast %26 : vector<1x16x256xbf16> to vector<16x256xbf16>
    %28 = arith.extf %27 : vector<16x256xbf16> to vector<16x256xf32>
    %c1_26 = arith.constant 1 : index
    %c0_27 = arith.constant 0 : index
    %c9_28 = arith.constant 9 : index
    %29 = vector.load %arg1[%c1_26, %c0_27, %c9_28] : memref<4x16x384xbf16, #tpu.memory_space<vmem>>, vector<1x16x256xbf16>
    %30 = vector.shape_cast %29 : vector<1x16x256xbf16> to vector<16x256xbf16>
    %31 = arith.extf %30 : vector<16x256xbf16> to vector<16x256xf32>
    %c0_29 = arith.constant 0 : index
    %c0_30 = arith.constant 0 : index
    %c10 = arith.constant 10 : index
    %32 = vector.load %arg1[%c0_29, %c0_30, %c10] : memref<4x16x384xbf16, #tpu.memory_space<vmem>>, vector<1x16x256xbf16>
    %33 = vector.shape_cast %32 : vector<1x16x256xbf16> to vector<16x256xbf16>
    %34 = arith.extf %33 : vector<16x256xbf16> to vector<16x256xf32>
    %c1_31 = arith.constant 1 : index
    %c0_32 = arith.constant 0 : index
    %c10_33 = arith.constant 10 : index
    %35 = vector.load %arg1[%c1_31, %c0_32, %c10_33] : memref<4x16x384xbf16, #tpu.memory_space<vmem>>, vector<1x16x256xbf16>
    %36 = vector.shape_cast %35 : vector<1x16x256xbf16> to vector<16x256xbf16>
    %37 = arith.extf %36 : vector<16x256xbf16> to vector<16x256xf32>
    %c2_34 = arith.constant 2 : index
    %c0_35 = arith.constant 0 : index
    %c9_36 = arith.constant 9 : index
    %38 = vector.load %arg1[%c2_34, %c0_35, %c9_36] : memref<4x16x384xbf16, #tpu.memory_space<vmem>>, vector<1x16x256xbf16>
    %39 = vector.shape_cast %38 : vector<1x16x256xbf16> to vector<16x256xbf16>
    %40 = arith.extf %39 : vector<16x256xbf16> to vector<16x256xf32>
    %c3_37 = arith.constant 3 : index
    %c0_38 = arith.constant 0 : index
    %c9_39 = arith.constant 9 : index
    %41 = vector.load %arg1[%c3_37, %c0_38, %c9_39] : memref<4x16x384xbf16, #tpu.memory_space<vmem>>, vector<1x16x256xbf16>
    %42 = vector.shape_cast %41 : vector<1x16x256xbf16> to vector<16x256xbf16>
    %43 = arith.extf %42 : vector<16x256xbf16> to vector<16x256xf32>
    %c2_40 = arith.constant 2 : index
    %c0_41 = arith.constant 0 : index
    %c10_42 = arith.constant 10 : index
    %44 = vector.load %arg1[%c2_40, %c0_41, %c10_42] : memref<4x16x384xbf16, #tpu.memory_space<vmem>>, vector<1x16x256xbf16>
    %45 = vector.shape_cast %44 : vector<1x16x256xbf16> to vector<16x256xbf16>
    %46 = arith.extf %45 : vector<16x256xbf16> to vector<16x256xf32>
    %c3_43 = arith.constant 3 : index
    %c0_44 = arith.constant 0 : index
    %c10_45 = arith.constant 10 : index
    %47 = vector.load %arg1[%c3_43, %c0_44, %c10_45] : memref<4x16x384xbf16, #tpu.memory_space<vmem>>, vector<1x16x256xbf16>
    %48 = vector.shape_cast %47 : vector<1x16x256xbf16> to vector<16x256xbf16>
    %49 = arith.extf %48 : vector<16x256xbf16> to vector<16x256xf32>
    %50 = tpu.concatenate %4, %7, %10, %13, %16, %19, %22, %25, %28, %31, %34, %37, %40, %43, %46, %49 in 0 : vector<16x256xf32>, vector<16x256xf32>, vector<16x256xf32>, vector<16x256xf32>, vector<16x256xf32>, vector<16x256xf32>, vector<16x256xf32>, vector<16x256xf32>, vector<16x256xf32>, vector<16x256xf32>, vector<16x256xf32>, vector<16x256xf32>, vector<16x256xf32>, vector<16x256xf32>, vector<16x256xf32>, vector<16x256xf32> -> vector<256x256xf32>
    %cst = arith.constant dense<0.000000e+00> : vector<16x256xf32>
    %51 = tpu.matmul %0, %50, %cst {dimension_numbers = #tpu.dot_dimension_numbers<[1], [0], [0], [1], [0, 0, 1, 1], [], []>} : vector<16x256xf32>, vector<256x256xf32>, vector<16x256xf32> -> vector<16x256xf32>
    %52 = vector.broadcast %1 : vector<16x1xf32> to vector<16x256xf32>
    %53 = arith.addf %51, %52 : vector<16x256xf32>
    %cst_46 = arith.constant 0.000000e+00 : f32
    %54 = vector.broadcast %cst_46 : f32 to vector<16x256xf32>
    %55 = arith.maximumf %53, %54 : vector<16x256xf32>
    %56 = arith.truncf %55 : vector<16x256xf32> to vector<16x256xbf16>
    %c0_47 = arith.constant 0 : index
    %c0_48 = arith.constant 0 : index
    %57 = vector.load %arg4[%c0_47, %c0_48] : memref<16x256xbf16, #tpu.memory_space<vmem>>, vector<16x256xbf16>
    tpu.vector_store %arg4[%c0_47, %c0_48], %56 {strides = array<i32>} : memref<16x256xbf16, #tpu.memory_space<vmem>>, vector<16x256xbf16>,
    return
  }
  func.func @transform_0(%arg0: i32) -> (i32, i32, i32) {
    %c0_i32 = arith.constant 0 : i32
    %c0_i32_0 = arith.constant 0 : i32
    %c0_i32_1 = arith.constant 0 : i32
    %c0_i32_2 = arith.constant 0 : i32
    return %c0_i32, %c0_i32_0, %c0_i32_1 : i32, i32, i32
  }
  func.func @transform_1(%arg0: i32) -> (i32, i32) {
    %c0_i32 = arith.constant 0 : i32
    %c0_i32_0 = arith.constant 0 : i32
    %c0_i32_1 = arith.constant 0 : i32
    return %c0_i32, %c0_i32_0 : i32, i32
  }
  func.func @transform_2(%arg0: i32) -> (i32, i32) {
    %c0_i32 = arith.constant 0 : i32
    %c0_i32_0 = arith.constant 0 : i32
    %c0_i32_1 = arith.constant 0 : i32
    return %c0_i32, %c0_i32_0 : i32, i32
  }
  func.func @transform_3(%arg0: i32) -> (i32, i32) {
    %c0_i32 = arith.constant 0 : i32
    %c0_i32_0 = arith.constant 0 : i32
    %c0_i32_1 = arith.constant 0 : i32
    return %c0_i32, %c0_i32_0 : i32, i32
  }
}

module attributes {stable_mosaic.version = 11 : i64} {
  func.func @kernel(%arg0: i32, %arg1: memref<16x384xbf16, #tpu.memory_space<vmem>>, %arg2: memref<1x384xf32, #tpu.memory_space<vmem>>, %arg3: memref<16x144xf32, #tpu.memory_space<vmem>>, %arg4: memref<16x1xf32, #tpu.memory_space<vmem>>, %arg5: memref<16x144xf32, #tpu.memory_space<vmem>>, %arg6: memref<16x1xf32, #tpu.memory_space<vmem>>, %arg7: memref<16x16xf32, #tpu.memory_space<vmem>>, %arg8: memref<16x1xf32, #tpu.memory_space<vmem>>, %arg9: memref<16x144xf32, #tpu.memory_space<vmem>>, %arg10: memref<16x1xf32, #tpu.memory_space<vmem>>, %arg11: memref<16x16xf32, #tpu.memory_space<vmem>>, %arg12: memref<16x1xf32, #tpu.memory_space<vmem>>, %arg13: memref<16x384xbf16, #tpu.memory_space<vmem>>, %arg14: memref<16x384xbf16, #tpu.memory_space<vmem>>, %arg15: memref<16x384xbf16, #tpu.memory_space<vmem>>) attributes {dimension_semantics = [#tpu.dimension_semantics<arbitrary>], iteration_bounds = array<i64: 1>, scalar_prefetch = 0 : i64, scratch_operands = 2 : i64, tpu.core_type = #tpu.core_type<tc>, window_params = [{pipeline_mode = #tpu.pipeline_mode<synchronous>, transform_indices = @transform_0, window_bounds = array<i64: 16, 384>}, {pipeline_mode = #tpu.pipeline_mode<synchronous>, transform_indices = @transform_1, window_bounds = array<i64: 1, 384>}, {pipeline_mode = #tpu.pipeline_mode<synchronous>, transform_indices = @transform_2, window_bounds = array<i64: 16, 144>}, {pipeline_mode = #tpu.pipeline_mode<synchronous>, transform_indices = @transform_3, window_bounds = array<i64: 16, 1>}, {pipeline_mode = #tpu.pipeline_mode<synchronous>, transform_indices = @transform_4, window_bounds = array<i64: 16, 144>}, {pipeline_mode = #tpu.pipeline_mode<synchronous>, transform_indices = @transform_5, window_bounds = array<i64: 16, 1>}, {pipeline_mode = #tpu.pipeline_mode<synchronous>, transform_indices = @transform_6, window_bounds = array<i64: 16, 16>}, {pipeline_mode = #tpu.pipeline_mode<synchronous>, transform_indices = @transform_7, window_bounds = array<i64: 16, 1>}, {pipeline_mode = #tpu.pipeline_mode<synchronous>, transform_indices = @transform_8, window_bounds = array<i64: 16, 144>}, {pipeline_mode = #tpu.pipeline_mode<synchronous>, transform_indices = @transform_9, window_bounds = array<i64: 16, 1>}, {pipeline_mode = #tpu.pipeline_mode<synchronous>, transform_indices = @transform_10, window_bounds = array<i64: 16, 16>}, {pipeline_mode = #tpu.pipeline_mode<synchronous>, transform_indices = @transform_11, window_bounds = array<i64: 16, 1>}, {pipeline_mode = #tpu.pipeline_mode<synchronous>, transform_indices = @transform_12, window_bounds = array<i64: 16, 384>}]} {
    %cst = arith.constant 0.000000e+00 : bf16
    %0 = vector.broadcast %cst : bf16 to vector<16x384xbf16>
    %c0 = arith.constant 0 : index
    %c0_0 = arith.constant 0 : index
    %1 = vector.load %arg14[%c0, %c0_0] : memref<16x384xbf16, #tpu.memory_space<vmem>>, vector<16x384xbf16>
    tpu.vector_store %arg14[%c0, %c0_0], %0 {strides = array<i32>} : memref<16x384xbf16, #tpu.memory_space<vmem>>, vector<16x384xbf16>,
    %c0_1 = arith.constant 0 : index
    %c0_2 = arith.constant 0 : index
    %2 = vector.load %arg3[%c0_1, %c0_2] : memref<16x144xf32, #tpu.memory_space<vmem>>, vector<16x144xf32>
    %c0_3 = arith.constant 0 : index
    %c0_4 = arith.constant 0 : index
    %3 = vector.load %arg4[%c0_3, %c0_4] : memref<16x1xf32, #tpu.memory_space<vmem>>, vector<16x1xf32>
    %c0_5 = arith.constant 0 : index
    %c0_6 = arith.constant 0 : index
    %4 = vector.load %arg1[%c0_5, %c0_6] : memref<16x384xbf16, #tpu.memory_space<vmem>>, vector<16x256xbf16>
    %5 = arith.extf %4 : vector<16x256xbf16> to vector<16x256xf32>
    %c0_7 = arith.constant 0 : index
    %c1 = arith.constant 1 : index
    %6 = vector.load %arg1[%c0_7, %c1] : memref<16x384xbf16, #tpu.memory_space<vmem>>, vector<16x256xbf16>
    %7 = arith.extf %6 : vector<16x256xbf16> to vector<16x256xf32>
    %c0_8 = arith.constant 0 : index
    %c2 = arith.constant 2 : index
    %8 = vector.load %arg1[%c0_8, %c2] : memref<16x384xbf16, #tpu.memory_space<vmem>>, vector<16x256xbf16>
    %9 = arith.extf %8 : vector<16x256xbf16> to vector<16x256xf32>
    %c0_9 = arith.constant 0 : index
    %c10 = arith.constant 10 : index
    %10 = vector.load %arg1[%c0_9, %c10] : memref<16x384xbf16, #tpu.memory_space<vmem>>, vector<16x256xbf16>
    %11 = arith.extf %10 : vector<16x256xbf16> to vector<16x256xf32>
    %c0_10 = arith.constant 0 : index
    %c11 = arith.constant 11 : index
    %12 = vector.load %arg1[%c0_10, %c11] : memref<16x384xbf16, #tpu.memory_space<vmem>>, vector<16x256xbf16>
    %13 = arith.extf %12 : vector<16x256xbf16> to vector<16x256xf32>
    %c0_11 = arith.constant 0 : index
    %c12 = arith.constant 12 : index
    %14 = vector.load %arg1[%c0_11, %c12] : memref<16x384xbf16, #tpu.memory_space<vmem>>, vector<16x256xbf16>
    %15 = arith.extf %14 : vector<16x256xbf16> to vector<16x256xf32>
    %c0_12 = arith.constant 0 : index
    %c20 = arith.constant 20 : index
    %16 = vector.load %arg1[%c0_12, %c20] : memref<16x384xbf16, #tpu.memory_space<vmem>>, vector<16x256xbf16>
    %17 = arith.extf %16 : vector<16x256xbf16> to vector<16x256xf32>
    %c0_13 = arith.constant 0 : index
    %c21 = arith.constant 21 : index
    %18 = vector.load %arg1[%c0_13, %c21] : memref<16x384xbf16, #tpu.memory_space<vmem>>, vector<16x256xbf16>
    %19 = arith.extf %18 : vector<16x256xbf16> to vector<16x256xf32>
    %c0_14 = arith.constant 0 : index
    %c22 = arith.constant 22 : index
    %20 = vector.load %arg1[%c0_14, %c22] : memref<16x384xbf16, #tpu.memory_space<vmem>>, vector<16x256xbf16>
    %21 = arith.extf %20 : vector<16x256xbf16> to vector<16x256xf32>
    %22 = tpu.concatenate %5, %7, %9, %11, %13, %15, %17, %19, %21 in 0 : vector<16x256xf32>, vector<16x256xf32>, vector<16x256xf32>, vector<16x256xf32>, vector<16x256xf32>, vector<16x256xf32>, vector<16x256xf32>, vector<16x256xf32>, vector<16x256xf32> -> vector<144x256xf32>
    %cst_15 = arith.constant dense<0.000000e+00> : vector<16x256xf32>
    %23 = tpu.matmul %2, %22, %cst_15 {dimension_numbers = #tpu.dot_dimension_numbers<[1], [0], [0], [1], [0, 0, 1, 1], [], []>} : vector<16x144xf32>, vector<144x256xf32>, vector<16x256xf32> -> vector<16x256xf32>
    %24 = vector.broadcast %3 : vector<16x1xf32> to vector<16x256xf32>
    %25 = arith.addf %23, %24 : vector<16x256xf32>
    %cst_16 = arith.constant 0.000000e+00 : f32
    %26 = vector.broadcast %cst_16 : f32 to vector<16x256xf32>
    %27 = arith.maximumf %25, %26 : vector<16x256xf32>
    %c0_17 = arith.constant 0 : index
    %c11_18 = arith.constant 11 : index
    %28 = vector.load %arg2[%c0_17, %c11_18] : memref<1x384xf32, #tpu.memory_space<vmem>>, vector<1x256xf32>
    %cst_19 = arith.constant 5.000000e-01 : f32
    %29 = vector.broadcast %cst_19 : f32 to vector<1x256xf32>
    %30 = arith.cmpf ogt, %28, %29 : vector<1x256xf32>
    %cst_20 = arith.constant 0.000000e+00 : f32
    %31 = vector.shape_cast %30 : vector<1x256xi1> to vector<1x256xi1>
    %32 = vector.broadcast %31 : vector<1x256xi1> to vector<16x256xi1>
    %33 = vector.broadcast %cst_20 : f32 to vector<16x256xf32>
    %34 = arith.select %32, %27, %33 : vector<16x256xi1>, vector<16x256xf32>
    %35 = arith.truncf %34 : vector<16x256xf32> to vector<16x256xbf16>
    %c0_21 = arith.constant 0 : index
    %c11_22 = arith.constant 11 : index
    %36 = vector.load %arg14[%c0_21, %c11_22] : memref<16x384xbf16, #tpu.memory_space<vmem>>, vector<16x256xbf16>
    tpu.vector_store %arg14[%c0_21, %c11_22], %35 {strides = array<i32>} : memref<16x384xbf16, #tpu.memory_space<vmem>>, vector<16x256xbf16>,
    %cst_23 = arith.constant 0.000000e+00 : bf16
    %37 = vector.broadcast %cst_23 : bf16 to vector<16x384xbf16>
    %c0_24 = arith.constant 0 : index
    %c0_25 = arith.constant 0 : index
    %38 = vector.load %arg15[%c0_24, %c0_25] : memref<16x384xbf16, #tpu.memory_space<vmem>>, vector<16x384xbf16>
    tpu.vector_store %arg15[%c0_24, %c0_25], %37 {strides = array<i32>} : memref<16x384xbf16, #tpu.memory_space<vmem>>, vector<16x384xbf16>,
    %c0_26 = arith.constant 0 : index
    %c0_27 = arith.constant 0 : index
    %39 = vector.load %arg5[%c0_26, %c0_27] : memref<16x144xf32, #tpu.memory_space<vmem>>, vector<16x144xf32>
    %c0_28 = arith.constant 0 : index
    %c0_29 = arith.constant 0 : index
    %40 = vector.load %arg6[%c0_28, %c0_29] : memref<16x1xf32, #tpu.memory_space<vmem>>, vector<16x1xf32>
    %c0_30 = arith.constant 0 : index
    %c0_31 = arith.constant 0 : index
    %41 = vector.load %arg7[%c0_30, %c0_31] : memref<16x16xf32, #tpu.memory_space<vmem>>, vector<16x16xf32>
    %c0_32 = arith.constant 0 : index
    %c0_33 = arith.constant 0 : index
    %42 = vector.load %arg8[%c0_32, %c0_33] : memref<16x1xf32, #tpu.memory_space<vmem>>, vector<16x1xf32>
    %c0_34 = arith.constant 0 : index
    %c0_35 = arith.constant 0 : index
    %43 = vector.load %arg14[%c0_34, %c0_35] : memref<16x384xbf16, #tpu.memory_space<vmem>>, vector<16x256xbf16>
    %44 = arith.extf %43 : vector<16x256xbf16> to vector<16x256xf32>
    %c0_36 = arith.constant 0 : index
    %c1_37 = arith.constant 1 : index
    %45 = vector.load %arg14[%c0_36, %c1_37] : memref<16x384xbf16, #tpu.memory_space<vmem>>, vector<16x256xbf16>
    %46 = arith.extf %45 : vector<16x256xbf16> to vector<16x256xf32>
    %c0_38 = arith.constant 0 : index
    %c2_39 = arith.constant 2 : index
    %47 = vector.load %arg14[%c0_38, %c2_39] : memref<16x384xbf16, #tpu.memory_space<vmem>>, vector<16x256xbf16>
    %48 = arith.extf %47 : vector<16x256xbf16> to vector<16x256xf32>
    %c0_40 = arith.constant 0 : index
    %c10_41 = arith.constant 10 : index
    %49 = vector.load %arg14[%c0_40, %c10_41] : memref<16x384xbf16, #tpu.memory_space<vmem>>, vector<16x256xbf16>
    %50 = arith.extf %49 : vector<16x256xbf16> to vector<16x256xf32>
    %c0_42 = arith.constant 0 : index
    %c11_43 = arith.constant 11 : index
    %51 = vector.load %arg14[%c0_42, %c11_43] : memref<16x384xbf16, #tpu.memory_space<vmem>>, vector<16x256xbf16>
    %52 = arith.extf %51 : vector<16x256xbf16> to vector<16x256xf32>
    %c0_44 = arith.constant 0 : index
    %c12_45 = arith.constant 12 : index
    %53 = vector.load %arg14[%c0_44, %c12_45] : memref<16x384xbf16, #tpu.memory_space<vmem>>, vector<16x256xbf16>
    %54 = arith.extf %53 : vector<16x256xbf16> to vector<16x256xf32>
    %c0_46 = arith.constant 0 : index
    %c20_47 = arith.constant 20 : index
    %55 = vector.load %arg14[%c0_46, %c20_47] : memref<16x384xbf16, #tpu.memory_space<vmem>>, vector<16x256xbf16>
    %56 = arith.extf %55 : vector<16x256xbf16> to vector<16x256xf32>
    %c0_48 = arith.constant 0 : index
    %c21_49 = arith.constant 21 : index
    %57 = vector.load %arg14[%c0_48, %c21_49] : memref<16x384xbf16, #tpu.memory_space<vmem>>, vector<16x256xbf16>
    %58 = arith.extf %57 : vector<16x256xbf16> to vector<16x256xf32>
    %c0_50 = arith.constant 0 : index
    %c22_51 = arith.constant 22 : index
    %59 = vector.load %arg14[%c0_50, %c22_51] : memref<16x384xbf16, #tpu.memory_space<vmem>>, vector<16x256xbf16>
    %60 = arith.extf %59 : vector<16x256xbf16> to vector<16x256xf32>
    %61 = tpu.concatenate %44, %46, %48, %50, %52, %54, %56, %58, %60 in 0 : vector<16x256xf32>, vector<16x256xf32>, vector<16x256xf32>, vector<16x256xf32>, vector<16x256xf32>, vector<16x256xf32>, vector<16x256xf32>, vector<16x256xf32>, vector<16x256xf32> -> vector<144x256xf32>
    %cst_52 = arith.constant dense<0.000000e+00> : vector<16x256xf32>
    %62 = tpu.matmul %39, %61, %cst_52 {dimension_numbers = #tpu.dot_dimension_numbers<[1], [0], [0], [1], [0, 0, 1, 1], [], []>} : vector<16x144xf32>, vector<144x256xf32>, vector<16x256xf32> -> vector<16x256xf32>
    %63 = vector.broadcast %40 : vector<16x1xf32> to vector<16x256xf32>
    %64 = arith.addf %62, %63 : vector<16x256xf32>
    %cst_53 = arith.constant 0.000000e+00 : f32
    %65 = vector.broadcast %cst_53 : f32 to vector<16x256xf32>
    %66 = arith.maximumf %64, %65 : vector<16x256xf32>
    %cst_54 = arith.constant dense<0.000000e+00> : vector<16x256xf32>
    %67 = tpu.matmul %41, %66, %cst_54 {dimension_numbers = #tpu.dot_dimension_numbers<[1], [0], [0], [1], [0, 0, 1, 1], [], []>} : vector<16x16xf32>, vector<16x256xf32>, vector<16x256xf32> -> vector<16x256xf32>
    %68 = vector.broadcast %42 : vector<16x1xf32> to vector<16x256xf32>
    %69 = arith.addf %67, %68 : vector<16x256xf32>
    %c0_55 = arith.constant 0 : index
    %c11_56 = arith.constant 11 : index
    %70 = vector.load %arg14[%c0_55, %c11_56] : memref<16x384xbf16, #tpu.memory_space<vmem>>, vector<16x256xbf16>
    %71 = arith.extf %70 : vector<16x256xbf16> to vector<16x256xf32>
    %72 = arith.addf %69, %71 : vector<16x256xf32>
    %c0_57 = arith.constant 0 : index
    %c11_58 = arith.constant 11 : index
    %73 = vector.load %arg2[%c0_57, %c11_58] : memref<1x384xf32, #tpu.memory_space<vmem>>, vector<1x256xf32>
    %cst_59 = arith.constant 5.000000e-01 : f32
    %74 = vector.broadcast %cst_59 : f32 to vector<1x256xf32>
    %75 = arith.cmpf ogt, %73, %74 : vector<1x256xf32>
    %cst_60 = arith.constant 0.000000e+00 : f32
    %76 = vector.shape_cast %75 : vector<1x256xi1> to vector<1x256xi1>
    %77 = vector.broadcast %76 : vector<1x256xi1> to vector<16x256xi1>
    %78 = vector.broadcast %cst_60 : f32 to vector<16x256xf32>
    %79 = arith.select %77, %72, %78 : vector<16x256xi1>, vector<16x256xf32>
    %80 = arith.truncf %79 : vector<16x256xf32> to vector<16x256xbf16>
    %c0_61 = arith.constant 0 : index
    %c11_62 = arith.constant 11 : index
    %81 = vector.load %arg15[%c0_61, %c11_62] : memref<16x384xbf16, #tpu.memory_space<vmem>>, vector<16x256xbf16>
    tpu.vector_store %arg15[%c0_61, %c11_62], %80 {strides = array<i32>} : memref<16x384xbf16, #tpu.memory_space<vmem>>, vector<16x256xbf16>,
    %cst_63 = arith.constant 0.000000e+00 : bf16
    %82 = vector.broadcast %cst_63 : bf16 to vector<16x384xbf16>
    %c0_64 = arith.constant 0 : index
    %c0_65 = arith.constant 0 : index
    %83 = vector.load %arg13[%c0_64, %c0_65] : memref<16x384xbf16, #tpu.memory_space<vmem>>, vector<16x384xbf16>
    tpu.vector_store %arg13[%c0_64, %c0_65], %82 {strides = array<i32>} : memref<16x384xbf16, #tpu.memory_space<vmem>>, vector<16x384xbf16>,
    %c0_66 = arith.constant 0 : index
    %c0_67 = arith.constant 0 : index
    %84 = vector.load %arg9[%c0_66, %c0_67] : memref<16x144xf32, #tpu.memory_space<vmem>>, vector<16x144xf32>
    %c0_68 = arith.constant 0 : index
    %c0_69 = arith.constant 0 : index
    %85 = vector.load %arg10[%c0_68, %c0_69] : memref<16x1xf32, #tpu.memory_space<vmem>>, vector<16x1xf32>
    %c0_70 = arith.constant 0 : index
    %c0_71 = arith.constant 0 : index
    %86 = vector.load %arg11[%c0_70, %c0_71] : memref<16x16xf32, #tpu.memory_space<vmem>>, vector<16x16xf32>
    %c0_72 = arith.constant 0 : index
    %c0_73 = arith.constant 0 : index
    %87 = vector.load %arg12[%c0_72, %c0_73] : memref<16x1xf32, #tpu.memory_space<vmem>>, vector<16x1xf32>
    %c0_74 = arith.constant 0 : index
    %c0_75 = arith.constant 0 : index
    %88 = vector.load %arg15[%c0_74, %c0_75] : memref<16x384xbf16, #tpu.memory_space<vmem>>, vector<16x256xbf16>
    %89 = arith.extf %88 : vector<16x256xbf16> to vector<16x256xf32>
    %c0_76 = arith.constant 0 : index
    %c1_77 = arith.constant 1 : index
    %90 = vector.load %arg15[%c0_76, %c1_77] : memref<16x384xbf16, #tpu.memory_space<vmem>>, vector<16x256xbf16>
    %91 = arith.extf %90 : vector<16x256xbf16> to vector<16x256xf32>
    %c0_78 = arith.constant 0 : index
    %c2_79 = arith.constant 2 : index
    %92 = vector.load %arg15[%c0_78, %c2_79] : memref<16x384xbf16, #tpu.memory_space<vmem>>, vector<16x256xbf16>
    %93 = arith.extf %92 : vector<16x256xbf16> to vector<16x256xf32>
    %c0_80 = arith.constant 0 : index
    %c10_81 = arith.constant 10 : index
    %94 = vector.load %arg15[%c0_80, %c10_81] : memref<16x384xbf16, #tpu.memory_space<vmem>>, vector<16x256xbf16>
    %95 = arith.extf %94 : vector<16x256xbf16> to vector<16x256xf32>
    %c0_82 = arith.constant 0 : index
    %c11_83 = arith.constant 11 : index
    %96 = vector.load %arg15[%c0_82, %c11_83] : memref<16x384xbf16, #tpu.memory_space<vmem>>, vector<16x256xbf16>
    %97 = arith.extf %96 : vector<16x256xbf16> to vector<16x256xf32>
    %c0_84 = arith.constant 0 : index
    %c12_85 = arith.constant 12 : index
    %98 = vector.load %arg15[%c0_84, %c12_85] : memref<16x384xbf16, #tpu.memory_space<vmem>>, vector<16x256xbf16>
    %99 = arith.extf %98 : vector<16x256xbf16> to vector<16x256xf32>
    %c0_86 = arith.constant 0 : index
    %c20_87 = arith.constant 20 : index
    %100 = vector.load %arg15[%c0_86, %c20_87] : memref<16x384xbf16, #tpu.memory_space<vmem>>, vector<16x256xbf16>
    %101 = arith.extf %100 : vector<16x256xbf16> to vector<16x256xf32>
    %c0_88 = arith.constant 0 : index
    %c21_89 = arith.constant 21 : index
    %102 = vector.load %arg15[%c0_88, %c21_89] : memref<16x384xbf16, #tpu.memory_space<vmem>>, vector<16x256xbf16>
    %103 = arith.extf %102 : vector<16x256xbf16> to vector<16x256xf32>
    %c0_90 = arith.constant 0 : index
    %c22_91 = arith.constant 22 : index
    %104 = vector.load %arg15[%c0_90, %c22_91] : memref<16x384xbf16, #tpu.memory_space<vmem>>, vector<16x256xbf16>
    %105 = arith.extf %104 : vector<16x256xbf16> to vector<16x256xf32>
    %106 = tpu.concatenate %89, %91, %93, %95, %97, %99, %101, %103, %105 in 0 : vector<16x256xf32>, vector<16x256xf32>, vector<16x256xf32>, vector<16x256xf32>, vector<16x256xf32>, vector<16x256xf32>, vector<16x256xf32>, vector<16x256xf32>, vector<16x256xf32> -> vector<144x256xf32>
    %cst_92 = arith.constant dense<0.000000e+00> : vector<16x256xf32>
    %107 = tpu.matmul %84, %106, %cst_92 {dimension_numbers = #tpu.dot_dimension_numbers<[1], [0], [0], [1], [0, 0, 1, 1], [], []>} : vector<16x144xf32>, vector<144x256xf32>, vector<16x256xf32> -> vector<16x256xf32>
    %108 = vector.broadcast %85 : vector<16x1xf32> to vector<16x256xf32>
    %109 = arith.addf %107, %108 : vector<16x256xf32>
    %cst_93 = arith.constant 0.000000e+00 : f32
    %110 = vector.broadcast %cst_93 : f32 to vector<16x256xf32>
    %111 = arith.maximumf %109, %110 : vector<16x256xf32>
    %cst_94 = arith.constant dense<0.000000e+00> : vector<16x256xf32>
    %112 = tpu.matmul %86, %111, %cst_94 {dimension_numbers = #tpu.dot_dimension_numbers<[1], [0], [0], [1], [0, 0, 1, 1], [], []>} : vector<16x16xf32>, vector<16x256xf32>, vector<16x256xf32> -> vector<16x256xf32>
    %113 = vector.broadcast %87 : vector<16x1xf32> to vector<16x256xf32>
    %114 = arith.addf %112, %113 : vector<16x256xf32>
    %c0_95 = arith.constant 0 : index
    %c11_96 = arith.constant 11 : index
    %115 = vector.load %arg15[%c0_95, %c11_96] : memref<16x384xbf16, #tpu.memory_space<vmem>>, vector<16x256xbf16>
    %116 = arith.extf %115 : vector<16x256xbf16> to vector<16x256xf32>
    %117 = arith.addf %114, %116 : vector<16x256xf32>
    %cst_97 = arith.constant 0.000000e+00 : f32
    %118 = vector.broadcast %cst_97 : f32 to vector<16x256xf32>
    %119 = arith.maximumf %117, %118 : vector<16x256xf32>
    %c0_98 = arith.constant 0 : index
    %c11_99 = arith.constant 11 : index
    %120 = vector.load %arg2[%c0_98, %c11_99] : memref<1x384xf32, #tpu.memory_space<vmem>>, vector<1x256xf32>
    %cst_100 = arith.constant 5.000000e-01 : f32
    %121 = vector.broadcast %cst_100 : f32 to vector<1x256xf32>
    %122 = arith.cmpf ogt, %120, %121 : vector<1x256xf32>
    %cst_101 = arith.constant 0.000000e+00 : f32
    %123 = vector.shape_cast %122 : vector<1x256xi1> to vector<1x256xi1>
    %124 = vector.broadcast %123 : vector<1x256xi1> to vector<16x256xi1>
    %125 = vector.broadcast %cst_101 : f32 to vector<16x256xf32>
    %126 = arith.select %124, %119, %125 : vector<16x256xi1>, vector<16x256xf32>
    %127 = arith.truncf %126 : vector<16x256xf32> to vector<16x256xbf16>
    %c0_102 = arith.constant 0 : index
    %c11_103 = arith.constant 11 : index
    %128 = vector.load %arg13[%c0_102, %c11_103] : memref<16x384xbf16, #tpu.memory_space<vmem>>, vector<16x256xbf16>
    tpu.vector_store %arg13[%c0_102, %c11_103], %127 {strides = array<i32>} : memref<16x384xbf16, #tpu.memory_space<vmem>>, vector<16x256xbf16>,
    return
  }
  func.func @transform_0(%arg0: i32) -> (i32, i32) {
    %c0_i32 = arith.constant 0 : i32
    %c0_i32_0 = arith.constant 0 : i32
    %c0_i32_1 = arith.constant 0 : i32
    return %c0_i32, %c0_i32_0 : i32, i32
  }
  func.func @transform_1(%arg0: i32) -> (i32, i32) {
    %c0_i32 = arith.constant 0 : i32
    %c0_i32_0 = arith.constant 0 : i32
    %c0_i32_1 = arith.constant 0 : i32
    return %c0_i32, %c0_i32_0 : i32, i32
  }
  func.func @transform_2(%arg0: i32) -> (i32, i32) {
    %c0_i32 = arith.constant 0 : i32
    %c0_i32_0 = arith.constant 0 : i32
    %c0_i32_1 = arith.constant 0 : i32
    return %c0_i32, %c0_i32_0 : i32, i32
  }
  func.func @transform_3(%arg0: i32) -> (i32, i32) {
    %c0_i32 = arith.constant 0 : i32
    %c0_i32_0 = arith.constant 0 : i32
    %c0_i32_1 = arith.constant 0 : i32
    return %c0_i32, %c0_i32_0 : i32, i32
  }
  func.func @transform_4(%arg0: i32) -> (i32, i32) {
    %c0_i32 = arith.constant 0 : i32
    %c0_i32_0 = arith.constant 0 : i32
    %c0_i32_1 = arith.constant 0 : i32
    return %c0_i32, %c0_i32_0 : i32, i32
  }
  func.func @transform_5(%arg0: i32) -> (i32, i32) {
    %c0_i32 = arith.constant 0 : i32
    %c0_i32_0 = arith.constant 0 : i32
    %c0_i32_1 = arith.constant 0 : i32
    return %c0_i32, %c0_i32_0 : i32, i32
  }
  func.func @transform_6(%arg0: i32) -> (i32, i32) {
    %c0_i32 = arith.constant 0 : i32
    %c0_i32_0 = arith.constant 0 : i32
    %c0_i32_1 = arith.constant 0 : i32
    return %c0_i32, %c0_i32_0 : i32, i32
  }
  func.func @transform_7(%arg0: i32) -> (i32, i32) {
    %c0_i32 = arith.constant 0 : i32
    %c0_i32_0 = arith.constant 0 : i32
    %c0_i32_1 = arith.constant 0 : i32
    return %c0_i32, %c0_i32_0 : i32, i32
  }
  func.func @transform_8(%arg0: i32) -> (i32, i32) {
    %c0_i32 = arith.constant 0 : i32
    %c0_i32_0 = arith.constant 0 : i32
    %c0_i32_1 = arith.constant 0 : i32
    return %c0_i32, %c0_i32_0 : i32, i32
  }
  func.func @transform_9(%arg0: i32) -> (i32, i32) {
    %c0_i32 = arith.constant 0 : i32
    %c0_i32_0 = arith.constant 0 : i32
    %c0_i32_1 = arith.constant 0 : i32
    return %c0_i32, %c0_i32_0 : i32, i32
  }
  func.func @transform_10(%arg0: i32) -> (i32, i32) {
    %c0_i32 = arith.constant 0 : i32
    %c0_i32_0 = arith.constant 0 : i32
    %c0_i32_1 = arith.constant 0 : i32
    return %c0_i32, %c0_i32_0 : i32, i32
  }
  func.func @transform_11(%arg0: i32) -> (i32, i32) {
    %c0_i32 = arith.constant 0 : i32
    %c0_i32_0 = arith.constant 0 : i32
    %c0_i32_1 = arith.constant 0 : i32
    return %c0_i32, %c0_i32_0 : i32, i32
  }
  func.func @transform_12(%arg0: i32) -> (i32, i32) {
    %c0_i32 = arith.constant 0 : i32
    %c0_i32_0 = arith.constant 0 : i32
    %c0_i32_1 = arith.constant 0 : i32
    return %c0_i32, %c0_i32_0 : i32, i32
  }
}

module attributes {stable_mosaic.version = 11 : i64} {
  func.func @kernel(%arg0: i32, %arg1: memref<4x16x256xbf16, #tpu.memory_space<vmem>>, %arg2: memref<16x256xf32, #tpu.memory_space<vmem>>, %arg3: memref<16x1xf32, #tpu.memory_space<vmem>>, %arg4: memref<16x128xbf16, #tpu.memory_space<vmem>>) attributes {dimension_semantics = [#tpu.dimension_semantics<arbitrary>], iteration_bounds = array<i64: 1>, scalar_prefetch = 0 : i64, scratch_operands = 0 : i64, tpu.core_type = #tpu.core_type<tc>, window_params = [{pipeline_mode = #tpu.pipeline_mode<synchronous>, transform_indices = @transform_0, window_bounds = array<i64: 4, 16, 256>}, {pipeline_mode = #tpu.pipeline_mode<synchronous>, transform_indices = @transform_1, window_bounds = array<i64: 16, 256>}, {pipeline_mode = #tpu.pipeline_mode<synchronous>, transform_indices = @transform_2, window_bounds = array<i64: 16, 1>}, {pipeline_mode = #tpu.pipeline_mode<synchronous>, transform_indices = @transform_3, window_bounds = array<i64: 16, 128>}]} {
    %c0 = arith.constant 0 : index
    %c0_0 = arith.constant 0 : index
    %0 = vector.load %arg2[%c0, %c0_0] : memref<16x256xf32, #tpu.memory_space<vmem>>, vector<16x256xf32>
    %c0_1 = arith.constant 0 : index
    %c0_2 = arith.constant 0 : index
    %1 = vector.load %arg3[%c0_1, %c0_2] : memref<16x1xf32, #tpu.memory_space<vmem>>, vector<16x1xf32>
    %c0_3 = arith.constant 0 : index
    %c0_4 = arith.constant 0 : index
    %c0_5 = arith.constant 0 : index
    %2 = vector.load %arg1[%c0_3, %c0_4, %c0_5] : memref<4x16x256xbf16, #tpu.memory_space<vmem>>, vector<1x16x128xbf16>
    %3 = vector.shape_cast %2 : vector<1x16x128xbf16> to vector<16x128xbf16>
    %4 = arith.extf %3 : vector<16x128xbf16> to vector<16x128xf32>
    %c1 = arith.constant 1 : index
    %c0_6 = arith.constant 0 : index
    %c0_7 = arith.constant 0 : index
    %5 = vector.load %arg1[%c1, %c0_6, %c0_7] : memref<4x16x256xbf16, #tpu.memory_space<vmem>>, vector<1x16x128xbf16>
    %6 = vector.shape_cast %5 : vector<1x16x128xbf16> to vector<16x128xbf16>
    %7 = arith.extf %6 : vector<16x128xbf16> to vector<16x128xf32>
    %c0_8 = arith.constant 0 : index
    %c0_9 = arith.constant 0 : index
    %c1_10 = arith.constant 1 : index
    %8 = vector.load %arg1[%c0_8, %c0_9, %c1_10] : memref<4x16x256xbf16, #tpu.memory_space<vmem>>, vector<1x16x128xbf16>
    %9 = vector.shape_cast %8 : vector<1x16x128xbf16> to vector<16x128xbf16>
    %10 = arith.extf %9 : vector<16x128xbf16> to vector<16x128xf32>
    %c1_11 = arith.constant 1 : index
    %c0_12 = arith.constant 0 : index
    %c1_13 = arith.constant 1 : index
    %11 = vector.load %arg1[%c1_11, %c0_12, %c1_13] : memref<4x16x256xbf16, #tpu.memory_space<vmem>>, vector<1x16x128xbf16>
    %12 = vector.shape_cast %11 : vector<1x16x128xbf16> to vector<16x128xbf16>
    %13 = arith.extf %12 : vector<16x128xbf16> to vector<16x128xf32>
    %c2 = arith.constant 2 : index
    %c0_14 = arith.constant 0 : index
    %c0_15 = arith.constant 0 : index
    %14 = vector.load %arg1[%c2, %c0_14, %c0_15] : memref<4x16x256xbf16, #tpu.memory_space<vmem>>, vector<1x16x128xbf16>
    %15 = vector.shape_cast %14 : vector<1x16x128xbf16> to vector<16x128xbf16>
    %16 = arith.extf %15 : vector<16x128xbf16> to vector<16x128xf32>
    %c3 = arith.constant 3 : index
    %c0_16 = arith.constant 0 : index
    %c0_17 = arith.constant 0 : index
    %17 = vector.load %arg1[%c3, %c0_16, %c0_17] : memref<4x16x256xbf16, #tpu.memory_space<vmem>>, vector<1x16x128xbf16>
    %18 = vector.shape_cast %17 : vector<1x16x128xbf16> to vector<16x128xbf16>
    %19 = arith.extf %18 : vector<16x128xbf16> to vector<16x128xf32>
    %c2_18 = arith.constant 2 : index
    %c0_19 = arith.constant 0 : index
    %c1_20 = arith.constant 1 : index
    %20 = vector.load %arg1[%c2_18, %c0_19, %c1_20] : memref<4x16x256xbf16, #tpu.memory_space<vmem>>, vector<1x16x128xbf16>
    %21 = vector.shape_cast %20 : vector<1x16x128xbf16> to vector<16x128xbf16>
    %22 = arith.extf %21 : vector<16x128xbf16> to vector<16x128xf32>
    %c3_21 = arith.constant 3 : index
    %c0_22 = arith.constant 0 : index
    %c1_23 = arith.constant 1 : index
    %23 = vector.load %arg1[%c3_21, %c0_22, %c1_23] : memref<4x16x256xbf16, #tpu.memory_space<vmem>>, vector<1x16x128xbf16>
    %24 = vector.shape_cast %23 : vector<1x16x128xbf16> to vector<16x128xbf16>
    %25 = arith.extf %24 : vector<16x128xbf16> to vector<16x128xf32>
    %c0_24 = arith.constant 0 : index
    %c0_25 = arith.constant 0 : index
    %c5 = arith.constant 5 : index
    %26 = vector.load %arg1[%c0_24, %c0_25, %c5] : memref<4x16x256xbf16, #tpu.memory_space<vmem>>, vector<1x16x128xbf16>
    %27 = vector.shape_cast %26 : vector<1x16x128xbf16> to vector<16x128xbf16>
    %28 = arith.extf %27 : vector<16x128xbf16> to vector<16x128xf32>
    %c1_26 = arith.constant 1 : index
    %c0_27 = arith.constant 0 : index
    %c5_28 = arith.constant 5 : index
    %29 = vector.load %arg1[%c1_26, %c0_27, %c5_28] : memref<4x16x256xbf16, #tpu.memory_space<vmem>>, vector<1x16x128xbf16>
    %30 = vector.shape_cast %29 : vector<1x16x128xbf16> to vector<16x128xbf16>
    %31 = arith.extf %30 : vector<16x128xbf16> to vector<16x128xf32>
    %c0_29 = arith.constant 0 : index
    %c0_30 = arith.constant 0 : index
    %c6 = arith.constant 6 : index
    %32 = vector.load %arg1[%c0_29, %c0_30, %c6] : memref<4x16x256xbf16, #tpu.memory_space<vmem>>, vector<1x16x128xbf16>
    %33 = vector.shape_cast %32 : vector<1x16x128xbf16> to vector<16x128xbf16>
    %34 = arith.extf %33 : vector<16x128xbf16> to vector<16x128xf32>
    %c1_31 = arith.constant 1 : index
    %c0_32 = arith.constant 0 : index
    %c6_33 = arith.constant 6 : index
    %35 = vector.load %arg1[%c1_31, %c0_32, %c6_33] : memref<4x16x256xbf16, #tpu.memory_space<vmem>>, vector<1x16x128xbf16>
    %36 = vector.shape_cast %35 : vector<1x16x128xbf16> to vector<16x128xbf16>
    %37 = arith.extf %36 : vector<16x128xbf16> to vector<16x128xf32>
    %c2_34 = arith.constant 2 : index
    %c0_35 = arith.constant 0 : index
    %c5_36 = arith.constant 5 : index
    %38 = vector.load %arg1[%c2_34, %c0_35, %c5_36] : memref<4x16x256xbf16, #tpu.memory_space<vmem>>, vector<1x16x128xbf16>
    %39 = vector.shape_cast %38 : vector<1x16x128xbf16> to vector<16x128xbf16>
    %40 = arith.extf %39 : vector<16x128xbf16> to vector<16x128xf32>
    %c3_37 = arith.constant 3 : index
    %c0_38 = arith.constant 0 : index
    %c5_39 = arith.constant 5 : index
    %41 = vector.load %arg1[%c3_37, %c0_38, %c5_39] : memref<4x16x256xbf16, #tpu.memory_space<vmem>>, vector<1x16x128xbf16>
    %42 = vector.shape_cast %41 : vector<1x16x128xbf16> to vector<16x128xbf16>
    %43 = arith.extf %42 : vector<16x128xbf16> to vector<16x128xf32>
    %c2_40 = arith.constant 2 : index
    %c0_41 = arith.constant 0 : index
    %c6_42 = arith.constant 6 : index
    %44 = vector.load %arg1[%c2_40, %c0_41, %c6_42] : memref<4x16x256xbf16, #tpu.memory_space<vmem>>, vector<1x16x128xbf16>
    %45 = vector.shape_cast %44 : vector<1x16x128xbf16> to vector<16x128xbf16>
    %46 = arith.extf %45 : vector<16x128xbf16> to vector<16x128xf32>
    %c3_43 = arith.constant 3 : index
    %c0_44 = arith.constant 0 : index
    %c6_45 = arith.constant 6 : index
    %47 = vector.load %arg1[%c3_43, %c0_44, %c6_45] : memref<4x16x256xbf16, #tpu.memory_space<vmem>>, vector<1x16x128xbf16>
    %48 = vector.shape_cast %47 : vector<1x16x128xbf16> to vector<16x128xbf16>
    %49 = arith.extf %48 : vector<16x128xbf16> to vector<16x128xf32>
    %50 = tpu.concatenate %4, %7, %10, %13, %16, %19, %22, %25, %28, %31, %34, %37, %40, %43, %46, %49 in 0 : vector<16x128xf32>, vector<16x128xf32>, vector<16x128xf32>, vector<16x128xf32>, vector<16x128xf32>, vector<16x128xf32>, vector<16x128xf32>, vector<16x128xf32>, vector<16x128xf32>, vector<16x128xf32>, vector<16x128xf32>, vector<16x128xf32>, vector<16x128xf32>, vector<16x128xf32>, vector<16x128xf32>, vector<16x128xf32> -> vector<256x128xf32>
    %cst = arith.constant dense<0.000000e+00> : vector<16x128xf32>
    %51 = tpu.matmul %0, %50, %cst {dimension_numbers = #tpu.dot_dimension_numbers<[1], [0], [0], [1], [0, 0, 1, 1], [], []>} : vector<16x256xf32>, vector<256x128xf32>, vector<16x128xf32> -> vector<16x128xf32>
    %52 = vector.broadcast %1 : vector<16x1xf32> to vector<16x128xf32>
    %53 = arith.addf %51, %52 : vector<16x128xf32>
    %cst_46 = arith.constant 0.000000e+00 : f32
    %54 = vector.broadcast %cst_46 : f32 to vector<16x128xf32>
    %55 = arith.maximumf %53, %54 : vector<16x128xf32>
    %56 = arith.truncf %55 : vector<16x128xf32> to vector<16x128xbf16>
    %c0_47 = arith.constant 0 : index
    %c0_48 = arith.constant 0 : index
    %57 = vector.load %arg4[%c0_47, %c0_48] : memref<16x128xbf16, #tpu.memory_space<vmem>>, vector<16x128xbf16>
    tpu.vector_store %arg4[%c0_47, %c0_48], %56 {strides = array<i32>} : memref<16x128xbf16, #tpu.memory_space<vmem>>, vector<16x128xbf16>,
    return
  }
  func.func @transform_0(%arg0: i32) -> (i32, i32, i32) {
    %c0_i32 = arith.constant 0 : i32
    %c0_i32_0 = arith.constant 0 : i32
    %c0_i32_1 = arith.constant 0 : i32
    %c0_i32_2 = arith.constant 0 : i32
    return %c0_i32, %c0_i32_0, %c0_i32_1 : i32, i32, i32
  }
  func.func @transform_1(%arg0: i32) -> (i32, i32) {
    %c0_i32 = arith.constant 0 : i32
    %c0_i32_0 = arith.constant 0 : i32
    %c0_i32_1 = arith.constant 0 : i32
    return %c0_i32, %c0_i32_0 : i32, i32
  }
  func.func @transform_2(%arg0: i32) -> (i32, i32) {
    %c0_i32 = arith.constant 0 : i32
    %c0_i32_0 = arith.constant 0 : i32
    %c0_i32_1 = arith.constant 0 : i32
    return %c0_i32, %c0_i32_0 : i32, i32
  }
  func.func @transform_3(%arg0: i32) -> (i32, i32) {
    %c0_i32 = arith.constant 0 : i32
    %c0_i32_0 = arith.constant 0 : i32
    %c0_i32_1 = arith.constant 0 : i32
    return %c0_i32, %c0_i32_0 : i32, i32
  }
}

module attributes {stable_mosaic.version = 11 : i64} {
  func.func @kernel(%arg0: i32, %arg1: memref<16x256xbf16, #tpu.memory_space<vmem>>, %arg2: memref<1x256xf32, #tpu.memory_space<vmem>>, %arg3: memref<16x144xf32, #tpu.memory_space<vmem>>, %arg4: memref<16x1xf32, #tpu.memory_space<vmem>>, %arg5: memref<16x144xf32, #tpu.memory_space<vmem>>, %arg6: memref<16x1xf32, #tpu.memory_space<vmem>>, %arg7: memref<16x16xf32, #tpu.memory_space<vmem>>, %arg8: memref<16x1xf32, #tpu.memory_space<vmem>>, %arg9: memref<16x144xf32, #tpu.memory_space<vmem>>, %arg10: memref<16x1xf32, #tpu.memory_space<vmem>>, %arg11: memref<16x16xf32, #tpu.memory_space<vmem>>, %arg12: memref<16x1xf32, #tpu.memory_space<vmem>>, %arg13: memref<16x144xf32, #tpu.memory_space<vmem>>, %arg14: memref<16x1xf32, #tpu.memory_space<vmem>>, %arg15: memref<16x16xf32, #tpu.memory_space<vmem>>, %arg16: memref<16x1xf32, #tpu.memory_space<vmem>>, %arg17: memref<16x144xf32, #tpu.memory_space<vmem>>, %arg18: memref<16x1xf32, #tpu.memory_space<vmem>>, %arg19: memref<16x16xf32, #tpu.memory_space<vmem>>, %arg20: memref<16x1xf32, #tpu.memory_space<vmem>>, %arg21: memref<16x144xf32, #tpu.memory_space<vmem>>, %arg22: memref<16x1xf32, #tpu.memory_space<vmem>>, %arg23: memref<16x144xf32, #tpu.memory_space<vmem>>, %arg24: memref<16x1xf32, #tpu.memory_space<vmem>>, %arg25: memref<16x256xbf16, #tpu.memory_space<vmem>>, %arg26: memref<16x256xbf16, #tpu.memory_space<vmem>>, %arg27: memref<16x256xbf16, #tpu.memory_space<vmem>>) attributes {dimension_semantics = [#tpu.dimension_semantics<arbitrary>], iteration_bounds = array<i64: 1>, scalar_prefetch = 0 : i64, scratch_operands = 2 : i64, tpu.core_type = #tpu.core_type<tc>, window_params = [{pipeline_mode = #tpu.pipeline_mode<synchronous>, transform_indices = @transform_0, window_bounds = array<i64: 16, 256>}, {pipeline_mode = #tpu.pipeline_mode<synchronous>, transform_indices = @transform_1, window_bounds = array<i64: 1, 256>}, {pipeline_mode = #tpu.pipeline_mode<synchronous>, transform_indices = @transform_2, window_bounds = array<i64: 16, 144>}, {pipeline_mode = #tpu.pipeline_mode<synchronous>, transform_indices = @transform_3, window_bounds = array<i64: 16, 1>}, {pipeline_mode = #tpu.pipeline_mode<synchronous>, transform_indices = @transform_4, window_bounds = array<i64: 16, 144>}, {pipeline_mode = #tpu.pipeline_mode<synchronous>, transform_indices = @transform_5, window_bounds = array<i64: 16, 1>}, {pipeline_mode = #tpu.pipeline_mode<synchronous>, transform_indices = @transform_6, window_bounds = array<i64: 16, 16>}, {pipeline_mode = #tpu.pipeline_mode<synchronous>, transform_indices = @transform_7, window_bounds = array<i64: 16, 1>}, {pipeline_mode = #tpu.pipeline_mode<synchronous>, transform_indices = @transform_8, window_bounds = array<i64: 16, 144>}, {pipeline_mode = #tpu.pipeline_mode<synchronous>, transform_indices = @transform_9, window_bounds = array<i64: 16, 1>}, {pipeline_mode = #tpu.pipeline_mode<synchronous>, transform_indices = @transform_10, window_bounds = array<i64: 16, 16>}, {pipeline_mode = #tpu.pipeline_mode<synchronous>, transform_indices = @transform_11, window_bounds = array<i64: 16, 1>}, {pipeline_mode = #tpu.pipeline_mode<synchronous>, transform_indices = @transform_12, window_bounds = array<i64: 16, 144>}, {pipeline_mode = #tpu.pipeline_mode<synchronous>, transform_indices = @transform_13, window_bounds = array<i64: 16, 1>}, {pipeline_mode = #tpu.pipeline_mode<synchronous>, transform_indices = @transform_14, window_bounds = array<i64: 16, 16>}, {pipeline_mode = #tpu.pipeline_mode<synchronous>, transform_indices = @transform_15, window_bounds = array<i64: 16, 1>}, {pipeline_mode = #tpu.pipeline_mode<synchronous>, transform_indices = @transform_16, window_bounds = array<i64: 16, 144>}, {pipeline_mode = #tpu.pipeline_mode<synchronous>, transform_indices = @transform_17, window_bounds = array<i64: 16, 1>}, {pipeline_mode = #tpu.pipeline_mode<synchronous>, transform_indices = @transform_18, window_bounds = array<i64: 16, 16>}, {pipeline_mode = #tpu.pipeline_mode<synchronous>, transform_indices = @transform_19, window_bounds = array<i64: 16, 1>}, {pipeline_mode = #tpu.pipeline_mode<synchronous>, transform_indices = @transform_20, window_bounds = array<i64: 16, 144>}, {pipeline_mode = #tpu.pipeline_mode<synchronous>, transform_indices = @transform_21, window_bounds = array<i64: 16, 1>}, {pipeline_mode = #tpu.pipeline_mode<synchronous>, transform_indices = @transform_22, window_bounds = array<i64: 16, 144>}, {pipeline_mode = #tpu.pipeline_mode<synchronous>, transform_indices = @transform_23, window_bounds = array<i64: 16, 1>}, {pipeline_mode = #tpu.pipeline_mode<synchronous>, transform_indices = @transform_24, window_bounds = array<i64: 16, 256>}]} {
    %cst = arith.constant 0.000000e+00 : bf16
    %0 = vector.broadcast %cst : bf16 to vector<16x256xbf16>
    %c0 = arith.constant 0 : index
    %c0_0 = arith.constant 0 : index
    %1 = vector.load %arg26[%c0, %c0_0] : memref<16x256xbf16, #tpu.memory_space<vmem>>, vector<16x256xbf16>
    tpu.vector_store %arg26[%c0, %c0_0], %0 {strides = array<i32>} : memref<16x256xbf16, #tpu.memory_space<vmem>>, vector<16x256xbf16>,
    %c0_1 = arith.constant 0 : index
    %c0_2 = arith.constant 0 : index
    %2 = vector.load %arg3[%c0_1, %c0_2] : memref<16x144xf32, #tpu.memory_space<vmem>>, vector<16x144xf32>
    %c0_3 = arith.constant 0 : index
    %c0_4 = arith.constant 0 : index
    %3 = vector.load %arg4[%c0_3, %c0_4] : memref<16x1xf32, #tpu.memory_space<vmem>>, vector<16x1xf32>
    %c0_5 = arith.constant 0 : index
    %c0_6 = arith.constant 0 : index
    %4 = vector.load %arg1[%c0_5, %c0_6] : memref<16x256xbf16, #tpu.memory_space<vmem>>, vector<16x128xbf16>
    %5 = arith.extf %4 : vector<16x128xbf16> to vector<16x128xf32>
    %c0_7 = arith.constant 0 : index
    %c1 = arith.constant 1 : index
    %6 = vector.load %arg1[%c0_7, %c1] : memref<16x256xbf16, #tpu.memory_space<vmem>>, vector<16x128xbf16>
    %7 = arith.extf %6 : vector<16x128xbf16> to vector<16x128xf32>
    %c0_8 = arith.constant 0 : index
    %c2 = arith.constant 2 : index
    %8 = vector.load %arg1[%c0_8, %c2] : memref<16x256xbf16, #tpu.memory_space<vmem>>, vector<16x128xbf16>
    %9 = arith.extf %8 : vector<16x128xbf16> to vector<16x128xf32>
    %c0_9 = arith.constant 0 : index
    %c6 = arith.constant 6 : index
    %10 = vector.load %arg1[%c0_9, %c6] : memref<16x256xbf16, #tpu.memory_space<vmem>>, vector<16x128xbf16>
    %11 = arith.extf %10 : vector<16x128xbf16> to vector<16x128xf32>
    %c0_10 = arith.constant 0 : index
    %c7 = arith.constant 7 : index
    %12 = vector.load %arg1[%c0_10, %c7] : memref<16x256xbf16, #tpu.memory_space<vmem>>, vector<16x128xbf16>
    %13 = arith.extf %12 : vector<16x128xbf16> to vector<16x128xf32>
    %c0_11 = arith.constant 0 : index
    %c8 = arith.constant 8 : index
    %14 = vector.load %arg1[%c0_11, %c8] : memref<16x256xbf16, #tpu.memory_space<vmem>>, vector<16x128xbf16>
    %15 = arith.extf %14 : vector<16x128xbf16> to vector<16x128xf32>
    %c0_12 = arith.constant 0 : index
    %c12 = arith.constant 12 : index
    %16 = vector.load %arg1[%c0_12, %c12] : memref<16x256xbf16, #tpu.memory_space<vmem>>, vector<16x128xbf16>
    %17 = arith.extf %16 : vector<16x128xbf16> to vector<16x128xf32>
    %c0_13 = arith.constant 0 : index
    %c13 = arith.constant 13 : index
    %18 = vector.load %arg1[%c0_13, %c13] : memref<16x256xbf16, #tpu.memory_space<vmem>>, vector<16x128xbf16>
    %19 = arith.extf %18 : vector<16x128xbf16> to vector<16x128xf32>
    %c0_14 = arith.constant 0 : index
    %c14 = arith.constant 14 : index
    %20 = vector.load %arg1[%c0_14, %c14] : memref<16x256xbf16, #tpu.memory_space<vmem>>, vector<16x128xbf16>
    %21 = arith.extf %20 : vector<16x128xbf16> to vector<16x128xf32>
    %22 = tpu.concatenate %5, %7, %9, %11, %13, %15, %17, %19, %21 in 0 : vector<16x128xf32>, vector<16x128xf32>, vector<16x128xf32>, vector<16x128xf32>, vector<16x128xf32>, vector<16x128xf32>, vector<16x128xf32>, vector<16x128xf32>, vector<16x128xf32> -> vector<144x128xf32>
    %cst_15 = arith.constant dense<0.000000e+00> : vector<16x128xf32>
    %23 = tpu.matmul %2, %22, %cst_15 {dimension_numbers = #tpu.dot_dimension_numbers<[1], [0], [0], [1], [0, 0, 1, 1], [], []>} : vector<16x144xf32>, vector<144x128xf32>, vector<16x128xf32> -> vector<16x128xf32>
    %24 = vector.broadcast %3 : vector<16x1xf32> to vector<16x128xf32>
    %25 = arith.addf %23, %24 : vector<16x128xf32>
    %cst_16 = arith.constant 0.000000e+00 : f32
    %26 = vector.broadcast %cst_16 : f32 to vector<16x128xf32>
    %27 = arith.maximumf %25, %26 : vector<16x128xf32>
    %c0_17 = arith.constant 0 : index
    %c7_18 = arith.constant 7 : index
    %28 = vector.load %arg2[%c0_17, %c7_18] : memref<1x256xf32, #tpu.memory_space<vmem>>, vector<1x128xf32>
    %cst_19 = arith.constant 5.000000e-01 : f32
    %29 = vector.broadcast %cst_19 : f32 to vector<1x128xf32>
    %30 = arith.cmpf ogt, %28, %29 : vector<1x128xf32>
    %cst_20 = arith.constant 0.000000e+00 : f32
    %31 = vector.shape_cast %30 : vector<1x128xi1> to vector<1x128xi1>
    %32 = vector.broadcast %31 : vector<1x128xi1> to vector<16x128xi1>
    %33 = vector.broadcast %cst_20 : f32 to vector<16x128xf32>
    %34 = arith.select %32, %27, %33 : vector<16x128xi1>, vector<16x128xf32>
    %35 = arith.truncf %34 : vector<16x128xf32> to vector<16x128xbf16>
    %c0_21 = arith.constant 0 : index
    %c7_22 = arith.constant 7 : index
    %36 = vector.load %arg26[%c0_21, %c7_22] : memref<16x256xbf16, #tpu.memory_space<vmem>>, vector<16x128xbf16>
    tpu.vector_store %arg26[%c0_21, %c7_22], %35 {strides = array<i32>} : memref<16x256xbf16, #tpu.memory_space<vmem>>, vector<16x128xbf16>,
    %cst_23 = arith.constant 0.000000e+00 : bf16
    %37 = vector.broadcast %cst_23 : bf16 to vector<16x256xbf16>
    %c0_24 = arith.constant 0 : index
    %c0_25 = arith.constant 0 : index
    %38 = vector.load %arg27[%c0_24, %c0_25] : memref<16x256xbf16, #tpu.memory_space<vmem>>, vector<16x256xbf16>
    tpu.vector_store %arg27[%c0_24, %c0_25], %37 {strides = array<i32>} : memref<16x256xbf16, #tpu.memory_space<vmem>>, vector<16x256xbf16>,
    %c0_26 = arith.constant 0 : index
    %c0_27 = arith.constant 0 : index
    %39 = vector.load %arg5[%c0_26, %c0_27] : memref<16x144xf32, #tpu.memory_space<vmem>>, vector<16x144xf32>
    %c0_28 = arith.constant 0 : index
    %c0_29 = arith.constant 0 : index
    %40 = vector.load %arg6[%c0_28, %c0_29] : memref<16x1xf32, #tpu.memory_space<vmem>>, vector<16x1xf32>
    %c0_30 = arith.constant 0 : index
    %c0_31 = arith.constant 0 : index
    %41 = vector.load %arg7[%c0_30, %c0_31] : memref<16x16xf32, #tpu.memory_space<vmem>>, vector<16x16xf32>
    %c0_32 = arith.constant 0 : index
    %c0_33 = arith.constant 0 : index
    %42 = vector.load %arg8[%c0_32, %c0_33] : memref<16x1xf32, #tpu.memory_space<vmem>>, vector<16x1xf32>
    %c0_34 = arith.constant 0 : index
    %c0_35 = arith.constant 0 : index
    %43 = vector.load %arg26[%c0_34, %c0_35] : memref<16x256xbf16, #tpu.memory_space<vmem>>, vector<16x128xbf16>
    %44 = arith.extf %43 : vector<16x128xbf16> to vector<16x128xf32>
    %c0_36 = arith.constant 0 : index
    %c1_37 = arith.constant 1 : index
    %45 = vector.load %arg26[%c0_36, %c1_37] : memref<16x256xbf16, #tpu.memory_space<vmem>>, vector<16x128xbf16>
    %46 = arith.extf %45 : vector<16x128xbf16> to vector<16x128xf32>
    %c0_38 = arith.constant 0 : index
    %c2_39 = arith.constant 2 : index
    %47 = vector.load %arg26[%c0_38, %c2_39] : memref<16x256xbf16, #tpu.memory_space<vmem>>, vector<16x128xbf16>
    %48 = arith.extf %47 : vector<16x128xbf16> to vector<16x128xf32>
    %c0_40 = arith.constant 0 : index
    %c6_41 = arith.constant 6 : index
    %49 = vector.load %arg26[%c0_40, %c6_41] : memref<16x256xbf16, #tpu.memory_space<vmem>>, vector<16x128xbf16>
    %50 = arith.extf %49 : vector<16x128xbf16> to vector<16x128xf32>
    %c0_42 = arith.constant 0 : index
    %c7_43 = arith.constant 7 : index
    %51 = vector.load %arg26[%c0_42, %c7_43] : memref<16x256xbf16, #tpu.memory_space<vmem>>, vector<16x128xbf16>
    %52 = arith.extf %51 : vector<16x128xbf16> to vector<16x128xf32>
    %c0_44 = arith.constant 0 : index
    %c8_45 = arith.constant 8 : index
    %53 = vector.load %arg26[%c0_44, %c8_45] : memref<16x256xbf16, #tpu.memory_space<vmem>>, vector<16x128xbf16>
    %54 = arith.extf %53 : vector<16x128xbf16> to vector<16x128xf32>
    %c0_46 = arith.constant 0 : index
    %c12_47 = arith.constant 12 : index
    %55 = vector.load %arg26[%c0_46, %c12_47] : memref<16x256xbf16, #tpu.memory_space<vmem>>, vector<16x128xbf16>
    %56 = arith.extf %55 : vector<16x128xbf16> to vector<16x128xf32>
    %c0_48 = arith.constant 0 : index
    %c13_49 = arith.constant 13 : index
    %57 = vector.load %arg26[%c0_48, %c13_49] : memref<16x256xbf16, #tpu.memory_space<vmem>>, vector<16x128xbf16>
    %58 = arith.extf %57 : vector<16x128xbf16> to vector<16x128xf32>
    %c0_50 = arith.constant 0 : index
    %c14_51 = arith.constant 14 : index
    %59 = vector.load %arg26[%c0_50, %c14_51] : memref<16x256xbf16, #tpu.memory_space<vmem>>, vector<16x128xbf16>
    %60 = arith.extf %59 : vector<16x128xbf16> to vector<16x128xf32>
    %61 = tpu.concatenate %44, %46, %48, %50, %52, %54, %56, %58, %60 in 0 : vector<16x128xf32>, vector<16x128xf32>, vector<16x128xf32>, vector<16x128xf32>, vector<16x128xf32>, vector<16x128xf32>, vector<16x128xf32>, vector<16x128xf32>, vector<16x128xf32> -> vector<144x128xf32>
    %cst_52 = arith.constant dense<0.000000e+00> : vector<16x128xf32>
    %62 = tpu.matmul %39, %61, %cst_52 {dimension_numbers = #tpu.dot_dimension_numbers<[1], [0], [0], [1], [0, 0, 1, 1], [], []>} : vector<16x144xf32>, vector<144x128xf32>, vector<16x128xf32> -> vector<16x128xf32>
    %63 = vector.broadcast %40 : vector<16x1xf32> to vector<16x128xf32>
    %64 = arith.addf %62, %63 : vector<16x128xf32>
    %cst_53 = arith.constant 0.000000e+00 : f32
    %65 = vector.broadcast %cst_53 : f32 to vector<16x128xf32>
    %66 = arith.maximumf %64, %65 : vector<16x128xf32>
    %cst_54 = arith.constant dense<0.000000e+00> : vector<16x128xf32>
    %67 = tpu.matmul %41, %66, %cst_54 {dimension_numbers = #tpu.dot_dimension_numbers<[1], [0], [0], [1], [0, 0, 1, 1], [], []>} : vector<16x16xf32>, vector<16x128xf32>, vector<16x128xf32> -> vector<16x128xf32>
    %68 = vector.broadcast %42 : vector<16x1xf32> to vector<16x128xf32>
    %69 = arith.addf %67, %68 : vector<16x128xf32>
    %c0_55 = arith.constant 0 : index
    %c7_56 = arith.constant 7 : index
    %70 = vector.load %arg26[%c0_55, %c7_56] : memref<16x256xbf16, #tpu.memory_space<vmem>>, vector<16x128xbf16>
    %71 = arith.extf %70 : vector<16x128xbf16> to vector<16x128xf32>
    %72 = arith.addf %69, %71 : vector<16x128xf32>
    %c0_57 = arith.constant 0 : index
    %c7_58 = arith.constant 7 : index
    %73 = vector.load %arg2[%c0_57, %c7_58] : memref<1x256xf32, #tpu.memory_space<vmem>>, vector<1x128xf32>
    %cst_59 = arith.constant 5.000000e-01 : f32
    %74 = vector.broadcast %cst_59 : f32 to vector<1x128xf32>
    %75 = arith.cmpf ogt, %73, %74 : vector<1x128xf32>
    %cst_60 = arith.constant 0.000000e+00 : f32
    %76 = vector.shape_cast %75 : vector<1x128xi1> to vector<1x128xi1>
    %77 = vector.broadcast %76 : vector<1x128xi1> to vector<16x128xi1>
    %78 = vector.broadcast %cst_60 : f32 to vector<16x128xf32>
    %79 = arith.select %77, %72, %78 : vector<16x128xi1>, vector<16x128xf32>
    %80 = arith.truncf %79 : vector<16x128xf32> to vector<16x128xbf16>
    %c0_61 = arith.constant 0 : index
    %c7_62 = arith.constant 7 : index
    %81 = vector.load %arg27[%c0_61, %c7_62] : memref<16x256xbf16, #tpu.memory_space<vmem>>, vector<16x128xbf16>
    tpu.vector_store %arg27[%c0_61, %c7_62], %80 {strides = array<i32>} : memref<16x256xbf16, #tpu.memory_space<vmem>>, vector<16x128xbf16>,
    %cst_63 = arith.constant 0.000000e+00 : bf16
    %82 = vector.broadcast %cst_63 : bf16 to vector<16x256xbf16>
    %c0_64 = arith.constant 0 : index
    %c0_65 = arith.constant 0 : index
    %83 = vector.load %arg26[%c0_64, %c0_65] : memref<16x256xbf16, #tpu.memory_space<vmem>>, vector<16x256xbf16>
    tpu.vector_store %arg26[%c0_64, %c0_65], %82 {strides = array<i32>} : memref<16x256xbf16, #tpu.memory_space<vmem>>, vector<16x256xbf16>,
    %c0_66 = arith.constant 0 : index
    %c0_67 = arith.constant 0 : index
    %84 = vector.load %arg9[%c0_66, %c0_67] : memref<16x144xf32, #tpu.memory_space<vmem>>, vector<16x144xf32>
    %c0_68 = arith.constant 0 : index
    %c0_69 = arith.constant 0 : index
    %85 = vector.load %arg10[%c0_68, %c0_69] : memref<16x1xf32, #tpu.memory_space<vmem>>, vector<16x1xf32>
    %c0_70 = arith.constant 0 : index
    %c0_71 = arith.constant 0 : index
    %86 = vector.load %arg11[%c0_70, %c0_71] : memref<16x16xf32, #tpu.memory_space<vmem>>, vector<16x16xf32>
    %c0_72 = arith.constant 0 : index
    %c0_73 = arith.constant 0 : index
    %87 = vector.load %arg12[%c0_72, %c0_73] : memref<16x1xf32, #tpu.memory_space<vmem>>, vector<16x1xf32>
    %c0_74 = arith.constant 0 : index
    %c0_75 = arith.constant 0 : index
    %88 = vector.load %arg27[%c0_74, %c0_75] : memref<16x256xbf16, #tpu.memory_space<vmem>>, vector<16x128xbf16>
    %89 = arith.extf %88 : vector<16x128xbf16> to vector<16x128xf32>
    %c0_76 = arith.constant 0 : index
    %c1_77 = arith.constant 1 : index
    %90 = vector.load %arg27[%c0_76, %c1_77] : memref<16x256xbf16, #tpu.memory_space<vmem>>, vector<16x128xbf16>
    %91 = arith.extf %90 : vector<16x128xbf16> to vector<16x128xf32>
    %c0_78 = arith.constant 0 : index
    %c2_79 = arith.constant 2 : index
    %92 = vector.load %arg27[%c0_78, %c2_79] : memref<16x256xbf16, #tpu.memory_space<vmem>>, vector<16x128xbf16>
    %93 = arith.extf %92 : vector<16x128xbf16> to vector<16x128xf32>
    %c0_80 = arith.constant 0 : index
    %c6_81 = arith.constant 6 : index
    %94 = vector.load %arg27[%c0_80, %c6_81] : memref<16x256xbf16, #tpu.memory_space<vmem>>, vector<16x128xbf16>
    %95 = arith.extf %94 : vector<16x128xbf16> to vector<16x128xf32>
    %c0_82 = arith.constant 0 : index
    %c7_83 = arith.constant 7 : index
    %96 = vector.load %arg27[%c0_82, %c7_83] : memref<16x256xbf16, #tpu.memory_space<vmem>>, vector<16x128xbf16>
    %97 = arith.extf %96 : vector<16x128xbf16> to vector<16x128xf32>
    %c0_84 = arith.constant 0 : index
    %c8_85 = arith.constant 8 : index
    %98 = vector.load %arg27[%c0_84, %c8_85] : memref<16x256xbf16, #tpu.memory_space<vmem>>, vector<16x128xbf16>
    %99 = arith.extf %98 : vector<16x128xbf16> to vector<16x128xf32>
    %c0_86 = arith.constant 0 : index
    %c12_87 = arith.constant 12 : index
    %100 = vector.load %arg27[%c0_86, %c12_87] : memref<16x256xbf16, #tpu.memory_space<vmem>>, vector<16x128xbf16>
    %101 = arith.extf %100 : vector<16x128xbf16> to vector<16x128xf32>
    %c0_88 = arith.constant 0 : index
    %c13_89 = arith.constant 13 : index
    %102 = vector.load %arg27[%c0_88, %c13_89] : memref<16x256xbf16, #tpu.memory_space<vmem>>, vector<16x128xbf16>
    %103 = arith.extf %102 : vector<16x128xbf16> to vector<16x128xf32>
    %c0_90 = arith.constant 0 : index
    %c14_91 = arith.constant 14 : index
    %104 = vector.load %arg27[%c0_90, %c14_91] : memref<16x256xbf16, #tpu.memory_space<vmem>>, vector<16x128xbf16>
    %105 = arith.extf %104 : vector<16x128xbf16> to vector<16x128xf32>
    %106 = tpu.concatenate %89, %91, %93, %95, %97, %99, %101, %103, %105 in 0 : vector<16x128xf32>, vector<16x128xf32>, vector<16x128xf32>, vector<16x128xf32>, vector<16x128xf32>, vector<16x128xf32>, vector<16x128xf32>, vector<16x128xf32>, vector<16x128xf32> -> vector<144x128xf32>
    %cst_92 = arith.constant dense<0.000000e+00> : vector<16x128xf32>
    %107 = tpu.matmul %84, %106, %cst_92 {dimension_numbers = #tpu.dot_dimension_numbers<[1], [0], [0], [1], [0, 0, 1, 1], [], []>} : vector<16x144xf32>, vector<144x128xf32>, vector<16x128xf32> -> vector<16x128xf32>
    %108 = vector.broadcast %85 : vector<16x1xf32> to vector<16x128xf32>
    %109 = arith.addf %107, %108 : vector<16x128xf32>
    %cst_93 = arith.constant 0.000000e+00 : f32
    %110 = vector.broadcast %cst_93 : f32 to vector<16x128xf32>
    %111 = arith.maximumf %109, %110 : vector<16x128xf32>
    %cst_94 = arith.constant dense<0.000000e+00> : vector<16x128xf32>
    %112 = tpu.matmul %86, %111, %cst_94 {dimension_numbers = #tpu.dot_dimension_numbers<[1], [0], [0], [1], [0, 0, 1, 1], [], []>} : vector<16x16xf32>, vector<16x128xf32>, vector<16x128xf32> -> vector<16x128xf32>
    %113 = vector.broadcast %87 : vector<16x1xf32> to vector<16x128xf32>
    %114 = arith.addf %112, %113 : vector<16x128xf32>
    %c0_95 = arith.constant 0 : index
    %c7_96 = arith.constant 7 : index
    %115 = vector.load %arg27[%c0_95, %c7_96] : memref<16x256xbf16, #tpu.memory_space<vmem>>, vector<16x128xbf16>
    %116 = arith.extf %115 : vector<16x128xbf16> to vector<16x128xf32>
    %117 = arith.addf %114, %116 : vector<16x128xf32>
    %cst_97 = arith.constant 0.000000e+00 : f32
    %118 = vector.broadcast %cst_97 : f32 to vector<16x128xf32>
    %119 = arith.maximumf %117, %118 : vector<16x128xf32>
    %c0_98 = arith.constant 0 : index
    %c7_99 = arith.constant 7 : index
    %120 = vector.load %arg2[%c0_98, %c7_99] : memref<1x256xf32, #tpu.memory_space<vmem>>, vector<1x128xf32>
    %cst_100 = arith.constant 5.000000e-01 : f32
    %121 = vector.broadcast %cst_100 : f32 to vector<1x128xf32>
    %122 = arith.cmpf ogt, %120, %121 : vector<1x128xf32>
    %cst_101 = arith.constant 0.000000e+00 : f32
    %123 = vector.shape_cast %122 : vector<1x128xi1> to vector<1x128xi1>
    %124 = vector.broadcast %123 : vector<1x128xi1> to vector<16x128xi1>
    %125 = vector.broadcast %cst_101 : f32 to vector<16x128xf32>
    %126 = arith.select %124, %119, %125 : vector<16x128xi1>, vector<16x128xf32>
    %127 = arith.truncf %126 : vector<16x128xf32> to vector<16x128xbf16>
    %c0_102 = arith.constant 0 : index
    %c7_103 = arith.constant 7 : index
    %128 = vector.load %arg26[%c0_102, %c7_103] : memref<16x256xbf16, #tpu.memory_space<vmem>>, vector<16x128xbf16>
    tpu.vector_store %arg26[%c0_102, %c7_103], %127 {strides = array<i32>} : memref<16x256xbf16, #tpu.memory_space<vmem>>, vector<16x128xbf16>,
    %cst_104 = arith.constant 0.000000e+00 : bf16
    %129 = vector.broadcast %cst_104 : bf16 to vector<16x256xbf16>
    %c0_105 = arith.constant 0 : index
    %c0_106 = arith.constant 0 : index
    %130 = vector.load %arg27[%c0_105, %c0_106] : memref<16x256xbf16, #tpu.memory_space<vmem>>, vector<16x256xbf16>
    tpu.vector_store %arg27[%c0_105, %c0_106], %129 {strides = array<i32>} : memref<16x256xbf16, #tpu.memory_space<vmem>>, vector<16x256xbf16>,
    %c0_107 = arith.constant 0 : index
    %c0_108 = arith.constant 0 : index
    %131 = vector.load %arg13[%c0_107, %c0_108] : memref<16x144xf32, #tpu.memory_space<vmem>>, vector<16x144xf32>
    %c0_109 = arith.constant 0 : index
    %c0_110 = arith.constant 0 : index
    %132 = vector.load %arg14[%c0_109, %c0_110] : memref<16x1xf32, #tpu.memory_space<vmem>>, vector<16x1xf32>
    %c0_111 = arith.constant 0 : index
    %c0_112 = arith.constant 0 : index
    %133 = vector.load %arg15[%c0_111, %c0_112] : memref<16x16xf32, #tpu.memory_space<vmem>>, vector<16x16xf32>
    %c0_113 = arith.constant 0 : index
    %c0_114 = arith.constant 0 : index
    %134 = vector.load %arg16[%c0_113, %c0_114] : memref<16x1xf32, #tpu.memory_space<vmem>>, vector<16x1xf32>
    %c0_115 = arith.constant 0 : index
    %c0_116 = arith.constant 0 : index
    %135 = vector.load %arg26[%c0_115, %c0_116] : memref<16x256xbf16, #tpu.memory_space<vmem>>, vector<16x128xbf16>
    %136 = arith.extf %135 : vector<16x128xbf16> to vector<16x128xf32>
    %c0_117 = arith.constant 0 : index
    %c1_118 = arith.constant 1 : index
    %137 = vector.load %arg26[%c0_117, %c1_118] : memref<16x256xbf16, #tpu.memory_space<vmem>>, vector<16x128xbf16>
    %138 = arith.extf %137 : vector<16x128xbf16> to vector<16x128xf32>
    %c0_119 = arith.constant 0 : index
    %c2_120 = arith.constant 2 : index
    %139 = vector.load %arg26[%c0_119, %c2_120] : memref<16x256xbf16, #tpu.memory_space<vmem>>, vector<16x128xbf16>
    %140 = arith.extf %139 : vector<16x128xbf16> to vector<16x128xf32>
    %c0_121 = arith.constant 0 : index
    %c6_122 = arith.constant 6 : index
    %141 = vector.load %arg26[%c0_121, %c6_122] : memref<16x256xbf16, #tpu.memory_space<vmem>>, vector<16x128xbf16>
    %142 = arith.extf %141 : vector<16x128xbf16> to vector<16x128xf32>
    %c0_123 = arith.constant 0 : index
    %c7_124 = arith.constant 7 : index
    %143 = vector.load %arg26[%c0_123, %c7_124] : memref<16x256xbf16, #tpu.memory_space<vmem>>, vector<16x128xbf16>
    %144 = arith.extf %143 : vector<16x128xbf16> to vector<16x128xf32>
    %c0_125 = arith.constant 0 : index
    %c8_126 = arith.constant 8 : index
    %145 = vector.load %arg26[%c0_125, %c8_126] : memref<16x256xbf16, #tpu.memory_space<vmem>>, vector<16x128xbf16>
    %146 = arith.extf %145 : vector<16x128xbf16> to vector<16x128xf32>
    %c0_127 = arith.constant 0 : index
    %c12_128 = arith.constant 12 : index
    %147 = vector.load %arg26[%c0_127, %c12_128] : memref<16x256xbf16, #tpu.memory_space<vmem>>, vector<16x128xbf16>
    %148 = arith.extf %147 : vector<16x128xbf16> to vector<16x128xf32>
    %c0_129 = arith.constant 0 : index
    %c13_130 = arith.constant 13 : index
    %149 = vector.load %arg26[%c0_129, %c13_130] : memref<16x256xbf16, #tpu.memory_space<vmem>>, vector<16x128xbf16>
    %150 = arith.extf %149 : vector<16x128xbf16> to vector<16x128xf32>
    %c0_131 = arith.constant 0 : index
    %c14_132 = arith.constant 14 : index
    %151 = vector.load %arg26[%c0_131, %c14_132] : memref<16x256xbf16, #tpu.memory_space<vmem>>, vector<16x128xbf16>
    %152 = arith.extf %151 : vector<16x128xbf16> to vector<16x128xf32>
    %153 = tpu.concatenate %136, %138, %140, %142, %144, %146, %148, %150, %152 in 0 : vector<16x128xf32>, vector<16x128xf32>, vector<16x128xf32>, vector<16x128xf32>, vector<16x128xf32>, vector<16x128xf32>, vector<16x128xf32>, vector<16x128xf32>, vector<16x128xf32> -> vector<144x128xf32>
    %cst_133 = arith.constant dense<0.000000e+00> : vector<16x128xf32>
    %154 = tpu.matmul %131, %153, %cst_133 {dimension_numbers = #tpu.dot_dimension_numbers<[1], [0], [0], [1], [0, 0, 1, 1], [], []>} : vector<16x144xf32>, vector<144x128xf32>, vector<16x128xf32> -> vector<16x128xf32>
    %155 = vector.broadcast %132 : vector<16x1xf32> to vector<16x128xf32>
    %156 = arith.addf %154, %155 : vector<16x128xf32>
    %cst_134 = arith.constant 0.000000e+00 : f32
    %157 = vector.broadcast %cst_134 : f32 to vector<16x128xf32>
    %158 = arith.maximumf %156, %157 : vector<16x128xf32>
    %cst_135 = arith.constant dense<0.000000e+00> : vector<16x128xf32>
    %159 = tpu.matmul %133, %158, %cst_135 {dimension_numbers = #tpu.dot_dimension_numbers<[1], [0], [0], [1], [0, 0, 1, 1], [], []>} : vector<16x16xf32>, vector<16x128xf32>, vector<16x128xf32> -> vector<16x128xf32>
    %160 = vector.broadcast %134 : vector<16x1xf32> to vector<16x128xf32>
    %161 = arith.addf %159, %160 : vector<16x128xf32>
    %c0_136 = arith.constant 0 : index
    %c7_137 = arith.constant 7 : index
    %162 = vector.load %arg26[%c0_136, %c7_137] : memref<16x256xbf16, #tpu.memory_space<vmem>>, vector<16x128xbf16>
    %163 = arith.extf %162 : vector<16x128xbf16> to vector<16x128xf32>
    %164 = arith.addf %161, %163 : vector<16x128xf32>
    %c0_138 = arith.constant 0 : index
    %c7_139 = arith.constant 7 : index
    %165 = vector.load %arg2[%c0_138, %c7_139] : memref<1x256xf32, #tpu.memory_space<vmem>>, vector<1x128xf32>
    %cst_140 = arith.constant 5.000000e-01 : f32
    %166 = vector.broadcast %cst_140 : f32 to vector<1x128xf32>
    %167 = arith.cmpf ogt, %165, %166 : vector<1x128xf32>
    %cst_141 = arith.constant 0.000000e+00 : f32
    %168 = vector.shape_cast %167 : vector<1x128xi1> to vector<1x128xi1>
    %169 = vector.broadcast %168 : vector<1x128xi1> to vector<16x128xi1>
    %170 = vector.broadcast %cst_141 : f32 to vector<16x128xf32>
    %171 = arith.select %169, %164, %170 : vector<16x128xi1>, vector<16x128xf32>
    %172 = arith.truncf %171 : vector<16x128xf32> to vector<16x128xbf16>
    %c0_142 = arith.constant 0 : index
    %c7_143 = arith.constant 7 : index
    %173 = vector.load %arg27[%c0_142, %c7_143] : memref<16x256xbf16, #tpu.memory_space<vmem>>, vector<16x128xbf16>
    tpu.vector_store %arg27[%c0_142, %c7_143], %172 {strides = array<i32>} : memref<16x256xbf16, #tpu.memory_space<vmem>>, vector<16x128xbf16>,
    %cst_144 = arith.constant 0.000000e+00 : bf16
    %174 = vector.broadcast %cst_144 : bf16 to vector<16x256xbf16>
    %c0_145 = arith.constant 0 : index
    %c0_146 = arith.constant 0 : index
    %175 = vector.load %arg26[%c0_145, %c0_146] : memref<16x256xbf16, #tpu.memory_space<vmem>>, vector<16x256xbf16>
    tpu.vector_store %arg26[%c0_145, %c0_146], %174 {strides = array<i32>} : memref<16x256xbf16, #tpu.memory_space<vmem>>, vector<16x256xbf16>,
    %c0_147 = arith.constant 0 : index
    %c0_148 = arith.constant 0 : index
    %176 = vector.load %arg17[%c0_147, %c0_148] : memref<16x144xf32, #tpu.memory_space<vmem>>, vector<16x144xf32>
    %c0_149 = arith.constant 0 : index
    %c0_150 = arith.constant 0 : index
    %177 = vector.load %arg18[%c0_149, %c0_150] : memref<16x1xf32, #tpu.memory_space<vmem>>, vector<16x1xf32>
    %c0_151 = arith.constant 0 : index
    %c0_152 = arith.constant 0 : index
    %178 = vector.load %arg19[%c0_151, %c0_152] : memref<16x16xf32, #tpu.memory_space<vmem>>, vector<16x16xf32>
    %c0_153 = arith.constant 0 : index
    %c0_154 = arith.constant 0 : index
    %179 = vector.load %arg20[%c0_153, %c0_154] : memref<16x1xf32, #tpu.memory_space<vmem>>, vector<16x1xf32>
    %c0_155 = arith.constant 0 : index
    %c0_156 = arith.constant 0 : index
    %180 = vector.load %arg27[%c0_155, %c0_156] : memref<16x256xbf16, #tpu.memory_space<vmem>>, vector<16x128xbf16>
    %181 = arith.extf %180 : vector<16x128xbf16> to vector<16x128xf32>
    %c0_157 = arith.constant 0 : index
    %c1_158 = arith.constant 1 : index
    %182 = vector.load %arg27[%c0_157, %c1_158] : memref<16x256xbf16, #tpu.memory_space<vmem>>, vector<16x128xbf16>
    %183 = arith.extf %182 : vector<16x128xbf16> to vector<16x128xf32>
    %c0_159 = arith.constant 0 : index
    %c2_160 = arith.constant 2 : index
    %184 = vector.load %arg27[%c0_159, %c2_160] : memref<16x256xbf16, #tpu.memory_space<vmem>>, vector<16x128xbf16>
    %185 = arith.extf %184 : vector<16x128xbf16> to vector<16x128xf32>
    %c0_161 = arith.constant 0 : index
    %c6_162 = arith.constant 6 : index
    %186 = vector.load %arg27[%c0_161, %c6_162] : memref<16x256xbf16, #tpu.memory_space<vmem>>, vector<16x128xbf16>
    %187 = arith.extf %186 : vector<16x128xbf16> to vector<16x128xf32>
    %c0_163 = arith.constant 0 : index
    %c7_164 = arith.constant 7 : index
    %188 = vector.load %arg27[%c0_163, %c7_164] : memref<16x256xbf16, #tpu.memory_space<vmem>>, vector<16x128xbf16>
    %189 = arith.extf %188 : vector<16x128xbf16> to vector<16x128xf32>
    %c0_165 = arith.constant 0 : index
    %c8_166 = arith.constant 8 : index
    %190 = vector.load %arg27[%c0_165, %c8_166] : memref<16x256xbf16, #tpu.memory_space<vmem>>, vector<16x128xbf16>
    %191 = arith.extf %190 : vector<16x128xbf16> to vector<16x128xf32>
    %c0_167 = arith.constant 0 : index
    %c12_168 = arith.constant 12 : index
    %192 = vector.load %arg27[%c0_167, %c12_168] : memref<16x256xbf16, #tpu.memory_space<vmem>>, vector<16x128xbf16>
    %193 = arith.extf %192 : vector<16x128xbf16> to vector<16x128xf32>
    %c0_169 = arith.constant 0 : index
    %c13_170 = arith.constant 13 : index
    %194 = vector.load %arg27[%c0_169, %c13_170] : memref<16x256xbf16, #tpu.memory_space<vmem>>, vector<16x128xbf16>
    %195 = arith.extf %194 : vector<16x128xbf16> to vector<16x128xf32>
    %c0_171 = arith.constant 0 : index
    %c14_172 = arith.constant 14 : index
    %196 = vector.load %arg27[%c0_171, %c14_172] : memref<16x256xbf16, #tpu.memory_space<vmem>>, vector<16x128xbf16>
    %197 = arith.extf %196 : vector<16x128xbf16> to vector<16x128xf32>
    %198 = tpu.concatenate %181, %183, %185, %187, %189, %191, %193, %195, %197 in 0 : vector<16x128xf32>, vector<16x128xf32>, vector<16x128xf32>, vector<16x128xf32>, vector<16x128xf32>, vector<16x128xf32>, vector<16x128xf32>, vector<16x128xf32>, vector<16x128xf32> -> vector<144x128xf32>
    %cst_173 = arith.constant dense<0.000000e+00> : vector<16x128xf32>
    %199 = tpu.matmul %176, %198, %cst_173 {dimension_numbers = #tpu.dot_dimension_numbers<[1], [0], [0], [1], [0, 0, 1, 1], [], []>} : vector<16x144xf32>, vector<144x128xf32>, vector<16x128xf32> -> vector<16x128xf32>
    %200 = vector.broadcast %177 : vector<16x1xf32> to vector<16x128xf32>
    %201 = arith.addf %199, %200 : vector<16x128xf32>
    %cst_174 = arith.constant 0.000000e+00 : f32
    %202 = vector.broadcast %cst_174 : f32 to vector<16x128xf32>
    %203 = arith.maximumf %201, %202 : vector<16x128xf32>
    %cst_175 = arith.constant dense<0.000000e+00> : vector<16x128xf32>
    %204 = tpu.matmul %178, %203, %cst_175 {dimension_numbers = #tpu.dot_dimension_numbers<[1], [0], [0], [1], [0, 0, 1, 1], [], []>} : vector<16x16xf32>, vector<16x128xf32>, vector<16x128xf32> -> vector<16x128xf32>
    %205 = vector.broadcast %179 : vector<16x1xf32> to vector<16x128xf32>
    %206 = arith.addf %204, %205 : vector<16x128xf32>
    %c0_176 = arith.constant 0 : index
    %c7_177 = arith.constant 7 : index
    %207 = vector.load %arg27[%c0_176, %c7_177] : memref<16x256xbf16, #tpu.memory_space<vmem>>, vector<16x128xbf16>
    %208 = arith.extf %207 : vector<16x128xbf16> to vector<16x128xf32>
    %209 = arith.addf %206, %208 : vector<16x128xf32>
    %cst_178 = arith.constant 0.000000e+00 : f32
    %210 = vector.broadcast %cst_178 : f32 to vector<16x128xf32>
    %211 = arith.maximumf %209, %210 : vector<16x128xf32>
    %c0_179 = arith.constant 0 : index
    %c7_180 = arith.constant 7 : index
    %212 = vector.load %arg2[%c0_179, %c7_180] : memref<1x256xf32, #tpu.memory_space<vmem>>, vector<1x128xf32>
    %cst_181 = arith.constant 5.000000e-01 : f32
    %213 = vector.broadcast %cst_181 : f32 to vector<1x128xf32>
    %214 = arith.cmpf ogt, %212, %213 : vector<1x128xf32>
    %cst_182 = arith.constant 0.000000e+00 : f32
    %215 = vector.shape_cast %214 : vector<1x128xi1> to vector<1x128xi1>
    %216 = vector.broadcast %215 : vector<1x128xi1> to vector<16x128xi1>
    %217 = vector.broadcast %cst_182 : f32 to vector<16x128xf32>
    %218 = arith.select %216, %211, %217 : vector<16x128xi1>, vector<16x128xf32>
    %219 = arith.truncf %218 : vector<16x128xf32> to vector<16x128xbf16>
    %c0_183 = arith.constant 0 : index
    %c7_184 = arith.constant 7 : index
    %220 = vector.load %arg26[%c0_183, %c7_184] : memref<16x256xbf16, #tpu.memory_space<vmem>>, vector<16x128xbf16>
    tpu.vector_store %arg26[%c0_183, %c7_184], %219 {strides = array<i32>} : memref<16x256xbf16, #tpu.memory_space<vmem>>, vector<16x128xbf16>,
    %cst_185 = arith.constant 0.000000e+00 : bf16
    %221 = vector.broadcast %cst_185 : bf16 to vector<16x256xbf16>
    %c0_186 = arith.constant 0 : index
    %c0_187 = arith.constant 0 : index
    %222 = vector.load %arg27[%c0_186, %c0_187] : memref<16x256xbf16, #tpu.memory_space<vmem>>, vector<16x256xbf16>
    tpu.vector_store %arg27[%c0_186, %c0_187], %221 {strides = array<i32>} : memref<16x256xbf16, #tpu.memory_space<vmem>>, vector<16x256xbf16>,
    %c0_188 = arith.constant 0 : index
    %c0_189 = arith.constant 0 : index
    %223 = vector.load %arg21[%c0_188, %c0_189] : memref<16x144xf32, #tpu.memory_space<vmem>>, vector<16x144xf32>
    %c0_190 = arith.constant 0 : index
    %c0_191 = arith.constant 0 : index
    %224 = vector.load %arg22[%c0_190, %c0_191] : memref<16x1xf32, #tpu.memory_space<vmem>>, vector<16x1xf32>
    %c0_192 = arith.constant 0 : index
    %c0_193 = arith.constant 0 : index
    %225 = vector.load %arg26[%c0_192, %c0_193] : memref<16x256xbf16, #tpu.memory_space<vmem>>, vector<16x128xbf16>
    %226 = arith.extf %225 : vector<16x128xbf16> to vector<16x128xf32>
    %c0_194 = arith.constant 0 : index
    %c1_195 = arith.constant 1 : index
    %227 = vector.load %arg26[%c0_194, %c1_195] : memref<16x256xbf16, #tpu.memory_space<vmem>>, vector<16x128xbf16>
    %228 = arith.extf %227 : vector<16x128xbf16> to vector<16x128xf32>
    %c0_196 = arith.constant 0 : index
    %c2_197 = arith.constant 2 : index
    %229 = vector.load %arg26[%c0_196, %c2_197] : memref<16x256xbf16, #tpu.memory_space<vmem>>, vector<16x128xbf16>
    %230 = arith.extf %229 : vector<16x128xbf16> to vector<16x128xf32>
    %c0_198 = arith.constant 0 : index
    %c6_199 = arith.constant 6 : index
    %231 = vector.load %arg26[%c0_198, %c6_199] : memref<16x256xbf16, #tpu.memory_space<vmem>>, vector<16x128xbf16>
    %232 = arith.extf %231 : vector<16x128xbf16> to vector<16x128xf32>
    %c0_200 = arith.constant 0 : index
    %c7_201 = arith.constant 7 : index
    %233 = vector.load %arg26[%c0_200, %c7_201] : memref<16x256xbf16, #tpu.memory_space<vmem>>, vector<16x128xbf16>
    %234 = arith.extf %233 : vector<16x128xbf16> to vector<16x128xf32>
    %c0_202 = arith.constant 0 : index
    %c8_203 = arith.constant 8 : index
    %235 = vector.load %arg26[%c0_202, %c8_203] : memref<16x256xbf16, #tpu.memory_space<vmem>>, vector<16x128xbf16>
    %236 = arith.extf %235 : vector<16x128xbf16> to vector<16x128xf32>
    %c0_204 = arith.constant 0 : index
    %c12_205 = arith.constant 12 : index
    %237 = vector.load %arg26[%c0_204, %c12_205] : memref<16x256xbf16, #tpu.memory_space<vmem>>, vector<16x128xbf16>
    %238 = arith.extf %237 : vector<16x128xbf16> to vector<16x128xf32>
    %c0_206 = arith.constant 0 : index
    %c13_207 = arith.constant 13 : index
    %239 = vector.load %arg26[%c0_206, %c13_207] : memref<16x256xbf16, #tpu.memory_space<vmem>>, vector<16x128xbf16>
    %240 = arith.extf %239 : vector<16x128xbf16> to vector<16x128xf32>
    %c0_208 = arith.constant 0 : index
    %c14_209 = arith.constant 14 : index
    %241 = vector.load %arg26[%c0_208, %c14_209] : memref<16x256xbf16, #tpu.memory_space<vmem>>, vector<16x128xbf16>
    %242 = arith.extf %241 : vector<16x128xbf16> to vector<16x128xf32>
    %243 = tpu.concatenate %226, %228, %230, %232, %234, %236, %238, %240, %242 in 0 : vector<16x128xf32>, vector<16x128xf32>, vector<16x128xf32>, vector<16x128xf32>, vector<16x128xf32>, vector<16x128xf32>, vector<16x128xf32>, vector<16x128xf32>, vector<16x128xf32> -> vector<144x128xf32>
    %cst_210 = arith.constant dense<0.000000e+00> : vector<16x128xf32>
    %244 = tpu.matmul %223, %243, %cst_210 {dimension_numbers = #tpu.dot_dimension_numbers<[1], [0], [0], [1], [0, 0, 1, 1], [], []>} : vector<16x144xf32>, vector<144x128xf32>, vector<16x128xf32> -> vector<16x128xf32>
    %245 = vector.broadcast %224 : vector<16x1xf32> to vector<16x128xf32>
    %246 = arith.addf %244, %245 : vector<16x128xf32>
    %cst_211 = arith.constant 0.000000e+00 : f32
    %247 = vector.broadcast %cst_211 : f32 to vector<16x128xf32>
    %248 = arith.maximumf %246, %247 : vector<16x128xf32>
    %c0_212 = arith.constant 0 : index
    %c7_213 = arith.constant 7 : index
    %249 = vector.load %arg2[%c0_212, %c7_213] : memref<1x256xf32, #tpu.memory_space<vmem>>, vector<1x128xf32>
    %cst_214 = arith.constant 5.000000e-01 : f32
    %250 = vector.broadcast %cst_214 : f32 to vector<1x128xf32>
    %251 = arith.cmpf ogt, %249, %250 : vector<1x128xf32>
    %cst_215 = arith.constant 0.000000e+00 : f32
    %252 = vector.shape_cast %251 : vector<1x128xi1> to vector<1x128xi1>
    %253 = vector.broadcast %252 : vector<1x128xi1> to vector<16x128xi1>
    %254 = vector.broadcast %cst_215 : f32 to vector<16x128xf32>
    %255 = arith.select %253, %248, %254 : vector<16x128xi1>, vector<16x128xf32>
    %256 = arith.truncf %255 : vector<16x128xf32> to vector<16x128xbf16>
    %c0_216 = arith.constant 0 : index
    %c7_217 = arith.constant 7 : index
    %257 = vector.load %arg27[%c0_216, %c7_217] : memref<16x256xbf16, #tpu.memory_space<vmem>>, vector<16x128xbf16>
    tpu.vector_store %arg27[%c0_216, %c7_217], %256 {strides = array<i32>} : memref<16x256xbf16, #tpu.memory_space<vmem>>, vector<16x128xbf16>,
    %cst_218 = arith.constant 0.000000e+00 : bf16
    %258 = vector.broadcast %cst_218 : bf16 to vector<16x256xbf16>
    %c0_219 = arith.constant 0 : index
    %c0_220 = arith.constant 0 : index
    %259 = vector.load %arg25[%c0_219, %c0_220] : memref<16x256xbf16, #tpu.memory_space<vmem>>, vector<16x256xbf16>
    tpu.vector_store %arg25[%c0_219, %c0_220], %258 {strides = array<i32>} : memref<16x256xbf16, #tpu.memory_space<vmem>>, vector<16x256xbf16>,
    %c0_221 = arith.constant 0 : index
    %c0_222 = arith.constant 0 : index
    %260 = vector.load %arg23[%c0_221, %c0_222] : memref<16x144xf32, #tpu.memory_space<vmem>>, vector<16x144xf32>
    %c0_223 = arith.constant 0 : index
    %c0_224 = arith.constant 0 : index
    %261 = vector.load %arg24[%c0_223, %c0_224] : memref<16x1xf32, #tpu.memory_space<vmem>>, vector<16x1xf32>
    %c0_225 = arith.constant 0 : index
    %c0_226 = arith.constant 0 : index
    %262 = vector.load %arg27[%c0_225, %c0_226] : memref<16x256xbf16, #tpu.memory_space<vmem>>, vector<16x128xbf16>
    %263 = arith.extf %262 : vector<16x128xbf16> to vector<16x128xf32>
    %c0_227 = arith.constant 0 : index
    %c1_228 = arith.constant 1 : index
    %264 = vector.load %arg27[%c0_227, %c1_228] : memref<16x256xbf16, #tpu.memory_space<vmem>>, vector<16x128xbf16>
    %265 = arith.extf %264 : vector<16x128xbf16> to vector<16x128xf32>
    %c0_229 = arith.constant 0 : index
    %c2_230 = arith.constant 2 : index
    %266 = vector.load %arg27[%c0_229, %c2_230] : memref<16x256xbf16, #tpu.memory_space<vmem>>, vector<16x128xbf16>
    %267 = arith.extf %266 : vector<16x128xbf16> to vector<16x128xf32>
    %c0_231 = arith.constant 0 : index
    %c6_232 = arith.constant 6 : index
    %268 = vector.load %arg27[%c0_231, %c6_232] : memref<16x256xbf16, #tpu.memory_space<vmem>>, vector<16x128xbf16>
    %269 = arith.extf %268 : vector<16x128xbf16> to vector<16x128xf32>
    %c0_233 = arith.constant 0 : index
    %c7_234 = arith.constant 7 : index
    %270 = vector.load %arg27[%c0_233, %c7_234] : memref<16x256xbf16, #tpu.memory_space<vmem>>, vector<16x128xbf16>
    %271 = arith.extf %270 : vector<16x128xbf16> to vector<16x128xf32>
    %c0_235 = arith.constant 0 : index
    %c8_236 = arith.constant 8 : index
    %272 = vector.load %arg27[%c0_235, %c8_236] : memref<16x256xbf16, #tpu.memory_space<vmem>>, vector<16x128xbf16>
    %273 = arith.extf %272 : vector<16x128xbf16> to vector<16x128xf32>
    %c0_237 = arith.constant 0 : index
    %c12_238 = arith.constant 12 : index
    %274 = vector.load %arg27[%c0_237, %c12_238] : memref<16x256xbf16, #tpu.memory_space<vmem>>, vector<16x128xbf16>
    %275 = arith.extf %274 : vector<16x128xbf16> to vector<16x128xf32>
    %c0_239 = arith.constant 0 : index
    %c13_240 = arith.constant 13 : index
    %276 = vector.load %arg27[%c0_239, %c13_240] : memref<16x256xbf16, #tpu.memory_space<vmem>>, vector<16x128xbf16>
    %277 = arith.extf %276 : vector<16x128xbf16> to vector<16x128xf32>
    %c0_241 = arith.constant 0 : index
    %c14_242 = arith.constant 14 : index
    %278 = vector.load %arg27[%c0_241, %c14_242] : memref<16x256xbf16, #tpu.memory_space<vmem>>, vector<16x128xbf16>
    %279 = arith.extf %278 : vector<16x128xbf16> to vector<16x128xf32>
    %280 = tpu.concatenate %263, %265, %267, %269, %271, %273, %275, %277, %279 in 0 : vector<16x128xf32>, vector<16x128xf32>, vector<16x128xf32>, vector<16x128xf32>, vector<16x128xf32>, vector<16x128xf32>, vector<16x128xf32>, vector<16x128xf32>, vector<16x128xf32> -> vector<144x128xf32>
    %cst_243 = arith.constant dense<0.000000e+00> : vector<16x128xf32>
    %281 = tpu.matmul %260, %280, %cst_243 {dimension_numbers = #tpu.dot_dimension_numbers<[1], [0], [0], [1], [0, 0, 1, 1], [], []>} : vector<16x144xf32>, vector<144x128xf32>, vector<16x128xf32> -> vector<16x128xf32>
    %282 = vector.broadcast %261 : vector<16x1xf32> to vector<16x128xf32>
    %283 = arith.addf %281, %282 : vector<16x128xf32>
    %cst_244 = arith.constant 0.000000e+00 : f32
    %284 = vector.broadcast %cst_244 : f32 to vector<16x128xf32>
    %285 = arith.maximumf %283, %284 : vector<16x128xf32>
    %c0_245 = arith.constant 0 : index
    %c7_246 = arith.constant 7 : index
    %286 = vector.load %arg2[%c0_245, %c7_246] : memref<1x256xf32, #tpu.memory_space<vmem>>, vector<1x128xf32>
    %cst_247 = arith.constant 5.000000e-01 : f32
    %287 = vector.broadcast %cst_247 : f32 to vector<1x128xf32>
    %288 = arith.cmpf ogt, %286, %287 : vector<1x128xf32>
    %cst_248 = arith.constant 0.000000e+00 : f32
    %289 = vector.shape_cast %288 : vector<1x128xi1> to vector<1x128xi1>
    %290 = vector.broadcast %289 : vector<1x128xi1> to vector<16x128xi1>
    %291 = vector.broadcast %cst_248 : f32 to vector<16x128xf32>
    %292 = arith.select %290, %285, %291 : vector<16x128xi1>, vector<16x128xf32>
    %293 = arith.truncf %292 : vector<16x128xf32> to vector<16x128xbf16>
    %c0_249 = arith.constant 0 : index
    %c7_250 = arith.constant 7 : index
    %294 = vector.load %arg25[%c0_249, %c7_250] : memref<16x256xbf16, #tpu.memory_space<vmem>>, vector<16x128xbf16>
    tpu.vector_store %arg25[%c0_249, %c7_250], %293 {strides = array<i32>} : memref<16x256xbf16, #tpu.memory_space<vmem>>, vector<16x128xbf16>,
    return
  }
  func.func @transform_0(%arg0: i32) -> (i32, i32) {
    %c0_i32 = arith.constant 0 : i32
    %c0_i32_0 = arith.constant 0 : i32
    %c0_i32_1 = arith.constant 0 : i32
    return %c0_i32, %c0_i32_0 : i32, i32
  }
  func.func @transform_1(%arg0: i32) -> (i32, i32) {
    %c0_i32 = arith.constant 0 : i32
    %c0_i32_0 = arith.constant 0 : i32
    %c0_i32_1 = arith.constant 0 : i32
    return %c0_i32, %c0_i32_0 : i32, i32
  }
  func.func @transform_2(%arg0: i32) -> (i32, i32) {
    %c0_i32 = arith.constant 0 : i32
    %c0_i32_0 = arith.constant 0 : i32
    %c0_i32_1 = arith.constant 0 : i32
    return %c0_i32, %c0_i32_0 : i32, i32
  }
  func.func @transform_3(%arg0: i32) -> (i32, i32) {
    %c0_i32 = arith.constant 0 : i32
    %c0_i32_0 = arith.constant 0 : i32
    %c0_i32_1 = arith.constant 0 : i32
    return %c0_i32, %c0_i32_0 : i32, i32
  }
  func.func @transform_4(%arg0: i32) -> (i32, i32) {
    %c0_i32 = arith.constant 0 : i32
    %c0_i32_0 = arith.constant 0 : i32
    %c0_i32_1 = arith.constant 0 : i32
    return %c0_i32, %c0_i32_0 : i32, i32
  }
  func.func @transform_5(%arg0: i32) -> (i32, i32) {
    %c0_i32 = arith.constant 0 : i32
    %c0_i32_0 = arith.constant 0 : i32
    %c0_i32_1 = arith.constant 0 : i32
    return %c0_i32, %c0_i32_0 : i32, i32
  }
  func.func @transform_6(%arg0: i32) -> (i32, i32) {
    %c0_i32 = arith.constant 0 : i32
    %c0_i32_0 = arith.constant 0 : i32
    %c0_i32_1 = arith.constant 0 : i32
    return %c0_i32, %c0_i32_0 : i32, i32
  }
  func.func @transform_7(%arg0: i32) -> (i32, i32) {
    %c0_i32 = arith.constant 0 : i32
    %c0_i32_0 = arith.constant 0 : i32
    %c0_i32_1 = arith.constant 0 : i32
    return %c0_i32, %c0_i32_0 : i32, i32
  }
  func.func @transform_8(%arg0: i32) -> (i32, i32) {
    %c0_i32 = arith.constant 0 : i32
    %c0_i32_0 = arith.constant 0 : i32
    %c0_i32_1 = arith.constant 0 : i32
    return %c0_i32, %c0_i32_0 : i32, i32
  }
  func.func @transform_9(%arg0: i32) -> (i32, i32) {
    %c0_i32 = arith.constant 0 : i32
    %c0_i32_0 = arith.constant 0 : i32
    %c0_i32_1 = arith.constant 0 : i32
    return %c0_i32, %c0_i32_0 : i32, i32
  }
  func.func @transform_10(%arg0: i32) -> (i32, i32) {
    %c0_i32 = arith.constant 0 : i32
    %c0_i32_0 = arith.constant 0 : i32
    %c0_i32_1 = arith.constant 0 : i32
    return %c0_i32, %c0_i32_0 : i32, i32
  }
  func.func @transform_11(%arg0: i32) -> (i32, i32) {
    %c0_i32 = arith.constant 0 : i32
    %c0_i32_0 = arith.constant 0 : i32
    %c0_i32_1 = arith.constant 0 : i32
    return %c0_i32, %c0_i32_0 : i32, i32
  }
  func.func @transform_12(%arg0: i32) -> (i32, i32) {
    %c0_i32 = arith.constant 0 : i32
    %c0_i32_0 = arith.constant 0 : i32
    %c0_i32_1 = arith.constant 0 : i32
    return %c0_i32, %c0_i32_0 : i32, i32
  }
  func.func @transform_13(%arg0: i32) -> (i32, i32) {
    %c0_i32 = arith.constant 0 : i32
    %c0_i32_0 = arith.constant 0 : i32
    %c0_i32_1 = arith.constant 0 : i32
    return %c0_i32, %c0_i32_0 : i32, i32
  }
  func.func @transform_14(%arg0: i32) -> (i32, i32) {
    %c0_i32 = arith.constant 0 : i32
    %c0_i32_0 = arith.constant 0 : i32
    %c0_i32_1 = arith.constant 0 : i32
    return %c0_i32, %c0_i32_0 : i32, i32
  }
  func.func @transform_15(%arg0: i32) -> (i32, i32) {
    %c0_i32 = arith.constant 0 : i32
    %c0_i32_0 = arith.constant 0 : i32
    %c0_i32_1 = arith.constant 0 : i32
    return %c0_i32, %c0_i32_0 : i32, i32
  }
  func.func @transform_16(%arg0: i32) -> (i32, i32) {
    %c0_i32 = arith.constant 0 : i32
    %c0_i32_0 = arith.constant 0 : i32
    %c0_i32_1 = arith.constant 0 : i32
    return %c0_i32, %c0_i32_0 : i32, i32
  }
  func.func @transform_17(%arg0: i32) -> (i32, i32) {
    %c0_i32 = arith.constant 0 : i32
    %c0_i32_0 = arith.constant 0 : i32
    %c0_i32_1 = arith.constant 0 : i32
    return %c0_i32, %c0_i32_0 : i32, i32
  }
  func.func @transform_18(%arg0: i32) -> (i32, i32) {
    %c0_i32 = arith.constant 0 : i32
    %c0_i32_0 = arith.constant 0 : i32
    %c0_i32_1 = arith.constant 0 : i32
    return %c0_i32, %c0_i32_0 : i32, i32
  }
  func.func @transform_19(%arg0: i32) -> (i32, i32) {
    %c0_i32 = arith.constant 0 : i32
    %c0_i32_0 = arith.constant 0 : i32
    %c0_i32_1 = arith.constant 0 : i32
    return %c0_i32, %c0_i32_0 : i32, i32
  }
  func.func @transform_20(%arg0: i32) -> (i32, i32) {
    %c0_i32 = arith.constant 0 : i32
    %c0_i32_0 = arith.constant 0 : i32
    %c0_i32_1 = arith.constant 0 : i32
    return %c0_i32, %c0_i32_0 : i32, i32
  }
  func.func @transform_21(%arg0: i32) -> (i32, i32) {
    %c0_i32 = arith.constant 0 : i32
    %c0_i32_0 = arith.constant 0 : i32
    %c0_i32_1 = arith.constant 0 : i32
    return %c0_i32, %c0_i32_0 : i32, i32
  }
  func.func @transform_22(%arg0: i32) -> (i32, i32) {
    %c0_i32 = arith.constant 0 : i32
    %c0_i32_0 = arith.constant 0 : i32
    %c0_i32_1 = arith.constant 0 : i32
    return %c0_i32, %c0_i32_0 : i32, i32
  }
  func.func @transform_23(%arg0: i32) -> (i32, i32) {
    %c0_i32 = arith.constant 0 : i32
    %c0_i32_0 = arith.constant 0 : i32
    %c0_i32_1 = arith.constant 0 : i32
    return %c0_i32, %c0_i32_0 : i32, i32
  }
  func.func @transform_24(%arg0: i32) -> (i32, i32) {
    %c0_i32 = arith.constant 0 : i32
    %c0_i32_0 = arith.constant 0 : i32
    %c0_i32_1 = arith.constant 0 : i32
    return %c0_i32, %c0_i32_0 : i32, i32
  }
}

</mosaic_0001>

<bundles_post_ra>
// kernel: _lambda_.6
= control target key start
LH: loop header
LB: loop body
LE: loop exit
PB: predicated region body
PF: predicated region fallthrough
CT: control target
= control target key end

     0   :  { %s753_s24 = smov 127   ;;  %s755_s10 = smov 118   ;;  %v756_v58 = vmov 0   ;;  %vm81_vm0 = vcmask 1039360   ;;  %vm180_vm1 = vcmask 973824   ;;  %vm221_vm2 = vcmask 965632   ;;  %s933_s0 = inlined_call_operand.vmem [shape: bf16[4,16,384], index: 0, kind: input, shape index: {}]   ;;  %s934_s1 = inlined_call_operand.vmem [shape: f32[16,256], index: 1, kind: input, shape index: {}]   ;;  %s935_s2 = inlined_call_operand.vmem [shape: f32[16,1], index: 2, kind: input, shape index: {}]   ;;  %s936_s3 = inlined_call_operand.vmem [shape: bf16[16,256], index: 3, kind: output, shape index: {}]  }
   0x1   :  { %v20_v0 = vld [vmem:[%s933_s0] sm:$0xff]  ;;  %v33_v1 = vld [vmem:[%s933_s0 + $0x8] ss:$12 sps:$4 sm:$0xff]   ;;  %v21_v2 = vld [vmem:[%s933_s0 + $0xc] sm:$0xff]  ;;  %744 = vset.pattern.permute.xlu1 %v756_v58  ;;  %743 = vset.pattern.permute.xlu0 %v756_v58 }
   0x2   :  { %v23_v3 = vunpack.c.h.bf16 %v20_v0  ;;  %v35_v4 = vunpack.c.l.bf16 %v33_v1  ;;  %v22_v5 = vunpack.c.l.bf16 %v20_v0  ;;  %v24_v6 = vunpack.c.l.bf16 %v21_v2  ;;  %v439_v7 = vld [vmem:[%s933_s0 + $0x18] sm:$0xff]  ;;  %v441_v8 = vld [vmem:[%s933_s0 + $0x20] ss:$12 sps:$4 sm:$0xff]   ;;  %v440_v9 = vld [vmem:[%s933_s0 + $0x24] sm:$0xff] }
   0x3   :  { %v25_v10 = vunpack.c.h.bf16 %v21_v2  ;;  %v36_v11 = vunpack.c.h.bf16 %v33_v1  ;;  %v30_v12 = vunpack.c.h.bf16 %v439_v7  ;;  %v39_v13 = vunpack.c.l.bf16 %v441_v8  ;;  %v443_v22 = vld [vmem:[%s933_s0 + $0x30] sm:$0xff]  ;;  %v447_v23 = vld [vmem:[%s933_s0 + $0x38] ss:$12 sps:$4 sm:$0xff]   ;;  %v444_v24 = vld [vmem:[%s933_s0 + $0x3c] sm:$0xff] }
   0x4   :  { %v795_v14 = vpack.i.bf16 %v35_v4, %v23_v3  ;;  %v797_v15 = vpack.i.bf16 %v24_v6, %v22_v5  ;;  %v32_v16 = vunpack.c.h.bf16 %v440_v9  ;;  %v40_v17 = vunpack.c.h.bf16 %v441_v8  ;;  %v445_v31 = vld [vmem:[%s933_s0 + $0x48] sm:$0xff]  ;;  %v449_v32 = vld [vmem:[%s933_s0 + $0x50] ss:$12 sps:$4 sm:$0xff]   ;;  %v446_v35 = vld [vmem:[%s933_s0 + $0x54] sm:$0xff]  ;;  %s754_s0 = smov 119  }
   0x5   :  { %v803_v18 = vpack.i.bf16 %v36_v11, %v25_v10  ;;  %v805_v19 = vpack.i.bf16 %v39_v13, %v30_v12  ;;  %v29_v20 = vunpack.c.l.bf16 %v439_v7  ;;  %v31_v21 = vunpack.c.l.bf16 %v440_v9  ;;  %v15_v56 = vld [vmem:[%s934_s1 + $0x8] sm:$0xff]  ;;  %v17_v57 = vld [vmem:[%s934_s1 + $0x18] sm:$0xff]  ;;  %v18_v59 = vld [vmem:[%s935_s2] sm:$0xff] }
   0x6   :  { %564 = vrot.lane.b32.xlu0 %v795_v14, %s753_s24  ;;  %574 = vrot.lane.b32.xlu1 %v797_v15, %s753_s24  ;;  %v583_v25 = vpack.i.bf16 %v40_v17, %v32_v16  ;;  %v45_v26 = vunpack.c.h.bf16 %v443_v22  ;;  %v57_v28 = vunpack.c.l.bf16 %v447_v23  ;;  %v47_v29 = vunpack.c.h.bf16 %v444_v24  ;;  %v19_v60 = vld [vmem:[%s935_s2 + $0x8] sm:$0xff] }
   0x7   :  { %v588_v27 = vpack.i.bf16 %v31_v21, %v29_v20  ;;  %v58_v30 = vunpack.c.h.bf16 %v447_v23  ;;  %v44_v33 = vunpack.c.l.bf16 %v443_v22  ;;  %v46_v34 = vunpack.c.l.bf16 %v444_v24  ;;  %404 = vmatprep.mubr.f32.mxu0 %v15_v56  ;;  %410 = vmatprep.mubr.f32.mxu1 %v17_v57 }
   0x8   :  { %v593_v36 = vpack.i.bf16 %v57_v28, %v45_v26  ;;  %v52_v38 = vunpack.c.h.bf16 %v445_v31  ;;  %v61_v39 = vunpack.c.l.bf16 %v449_v32  ;;  %v54_v41 = vunpack.c.h.bf16 %v446_v35 }
   0x9   :  { %v598_v37 = vpack.i.bf16 %v58_v30, %v47_v29  ;;  %v603_v40 = vpack.i.bf16 %v46_v34, %v44_v33  ;;  %v62_v42 = vunpack.c.h.bf16 %v449_v32  ;;  %v51_v43 = vunpack.c.l.bf16 %v445_v31 }
   0xa   :  { %569 = vrot.lane.b32.xlu0 %v803_v18, %s753_s24  ;;  %579 = vrot.lane.b32.xlu1 %v805_v19, %s753_s24  ;;  %v551_v44 = vcombine.high %v20_v0, %v21_v2  ;;  %v552_v45 = vcombine.low %v20_v0, %v21_v2  ;;  %v553_v46 = vcombine.high %v439_v7, %v440_v9  ;;  %v53_v48 = vunpack.c.l.bf16 %v446_v35 }
   0xb   :  { %v608_v47 = vpack.i.bf16 %v61_v39, %v52_v38  ;;  %v833_v49 = vcombine.high %v443_v22, %v444_v24  ;;  %v835_v50 = vcombine.low %v443_v22, %v444_v24  ;;  %v837_v51 = vcombine.high %v445_v31, %v446_v35 }
   0xc   :  { %456 = vmatprep.subr.bf16.mxu0 %v551_v44  ;;  %519 = vmatprep.subr.bf16.mxu1 %v551_v44  ;;  %v839_v52 = vcombine.low %v445_v31, %v446_v35  ;;  %v554_v53 = vcombine.low %v439_v7, %v440_v9  ;;  %v613_v54 = vpack.i.bf16 %v62_v42, %v54_v41 }
   0xd   :  { %458 = vmatpush1.bf16.msra.mxu0 %v552_v45  ;;  %535 = vmatpush1.bf16.msra.mxu1 %v552_v45  ;;  %v618_v55 = vpack.i.bf16 %v53_v48, %v51_v43 }
   0xe   :  { %584 = vrot.lane.b32.xlu0 %v583_v25, %s753_s24  ;;  %589 = vrot.lane.b32.xlu1 %v588_v27, %s753_s24 }
   0xf   :  { %460 = vmatprep.subr.bf16.mxu0 %v553_v46  ;;  %520 = vmatprep.subr.bf16.mxu1 %v553_v46 }
  0x11   :  { %462 = vmatpush1.bf16.msra.mxu0 %v554_v53  ;;  %536 = vmatpush1.bf16.msra.mxu1 %v554_v53 }
  0x12   :  { %594 = vrot.lane.b32.xlu0 %v593_v36, %s753_s24  ;;  %599 = vrot.lane.b32.xlu1 %v598_v37, %s753_s24 }
  0x16   :  { %604 = vrot.lane.b32.xlu0 %v603_v40, %s753_s24  ;;  %609 = vrot.lane.b32.xlu1 %v608_v47, %s753_s24 }
  0x1a   :  { %614 = vrot.lane.b32.xlu0 %v613_v54, %s753_s24  ;;  %619 = vrot.lane.b32.xlu1 %v618_v55, %s753_s24 }
  0x1e   :  { %624 = vrot.lane.b32.xlu0 %v795_v14, %s754_s0  ;;  %629 = vrot.lane.b32.xlu1 %v803_v18, %s754_s0 }
  0x22   :  { %634 = vrot.lane.b32.xlu0 %v797_v15, %s754_s0  ;;  %639 = vrot.lane.b32.xlu1 %v805_v19, %s754_s0 }
  0x26   :  { %644 = vrot.lane.b32.xlu0 %v583_v25, %s754_s0  ;;  %649 = vrot.lane.b32.xlu1 %v588_v27, %s754_s0 }
  0x2a   :  { %654 = vrot.lane.b32.xlu0 %v795_v14, %s755_s10  ;;  %659 = vrot.lane.b32.xlu1 %v803_v18, %s755_s10 }
  0x2e   :  { %664 = vrot.lane.b32.xlu0 %v797_v15, %s755_s10  ;;  %669 = vrot.lane.b32.xlu1 %v805_v19, %s755_s10 }
  0x32   :  { %674 = vrot.lane.b32.xlu0 %v583_v25, %s755_s10  ;;  %679 = vrot.lane.b32.xlu1 %v588_v27, %s755_s10 }
  0x36   :  { %684 = vrot.lane.b32.xlu0 %v593_v36, %s754_s0  ;;  %689 = vrot.lane.b32.xlu1 %v598_v37, %s754_s0 }
  0x3a   :  { %694 = vrot.lane.b32.xlu0 %v603_v40, %s754_s0  ;;  %699 = vrot.lane.b32.xlu1 %v608_v47, %s754_s0 }
  0x3e   :  { %704 = vrot.lane.b32.xlu0 %v613_v54, %s754_s0  ;;  %709 = vrot.lane.b32.xlu1 %v618_v55, %s754_s0 }
  0x42   :  { %714 = vrot.lane.b32.xlu0 %v593_v36, %s755_s10  ;;  %719 = vrot.lane.b32.xlu1 %v598_v37, %s755_s10 }
  0x46   :  { %724 = vrot.lane.b32.xlu0 %v603_v40, %s755_s10  ;;  %729 = vrot.lane.b32.xlu1 %v608_v47, %s755_s10 }
  0x4a   :  { %734 = vrot.lane.b32.xlu0 %v613_v54, %s755_s10  ;;  %739 = vrot.lane.b32.xlu1 %v618_v55, %s755_s10 }
  0x4e   :  { %332 = vperm.xlu0 %743, %v18_v59   ;;  %337 = vperm.xlu1 %744, %v19_v60  }
  0x78   :  { %v565_v61 = vpop.permute.xlu0 %564  ;;  %v575_v62 = vpop.permute.xlu1 %574 }
  0x79   :  { %v567_v63 = vunpack.i.h.bf16 %v565_v61  ;;  %v566_v0 = vunpack.i.l.bf16 %v565_v61  ;;  %v576_v1 = vunpack.i.l.bf16 %v575_v62  ;;  %v577_v4 = vunpack.i.h.bf16 %v575_v62 }
  0x7b   :  { %v83_v9 = vsel %vm81_vm0, %v566_v0, %v567_v63  ;;  %v82_v11 = vsel %vm81_vm0, %v576_v1, %v566_v0 }
  0x7c   :  { %v570_v2 = vpop.permute.xlu0 %569  ;;  %v580_v3 = vpop.permute.xlu1 %579 }
  0x7d   :  { %v572_v5 = vunpack.i.h.bf16 %v570_v2  ;;  %v571_v6 = vunpack.i.l.bf16 %v570_v2  ;;  %v582_v7 = vunpack.i.h.bf16 %v580_v3  ;;  %v581_v8 = vunpack.i.l.bf16 %v580_v3 }
  0x7f   :  { %v85_v10 = vsel %vm81_vm0, %v571_v6, %v572_v5  ;;  %v84_v12 = vsel %vm81_vm0, %v577_v4, %v571_v6  ;;  %v109_v21 = vsel %vm81_vm0, %v581_v8, %v582_v7 }
  0x80   :  { %v585_v13 = vpop.permute.xlu0 %584  ;;  %v590_v14 = vpop.permute.xlu1 %589  ;;  %v463_v15 = vpack.c.bf16 %v85_v10, %v83_v9  ;;  %v465_v16 = vpack.c.bf16 %v84_v12, %v82_v11 }
  0x81   :  { %v587_v17 = vunpack.i.h.bf16 %v585_v13  ;;  %v586_v18 = vunpack.i.l.bf16 %v585_v13  ;;  %v592_v19 = vunpack.i.h.bf16 %v590_v14  ;;  %v591_v20 = vunpack.i.l.bf16 %v590_v14 }
  0x82   :  { %464 = vmatprep.subr.bf16.mxu0 %v463_v15  ;;  %521 = vmatprep.subr.bf16.mxu1 %v463_v15 }
  0x83   :  { %466 = vmatpush1.bf16.msra.mxu0 %v465_v16  ;;  %537 = vmatpush1.bf16.msra.mxu1 %v465_v16  ;;  %v111_v22 = vsel %vm81_vm0, %v586_v18, %v587_v17  ;;  %v108_v23 = vsel %vm81_vm0, %v591_v20, %v581_v8  ;;  %v110_v24 = vsel %vm81_vm0, %v592_v19, %v586_v18 }
  0x84   :  { %v595_v25 = vpop.permute.xlu0 %594  ;;  %v600_v26 = vpop.permute.xlu1 %599  ;;  %v467_v27 = vpack.c.bf16 %v111_v22, %v109_v21  ;;  %v469_v28 = vpack.c.bf16 %v110_v24, %v108_v23 }
  0x85   :  { %v597_v29 = vunpack.i.h.bf16 %v595_v25  ;;  %v596_v30 = vunpack.i.l.bf16 %v595_v25  ;;  %v602_v31 = vunpack.i.h.bf16 %v600_v26  ;;  %v601_v32 = vunpack.i.l.bf16 %v600_v26 }
  0x86   :  { %468 = vmatprep.subr.bf16.mxu0 %v467_v27  ;;  %522 = vmatprep.subr.bf16.mxu1 %v467_v27 }
  0x87   :  { %470 = vmatpush1.bf16.msra.mxu0 %v469_v28  ;;  %538 = vmatpush1.bf16.msra.mxu1 %v469_v28  ;;  %v135_v37 = vsel %vm81_vm0, %v596_v30, %v597_v29  ;;  %v137_v38 = vsel %vm81_vm0, %v601_v32, %v602_v31 }
  0x88   :  { %v605_v33 = vpop.permute.xlu0 %604  ;;  %v610_v34 = vpop.permute.xlu1 %609  ;;  %472 = vmatprep.subr.bf16.mxu0 %v833_v49  ;;  %523 = vmatprep.subr.bf16.mxu1 %v833_v49  ;;  %v479_v49 = vpack.c.bf16 %v137_v38, %v135_v37 }
  0x89   :  { %v607_v35 = vunpack.i.h.bf16 %v605_v33  ;;  %v606_v36 = vunpack.i.l.bf16 %v605_v33  ;;  %v612_v39 = vunpack.i.h.bf16 %v610_v34  ;;  %v611_v40 = vunpack.i.l.bf16 %v610_v34 }
  0x8b   :  { %474 = vmatpush1.bf16.msra.mxu0 %v835_v50  ;;  %539 = vmatpush1.bf16.msra.mxu1 %v835_v50  ;;  %v134_v45 = vsel %vm81_vm0, %v606_v36, %v596_v30  ;;  %v136_v46 = vsel %vm81_vm0, %v607_v35, %v601_v32  ;;  %v161_v55 = vsel %vm81_vm0, %v611_v40, %v612_v39 }
  0x8c   :  { %v615_v41 = vpop.permute.xlu0 %614  ;;  %v620_v42 = vpop.permute.xlu1 %619  ;;  %476 = vmatprep.subr.bf16.mxu0 %v837_v51  ;;  %524 = vmatprep.subr.bf16.mxu1 %v837_v51  ;;  %v481_v51 = vpack.c.bf16 %v136_v46, %v134_v45 }
  0x8d   :  { %v617_v43 = vunpack.i.h.bf16 %v615_v41  ;;  %v616_v44 = vunpack.i.l.bf16 %v615_v41  ;;  %v622_v47 = vunpack.i.h.bf16 %v620_v42  ;;  %v621_v48 = vunpack.i.l.bf16 %v620_v42 }
  0x8f   :  { %478 = vmatpush1.bf16.msra.mxu0 %v839_v52  ;;  %540 = vmatpush1.bf16.msra.mxu1 %v839_v52  ;;  %v163_v50 = vsel %vm81_vm0, %v616_v44, %v617_v43  ;;  %v160_v61 = vsel %vm81_vm0, %v621_v48, %v611_v40  ;;  %v162_v62 = vsel %vm81_vm0, %v622_v47, %v616_v44 }
  0x90   :  { %v625_v53 = vpop.permute.xlu0 %624  ;;  %v630_v54 = vpop.permute.xlu1 %629  ;;  %480 = vmatprep.subr.bf16.mxu0 %v479_v49  ;;  %525 = vmatprep.subr.bf16.mxu1 %v479_v49  ;;  %v483_v60 = vpack.c.bf16 %v163_v50, %v161_v55  ;;  %v485_v4 = vpack.c.bf16 %v162_v62, %v160_v61 }
  0x91   :  { %v627_v56 = vunpack.i.h.bf16 %v625_v53  ;;  %v626_v57 = vunpack.i.l.bf16 %v625_v53  ;;  %v632_v58 = vunpack.i.h.bf16 %v630_v54  ;;  %v631_v59 = vunpack.i.l.bf16 %v630_v54 }
  0x93   :  { %482 = vmatpush1.bf16.msra.mxu0 %v481_v51  ;;  %541 = vmatpush1.bf16.msra.mxu1 %v481_v51  ;;  %v182_v52 = vsel %vm180_vm1, %v626_v57, %v627_v56  ;;  %v184_v63 = vsel %vm180_vm1, %v631_v59, %v632_v58 }
  0x94   :  { %v635_v0 = vpop.permute.xlu0 %634  ;;  %v640_v1 = vpop.permute.xlu1 %639  ;;  %484 = vmatprep.subr.bf16.mxu0 %v483_v60  ;;  %526 = vmatprep.subr.bf16.mxu1 %v483_v60  ;;  %v487_v7 = vpack.c.bf16 %v184_v63, %v182_v52 }
  0x95   :  { %v637_v2 = vunpack.i.h.bf16 %v635_v0  ;;  %v636_v3 = vunpack.i.l.bf16 %v635_v0  ;;  %v642_v5 = vunpack.i.h.bf16 %v640_v1  ;;  %v641_v6 = vunpack.i.l.bf16 %v640_v1 }
  0x97   :  { %486 = vmatpush1.bf16.msra.mxu0 %v485_v4  ;;  %542 = vmatpush1.bf16.msra.mxu1 %v485_v4  ;;  %v181_v8 = vsel %vm180_vm1, %v636_v3, %v626_v57  ;;  %v183_v9 = vsel %vm180_vm1, %v637_v2, %v631_v59  ;;  %v202_v17 = vsel %vm180_vm1, %v641_v6, %v642_v5 }
  0x98   :  { %v645_v10 = vpop.permute.xlu0 %644  ;;  %v650_v11 = vpop.permute.xlu1 %649  ;;  %488 = vmatprep.subr.bf16.mxu0 %v487_v7  ;;  %527 = vmatprep.subr.bf16.mxu1 %v487_v7  ;;  %v489_v12 = vpack.c.bf16 %v183_v9, %v181_v8 }
  0x99   :  { %v647_v13 = vunpack.i.h.bf16 %v645_v10  ;;  %v646_v14 = vunpack.i.l.bf16 %v645_v10  ;;  %v652_v15 = vunpack.i.h.bf16 %v650_v11  ;;  %v651_v16 = vunpack.i.l.bf16 %v650_v11 }
  0x9b   :  { %490 = vmatpush1.bf16.msra.mxu0 %v489_v12  ;;  %543 = vmatpush1.bf16.msra.mxu1 %v489_v12  ;;  %v204_v18 = vsel %vm180_vm1, %v646_v14, %v647_v13  ;;  %v201_v19 = vsel %vm180_vm1, %v651_v16, %v641_v6  ;;  %v203_v20 = vsel %vm180_vm1, %v652_v15, %v646_v14 }
  0x9c   :  { %v655_v21 = vpop.permute.xlu0 %654  ;;  %v660_v22 = vpop.permute.xlu1 %659  ;;  %v491_v23 = vpack.c.bf16 %v204_v18, %v202_v17  ;;  %v493_v24 = vpack.c.bf16 %v203_v20, %v201_v19 }
  0x9d   :  { %v657_v25 = vunpack.i.h.bf16 %v655_v21  ;;  %v656_v26 = vunpack.i.l.bf16 %v655_v21  ;;  %v662_v27 = vunpack.i.h.bf16 %v660_v22  ;;  %v661_v28 = vunpack.i.l.bf16 %v660_v22 }
  0x9e   :  { %492 = vmatprep.subr.bf16.mxu0 %v491_v23  ;;  %528 = vmatprep.subr.bf16.mxu1 %v491_v23 }
  0x9f   :  { %494 = vmatpush1.bf16.msra.mxu0 %v493_v24  ;;  %544 = vmatpush1.bf16.msra.mxu1 %v493_v24  ;;  %v223_v29 = vsel %vm221_vm2, %v656_v26, %v657_v25  ;;  %v225_v30 = vsel %vm221_vm2, %v661_v28, %v662_v27 }
  0xa0   :  { %v665_v31 = vpop.permute.xlu0 %664  ;;  %v670_v32 = vpop.permute.xlu1 %669  ;;  %v495_v33 = vpack.c.bf16 %v225_v30, %v223_v29 }
  0xa1   :  { %v667_v34 = vunpack.i.h.bf16 %v665_v31  ;;  %v666_v35 = vunpack.i.l.bf16 %v665_v31  ;;  %v672_v36 = vunpack.i.h.bf16 %v670_v32  ;;  %v671_v37 = vunpack.i.l.bf16 %v670_v32 }
  0xa2   :  { %496 = vmatprep.subr.bf16.mxu0 %v495_v33  ;;  %529 = vmatprep.subr.bf16.mxu1 %v495_v33 }
  0xa3   :  { %v222_v38 = vsel %vm221_vm2, %v666_v35, %v656_v26  ;;  %v224_v39 = vsel %vm221_vm2, %v667_v34, %v661_v28  ;;  %v243_v47 = vsel %vm221_vm2, %v671_v37, %v672_v36 }
  0xa4   :  { %v675_v40 = vpop.permute.xlu0 %674  ;;  %v680_v41 = vpop.permute.xlu1 %679  ;;  %v497_v42 = vpack.c.bf16 %v224_v39, %v222_v38 }
  0xa5   :  { %v677_v43 = vunpack.i.h.bf16 %v675_v40  ;;  %v676_v44 = vunpack.i.l.bf16 %v675_v40  ;;  %v682_v45 = vunpack.i.h.bf16 %v680_v41  ;;  %v681_v46 = vunpack.i.l.bf16 %v680_v41 }
  0xa6   :  { %498 = vmatpush1.bf16.msra.mxu0 %v497_v42  ;;  %545 = vmatpush1.bf16.msra.mxu1 %v497_v42 }
  0xa7   :  { %v245_v48 = vsel %vm221_vm2, %v676_v44, %v677_v43  ;;  %v242_v49 = vsel %vm221_vm2, %v681_v46, %v671_v37  ;;  %v244_v50 = vsel %vm221_vm2, %v682_v45, %v676_v44 }
  0xa8   :  { %v685_v53 = vpop.permute.xlu0 %684  ;;  %v690_v54 = vpop.permute.xlu1 %689  ;;  %v499_v51 = vpack.c.bf16 %v245_v48, %v243_v47  ;;  %v501_v55 = vpack.c.bf16 %v244_v50, %v242_v49  ;;  %v14_v49 = vld [vmem:[%s934_s1] sm:$0xff]  ;;  %v16_v50 = vld [vmem:[%s934_s1 + $0x10] sm:$0xff] }
  0xa9   :  { %v687_v56 = vunpack.i.h.bf16 %v685_v53  ;;  %v686_v57 = vunpack.i.l.bf16 %v685_v53  ;;  %v692_v58 = vunpack.i.h.bf16 %v690_v54  ;;  %v691_v59 = vunpack.i.l.bf16 %v690_v54 }
  0xaa   :  { %500 = vmatprep.subr.bf16.mxu0 %v499_v51  ;;  %530 = vmatprep.subr.bf16.mxu1 %v499_v51 }
  0xab   :  { %502 = vmatpush1.bf16.msra.mxu0 %v501_v55  ;;  %546 = vmatpush1.bf16.msra.mxu1 %v501_v55  ;;  %v263_v60 = vsel %vm180_vm1, %v686_v57, %v687_v56  ;;  %v265_v61 = vsel %vm180_vm1, %v691_v59, %v692_v58 }
  0xac   :  { %v695_v62 = vpop.permute.xlu0 %694  ;;  %v700_v52 = vpop.permute.xlu1 %699  ;;  %v503_v63 = vpack.c.bf16 %v265_v61, %v263_v60 }
  0xad   :  { %v697_v0 = vunpack.i.h.bf16 %v695_v62  ;;  %v696_v1 = vunpack.i.l.bf16 %v695_v62  ;;  %v702_v2 = vunpack.i.h.bf16 %v700_v52  ;;  %v701_v3 = vunpack.i.l.bf16 %v700_v52 }
  0xae   :  { %504 = vmatprep.subr.bf16.mxu0 %v503_v63  ;;  %531 = vmatprep.subr.bf16.mxu1 %v503_v63 }
  0xaf   :  { %v262_v4 = vsel %vm180_vm1, %v696_v1, %v686_v57  ;;  %v264_v5 = vsel %vm180_vm1, %v697_v0, %v691_v59  ;;  %v283_v13 = vsel %vm180_vm1, %v701_v3, %v702_v2 }
  0xb0   :  { %v705_v6 = vpop.permute.xlu0 %704  ;;  %v710_v7 = vpop.permute.xlu1 %709  ;;  %v505_v8 = vpack.c.bf16 %v264_v5, %v262_v4 }
  0xb1   :  { %v707_v9 = vunpack.i.h.bf16 %v705_v6  ;;  %v706_v10 = vunpack.i.l.bf16 %v705_v6  ;;  %v712_v11 = vunpack.i.h.bf16 %v710_v7  ;;  %v711_v12 = vunpack.i.l.bf16 %v710_v7 }
  0xb2   :  { %506 = vmatpush1.bf16.msra.mxu0 %v505_v8  ;;  %547 = vmatpush1.bf16.msra.mxu1 %v505_v8 }
  0xb3   :  { %v285_v14 = vsel %vm180_vm1, %v706_v10, %v707_v9  ;;  %v282_v15 = vsel %vm180_vm1, %v711_v12, %v701_v3  ;;  %v284_v16 = vsel %vm180_vm1, %v712_v11, %v706_v10 }
  0xb4   :  { %v715_v17 = vpop.permute.xlu0 %714  ;;  %v720_v18 = vpop.permute.xlu1 %719  ;;  %v507_v19 = vpack.c.bf16 %v285_v14, %v283_v13  ;;  %v509_v20 = vpack.c.bf16 %v284_v16, %v282_v15 }
  0xb5   :  { %v717_v21 = vunpack.i.h.bf16 %v715_v17  ;;  %v716_v22 = vunpack.i.l.bf16 %v715_v17  ;;  %v722_v23 = vunpack.i.h.bf16 %v720_v18  ;;  %v721_v24 = vunpack.i.l.bf16 %v720_v18 }
  0xb6   :  { %508 = vmatprep.subr.bf16.mxu0 %v507_v19  ;;  %532 = vmatprep.subr.bf16.mxu1 %v507_v19 }
  0xb7   :  { %510 = vmatpush1.bf16.msra.mxu0 %v509_v20  ;;  %548 = vmatpush1.bf16.msra.mxu1 %v509_v20  ;;  %v303_v25 = vsel %vm221_vm2, %v716_v22, %v717_v21  ;;  %v305_v26 = vsel %vm221_vm2, %v721_v24, %v722_v23 }
  0xb8   :  { %v725_v27 = vpop.permute.xlu0 %724  ;;  %v730_v28 = vpop.permute.xlu1 %729  ;;  %v511_v29 = vpack.c.bf16 %v305_v26, %v303_v25 }
  0xb9   :  { %v727_v30 = vunpack.i.h.bf16 %v725_v27  ;;  %v726_v31 = vunpack.i.l.bf16 %v725_v27  ;;  %v732_v32 = vunpack.i.h.bf16 %v730_v28  ;;  %v731_v33 = vunpack.i.l.bf16 %v730_v28 }
  0xba   :  { %512 = vmatprep.subr.bf16.mxu0 %v511_v29  ;;  %533 = vmatprep.subr.bf16.mxu1 %v511_v29 }
  0xbb   :  { %v302_v34 = vsel %vm221_vm2, %v726_v31, %v716_v22  ;;  %v304_v35 = vsel %vm221_vm2, %v727_v30, %v721_v24  ;;  %v323_v43 = vsel %vm221_vm2, %v731_v33, %v732_v32 }
  0xbc   :  { %v735_v36 = vpop.permute.xlu0 %734  ;;  %v740_v37 = vpop.permute.xlu1 %739  ;;  %v513_v38 = vpack.c.bf16 %v304_v35, %v302_v34 }
  0xbd   :  { %v737_v39 = vunpack.i.h.bf16 %v735_v36  ;;  %v736_v40 = vunpack.i.l.bf16 %v735_v36  ;;  %v742_v41 = vunpack.i.h.bf16 %v740_v37  ;;  %v741_v42 = vunpack.i.l.bf16 %v740_v37 }
  0xbe   :  { %514 = vmatpush1.bf16.msra.mxu0 %v513_v38  ;;  %549 = vmatpush1.bf16.msra.mxu1 %v513_v38 }
  0xbf   :  { %v325_v44 = vsel %vm221_vm2, %v736_v40, %v737_v39  ;;  %v322_v45 = vsel %vm221_vm2, %v741_v42, %v731_v33  ;;  %v324_v46 = vsel %vm221_vm2, %v742_v41, %v736_v40 }
  0xc0   :  { %v515_v47 = vpack.c.bf16 %v325_v44, %v323_v43  ;;  %v517_v48 = vpack.c.bf16 %v324_v46, %v322_v45 }
  0xc2   :  { %516 = vmatprep.subr.bf16.mxu0 %v515_v47  ;;  %534 = vmatprep.subr.bf16.mxu1 %v515_v47 }
  0xc3   :  { %518 = vmatpush1.bf16.msra.mxu0 %v517_v48  ;;  %550 = vmatpush1.bf16.msra.mxu1 %v517_v48 }
  0xc6   :  { %405 = vmatmul.mubr.f32.vlgmr.msra.gmra.mrb[0].mxu0 %v14_v49  ;;  %411 = vmatmul.mubr.f32.vlgmr.msra.gmra.mrb[0].mxu1 %v16_v50 }
  0xcd   :  { %v333_v53 = vpop.permute.xlu0 %332  ;;  %v338_v54 = vpop.permute.xlu1 %337 }
 0x199   :  { %v406_v51 = vpop.f32.mrb[0].mxu0  ;;  %v412_v55 = vpop.f32.mrb[0].mxu1 }
 0x19a   :  { %v407_v56 = vadd.f32 %v406_v51, %v333_v53  ;;  %v413_v57 = vadd.f32 %v412_v55, %v338_v54  ;;  %v408_v58 = vpop.f32.mrb[1].mxu0  ;;  %v414_v59 = vpop.f32.mrb[1].mxu1 }
 0x19b   :  { %v409_v60 = vadd.f32 %v408_v58, %v333_v53  ;;  %v415_v61 = vadd.f32 %v414_v59, %v338_v54 }
 0x19c   :  { %v417_v62 = vmax.f32 %v407_v56, 0.0  ;;  %v419_v52 = vmax.f32 %v413_v57, 0.0 }
 0x19d   :  { %v418_v63 = vmax.f32 %v409_v60, 0.0  ;;  %v420_v0 = vmax.f32 %v415_v61, 0.0 }
 0x19f   :  { %v453_v1 = vpack.c.bf16 %v418_v63, %v417_v62  ;;  %v454_v2 = vpack.c.bf16 %v420_v0, %v419_v52 }
 0x1a1   :  { %433 = vst [vmem:[%s936_s3] sm:$0xff] %v453_v1  ;;  %434 = vst [vmem:[%s936_s3 + $0x8] sm:$0xff] %v454_v2 }

// kernel: _lambda_.5
= control target key start
LH: loop header
LB: loop body
LE: loop exit
PB: predicated region body
PF: predicated region fallthrough
CT: control target
= control target key end

     0   :  { %s3697_s29 = smov 127   ;;  %s3698_s30 = smov 126   ;;  %vm371_vm0 = vcmask 130048   ;;  %vm85_vm1 = vcmask 1039360   ;;  %vm122_vm2 = vcmask 1031168   ;;  %vm159_vm3 = vcmask 900096   ;;  %s5275_s0 = inlined_call_operand.vmem [shape: bf16[16,1152], index: 0, kind: input, shape index: {}]   ;;  %s5276_s2 = inlined_call_operand.vmem [shape: f32[16,144], index: 2, kind: input, shape index: {}]   ;;  %s5277_s3 = inlined_call_operand.vmem [shape: f32[16,1], index: 3, kind: input, shape index: {}]   ;;  %s5278_s1 = inlined_call_operand.vmem [shape: f32[1,1152], index: 1, kind: input, shape index: {}]   ;;  %s5279_s4 = inlined_call_operand.vmem [shape: f32[16,144], index: 4, kind: input, shape index: {}]   ;;  %s5280_s5 = inlined_call_operand.vmem [shape: f32[16,1], index: 5, kind: input, shape index: {}]   ;;  %s5281_s6 = inlined_call_operand.vmem [shape: bf16[16,1152], index: 6, kind: output, shape index: {}]  }
   0x1   :  { %v39_v0 = vld [vmem:[%s5275_s0] sm:$0xff]  ;;  %v40_v1 = vld [vmem:[%s5275_s0 + $0x8] sm:$0xff]  ;;  %v51_v13 = vld [vmem:[%s5275_s0 + $0x10] ss:$36 sps:$4 sm:$0xff]   ;;  %s3699_s9 = smov 110   ;;  %s3700_s10 = smov 109  }
   0x2   :  { %v41_v2 = vld [vmem:[%s5275_s0 + $0x24] sm:$0xff]  ;;  %v44_v3 = vunpack.c.h.bf16 %v39_v0  ;;  %v45_v4 = vunpack.c.l.bf16 %v40_v1  ;;  %v43_v5 = vunpack.c.l.bf16 %v39_v0  ;;  %v42_v7 = vld [vmem:[%s5275_s0 + $0x2c] sm:$0xff]  ;;  %v46_v14 = vunpack.c.h.bf16 %v40_v1  ;;  %s3701_s11 = smov 108   ;;  %s3702_s12 = smov 92   ;;  %v3791_v25 = vld [vmem:[%s5275_s0 + $0x34] sm:$0xff] }
   0x3   :  { %v47_v6 = vunpack.c.l.bf16 %v41_v2  ;;  %v48_v8 = vunpack.c.h.bf16 %v41_v2  ;;  %v49_v9 = vunpack.c.l.bf16 %v42_v7  ;;  %v53_v15 = vunpack.c.l.bf16 %v51_v13  ;;  %s3703_s13 = smov 91   ;;  %s3704_s14 = smov 90   ;;  %v3786_v24 = vld [vmem:[%s5275_s0 + $0x10] sm:$0xff]  ;;  %v3796_v26 = vld [vmem:[%s5275_s0 + $0x18] sm:$0xff]  ;;  %v3808_v29 = vld [vmem:[%s5276_s2 + $0x8] sm:$0xff] }
   0x4   :  { %v2786_v10 = vpack.i.bf16 %v45_v4, %v44_v3  ;;  %v50_v16 = vunpack.c.h.bf16 %v42_v7  ;;  %v54_v17 = vunpack.c.h.bf16 %v51_v13  ;;  %v2768_v19 = vcombine.high %v39_v0, %v41_v2  ;;  %v3801_v27 = vld [vmem:[%s5275_s0 + $0x3c] sm:$0xff]  ;;  %2440 = vmatprep.mubr.msk.f32.mxu0 %vm371_vm0, %v3808_v29  ;;  %2442 = vmatprep.mubr.msk.f32.mxu1 %vm371_vm0, %v3808_v29 }
   0x5   :  { %v2796_v11 = vpack.i.bf16 %v47_v6, %v43_v5  ;;  %v2791_v12 = vpack.i.bf16 %v49_v9, %v48_v8  ;;  %v3763_v18 = vpack.i.bf16 %v53_v15, %v46_v14  ;;  %v2769_v21 = vcombine.low %v39_v0, %v41_v2  ;;  %v644_v46 = vld [vmem:[%s5275_s0 + $0x20] ss:$36 sps:$4 sm:$0xff]  }
   0x6   :  { %2787 = vrot.lane.b32.xlu0 %v2786_v10, %s3697_s29  ;;  %v3765_v20 = vpack.i.bf16 %v54_v17, %v50_v16  ;;  %2481 = vmatprep.subr.bf16.mxu0 %v2768_v19  ;;  %v2770_v22 = vcombine.high %v40_v1, %v42_v7  ;;  %v2771_v23 = vcombine.low %v40_v1, %v42_v7  ;;  %v649_v31 = vunpack.c.h.bf16 %v3786_v24 }
   0x7   :  { %2797 = vrot.lane.b32.xlu1 %v2796_v11, %s3697_s29  ;;  %2483 = vmatpush1.bf16.msra.mxu0 %v2769_v21  ;;  %v2772_v28 = vcombine.high %v3786_v24, %v3791_v25  ;;  %v2773_v30 = vcombine.low %v3786_v24, %v3791_v25  ;;  %v650_v32 = vunpack.c.l.bf16 %v3796_v26  ;;  %v654_v33 = vunpack.c.h.bf16 %v3791_v25 }
   0x8   :  { %2517 = vmatprep.subr.bf16.mxu1 %v2770_v22  ;;  %v655_v34 = vunpack.c.l.bf16 %v3801_v27  ;;  %v648_v37 = vunpack.c.l.bf16 %v3786_v24  ;;  %v653_v38 = vunpack.c.l.bf16 %v3791_v25  ;;  %v651_v53 = vunpack.c.h.bf16 %v3796_v26 }
   0x9   :  { %2519 = vmatpush1.bf16.msra.mxu1 %v2771_v23  ;;  %v2916_v35 = vpack.i.bf16 %v650_v32, %v649_v31  ;;  %v652_v54 = vunpack.c.l.bf16 %v644_v46  ;;  %v656_v55 = vunpack.c.h.bf16 %v3801_v27  ;;  %v657_v56 = vunpack.c.h.bf16 %v644_v46 }
   0xa   :  { %2792 = vrot.lane.b32.xlu0 %v2791_v12, %s3697_s29  ;;  %v3826_v36 = vpack.i.bf16 %v655_v34, %v654_v33  ;;  %v3833_v39 = vpack.i.bf16 %v653_v38, %v648_v37  ;;  %vm196_vm4 = vcmask 891904   ;;  %vm233_vm5 = vcmask 883712  }
   0xb   :  { %2802 = vrot.lane.b32.xlu1 %v2786_v10, %s3698_s30  ;;  %v3930_v6 = vpack.i.bf16 %v652_v54, %v651_v53  ;;  %v3932_v7 = vpack.i.bf16 %v657_v56, %v656_v55  ;;  %vm270_vm6 = vcmask 752640   ;;  %vm307_vm7 = vcmask 744448  }
   0xc   :  { %vm5282_vm8 = vcmask 736256   ;;  %vm592_vm10 = vcmask 154624   ;;  %vm624_vm13 = vcmask 1047704  }
   0xe   :  { %2807 = vrot.lane.b32.xlu0 %v2791_v12, %s3698_s30 }
   0xf   :  { %2812 = vrot.lane.b32.xlu1 %v2796_v11, %s3698_s30 }
  0x12   :  { %2817 = vrot.lane.b32.xlu0 %v2786_v10, %s3699_s9 }
  0x13   :  { %2822 = vrot.lane.b32.xlu1 %v2791_v12, %s3699_s9 }
  0x16   :  { %2827 = vrot.lane.b32.xlu0 %v2796_v11, %s3699_s9 }
  0x17   :  { %2832 = vrot.lane.b32.xlu1 %v2786_v10, %s3700_s10 }
  0x1a   :  { %2837 = vrot.lane.b32.xlu0 %v2791_v12, %s3700_s10 }
  0x1b   :  { %2842 = vrot.lane.b32.xlu1 %v2796_v11, %s3700_s10 }
  0x1e   :  { %2847 = vrot.lane.b32.xlu0 %v2786_v10, %s3701_s11 }
  0x1f   :  { %2852 = vrot.lane.b32.xlu1 %v2791_v12, %s3701_s11 }
  0x22   :  { %2857 = vrot.lane.b32.xlu0 %v2796_v11, %s3701_s11 }
  0x23   :  { %2862 = vrot.lane.b32.xlu1 %v2786_v10, %s3702_s12 }
  0x26   :  { %2867 = vrot.lane.b32.xlu0 %v2791_v12, %s3702_s12 }
  0x27   :  { %2872 = vrot.lane.b32.xlu1 %v2796_v11, %s3702_s12 }
  0x2a   :  { %2877 = vrot.lane.b32.xlu0 %v2786_v10, %s3703_s13 }
  0x2b   :  { %2882 = vrot.lane.b32.xlu1 %v2791_v12, %s3703_s13 }
  0x2e   :  { %2887 = vrot.lane.b32.xlu0 %v2796_v11, %s3703_s13 }
  0x2f   :  { %2892 = vrot.lane.b32.xlu1 %v2786_v10, %s3704_s14 }
  0x32   :  { %2897 = vrot.lane.b32.xlu0 %v2791_v12, %s3704_s14 }
  0x33   :  { %2902 = vrot.lane.b32.xlu1 %v2796_v11, %s3704_s14 }
  0x36   :  { %2907 = vrot.lane.b32.xlu0 %v3763_v18, %s3697_s29 }
  0x37   :  { %2912 = vrot.lane.b32.xlu1 %v3765_v20, %s3697_s29 }
  0x3a   :  { %2917 = vrot.lane.b32.xlu0 %v2916_v35, %s3697_s29 }
  0x3b   :  { %2922 = vrot.lane.b32.xlu1 %v3826_v36, %s3697_s29 }
  0x3e   :  { %2927 = vrot.lane.b32.xlu0 %v3833_v39, %s3697_s29 }
  0x3f   :  { %2932 = vrot.lane.b32.xlu1 %v3763_v18, %s3698_s30 }
  0x42   :  { %2937 = vrot.lane.b32.xlu0 %v3765_v20, %s3698_s30 }
  0x43   :  { %2942 = vrot.lane.b32.xlu1 %v2916_v35, %s3698_s30 }
  0x46   :  { %2947 = vrot.lane.b32.xlu0 %v3826_v36, %s3698_s30 }
  0x47   :  { %2952 = vrot.lane.b32.xlu1 %v3833_v39, %s3698_s30 }
  0x4a   :  { %2957 = vrot.lane.b32.xlu0 %v3763_v18, %s3699_s9 }
  0x4b   :  { %2962 = vrot.lane.b32.xlu1 %v3765_v20, %s3699_s9 }
  0x4e   :  { %2967 = vrot.lane.b32.xlu0 %v2916_v35, %s3699_s9 }
  0x4f   :  { %2972 = vrot.lane.b32.xlu1 %v3826_v36, %s3699_s9 }
  0x52   :  { %2977 = vrot.lane.b32.xlu0 %v3833_v39, %s3699_s9 }
  0x53   :  { %2982 = vrot.lane.b32.xlu1 %v3763_v18, %s3700_s10 }
  0x56   :  { %2987 = vrot.lane.b32.xlu0 %v3765_v20, %s3700_s10 }
  0x57   :  { %2992 = vrot.lane.b32.xlu1 %v2916_v35, %s3700_s10 }
  0x5a   :  { %2997 = vrot.lane.b32.xlu0 %v3826_v36, %s3700_s10 }
  0x5b   :  { %3002 = vrot.lane.b32.xlu1 %v3833_v39, %s3700_s10 }
  0x5e   :  { %3007 = vrot.lane.b32.xlu0 %v3763_v18, %s3701_s11 }
  0x5f   :  { %3012 = vrot.lane.b32.xlu1 %v3765_v20, %s3701_s11 }
  0x62   :  { %3017 = vrot.lane.b32.xlu0 %v2916_v35, %s3701_s11 }
  0x63   :  { %3022 = vrot.lane.b32.xlu1 %v3826_v36, %s3701_s11 }
  0x66   :  { %3027 = vrot.lane.b32.xlu0 %v3833_v39, %s3701_s11 }
  0x67   :  { %3032 = vrot.lane.b32.xlu1 %v3763_v18, %s3702_s12 }
  0x6a   :  { %3037 = vrot.lane.b32.xlu0 %v3765_v20, %s3702_s12 }
  0x6b   :  { %3042 = vrot.lane.b32.xlu1 %v2916_v35, %s3702_s12 }
  0x6e   :  { %3047 = vrot.lane.b32.xlu0 %v3826_v36, %s3702_s12 }
  0x6f   :  { %3052 = vrot.lane.b32.xlu1 %v3833_v39, %s3702_s12 }
  0x72   :  { %3057 = vrot.lane.b32.xlu0 %v3763_v18, %s3703_s13 }
  0x73   :  { %3062 = vrot.lane.b32.xlu1 %v3765_v20, %s3703_s13 }
  0x76   :  { %3067 = vrot.lane.b32.xlu0 %v2916_v35, %s3703_s13 }
  0x77   :  { %3072 = vrot.lane.b32.xlu1 %v3826_v36, %s3703_s13 }
  0x78   :  { %v3889_v40 = vpop.permute.xlu0 %2787 }
  0x79   :  { %v2798_v41 = vpop.permute.xlu1 %2797  ;;  %v2790_v42 = vunpack.i.h.bf16 %v3889_v40  ;;  %v2789_v43 = vunpack.i.l.bf16 %v3889_v40 }
  0x7a   :  { %3077 = vrot.lane.b32.xlu0 %v3833_v39, %s3703_s13  ;;  %v2800_v44 = vunpack.i.h.bf16 %v2798_v41  ;;  %v2799_v45 = vunpack.i.l.bf16 %v2798_v41 }
  0x7b   :  { %3082 = vrot.lane.b32.xlu1 %v3763_v18, %s3704_s14  ;;  %v87_v57 = vsel %vm85_vm1, %v2789_v43, %v2790_v42 }
  0x7c   :  { %v3900_v47 = vpop.permute.xlu0 %2792  ;;  %v86_v59 = vsel %vm85_vm1, %v2799_v45, %v2789_v43 }
  0x7d   :  { %v3902_v48 = vpop.permute.xlu1 %2802  ;;  %v2795_v49 = vunpack.i.h.bf16 %v3900_v47  ;;  %v2794_v50 = vunpack.i.l.bf16 %v3900_v47 }
  0x7e   :  { %v2805_v51 = vunpack.i.h.bf16 %v3902_v48  ;;  %v2804_v52 = vunpack.i.l.bf16 %v3902_v48  ;;  %3087 = vrot.lane.b32.xlu0 %v3765_v20, %s3704_s14 }
  0x7f   :  { %3092 = vrot.lane.b32.xlu1 %v2916_v35, %s3704_s14  ;;  %v91_v58 = vsel %vm85_vm1, %v2794_v50, %v2795_v49  ;;  %v90_v60 = vsel %vm85_vm1, %v2800_v44, %v2794_v50 }
  0x80   :  { %v3921_v61 = vpop.permute.xlu0 %2807  ;;  %v2484_v63 = vpack.c.bf16 %v91_v58, %v87_v57  ;;  %v2486_v0 = vpack.c.bf16 %v90_v60, %v86_v59  ;;  %v124_v1 = vsel %vm122_vm2, %v2804_v52, %v2805_v51 }
  0x81   :  { %v2813_v62 = vpop.permute.xlu1 %2812  ;;  %v2810_v2 = vunpack.i.h.bf16 %v3921_v61  ;;  %v2809_v3 = vunpack.i.l.bf16 %v3921_v61 }
  0x82   :  { %v2815_v4 = vunpack.i.h.bf16 %v2813_v62  ;;  %v2814_v5 = vunpack.i.l.bf16 %v2813_v62  ;;  %2485 = vmatprep.subr.bf16.mxu0 %v2484_v63  ;;  %3097 = vrot.lane.b32.xlu0 %v3826_v36, %s3704_s14 }
  0x83   :  { %3102 = vrot.lane.b32.xlu1 %v3833_v39, %s3704_s14  ;;  %2487 = vmatpush1.bf16.msra.mxu0 %v2486_v0  ;;  %v128_v8 = vsel %vm122_vm2, %v2809_v3, %v2810_v2 }
  0x84   :  { %v123_v9 = vsel %vm122_vm2, %v2814_v5, %v2804_v52  ;;  %v127_v10 = vsel %vm122_vm2, %v2815_v4, %v2809_v3  ;;  %v3941_v11 = vpop.permute.xlu0 %2817  ;;  %v2488_v13 = vpack.c.bf16 %v128_v8, %v124_v1 }
  0x85   :  { %v3943_v12 = vpop.permute.xlu1 %2822  ;;  %v2490_v14 = vpack.c.bf16 %v127_v10, %v123_v9  ;;  %v2820_v15 = vunpack.i.h.bf16 %v3941_v11  ;;  %v2819_v16 = vunpack.i.l.bf16 %v3941_v11 }
  0x86   :  { %v2825_v17 = vunpack.i.h.bf16 %v3943_v12  ;;  %v2824_v18 = vunpack.i.l.bf16 %v3943_v12  ;;  %3107 = vrot.lane.b32.xlu0 %v3930_v6, %s3697_s29  ;;  %2489 = vmatprep.subr.bf16.mxu0 %v2488_v13 }
  0x87   :  { %3112 = vrot.lane.b32.xlu1 %v3932_v7, %s3697_s29  ;;  %2491 = vmatpush1.bf16.msra.mxu0 %v2490_v14  ;;  %v161_v19 = vsel %vm159_vm3, %v2819_v16, %v2820_v15 }
  0x88   :  { %v165_v20 = vsel %vm159_vm3, %v2824_v18, %v2825_v17  ;;  %v2828_v21 = vpop.permute.xlu0 %2827 }
  0x89   :  { %v3959_v22 = vpop.permute.xlu1 %2832  ;;  %v2492_v23 = vpack.c.bf16 %v165_v20, %v161_v19  ;;  %v2830_v26 = vunpack.i.h.bf16 %v2828_v21  ;;  %v2829_v27 = vunpack.i.l.bf16 %v2828_v21 }
  0x8a   :  { %v2835_v31 = vunpack.i.h.bf16 %v3959_v22  ;;  %v2834_v32 = vunpack.i.l.bf16 %v3959_v22  ;;  %3117 = vrot.lane.b32.xlu0 %v3930_v6, %s3698_s30 }
  0x8b   :  { %2493 = vmatprep.subr.bf16.mxu0 %v2492_v23  ;;  %3122 = vrot.lane.b32.xlu1 %v3932_v7, %s3698_s30  ;;  %v160_v33 = vsel %vm159_vm3, %v2829_v27, %v2819_v16  ;;  %v164_v34 = vsel %vm159_vm3, %v2830_v26, %v2824_v18 }
  0x8c   :  { %v3969_v35 = vpop.permute.xlu0 %2837  ;;  %v2494_v37 = vpack.c.bf16 %v164_v34, %v160_v33  ;;  %v198_v38 = vsel %vm196_vm4, %v2834_v32, %v2835_v31 }
  0x8d   :  { %v2843_v36 = vpop.permute.xlu1 %2842  ;;  %v2840_v39 = vunpack.i.h.bf16 %v3969_v35  ;;  %v2839_v41 = vunpack.i.l.bf16 %v3969_v35 }
  0x8e   :  { %v2845_v43 = vunpack.i.h.bf16 %v2843_v36  ;;  %v2844_v44 = vunpack.i.l.bf16 %v2843_v36  ;;  %3127 = vrot.lane.b32.xlu0 %v3930_v6, %s3699_s9  ;;  %2495 = vmatpush1.bf16.msra.mxu0 %v2494_v37 }
  0x8f   :  { %3132 = vrot.lane.b32.xlu1 %v3932_v7, %s3699_s9  ;;  %v202_v45 = vsel %vm196_vm4, %v2839_v41, %v2840_v39 }
  0x90   :  { %v197_v46 = vsel %vm196_vm4, %v2844_v44, %v2834_v32  ;;  %v201_v50 = vsel %vm196_vm4, %v2845_v43, %v2839_v41  ;;  %v3985_v52 = vpop.permute.xlu0 %2847  ;;  %v2496_v54 = vpack.c.bf16 %v202_v45, %v198_v38 }
  0x91   :  { %v3987_v53 = vpop.permute.xlu1 %2852  ;;  %v2498_v55 = vpack.c.bf16 %v201_v50, %v197_v46  ;;  %v2850_v56 = vunpack.i.h.bf16 %v3985_v52  ;;  %v2849_v57 = vunpack.i.l.bf16 %v3985_v52 }
  0x92   :  { %v2855_v58 = vunpack.i.h.bf16 %v3987_v53  ;;  %v2854_v59 = vunpack.i.l.bf16 %v3987_v53  ;;  %3137 = vrot.lane.b32.xlu0 %v3930_v6, %s3700_s10  ;;  %2497 = vmatprep.subr.bf16.mxu0 %v2496_v54 }
  0x93   :  { %3142 = vrot.lane.b32.xlu1 %v3932_v7, %s3700_s10  ;;  %2499 = vmatpush1.bf16.msra.mxu0 %v2498_v55  ;;  %v235_v60 = vsel %vm233_vm5, %v2849_v57, %v2850_v56 }
  0x94   :  { %v239_v62 = vsel %vm233_vm5, %v2854_v59, %v2855_v58  ;;  %v2858_v63 = vpop.permute.xlu0 %2857 }
  0x95   :  { %v4003_v0 = vpop.permute.xlu1 %2862  ;;  %v2500_v1 = vpack.c.bf16 %v239_v62, %v235_v60  ;;  %v2860_v3 = vunpack.i.h.bf16 %v2858_v63  ;;  %v2859_v4 = vunpack.i.l.bf16 %v2858_v63 }
  0x96   :  { %v2865_v5 = vunpack.i.h.bf16 %v4003_v0  ;;  %v2864_v8 = vunpack.i.l.bf16 %v4003_v0  ;;  %3147 = vrot.lane.b32.xlu0 %v3930_v6, %s3701_s11 }
  0x97   :  { %2501 = vmatprep.subr.bf16.mxu0 %v2500_v1  ;;  %3152 = vrot.lane.b32.xlu1 %v3932_v7, %s3701_s11  ;;  %v234_v9 = vsel %vm233_vm5, %v2859_v4, %v2849_v57  ;;  %v238_v10 = vsel %vm233_vm5, %v2860_v3, %v2854_v59 }
  0x98   :  { %v4013_v13 = vpop.permute.xlu0 %2867  ;;  %v2502_v16 = vpack.c.bf16 %v238_v10, %v234_v9  ;;  %v272_v18 = vsel %vm270_vm6, %v2864_v8, %v2865_v5  ;;  %v3705_v10 = vmov 0  }
  0x99   :  { %v2873_v14 = vpop.permute.xlu1 %2872  ;;  %v2870_v19 = vunpack.i.h.bf16 %v4013_v13  ;;  %v2869_v20 = vunpack.i.l.bf16 %v4013_v13  ;;  %3186 = vset.pattern.permute.xlu0 %v3705_v10  ;;  %24 = vst [vmem:[#allocation2] sm:$0xff] %v3705_v10  ;;  %28 = vst [vmem:[#allocation2 + $0x20] sm:$0xff] %v3705_v10  ;;  %3187 = vset.pattern.permute.xlu1 %v3705_v10 }
  0x9a   :  { %v2875_v21 = vunpack.i.h.bf16 %v2873_v14  ;;  %v2874_v23 = vunpack.i.l.bf16 %v2873_v14  ;;  %3157 = vrot.lane.b32.xlu0 %v3930_v6, %s3702_s12  ;;  %2503 = vmatpush1.bf16.msra.mxu0 %v2502_v16  ;;  %32 = vst [vmem:[#allocation2 + $0x40] sm:$0xff] %v3705_v10 }
  0x9b   :  { %3162 = vrot.lane.b32.xlu1 %v3932_v7, %s3702_s12  ;;  %v276_v26 = vsel %vm270_vm6, %v2869_v20, %v2870_v19 }
  0x9c   :  { %v271_v27 = vsel %vm270_vm6, %v2874_v23, %v2864_v8  ;;  %v275_v32 = vsel %vm270_vm6, %v2875_v21, %v2869_v20  ;;  %v4029_v33 = vpop.permute.xlu0 %2877  ;;  %v2504_v36 = vpack.c.bf16 %v276_v26, %v272_v18 }
  0x9d   :  { %v4031_v34 = vpop.permute.xlu1 %2882  ;;  %v2506_v37 = vpack.c.bf16 %v275_v32, %v271_v27  ;;  %v2880_v38 = vunpack.i.h.bf16 %v4029_v33  ;;  %v2879_v41 = vunpack.i.l.bf16 %v4029_v33 }
  0x9e   :  { %v2885_v43 = vunpack.i.h.bf16 %v4031_v34  ;;  %v2884_v44 = vunpack.i.l.bf16 %v4031_v34  ;;  %3167 = vrot.lane.b32.xlu0 %v3930_v6, %s3703_s13  ;;  %2505 = vmatprep.subr.bf16.mxu0 %v2504_v36 }
  0x9f   :  { %3172 = vrot.lane.b32.xlu1 %v3932_v7, %s3703_s13  ;;  %2507 = vmatpush1.bf16.msra.mxu0 %v2506_v37  ;;  %v309_v45 = vsel %vm307_vm7, %v2879_v41, %v2880_v38 }
  0xa0   :  { %v313_v46 = vsel %vm307_vm7, %v2884_v44, %v2885_v43  ;;  %v2888_v50 = vpop.permute.xlu0 %2887 }
  0xa1   :  { %v4047_v54 = vpop.permute.xlu1 %2892  ;;  %v2508_v55 = vpack.c.bf16 %v313_v46, %v309_v45  ;;  %v2890_v57 = vunpack.i.h.bf16 %v2888_v50  ;;  %v2889_v59 = vunpack.i.l.bf16 %v2888_v50 }
  0xa2   :  { %v2895_v60 = vunpack.i.h.bf16 %v4047_v54  ;;  %v2894_v62 = vunpack.i.l.bf16 %v4047_v54  ;;  %3177 = vrot.lane.b32.xlu0 %v3930_v6, %s3704_s14  ;;  %v37_v6 = vld [vmem:[%s5277_s3] sm:$0xff] }
  0xa3   :  { %2509 = vmatprep.subr.bf16.mxu0 %v2508_v55  ;;  %3182 = vrot.lane.b32.xlu1 %v3932_v7, %s3704_s14  ;;  %v308_v63 = vsel %vm307_vm7, %v2889_v59, %v2879_v41  ;;  %v312_v1 = vsel %vm307_vm7, %v2890_v57, %v2884_v44  ;;  %v38_v7 = vld [vmem:[%s5277_s3 + $0x8] sm:$0xff] }
  0xa4   :  { %v4057_v3 = vpop.permute.xlu0 %2897  ;;  %v2510_v8 = vpack.c.bf16 %v312_v1, %v308_v63  ;;  %v346_v9 = vsel %vm5282_vm8, %v2894_v62, %v2895_v60 }
  0xa5   :  { %v2903_v4 = vpop.permute.xlu1 %2902  ;;  %v2900_v14 = vunpack.i.h.bf16 %v4057_v3  ;;  %v2899_v16 = vunpack.i.l.bf16 %v4057_v3 }
  0xa6   :  { %v2905_v18 = vunpack.i.h.bf16 %v2903_v4  ;;  %v2904_v20 = vunpack.i.l.bf16 %v2903_v4  ;;  %2511 = vmatpush1.bf16.msra.mxu0 %v2510_v8  ;;  %363 = vperm.xlu0 %3186, %v37_v6  }
  0xa7   :  { %v350_v21 = vsel %vm5282_vm8, %v2899_v16, %v2900_v14  ;;  %368 = vperm.xlu1 %3187, %v38_v7   ;;  %v4122_v7 = vld [vmem:[%s5276_s2 + $0x10] sm:$0xff] }
  0xa8   :  { %v345_v23 = vsel %vm5282_vm8, %v2904_v20, %v2894_v62  ;;  %v349_v26 = vsel %vm5282_vm8, %v2905_v18, %v2899_v16  ;;  %v2908_v27 = vpop.permute.xlu0 %2907  ;;  %v2512_v36 = vpack.c.bf16 %v350_v21, %v346_v9  ;;  %v4091_v62 = vld [vmem:[%s5276_s2] sm:$0xff]  ;;  %v4107_v9 = vld [vmem:[%s5276_s2 + $0x18] sm:$0xff] }
  0xa9   :  { %v2913_v32 = vpop.permute.xlu1 %2912  ;;  %v2514_v37 = vpack.c.bf16 %v349_v26, %v345_v23  ;;  %v2910_v41 = vunpack.i.h.bf16 %v2908_v27  ;;  %v2909_v44 = vunpack.i.l.bf16 %v2908_v27 }
  0xaa   :  { %v2915_v45 = vunpack.i.h.bf16 %v2913_v32  ;;  %v2914_v46 = vunpack.i.l.bf16 %v2913_v32  ;;  %2513 = vmatprep.subr.bf16.mxu0 %v2512_v36 }
  0xab   :  { %2515 = vmatpush1.bf16.msra.mxu0 %v2514_v37  ;;  %v89_v50 = vsel %vm85_vm1, %v2909_v44, %v2910_v41  ;;  %v88_v57 = vsel %vm85_vm1, %v2790_v42, %v2909_v44 }
  0xac   :  { %v93_v55 = vsel %vm85_vm1, %v2914_v46, %v2915_v45  ;;  %v92_v59 = vsel %vm85_vm1, %v2795_v49, %v2914_v46  ;;  %v4093_v63 = vpop.permute.xlu0 %2917  ;;  %2553 = vmatprep.subr.bf16.mxu0 %v2772_v28 }
  0xad   :  { %v4095_v1 = vpop.permute.xlu1 %2922  ;;  %v2520_v4 = vpack.c.bf16 %v93_v55, %v89_v50  ;;  %v2522_v8 = vpack.c.bf16 %v92_v59, %v88_v57  ;;  %v2920_v40 = vunpack.i.h.bf16 %v4093_v63  ;;  %v2919_v42 = vunpack.i.l.bf16 %v4093_v63 }
  0xae   :  { %v2925_v47 = vunpack.i.h.bf16 %v4095_v1  ;;  %v2924_v49 = vunpack.i.l.bf16 %v4095_v1  ;;  %443 = vmatmul.mubr.f32.vlgmr.msra.gmra.mrb[0].mxu0 %v4091_v62 }
  0xaf   :  { %2521 = vmatprep.subr.bf16.mxu1 %v2520_v4  ;;  %2555 = vmatpush1.bf16.msra.mxu0 %v2773_v30  ;;  %v689_v28 = vsel %vm85_vm1, %v2919_v42, %v2920_v40 }
  0xb0   :  { %2523 = vmatpush1.bf16.msra.mxu1 %v2522_v8  ;;  %v693_v6 = vsel %vm85_vm1, %v2924_v49, %v2925_v47  ;;  %v2928_v16 = vpop.permute.xlu0 %2927  ;;  %2441 = vmatprep.mubr.msk.f32.mxu0 %vm371_vm0, %v4107_v9 }
  0xb1   :  { %v2933_v18 = vpop.permute.xlu1 %2932  ;;  %v2556_v20 = vpack.c.bf16 %v693_v6, %v689_v28  ;;  %v2930_v24 = vunpack.i.h.bf16 %v2928_v16  ;;  %v2929_v25 = vunpack.i.l.bf16 %v2928_v16 }
  0xb2   :  { %v2935_v30 = vunpack.i.h.bf16 %v2933_v18  ;;  %v2934_v21 = vunpack.i.l.bf16 %v2933_v18  ;;  %449 = vmatmul.mubr.f32.gmra.mrb[2].mxu0 %v4122_v7 }
  0xb3   :  { %2557 = vmatprep.subr.bf16.mxu0 %v2556_v20  ;;  %v688_v23 = vsel %vm85_vm1, %v2929_v25, %v2919_v42  ;;  %v692_v26 = vsel %vm85_vm1, %v2930_v24, %v2924_v49  ;;  %2444 = vmatprep.mubr.msk.f32.mxu0 %vm371_vm0, %v3808_v29 }
  0xb4   :  { %v2938_v27 = vpop.permute.xlu0 %2937  ;;  %v2558_v36 = vpack.c.bf16 %v692_v26, %v688_v23  ;;  %v126_v37 = vsel %vm122_vm2, %v2934_v21, %v2935_v30  ;;  %v125_v55 = vsel %vm122_vm2, %v2805_v51, %v2934_v21 }
  0xb5   :  { %v4131_v32 = vpop.permute.xlu1 %2942  ;;  %v2940_v41 = vunpack.i.h.bf16 %v2938_v27  ;;  %v2939_v44 = vunpack.i.l.bf16 %v2938_v27 }
  0xb6   :  { %v2945_v45 = vunpack.i.h.bf16 %v4131_v32  ;;  %v2944_v46 = vunpack.i.l.bf16 %v4131_v32  ;;  %2559 = vmatpush1.bf16.msra.mxu0 %v2558_v36  ;;  %v3677_v32 = vld [vmem:[%s5276_s2 + $0x8] sm:$0xff]  ;;  %s3706_s2 = smov 19  }
  0xb7   :  { %v130_v50 = vsel %vm122_vm2, %v2939_v44, %v2940_v41  ;;  %v129_v29 = vsel %vm122_vm2, %v2810_v2, %v2939_v44 }
  0xb8   :  { %v4143_v57 = vpop.permute.xlu0 %2947  ;;  %v2524_v4 = vpack.c.bf16 %v130_v50, %v126_v37  ;;  %v2526_v8 = vpack.c.bf16 %v129_v29, %v125_v55  ;;  %v725_v42 = vsel %vm122_vm2, %v2944_v46, %v2945_v45 }
  0xb9   :  { %v2953_v59 = vpop.permute.xlu1 %2952  ;;  %v2950_v49 = vunpack.i.h.bf16 %v4143_v57  ;;  %v2949_v28 = vunpack.i.l.bf16 %v4143_v57 }
  0xba   :  { %v2955_v48 = vunpack.i.h.bf16 %v2953_v59  ;;  %v2954_v6 = vunpack.i.l.bf16 %v2953_v59  ;;  %2525 = vmatprep.subr.bf16.mxu1 %v2524_v4 }
  0xbb   :  { %2527 = vmatpush1.bf16.msra.mxu1 %v2526_v8  ;;  %v729_v2 = vsel %vm122_vm2, %v2949_v28, %v2950_v49 }
  0xbc   :  { %v728_v51 = vsel %vm122_vm2, %v2955_v48, %v2949_v28  ;;  %v724_v61 = vsel %vm122_vm2, %v2954_v6, %v2944_v46  ;;  %v2958_v16 = vpop.permute.xlu0 %2957  ;;  %v2560_v20 = vpack.c.bf16 %v729_v2, %v725_v42 }
  0xbd   :  { %v2963_v18 = vpop.permute.xlu1 %2962  ;;  %v2562_v24 = vpack.c.bf16 %v728_v51, %v724_v61  ;;  %v2960_v25 = vunpack.i.h.bf16 %v2958_v16  ;;  %v2959_v30 = vunpack.i.l.bf16 %v2958_v16 }
  0xbe   :  { %v2965_v21 = vunpack.i.h.bf16 %v2963_v18  ;;  %v2964_v23 = vunpack.i.l.bf16 %v2963_v18  ;;  %2561 = vmatprep.subr.bf16.mxu0 %v2560_v20 }
  0xbf   :  { %2563 = vmatpush1.bf16.msra.mxu0 %v2562_v24  ;;  %v163_v26 = vsel %vm159_vm3, %v2959_v30, %v2960_v25  ;;  %v162_v36 = vsel %vm159_vm3, %v2820_v15, %v2959_v30 }
  0xc0   :  { %v167_v27 = vsel %vm159_vm3, %v2964_v23, %v2965_v21  ;;  %v166_v37 = vsel %vm159_vm3, %v2825_v17, %v2964_v23  ;;  %v4163_v41 = vpop.permute.xlu0 %2967 }
  0xc1   :  { %v4165_v44 = vpop.permute.xlu1 %2972  ;;  %v2528_v46 = vpack.c.bf16 %v167_v27, %v163_v26  ;;  %v2530_v50 = vpack.c.bf16 %v166_v37, %v162_v36  ;;  %v2970_v55 = vunpack.i.h.bf16 %v4163_v41  ;;  %v2969_v29 = vunpack.i.l.bf16 %v4163_v41 }
  0xc2   :  { %v2975_v59 = vunpack.i.h.bf16 %v4165_v44  ;;  %v2974_v11 = vunpack.i.l.bf16 %v4165_v44 }
  0xc3   :  { %2529 = vmatprep.subr.bf16.mxu1 %v2528_v46  ;;  %v761_v12 = vsel %vm159_vm3, %v2969_v29, %v2970_v55 }
  0xc4   :  { %2531 = vmatpush1.bf16.msra.mxu1 %v2530_v50  ;;  %v765_v15 = vsel %vm159_vm3, %v2974_v11, %v2975_v59  ;;  %v2978_v17 = vpop.permute.xlu0 %2977 }
  0xc5   :  { %v2983_v4 = vpop.permute.xlu1 %2982  ;;  %v2564_v8 = vpack.c.bf16 %v765_v15, %v761_v12  ;;  %v2980_v42 = vunpack.i.h.bf16 %v2978_v17  ;;  %v2979_v28 = vunpack.i.l.bf16 %v2978_v17 }
  0xc6   :  { %v2985_v48 = vunpack.i.h.bf16 %v2983_v4  ;;  %v2984_v6 = vunpack.i.l.bf16 %v2983_v4 }
  0xc7   :  { %2565 = vmatprep.subr.bf16.mxu0 %v2564_v8  ;;  %v760_v51 = vsel %vm159_vm3, %v2979_v28, %v2969_v29  ;;  %v764_v61 = vsel %vm159_vm3, %v2980_v42, %v2974_v11 }
  0xc8   :  { %v2988_v2 = vpop.permute.xlu0 %2987  ;;  %v2566_v18 = vpack.c.bf16 %v764_v61, %v760_v51  ;;  %v200_v20 = vsel %vm196_vm4, %v2984_v6, %v2985_v48  ;;  %v199_v26 = vsel %vm196_vm4, %v2835_v31, %v2984_v6 }
  0xc9   :  { %v4179_v16 = vpop.permute.xlu1 %2992  ;;  %v2990_v24 = vunpack.i.h.bf16 %v2988_v2  ;;  %v2989_v25 = vunpack.i.l.bf16 %v2988_v2 }
  0xca   :  { %v2995_v30 = vunpack.i.h.bf16 %v4179_v16  ;;  %v2994_v21 = vunpack.i.l.bf16 %v4179_v16  ;;  %2567 = vmatpush1.bf16.msra.mxu0 %v2566_v18 }
  0xcb   :  { %v204_v23 = vsel %vm196_vm4, %v2989_v25, %v2990_v24  ;;  %v203_v27 = vsel %vm196_vm4, %v2840_v39, %v2989_v25 }
  0xcc   :  { %v4191_v36 = vpop.permute.xlu0 %2997  ;;  %v2532_v46 = vpack.c.bf16 %v204_v23, %v200_v20  ;;  %v2534_v50 = vpack.c.bf16 %v203_v27, %v199_v26  ;;  %v797_v29 = vsel %vm196_vm4, %v2994_v21, %v2995_v30 }
  0xcd   :  { %v3003_v37 = vpop.permute.xlu1 %3002  ;;  %v3000_v11 = vunpack.i.h.bf16 %v4191_v36  ;;  %v2999_v12 = vunpack.i.l.bf16 %v4191_v36 }
  0xce   :  { %v3005_v22 = vunpack.i.h.bf16 %v3003_v37  ;;  %v3004_v15 = vunpack.i.l.bf16 %v3003_v37  ;;  %2533 = vmatprep.subr.bf16.mxu1 %v2532_v46 }
  0xcf   :  { %2535 = vmatpush1.bf16.msra.mxu1 %v2534_v50  ;;  %v801_v39 = vsel %vm196_vm4, %v2999_v12, %v3000_v11 }
  0xd0   :  { %v800_v31 = vsel %vm196_vm4, %v3005_v22, %v2999_v12  ;;  %v796_v35 = vsel %vm196_vm4, %v3004_v15, %v2994_v21  ;;  %v3008_v17 = vpop.permute.xlu0 %3007  ;;  %v2568_v8 = vpack.c.bf16 %v801_v39, %v797_v29 }
  0xd1   :  { %v3013_v4 = vpop.permute.xlu1 %3012  ;;  %v2570_v42 = vpack.c.bf16 %v800_v31, %v796_v35  ;;  %v3010_v28 = vunpack.i.h.bf16 %v3008_v17  ;;  %v3009_v48 = vunpack.i.l.bf16 %v3008_v17 }
  0xd2   :  { %v3015_v6 = vunpack.i.h.bf16 %v3013_v4  ;;  %v3014_v51 = vunpack.i.l.bf16 %v3013_v4  ;;  %2569 = vmatprep.subr.bf16.mxu0 %v2568_v8 }
  0xd3   :  { %2571 = vmatpush1.bf16.msra.mxu0 %v2570_v42  ;;  %v237_v61 = vsel %vm233_vm5, %v3009_v48, %v3010_v28  ;;  %v236_v18 = vsel %vm233_vm5, %v2850_v56, %v3009_v48 }
  0xd4   :  { %v241_v2 = vsel %vm233_vm5, %v3014_v51, %v3015_v6  ;;  %v240_v20 = vsel %vm233_vm5, %v2855_v58, %v3014_v51  ;;  %v4211_v24 = vpop.permute.xlu0 %3017 }
  0xd5   :  { %v4213_v25 = vpop.permute.xlu1 %3022  ;;  %v2536_v21 = vpack.c.bf16 %v241_v2, %v237_v61  ;;  %v2538_v23 = vpack.c.bf16 %v240_v20, %v236_v18  ;;  %v3020_v26 = vunpack.i.h.bf16 %v4211_v24  ;;  %v3019_v27 = vunpack.i.l.bf16 %v4211_v24 }
  0xd6   :  { %v3025_v37 = vunpack.i.h.bf16 %v4213_v25  ;;  %v3024_v52 = vunpack.i.l.bf16 %v4213_v25 }
  0xd7   :  { %2537 = vmatprep.subr.bf16.mxu1 %v2536_v21  ;;  %v833_v53 = vsel %vm233_vm5, %v3019_v27, %v3020_v26 }
  0xd8   :  { %2539 = vmatpush1.bf16.msra.mxu1 %v2538_v23  ;;  %v837_v56 = vsel %vm233_vm5, %v3024_v52, %v3025_v37  ;;  %v3028_v58 = vpop.permute.xlu0 %3027 }
  0xd9   :  { %v3033_v46 = vpop.permute.xlu1 %3032  ;;  %v2572_v50 = vpack.c.bf16 %v837_v56, %v833_v53  ;;  %v3030_v29 = vunpack.i.h.bf16 %v3028_v58  ;;  %v3029_v12 = vunpack.i.l.bf16 %v3028_v58 }
  0xda   :  { %v3035_v22 = vunpack.i.h.bf16 %v3033_v46  ;;  %v3034_v15 = vunpack.i.l.bf16 %v3033_v46 }
  0xdb   :  { %2573 = vmatprep.subr.bf16.mxu0 %v2572_v50  ;;  %v832_v31 = vsel %vm233_vm5, %v3029_v12, %v3019_v27  ;;  %v836_v35 = vsel %vm233_vm5, %v3030_v29, %v3024_v52 }
  0xdc   :  { %v3038_v39 = vpop.permute.xlu0 %3037  ;;  %v2574_v4 = vpack.c.bf16 %v836_v35, %v832_v31  ;;  %v274_v8 = vsel %vm270_vm6, %v3034_v15, %v3035_v22  ;;  %v273_v61 = vsel %vm270_vm6, %v2865_v5, %v3034_v15 }
  0xdd   :  { %v4227_v17 = vpop.permute.xlu1 %3042  ;;  %v3040_v42 = vunpack.i.h.bf16 %v3038_v39  ;;  %v3039_v28 = vunpack.i.l.bf16 %v3038_v39 }
  0xde   :  { %v3045_v48 = vunpack.i.h.bf16 %v4227_v17  ;;  %v3044_v6 = vunpack.i.l.bf16 %v4227_v17  ;;  %2575 = vmatpush1.bf16.msra.mxu0 %v2574_v4 }
  0xdf   :  { %v278_v51 = vsel %vm270_vm6, %v3039_v28, %v3040_v42  ;;  %v277_v2 = vsel %vm270_vm6, %v2870_v19, %v3039_v28 }
  0xe0   :  { %v4239_v18 = vpop.permute.xlu0 %3047  ;;  %v2540_v21 = vpack.c.bf16 %v278_v51, %v274_v8  ;;  %v2542_v23 = vpack.c.bf16 %v277_v2, %v273_v61  ;;  %v869_v27 = vsel %vm270_vm6, %v3044_v6, %v3045_v48 }
  0xe1   :  { %v3053_v20 = vpop.permute.xlu1 %3052  ;;  %v3050_v52 = vunpack.i.h.bf16 %v4239_v18  ;;  %v3049_v53 = vunpack.i.l.bf16 %v4239_v18 }
  0xe2   :  { %v3055_v0 = vunpack.i.h.bf16 %v3053_v20  ;;  %v3054_v56 = vunpack.i.l.bf16 %v3053_v20  ;;  %2541 = vmatprep.subr.bf16.mxu1 %v2540_v21 }
  0xe3   :  { %2543 = vmatpush1.bf16.msra.mxu1 %v2542_v23  ;;  %v873_v19 = vsel %vm270_vm6, %v3049_v53, %v3050_v52 }
  0xe4   :  { %v872_v5 = vsel %vm270_vm6, %v3055_v0, %v3049_v53  ;;  %v868_v13 = vsel %vm270_vm6, %v3054_v56, %v3044_v6  ;;  %v3058_v58 = vpop.permute.xlu0 %3057  ;;  %v2576_v50 = vpack.c.bf16 %v873_v19, %v869_v27 }
  0xe5   :  { %v3063_v46 = vpop.permute.xlu1 %3062  ;;  %v2578_v29 = vpack.c.bf16 %v872_v5, %v868_v13  ;;  %v3060_v12 = vunpack.i.h.bf16 %v3058_v58  ;;  %v3059_v22 = vunpack.i.l.bf16 %v3058_v58 }
  0xe6   :  { %v3065_v15 = vunpack.i.h.bf16 %v3063_v46  ;;  %v3064_v31 = vunpack.i.l.bf16 %v3063_v46  ;;  %2577 = vmatprep.subr.bf16.mxu0 %v2576_v50 }
  0xe7   :  { %2579 = vmatpush1.bf16.msra.mxu0 %v2578_v29  ;;  %v311_v35 = vsel %vm307_vm7, %v3059_v22, %v3060_v12  ;;  %v310_v4 = vsel %vm307_vm7, %v2880_v38, %v3059_v22 }
  0xe8   :  { %v315_v39 = vsel %vm307_vm7, %v3064_v31, %v3065_v15  ;;  %v314_v8 = vsel %vm307_vm7, %v2885_v43, %v3064_v31  ;;  %v4259_v42 = vpop.permute.xlu0 %3067 }
  0xe9   :  { %v4261_v28 = vpop.permute.xlu1 %3072  ;;  %v2544_v6 = vpack.c.bf16 %v315_v39, %v311_v35  ;;  %v2546_v51 = vpack.c.bf16 %v314_v8, %v310_v4  ;;  %v3070_v61 = vunpack.i.h.bf16 %v4259_v42  ;;  %v3069_v2 = vunpack.i.l.bf16 %v4259_v42 }
  0xea   :  { %v3075_v20 = vunpack.i.h.bf16 %v4261_v28  ;;  %v3074_v33 = vunpack.i.l.bf16 %v4261_v28 }
  0xeb   :  { %2545 = vmatprep.subr.bf16.mxu1 %v2544_v6  ;;  %v905_v34 = vsel %vm307_vm7, %v3069_v2, %v3070_v61 }
  0xec   :  { %2547 = vmatpush1.bf16.msra.mxu1 %v2546_v51  ;;  %v909_v38 = vsel %vm307_vm7, %v3074_v33, %v3075_v20  ;;  %v3078_v43 = vpop.permute.xlu0 %3077  ;;  %v3674_v51 = vld [vmem:[%s5275_s0 + $0x1c] ss:$36 sps:$4 sm:$0xff]  }
  0xed   :  { %v3083_v21 = vpop.permute.xlu1 %3082  ;;  %v2580_v23 = vpack.c.bf16 %v909_v38, %v905_v34  ;;  %v3080_v27 = vunpack.i.h.bf16 %v3078_v43  ;;  %v3079_v53 = vunpack.i.l.bf16 %v3078_v43  ;;  %v3676_v38 = vld [vmem:[%s5275_s0 + $0x18] ss:$36 sps:$4 sm:$0xff]  }
  0xee   :  { %v3085_v0 = vunpack.i.h.bf16 %v3083_v21  ;;  %v3084_v56 = vunpack.i.l.bf16 %v3083_v21 }
  0xef   :  { %2581 = vmatprep.subr.bf16.mxu0 %v2580_v23  ;;  %v904_v5 = vsel %vm307_vm7, %v3079_v53, %v3069_v2  ;;  %v908_v13 = vsel %vm307_vm7, %v3080_v27, %v3074_v33 }
  0xf0   :  { %v3088_v19 = vpop.permute.xlu0 %3087  ;;  %v2582_v46 = vpack.c.bf16 %v908_v13, %v904_v5  ;;  %v348_v50 = vsel %vm5282_vm8, %v3084_v56, %v3085_v0  ;;  %v347_v35 = vsel %vm5282_vm8, %v2895_v60, %v3084_v56 }
  0xf1   :  { %v4275_v58 = vpop.permute.xlu1 %3092  ;;  %v3090_v29 = vunpack.i.h.bf16 %v3088_v19  ;;  %v3089_v12 = vunpack.i.l.bf16 %v3088_v19 }
  0xf2   :  { %v3095_v22 = vunpack.i.h.bf16 %v4275_v58  ;;  %v3094_v15 = vunpack.i.l.bf16 %v4275_v58  ;;  %2583 = vmatpush1.bf16.msra.mxu0 %v2582_v46 }
  0xf3   :  { %v352_v31 = vsel %vm5282_vm8, %v3089_v12, %v3090_v29  ;;  %v351_v39 = vsel %vm5282_vm8, %v2900_v14, %v3089_v12 }
  0xf4   :  { %v4287_v4 = vpop.permute.xlu0 %3097  ;;  %v2548_v8 = vpack.c.bf16 %v352_v31, %v348_v50  ;;  %v2550_v6 = vpack.c.bf16 %v351_v39, %v347_v35  ;;  %v941_v54 = vsel %vm5282_vm8, %v3094_v15, %v3095_v22 }
  0xf5   :  { %v3100_v2 = vunpack.i.h.bf16 %v4287_v4  ;;  %v3099_v33 = vunpack.i.l.bf16 %v4287_v4  ;;  %v3103_v34 = vpop.permute.xlu1 %3102 }
  0xf6   :  { %v3105_v60 = vunpack.i.h.bf16 %v3103_v34  ;;  %v3104_v3 = vunpack.i.l.bf16 %v3103_v34  ;;  %2549 = vmatprep.subr.bf16.mxu1 %v2548_v8 }
  0xf7   :  { %2551 = vmatpush1.bf16.msra.mxu1 %v2550_v6  ;;  %v945_v14 = vsel %vm5282_vm8, %v3099_v33, %v3100_v2 }
  0xf8   :  { %v944_v43 = vsel %vm5282_vm8, %v3105_v60, %v3099_v33  ;;  %v940_v21 = vsel %vm5282_vm8, %v3104_v3, %v3094_v15  ;;  %v3108_v23 = vpop.permute.xlu0 %3107  ;;  %v2584_v27 = vpack.c.bf16 %v945_v14, %v941_v54  ;;  %2589 = vmatprep.subr.bf16.mxu1 %v3674_v51 }
  0xf9   :  { %v3110_v53 = vunpack.i.h.bf16 %v3108_v23  ;;  %v3109_v0 = vunpack.i.l.bf16 %v3108_v23  ;;  %v3113_v56 = vpop.permute.xlu1 %3112  ;;  %v2586_v5 = vpack.c.bf16 %v944_v43, %v940_v21 }
  0xfa   :  { %v3115_v13 = vunpack.i.h.bf16 %v3113_v56  ;;  %v3114_v19 = vunpack.i.l.bf16 %v3113_v56  ;;  %520 = vmatmul.mubr.f32.vlgmr.msra.gmra.mrb[0].mxu1 %v4091_v62  ;;  %2585 = vmatprep.subr.bf16.mxu0 %v2584_v27 }
  0xfb   :  { %v690_v46 = vsel %vm85_vm1, %v2920_v40, %v3109_v0  ;;  %2587 = vmatpush1.bf16.msra.mxu0 %v2586_v5  ;;  %2591 = vmatpush1.bf16.msra.mxu1 %v3676_v38  ;;  %v691_v50 = vsel %vm85_vm1, %v3109_v0, %v3110_v53 }
  0xfc   :  { %v694_v29 = vsel %vm85_vm1, %v2925_v47, %v3114_v19  ;;  %v3118_v12 = vpop.permute.xlu0 %3117  ;;  %2443 = vmatprep.mubr.msk.f32.mxu1 %vm371_vm0, %v4107_v9  ;;  %v695_v15 = vsel %vm85_vm1, %v3114_v19, %v3115_v13 }
  0xfd   :  { %v3120_v31 = vunpack.i.h.bf16 %v3118_v12  ;;  %v3119_v35 = vunpack.i.l.bf16 %v3118_v12  ;;  %v3123_v39 = vpop.permute.xlu1 %3122  ;;  %v2592_v63 = vpack.c.bf16 %v695_v15, %v691_v50  ;;  %v2594_v8 = vpack.c.bf16 %v694_v29, %v690_v46 }
  0xfe   :  { %v3125_v40 = vunpack.i.h.bf16 %v3123_v39  ;;  %v3124_v6 = vunpack.i.l.bf16 %v3123_v39  ;;  %526 = vmatmul.mubr.f32.gmra.mrb[2].mxu1 %v4122_v7  ;;  %1021 = vmatmul.mubr.f32.vlgmr.msra.gmra.mrb[4].mxu0 %v4091_v62 }
  0xff   :  { %v726_v1 = vsel %vm122_vm2, %v2945_v45, %v3119_v35  ;;  %2593 = vmatprep.subr.bf16.mxu1 %v2592_v63  ;;  %2445 = vmatprep.mubr.msk.f32.mxu0 %vm371_vm0, %v4107_v9  ;;  %v727_v47 = vsel %vm122_vm2, %v3119_v35, %v3120_v31 }
 0x100   :  { %v730_v51 = vsel %vm122_vm2, %v2950_v49, %v3124_v6  ;;  %2595 = vmatpush1.bf16.msra.mxu1 %v2594_v8  ;;  %v3128_v33 = vpop.permute.xlu0 %3127  ;;  %v731_v34 = vsel %vm122_vm2, %v3124_v6, %v3125_v40  ;;  %2446 = vmatprep.mubr.msk.f32.mxu1 %vm371_vm0, %v3677_v32 }
 0x101   :  { %v3130_v45 = vunpack.i.h.bf16 %v3128_v33  ;;  %v3129_v54 = vunpack.i.l.bf16 %v3128_v33  ;;  %v3133_v60 = vpop.permute.xlu1 %3132  ;;  %v2596_v3 = vpack.c.bf16 %v731_v34, %v727_v47  ;;  %v2598_v14 = vpack.c.bf16 %v730_v51, %v726_v1 }
 0x102   :  { %v3135_v38 = vunpack.i.h.bf16 %v3133_v60  ;;  %v3134_v43 = vunpack.i.l.bf16 %v3133_v60  ;;  %1027 = vmatmul.mubr.f32.gmra.mrb[6].mxu0 %v4122_v7 }
 0x103   :  { %v762_v57 = vsel %vm159_vm3, %v2970_v55, %v3129_v54  ;;  %2597 = vmatprep.subr.bf16.mxu1 %v2596_v3  ;;  %v763_v49 = vsel %vm159_vm3, %v3129_v54, %v3130_v45 }
 0x104   :  { %v766_v21 = vsel %vm159_vm3, %v2975_v59, %v3134_v43  ;;  %2599 = vmatpush1.bf16.msra.mxu1 %v2598_v14  ;;  %v3138_v23 = vpop.permute.xlu0 %3137  ;;  %v767_v27 = vsel %vm159_vm3, %v3134_v43, %v3135_v38 }
 0x105   :  { %v3140_v53 = vunpack.i.h.bf16 %v3138_v23  ;;  %v3139_v0 = vunpack.i.l.bf16 %v3138_v23  ;;  %v3143_v56 = vpop.permute.xlu1 %3142  ;;  %v2600_v5 = vpack.c.bf16 %v767_v27, %v763_v49  ;;  %v2602_v13 = vpack.c.bf16 %v766_v21, %v762_v57 }
 0x106   :  { %v3145_v19 = vunpack.i.h.bf16 %v3143_v56  ;;  %v3144_v41 = vunpack.i.l.bf16 %v3143_v56 }
 0x107   :  { %v798_v55 = vsel %vm196_vm4, %v2995_v30, %v3139_v0  ;;  %2601 = vmatprep.subr.bf16.mxu1 %v2600_v5  ;;  %v799_v44 = vsel %vm196_vm4, %v3139_v0, %v3140_v53 }
 0x108   :  { %v802_v59 = vsel %vm196_vm4, %v3000_v11, %v3144_v41  ;;  %2603 = vmatpush1.bf16.msra.mxu1 %v2602_v13  ;;  %v3148_v46 = vpop.permute.xlu0 %3147  ;;  %v803_v50 = vsel %vm196_vm4, %v3144_v41, %v3145_v19 }
 0x109   :  { %v3150_v29 = vunpack.i.h.bf16 %v3148_v46  ;;  %v3149_v12 = vunpack.i.l.bf16 %v3148_v46  ;;  %v3153_v15 = vpop.permute.xlu1 %3152  ;;  %v2604_v31 = vpack.c.bf16 %v803_v50, %v799_v44  ;;  %v2606_v35 = vpack.c.bf16 %v802_v59, %v798_v55 }
 0x10a   :  { %v3155_v39 = vunpack.i.h.bf16 %v3153_v15  ;;  %v3154_v16 = vunpack.i.l.bf16 %v3153_v15 }
 0x10b   :  { %v834_v30 = vsel %vm233_vm5, %v3020_v26, %v3149_v12  ;;  %2605 = vmatprep.subr.bf16.mxu1 %v2604_v31  ;;  %v835_v36 = vsel %vm233_vm5, %v3149_v12, %v3150_v29 }
 0x10c   :  { %v838_v11 = vsel %vm233_vm5, %v3025_v37, %v3154_v16  ;;  %2607 = vmatpush1.bf16.msra.mxu1 %v2606_v35  ;;  %v3158_v63 = vpop.permute.xlu0 %3157  ;;  %v839_v8 = vsel %vm233_vm5, %v3154_v16, %v3155_v39 }
 0x10d   :  { %v3160_v40 = vunpack.i.h.bf16 %v3158_v63  ;;  %v3159_v6 = vunpack.i.l.bf16 %v3158_v63  ;;  %v3163_v1 = vpop.permute.xlu1 %3162  ;;  %v2608_v47 = vpack.c.bf16 %v839_v8, %v835_v36  ;;  %v2610_v51 = vpack.c.bf16 %v838_v11, %v834_v30 }
 0x10e   :  { %v3165_v33 = vunpack.i.h.bf16 %v3163_v1  ;;  %v3164_v24 = vunpack.i.l.bf16 %v3163_v1 }
 0x10f   :  { %v870_v26 = vsel %vm270_vm6, %v3045_v48, %v3159_v6  ;;  %2609 = vmatprep.subr.bf16.mxu1 %v2608_v47  ;;  %v871_v25 = vsel %vm270_vm6, %v3159_v6, %v3160_v40 }
 0x110   :  { %v874_v37 = vsel %vm270_vm6, %v3050_v52, %v3164_v24  ;;  %2611 = vmatpush1.bf16.msra.mxu1 %v2610_v51  ;;  %v3168_v34 = vpop.permute.xlu0 %3167  ;;  %v875_v32 = vsel %vm270_vm6, %v3164_v24, %v3165_v33 }
 0x111   :  { %v3170_v45 = vunpack.i.h.bf16 %v3168_v34  ;;  %v3169_v54 = vunpack.i.l.bf16 %v3168_v34  ;;  %v3173_v60 = vpop.permute.xlu1 %3172  ;;  %v2612_v3 = vpack.c.bf16 %v875_v32, %v871_v25  ;;  %v2614_v14 = vpack.c.bf16 %v874_v37, %v870_v26 }
 0x112   :  { %v3175_v38 = vunpack.i.h.bf16 %v3173_v60  ;;  %v3174_v17 = vunpack.i.l.bf16 %v3173_v60  ;;  %v540_v60 = vld [vmem:[%s5278_s1] sm:$0x1f] }
 0x113   :  { %v906_v48 = vsel %vm307_vm7, %v3070_v61, %v3169_v54  ;;  %2613 = vmatprep.subr.bf16.mxu1 %v2612_v3  ;;  %v907_v18 = vsel %vm307_vm7, %v3169_v54, %v3170_v45  ;;  %v543_v54 = vlaneseq  ;;  %vm541_vm9 = vcmp.gt.f32.partialorder %v540_v60, 0.5 }
 0x114   :  { %v910_v52 = vsel %vm307_vm7, %v3075_v20, %v3174_v17  ;;  %2615 = vmatpush1.bf16.msra.mxu1 %v2614_v14  ;;  %v3178_v43 = vpop.permute.xlu0 %3177  ;;  %v911_v57 = vsel %vm307_vm7, %v3174_v17, %v3175_v38 }
 0x115   :  { %v3180_v49 = vunpack.i.h.bf16 %v3178_v43  ;;  %v3179_v21 = vunpack.i.l.bf16 %v3178_v43  ;;  %v3183_v23 = vpop.permute.xlu1 %3182  ;;  %v2616_v27 = vpack.c.bf16 %v911_v57, %v907_v18  ;;  %v2618_v53 = vpack.c.bf16 %v910_v52, %v906_v48 }
 0x116   :  { %v3185_v0 = vunpack.i.h.bf16 %v3183_v23  ;;  %v3184_v42 = vunpack.i.l.bf16 %v3183_v23  ;;  %v4400_v14 = vshrl.u32 %v543_v54, 7 }
 0x117   :  { %v942_v61 = vsel %vm5282_vm8, %v3095_v22, %v3179_v21  ;;  %2617 = vmatprep.subr.bf16.mxu1 %v2616_v27  ;;  %v943_v28 = vsel %vm5282_vm8, %v3179_v21, %v3180_v49 }
 0x118   :  { %v946_v20 = vsel %vm5282_vm8, %v3100_v2, %v3184_v42  ;;  %2619 = vmatpush1.bf16.msra.mxu1 %v2618_v53  ;;  %v947_v56 = vsel %vm5282_vm8, %v3184_v42, %v3185_v0  ;;  %v4404_v49 = vsub.s32 0, %v4400_v14  ;;  %v4407_v53 = vsel %vm541_vm9, 1, %v3705_v10 }
 0x119   :  { %v2620_v5 = vpack.c.bf16 %v947_v56, %v943_v28  ;;  %v2622_v13 = vpack.c.bf16 %v946_v20, %v942_v61  ;;  %v4410_v0 = vsub.s32 1, %v4400_v14 }
 0x11b   :  { %2621 = vmatprep.subr.bf16.mxu1 %v2620_v5  ;;  %v550_v10 = vrot.slane %v4407_v53, %v4410_v0 }
 0x11c   :  { %2623 = vmatpush1.bf16.msra.mxu1 %v2622_v13  ;;  %v546_v13 = vrot.slane %v4407_v53, %v4404_v49 }
 0x11d   :  { %vm4421_vm12 = vcmp.eq.s32.totalorder %v550_v10, 1 }
 0x11e   :  { %vm563_vm11 = vcmp.eq.s32.totalorder %v546_v13, 1  ;;  %vm3679_vm14 = vmpackc.low %vm4421_vm12, %vm4421_vm12 }
 0x11f   :  { %1098 = vmatmul.mubr.f32.vlgmr.msra.gmra.mrb[4].mxu1 %v4091_v62 }
 0x120   :  { %2447 = vmatprep.mubr.msk.f32.mxu1 %vm371_vm0, %v4107_v9 }
 0x123   :  { %1104 = vmatmul.mubr.f32.gmra.mrb[6].mxu1 %v4122_v7 }
 0x125   :  { %v364_v58 = vpop.permute.xlu0 %363 }
 0x126   :  { %v4385_v2 = vpop.permute.xlu1 %368 }
 0x181   :  { %v444_v22 = vpop.f32.mrb[0].mxu0 }
 0x182   :  { %v445_v19 = vadd.f32 %v444_v22, %v364_v58  ;;  %v446_v4 = vpop.f32.mrb[1].mxu0 }
 0x183   :  { %v447_v41 = vadd.f32 %v446_v4, %v364_v58 }
 0x184   :  { %v532_v55 = vmax.f32 %v445_v19, 0.0 }
 0x185   :  { %v533_v44 = vmax.f32 %v447_v41, 0.0  ;;  %v450_v59 = vpop.f32.mrb[2].mxu0 }
 0x186   :  { %v451_v46 = vadd.f32 %v450_v59, %v4385_v2  ;;  %v452_v50 = vpop.f32.mrb[3].mxu0 }
 0x187   :  { %v3188_v29 = vpack.i.bf16 %v533_v44, %v532_v55  ;;  %v453_v62 = vadd.f32 %v452_v50, %v4385_v2 }
 0x188   :  { %v536_v12 = vmax.f32 %v451_v46, 0.0 }
 0x189   :  { %v537_v9 = vmax.f32 %v453_v62, 0.0  ;;  %3189 = vrot.lane.b32.xlu1 %v3188_v29, %s3706_s2 }
 0x18b   :  { %v3198_v7 = vpack.i.bf16 %v537_v9, %v536_v12 }
 0x18d   :  { %3199 = vrot.lane.b32.xlu1 %v3198_v7, %s3706_s2 }
 0x1cd   :  { %v521_v15 = vpop.f32.mrb[0].mxu1 }
 0x1ce   :  { %v522_v31 = vadd.f32 %v521_v15, %v364_v58  ;;  %v523_v35 = vpop.f32.mrb[1].mxu1 }
 0x1cf   :  { %v524_v39 = vadd.f32 %v523_v35, %v364_v58 }
 0x1d0   :  { %v534_v16 = vmax.f32 %v522_v31, 0.0 }
 0x1d1   :  { %v535_v30 = vmax.f32 %v524_v39, 0.0  ;;  %v527_v36 = vpop.f32.mrb[2].mxu1  ;;  %v1022_v11 = vpop.f32.mrb[4].mxu0 }
 0x1d2   :  { %v528_v63 = vadd.f32 %v527_v36, %v4385_v2  ;;  %v529_v8 = vpop.f32.mrb[3].mxu1  ;;  %v1024_v40 = vpop.f32.mrb[5].mxu0  ;;  %v1023_v51 = vadd.f32 %v1022_v11, %v364_v58  ;;  %v4455_v36 = vsub.s32 2, %v4400_v14  ;;  %v4458_v11 = vsub.s32 4, %v4400_v14 }
 0x1d3   :  { %v3193_v6 = vpack.i.bf16 %v535_v30, %v534_v16  ;;  %v530_v1 = vadd.f32 %v529_v8, %v4385_v2  ;;  %v1025_v3 = vadd.f32 %v1024_v40, %v364_v58  ;;  %v1118_v30 = vld [vmem:[%s5278_s1 + $0x4] sm:$0x1f] }
 0x1d4   :  { %v538_v47 = vmax.f32 %v528_v63, 0.0  ;;  %v1110_v34 = vmax.f32 %v1023_v51, 0.0  ;;  %v4461_v63 = vsub.s32 3, %v4400_v14  ;;  %vm1119_vm15 = vcmp.gt.f32.partialorder %v1118_v30, 0.5 }
 0x1d5   :  { %v539_v33 = vmax.f32 %v530_v1, 0.0  ;;  %3194 = vrot.lane.b32.xlu0 %v3193_v6, %s3706_s2  ;;  %v1028_v24 = vpop.f32.mrb[6].mxu0  ;;  %v1111_v43 = vmax.f32 %v1025_v3, 0.0  ;;  %v554_v8 = vrot.slane %v4407_v53, %v4455_v36  ;;  %v562_v40 = vrot.slane %v4407_v53, %v4458_v11  ;;  %v4467_v6 = vld [vmem:[#allocation2 + $0x20] sm:$0xff] }
 0x1d6   :  { %v1029_v26 = vadd.f32 %v1028_v24, %v4385_v2  ;;  %v1030_v25 = vpop.f32.mrb[7].mxu0  ;;  %v4470_v1 = vsel %vm1119_vm15, 1, %v4467_v6  ;;  %1206 = vst [vmem:[%s5281_s6] sm:$0xff] %v4467_v6  ;;  %1208 = vst [vmem:[%s5281_s6 + $0x10] sm:$0xff] %v4467_v6 }
 0x1d7   :  { %v3203_v37 = vpack.i.bf16 %v539_v33, %v538_v47  ;;  %v1031_v38 = vadd.f32 %v1030_v25, %v4385_v2  ;;  %v558_v47 = vrot.slane %v4407_v53, %v4461_v63  ;;  %vm4476_vm9 = vcmp.eq.s32.totalorder %v554_v8, 1  ;;  %v4596_v25 = vld [vmem:[%s5279_s4 + $0x8] sm:$0xff]  ;;  %1210 = vst [vmem:[%s5281_s6 + $0x20] sm:$0xf] %v4467_v6  ;;  %1211 = vst [vmem:[%s5281_s6 + $0x24] sm:$0xff] %v4467_v6 }
 0x1d8   :  { %v1114_v32 = vmax.f32 %v1029_v26, 0.0  ;;  %v1124_v26 = vrot.slane %v4470_v1, %v4404_v49  ;;  %vm3685_vm8 = vmpackc.low %vm4476_vm9, %vm4476_vm9  ;;  %2448 = vmatprep.mubr.msk.f32.mxu0 %vm371_vm0, %v4596_v25  ;;  %2450 = vmatprep.mubr.msk.f32.mxu1 %vm371_vm0, %v4596_v25  ;;  %1213 = vst [vmem:[%s5281_s6 + $0x34] sm:$0xff] %v4467_v6 }
 0x1d9   :  { %3204 = vrot.lane.b32.xlu0 %v3203_v37, %s3706_s2  ;;  %v1115_v21 = vmax.f32 %v1031_v38, 0.0  ;;  %1215 = vst [vmem:[%s5281_s6 + $0x44] sm:$0xf] %v4467_v6 }
 0x1da   :  { %v3213_v45 = vpack.i.bf16 %v1114_v32, %v1110_v34  ;;  %vm1141_vm15 = vcmp.eq.s32.totalorder %v1124_v26, 1 }
 0x1dc   :  { %3214 = vrot.lane.b32.xlu1 %v3213_v45, %s3706_s2 }
 0x1f2   :  { %v1099_v17 = vpop.f32.mrb[4].mxu1 }
 0x1f3   :  { %v1100_v48 = vadd.f32 %v1099_v17, %v364_v58  ;;  %v1101_v18 = vpop.f32.mrb[5].mxu1 }
 0x1f4   :  { %v1102_v52 = vadd.f32 %v1101_v18, %v364_v58 }
 0x1f5   :  { %v1112_v57 = vmax.f32 %v1100_v48, 0.0 }
 0x1f6   :  { %v1113_v23 = vmax.f32 %v1102_v52, 0.0  ;;  %v1105_v27 = vpop.f32.mrb[6].mxu1 }
 0x1f7   :  { %v3208_v42 = vpack.i.bf16 %v1112_v57, %v1111_v43  ;;  %v1106_v61 = vadd.f32 %v1105_v27, %v4385_v2  ;;  %v1107_v28 = vpop.f32.mrb[7].mxu1 }
 0x1f8   :  { %v3218_v20 = vpack.i.bf16 %v1115_v21, %v1113_v23  ;;  %v1108_v56 = vadd.f32 %v1107_v28, %v4385_v2 }
 0x1f9   :  { %v1116_v5 = vmax.f32 %v1106_v61, 0.0  ;;  %3209 = vrot.lane.b32.xlu0 %v3208_v42, %s3706_s2 }
 0x1fa   :  { %v1117_v58 = vmax.f32 %v1108_v56, 0.0  ;;  %3219 = vrot.lane.b32.xlu1 %v3218_v20, %s3706_s2 }
 0x1fb   :  { %v3190_v22 = vpop.permute.xlu1 %3189 }
 0x1fc   :  { %v3223_v19 = vpack.i.bf16 %v1117_v58, %v1116_v5  ;;  %v3192_v4 = vunpack.i.h.bf16 %v3190_v22  ;;  %v3191_v41 = vunpack.i.l.bf16 %v3190_v22 }
 0x1fe   :  { %3224 = vrot.lane.b32.xlu0 %v3223_v19, %s3706_s2  ;;  %v4426_v55 = vsel %vm592_vm10, %v3191_v41, %v3192_v4  ;;  %v609_v59 = vsel %vm563_vm11, %v3191_v41, 0.0  ;;  %v1128_v19 = vrot.slane %v4470_v1, %v4410_v0 }
 0x1ff   :  { %v3200_v44 = vpop.permute.xlu1 %3199  ;;  %v610_v29 = vsel %vm4421_vm12, %v4426_v55, 0.0 }
 0x200   :  { %v3202_v46 = vunpack.i.h.bf16 %v3200_v44  ;;  %v3201_v50 = vunpack.i.l.bf16 %v3200_v44 }
 0x202   :  { %v4432_v62 = vsel %vm592_vm10, %v3201_v50, %v3202_v46  ;;  %v614_v12 = vsel %vm563_vm11, %v3201_v50, 0.0  ;;  %vm567_vm11 = vcmp.eq.s32.totalorder %v562_v40, 1 }
 0x203   :  { %v615_v9 = vsel %vm4421_vm12, %v4432_v62, 0.0  ;;  %v619_v7 = vpack.c.bf16 %v614_v12, %v609_v59  ;;  %v3680_v15 = vpack.c.bf16 %v4432_v62, %v4426_v55  ;;  %v1136_v59 = vrot.slane %v4470_v1, %v4461_v63 }
 0x205   :  { %625 = vst.msk [vmem:[#allocation2] sm:$0xff] %vm624_vm13, %v619_v7  ;;  %3681 = vmatprep.subr.msk.bf16.mxu0 %vm3679_vm14, %v3680_v15  ;;  %vm4481_vm14 = vcmp.eq.s32.totalorder %v558_v47, 1 }
 0x20c   :  { %v1222_v31 = vld [vmem:[#allocation2] sm:$0xff] }
 0x20d   :  { %v1226_v35 = vunpack.c.l.bf16 %v1222_v31  ;;  %v1230_v39 = vunpack.c.h.bf16 %v1222_v31  ;;  %2627 = vmatpush1.bf16.msra.mxu0 %v1222_v31 }
 0x20f   :  { %v3233_v16 = vpack.i.bf16 %v1230_v39, %v1226_v35 }
 0x211   :  { %3234 = vrot.lane.b32.xlu0 %v3233_v16, %s3698_s30  ;;  %3229 = vrot.lane.b32.xlu1 %v3233_v16, %s3697_s29 }
 0x215   :  { %3244 = vrot.lane.b32.xlu0 %v3233_v16, %s3700_s10  ;;  %3239 = vrot.lane.b32.xlu1 %v3233_v16, %s3699_s9 }
 0x219   :  { %3254 = vrot.lane.b32.xlu0 %v3233_v16, %s3702_s12  ;;  %3249 = vrot.lane.b32.xlu1 %v3233_v16, %s3701_s11 }
 0x21d   :  { %3264 = vrot.lane.b32.xlu0 %v3233_v16, %s3704_s14  ;;  %3259 = vrot.lane.b32.xlu1 %v3233_v16, %s3703_s13 }
 0x247   :  { %v3195_v51 = vpop.permute.xlu0 %3194 }
 0x248   :  { %v3197_v33 = vunpack.i.h.bf16 %v3195_v51  ;;  %v3196_v24 = vunpack.i.l.bf16 %v3195_v51 }
 0x24a   :  { %v594_v37 = vsel %vm592_vm10, %v3192_v4, %v3196_v24  ;;  %v4486_v32 = vsel %vm592_vm10, %v3196_v24, %v3197_v33  ;;  %v613_v3 = vsel %vm567_vm11, %v3197_v33, 0.0  ;;  %v1132_v4 = vrot.slane %v4470_v1, %v4455_v36 }
 0x24b   :  { %v3205_v45 = vpop.permute.xlu0 %3204  ;;  %v611_v14 = vsel %vm4476_vm9, %v594_v37, 0.0  ;;  %v612_v38 = vsel %vm4481_vm14, %v4486_v32, 0.0 }
 0x24c   :  { %v3207_v54 = vunpack.i.h.bf16 %v3205_v45  ;;  %v3206_v60 = vunpack.i.l.bf16 %v3205_v45  ;;  %v3278_v56 = vpack.i.bf16 %v611_v14, %v610_v29  ;;  %vm4555_vm12 = vcmp.eq.s32.totalorder %v1132_v4, 1 }
 0x24e   :  { %v618_v17 = vsel %vm567_vm11, %v3207_v54, 0.0  ;;  %v597_v48 = vsel %vm592_vm10, %v3202_v46, %v3206_v60  ;;  %v4495_v18 = vsel %vm592_vm10, %v3206_v60, %v3207_v54  ;;  %v3215_v52 = vpop.permute.xlu1 %3214  ;;  %vm3682_vm11 = vmpackc.low %vm4481_vm14, %vm4481_vm14  ;;  %3279 = vrot.lane.b32.xlu0 %v3278_v56, %s3698_s30  ;;  %3269 = vrot.lane.b32.xlu1 %v3278_v56, %s3697_s29  ;;  %v1140_v46 = vrot.slane %v4470_v1, %v4458_v11 }
 0x24f   :  { %v616_v43 = vsel %vm4476_vm9, %v597_v48, 0.0  ;;  %v617_v57 = vsel %vm4481_vm14, %v4495_v18, 0.0  ;;  %v623_v21 = vpack.c.bf16 %v618_v17, %v613_v3  ;;  %v3217_v23 = vunpack.i.h.bf16 %v3215_v52 }
 0x250   :  { %v3216_v27 = vunpack.i.l.bf16 %v3215_v52  ;;  %v3683_v61 = vpack.c.bf16 %v4495_v18, %v4486_v32  ;;  %v3686_v20 = vpack.c.bf16 %v597_v48, %v594_v37  ;;  %v3283_v5 = vpack.i.bf16 %v616_v43, %v615_v9 }
 0x251   :  { %629 = vst.msk [vmem:[#allocation2 + $0x20] sm:$0xff] %vm592_vm10, %v623_v21  ;;  %v1191_v53 = vsel %vm1141_vm15, %v3217_v23, 0.0  ;;  %vm1145_vm9 = vcmp.eq.s32.totalorder %v1140_v46, 1  ;;  %vm5304_vm14 = vcmask 736256  }
 0x252   :  { %v1186_v42 = vsel %vm1141_vm15, %v3216_v27, 0.0  ;;  %3684 = vmatprep.subr.msk.bf16.mxu1 %vm3682_vm11, %v3683_v61  ;;  %3284 = vrot.lane.b32.xlu0 %v3283_v5, %s3698_s30  ;;  %vm5305_vm15 = vmmov %vm5304_vm14 }
 0x253   :  { %v1196_v28 = vpack.c.bf16 %v1191_v53, %v1186_v42  ;;  %3687 = vmatpush1.bf16.msk.msra.mxu1 %vm3685_vm8, %v3686_v20  ;;  %3274 = vrot.lane.b32.xlu1 %v3283_v5, %s3697_s29  ;;  %vm4542_vm8 = vcmp.eq.s32.totalorder %v1128_v19, 1  ;;  %vm5306_vm11 = vmmov %vm5304_vm14 }
 0x255   :  { %1201 = vst.msk [vmem:[#allocation2 + $0x20] sm:$0xff] %vm624_vm13, %v1196_v28  ;;  %vm4568_vm13 = vcmp.eq.s32.totalorder %v1136_v59, 1 }
 0x256   :  { %3299 = vrot.lane.b32.xlu0 %v3278_v56, %s3700_s10 }
 0x257   :  { %3289 = vrot.lane.b32.xlu1 %v3278_v56, %s3699_s9 }
 0x25a   :  { %3304 = vrot.lane.b32.xlu0 %v3283_v5, %s3700_s10 }
 0x25b   :  { %3294 = vrot.lane.b32.xlu1 %v3283_v5, %s3699_s9 }
 0x25c   :  { %v4524_v13 = vld [vmem:[#allocation2 + $0x20] sm:$0xff] }
 0x25d   :  { %v1235_v58 = vunpack.c.l.bf16 %v4524_v13  ;;  %v1236_v10 = vunpack.c.h.bf16 %v4524_v13 }
 0x25e   :  { %3319 = vrot.lane.b32.xlu0 %v3278_v56, %s3702_s12 }
 0x25f   :  { %v4530_v22 = vpack.i.bf16 %v1236_v10, %v1235_v58  ;;  %3309 = vrot.lane.b32.xlu1 %v3278_v56, %s3701_s11  ;;  %v3348_v47 = vpack.i.bf16 %v1235_v58, %v612_v38  ;;  %v3353_v60 = vpack.i.bf16 %v1236_v10, %v617_v57 }
 0x262   :  { %3324 = vrot.lane.b32.xlu0 %v3283_v5, %s3702_s12 }
 0x263   :  { %3314 = vrot.lane.b32.xlu1 %v3283_v5, %s3701_s11 }
 0x266   :  { %3339 = vrot.lane.b32.xlu0 %v3278_v56, %s3704_s14 }
 0x267   :  { %3329 = vrot.lane.b32.xlu1 %v3278_v56, %s3703_s13 }
 0x26a   :  { %3344 = vrot.lane.b32.xlu0 %v3283_v5, %s3704_s14 }
 0x26b   :  { %v3210_v2 = vpop.permute.xlu0 %3209  ;;  %3334 = vrot.lane.b32.xlu1 %v3283_v5, %s3703_s13 }
 0x26c   :  { %v3212_v55 = vunpack.i.h.bf16 %v3210_v2  ;;  %v3211_v44 = vunpack.i.l.bf16 %v3210_v2  ;;  %v3220_v50 = vpop.permute.xlu1 %3219 }
 0x26d   :  { %v3222_v29 = vunpack.i.h.bf16 %v3220_v50  ;;  %v3221_v62 = vunpack.i.l.bf16 %v3220_v50 }
 0x26e   :  { %v4551_v12 = vsel %vm592_vm10, %v3216_v27, %v3211_v44  ;;  %v4560_v7 = vsel %vm592_vm10, %v3211_v44, %v3212_v55  ;;  %3349 = vrot.lane.b32.xlu0 %v3348_v47, %s3697_s29 }
 0x26f   :  { %v1187_v15 = vsel %vm4542_vm8, %v4551_v12, 0.0  ;;  %v4566_v31 = vsel %vm592_vm10, %v3217_v23, %v3222_v29  ;;  %v4576_v30 = vsel %vm592_vm10, %v3212_v55, %v3221_v62  ;;  %v1188_v1 = vsel %vm4555_vm12, %v4560_v7, 0.0  ;;  %3359 = vrot.lane.b32.xlu1 %v3348_v47, %s3698_s30 }
 0x270   :  { %v1192_v39 = vsel %vm4542_vm8, %v4566_v31, 0.0  ;;  %v3225_v16 = vpop.permute.xlu0 %3224  ;;  %v1190_v51 = vsel %vm1145_vm9, %v3221_v62, 0.0  ;;  %v1189_v37 = vsel %vm4568_vm13, %v4576_v30, 0.0  ;;  %v4652_v48 = vpack.i.bf16 %v1188_v1, %v1187_v15 }
 0x271   :  { %v3227_v8 = vunpack.i.h.bf16 %v3225_v16  ;;  %v3226_v40 = vunpack.i.l.bf16 %v3225_v16 }
 0x272   :  { %3354 = vrot.lane.b32.xlu0 %v3353_v60, %s3697_s29 }
 0x273   :  { %v1195_v33 = vsel %vm1145_vm9, %v3227_v8, 0.0  ;;  %v4588_v24 = vsel %vm592_vm10, %v3222_v29, %v3226_v40  ;;  %v4591_v26 = vsel %vm592_vm10, %v3226_v40, %v3227_v8  ;;  %3364 = vrot.lane.b32.xlu1 %v3353_v60, %s3698_s30  ;;  %vm5307_vm9 = vmmov %vm5306_vm11 }
 0x274   :  { %v1193_v32 = vsel %vm4555_vm12, %v4588_v24, 0.0  ;;  %v1194_v45 = vsel %vm4568_vm13, %v4591_v26, 0.0  ;;  %v1200_v54 = vpack.c.bf16 %v1195_v33, %v1190_v51 }
 0x275   :  { %v4658_v18 = vpack.i.bf16 %v1193_v32, %v1192_v39 }
 0x276   :  { %1205 = vst.msk [vmem:[#allocation2 + $0x40] sm:$0xff] %vm592_vm10, %v1200_v54  ;;  %3369 = vrot.lane.b32.xlu0 %v3348_v47, %s3699_s9 }
 0x277   :  { %3379 = vrot.lane.b32.xlu1 %v3348_v47, %s3700_s10 }
 0x27a   :  { %3374 = vrot.lane.b32.xlu0 %v3353_v60, %s3699_s9 }
 0x27b   :  { %3384 = vrot.lane.b32.xlu1 %v3353_v60, %s3700_s10 }
 0x27d   :  { %v1849_v34 = vld [vmem:[#allocation2 + $0x40] sm:$0xff] }
 0x27e   :  { %3389 = vrot.lane.b32.xlu0 %v3348_v47, %s3701_s11  ;;  %v1854_v3 = vunpack.c.l.bf16 %v1849_v34  ;;  %v1859_v38 = vunpack.c.h.bf16 %v1849_v34 }
 0x27f   :  { %3399 = vrot.lane.b32.xlu1 %v3348_v47, %s3702_s12 }
 0x280   :  { %v4644_v14 = vpack.i.bf16 %v1854_v3, %v1189_v37  ;;  %v4650_v17 = vpack.i.bf16 %v1859_v38, %v1194_v45 }
 0x282   :  { %3394 = vrot.lane.b32.xlu0 %v3353_v60, %s3701_s11 }
 0x283   :  { %3404 = vrot.lane.b32.xlu1 %v3353_v60, %s3702_s12  ;;  %v3235_v52 = vpop.permute.xlu0 %3234  ;;  %v3230_v43 = vpop.permute.xlu1 %3229 }
 0x284   :  { %v3232_v5 = vunpack.i.h.bf16 %v3230_v43  ;;  %v3231_v58 = vunpack.i.l.bf16 %v3230_v43  ;;  %v3236_v51 = vunpack.i.l.bf16 %v3235_v52 }
 0x286   :  { %3409 = vrot.lane.b32.xlu0 %v3348_v47, %s3703_s13 }
 0x287   :  { %3419 = vrot.lane.b32.xlu1 %v3348_v47, %s3704_s14  ;;  %v4676_v57 = vpop.permute.xlu0 %3244  ;;  %v4678_v21 = vpop.permute.xlu1 %3239  ;;  %v3237_v47 = vunpack.i.h.bf16 %v3235_v52 }
 0x288   :  { %v3241_v34 = vunpack.i.l.bf16 %v4678_v21 }
 0x28a   :  { %3414 = vrot.lane.b32.xlu0 %v3353_v60, %s3703_s13 }
 0x28b   :  { %3424 = vrot.lane.b32.xlu1 %v3353_v60, %s3704_s14  ;;  %v4684_v23 = vpop.permute.xlu0 %3254  ;;  %v4686_v27 = vpop.permute.xlu1 %3249  ;;  %v3242_v60 = vunpack.i.h.bf16 %v4678_v21 }
 0x28e   :  { %3434 = vrot.lane.b32.xlu0 %v4530_v22, %s3698_s30 }
 0x28f   :  { %3429 = vrot.lane.b32.xlu1 %v4530_v22, %s3697_s29  ;;  %v4696_v53 = vpop.permute.xlu0 %3264  ;;  %v4698_v42 = vpop.permute.xlu1 %3259 }
 0x292   :  { %3444 = vrot.lane.b32.xlu0 %v4530_v22, %s3700_s10 }
 0x293   :  { %3439 = vrot.lane.b32.xlu1 %v4530_v22, %s3699_s9 }
 0x296   :  { %3454 = vrot.lane.b32.xlu0 %v4530_v22, %s3702_s12 }
 0x297   :  { %3449 = vrot.lane.b32.xlu1 %v4530_v22, %s3701_s11 }
 0x29a   :  { %3469 = vrot.lane.b32.xlu0 %v4644_v14, %s3697_s29 }
 0x29b   :  { %3459 = vrot.lane.b32.xlu1 %v4530_v22, %s3703_s13 }
 0x29e   :  { %3479 = vrot.lane.b32.xlu0 %v4650_v17, %s3697_s29 }
 0x29f   :  { %3464 = vrot.lane.b32.xlu1 %v4652_v48, %s3697_s29 }
 0x2a2   :  { %3484 = vrot.lane.b32.xlu0 %v4652_v48, %s3698_s30 }
 0x2a3   :  { %3474 = vrot.lane.b32.xlu1 %v4658_v18, %s3697_s29 }
 0x2a6   :  { %3494 = vrot.lane.b32.xlu0 %v4658_v18, %s3698_s30 }
 0x2a7   :  { %3489 = vrot.lane.b32.xlu1 %v4644_v14, %s3698_s30 }
 0x2aa   :  { %3509 = vrot.lane.b32.xlu0 %v4644_v14, %s3699_s9 }
 0x2ab   :  { %3499 = vrot.lane.b32.xlu1 %v4650_v17, %s3698_s30 }
 0x2ae   :  { %3519 = vrot.lane.b32.xlu0 %v4650_v17, %s3699_s9 }
 0x2af   :  { %3504 = vrot.lane.b32.xlu1 %v4652_v48, %s3699_s9 }
 0x2b2   :  { %3524 = vrot.lane.b32.xlu0 %v4652_v48, %s3700_s10 }
 0x2b3   :  { %3514 = vrot.lane.b32.xlu1 %v4658_v18, %s3699_s9 }
 0x2b6   :  { %3534 = vrot.lane.b32.xlu0 %v4658_v18, %s3700_s10 }
 0x2b7   :  { %3529 = vrot.lane.b32.xlu1 %v4644_v14, %s3700_s10 }
 0x2ba   :  { %3549 = vrot.lane.b32.xlu0 %v4644_v14, %s3701_s11 }
 0x2bb   :  { %3539 = vrot.lane.b32.xlu1 %v4650_v17, %s3700_s10 }
 0x2be   :  { %3559 = vrot.lane.b32.xlu0 %v4650_v17, %s3701_s11 }
 0x2bf   :  { %3544 = vrot.lane.b32.xlu1 %v4652_v48, %s3701_s11 }
 0x2c0   :  { %v4704_v61 = vpop.permute.xlu0 %3279  ;;  %v4706_v28 = vpop.permute.xlu1 %3269 }
 0x2c1   :  { %v3272_v20 = vunpack.i.h.bf16 %v4706_v28  ;;  %v3271_v56 = vunpack.i.l.bf16 %v4706_v28  ;;  %v3282_v59 = vunpack.i.h.bf16 %v4704_v61  ;;  %v3281_v46 = vunpack.i.l.bf16 %v4704_v61  ;;  %v4890_v28 = vld [vmem:[%s5279_s4] sm:$0xff] }
 0x2c2   :  { %3564 = vrot.lane.b32.xlu0 %v4652_v48, %s3702_s12 }
 0x2c3   :  { %3554 = vrot.lane.b32.xlu1 %v4658_v18, %s3701_s11  ;;  %v1267_v50 = vsel %vm85_vm1, %v3231_v58, %v3271_v56  ;;  %v1268_v62 = vsel %vm85_vm1, %v3271_v56, %v3272_v20  ;;  %v1304_v33 = vsel %vm122_vm2, %v3281_v46, %v3282_v59  ;;  %v1303_v3 = vsel %vm122_vm2, %v3236_v51, %v3281_v46 }
 0x2c4   :  { %v4714_v10 = vpop.permute.xlu0 %3284  ;;  %v3247_v51 = vunpack.i.h.bf16 %v4676_v57 }
 0x2c5   :  { %v4716_v19 = vpop.permute.xlu1 %3274  ;;  %v3287_v4 = vunpack.i.h.bf16 %v4714_v10  ;;  %v3286_v2 = vunpack.i.l.bf16 %v4714_v10 }
 0x2c6   :  { %v3277_v55 = vunpack.i.h.bf16 %v4716_v19  ;;  %v3276_v44 = vunpack.i.l.bf16 %v4716_v19  ;;  %3574 = vrot.lane.b32.xlu0 %v4658_v18, %s3702_s12 }
 0x2c7   :  { %3569 = vrot.lane.b32.xlu1 %v4644_v14, %s3702_s12  ;;  %v1308_v1 = vsel %vm122_vm2, %v3286_v2, %v3287_v4  ;;  %v1307_v37 = vsel %vm122_vm2, %v3237_v47, %v3286_v2 }
 0x2c8   :  { %v1271_v29 = vsel %vm85_vm1, %v3232_v5, %v3276_v44  ;;  %v1272_v15 = vsel %vm85_vm1, %v3276_v44, %v3277_v55  ;;  %v4736_v16 = vpop.permute.xlu0 %3299  ;;  %v2632_v54 = vpack.c.bf16 %v1308_v1, %v1304_v33  ;;  %v2634_v2 = vpack.c.bf16 %v1307_v37, %v1303_v3 }
 0x2c9   :  { %v2630_v39 = vpack.c.bf16 %v1271_v29, %v1267_v50  ;;  %v4738_v8 = vpop.permute.xlu1 %3289  ;;  %v2628_v40 = vpack.c.bf16 %v1272_v15, %v1268_v62  ;;  %v5290_v44 = vunpack.i.h.bf16 %v4736_v16  ;;  %v3301_v21 = vunpack.i.l.bf16 %v4736_v16 }
 0x2ca   :  { %3589 = vrot.lane.b32.xlu0 %v4644_v14, %s3703_s13  ;;  %v3292_v32 = vunpack.i.h.bf16 %v4738_v8  ;;  %v3291_v45 = vunpack.i.l.bf16 %v4738_v8  ;;  %v3246_v33 = vunpack.i.l.bf16 %v4676_v57  ;;  %v3252_v57 = vunpack.i.h.bf16 %v4686_v27 }
 0x2cb   :  { %3579 = vrot.lane.b32.xlu1 %v4650_v17, %s3702_s12  ;;  %2629 = vmatprep.subr.bf16.mxu0 %v2628_v40  ;;  %v1376_v37 = vsel %vm196_vm4, %v3301_v21, %v5290_v44  ;;  %v3251_v3 = vunpack.i.l.bf16 %v4686_v27 }
 0x2cc   :  { %2631 = vmatpush1.bf16.msra.mxu0 %v2630_v39  ;;  %v4756_v38 = vpop.permute.xlu0 %3304  ;;  %v1339_v46 = vsel %vm159_vm3, %v3241_v34, %v3291_v45  ;;  %v1340_v29 = vsel %vm159_vm3, %v3291_v45, %v3292_v32 }
 0x2cd   :  { %v4758_v52 = vpop.permute.xlu1 %3294  ;;  %v3307_v43 = vunpack.i.h.bf16 %v4756_v38  ;;  %v3306_v56 = vunpack.i.l.bf16 %v4756_v38  ;;  %2633 = vmatprep.subr.bf16.mxu0 %v2632_v54 }
 0x2ce   :  { %v3297_v5 = vunpack.i.h.bf16 %v4758_v52  ;;  %v3296_v58 = vunpack.i.l.bf16 %v4758_v52  ;;  %3599 = vrot.lane.b32.xlu0 %v4650_v17, %s3703_s13 }
 0x2cf   :  { %3584 = vrot.lane.b32.xlu1 %v4652_v48, %s3703_s13  ;;  %v1380_v47 = vsel %vm196_vm4, %v3306_v56, %v3307_v43  ;;  %v1379_v45 = vsel %vm196_vm4, %v3247_v51, %v3306_v56 }
 0x2d0   :  { %v1343_v50 = vsel %vm159_vm3, %v3242_v60, %v3296_v58  ;;  %v1344_v62 = vsel %vm159_vm3, %v3296_v58, %v3297_v5  ;;  %2635 = vmatpush1.bf16.msra.mxu0 %v2634_v2  ;;  %v4778_v39 = vpop.permute.xlu0 %3319  ;;  %v2640_v34 = vpack.c.bf16 %v1380_v47, %v1376_v37 }
 0x2d1   :  { %v2638_v15 = vpack.c.bf16 %v1343_v50, %v1339_v46  ;;  %v4780_v40 = vpop.permute.xlu1 %3309  ;;  %v2636_v1 = vpack.c.bf16 %v1344_v62, %v1340_v29  ;;  %v3321_v27 = vunpack.i.l.bf16 %v4778_v39 }
 0x2d2   :  { %3604 = vrot.lane.b32.xlu0 %v4652_v48, %s3704_s14  ;;  %v5289_v54 = vunpack.i.h.bf16 %v4780_v40  ;;  %v3311_v60 = vunpack.i.l.bf16 %v4780_v40  ;;  %v1375_v48 = vsel %vm196_vm4, %v3246_v33, %v3301_v21 }
 0x2d3   :  { %3594 = vrot.lane.b32.xlu1 %v4658_v18, %s3703_s13  ;;  %2637 = vmatprep.subr.bf16.mxu0 %v2636_v1  ;;  %v2642_v62 = vpack.c.bf16 %v1379_v45, %v1375_v48  ;;  %v5283_v1 = vunpack.i.h.bf16 %v4778_v39 }
 0x2d4   :  { %2639 = vmatpush1.bf16.msra.mxu0 %v2638_v15  ;;  %v4800_v58 = vpop.permute.xlu0 %3324  ;;  %v1411_v21 = vsel %vm233_vm5, %v3251_v3, %v3311_v60  ;;  %v1412_v47 = vsel %vm233_vm5, %v3311_v60, %v5289_v54 }
 0x2d5   :  { %v4802_v2 = vpop.permute.xlu1 %3314  ;;  %v5284_v46 = vunpack.i.h.bf16 %v4800_v58  ;;  %v3326_v56 = vunpack.i.l.bf16 %v4800_v58  ;;  %2641 = vmatprep.subr.bf16.mxu0 %v2640_v34  ;;  %v3257_v34 = vunpack.i.h.bf16 %v4684_v23  ;;  %v1448_v60 = vsel %vm270_vm6, %v3321_v27, %v5283_v1 }
 0x2d6   :  { %v5285_v50 = vunpack.i.h.bf16 %v4802_v2  ;;  %v3316_v29 = vunpack.i.l.bf16 %v4802_v2  ;;  %3614 = vrot.lane.b32.xlu0 %v4658_v18, %s3704_s14 }
 0x2d7   :  { %3609 = vrot.lane.b32.xlu1 %v4644_v14, %s3704_s14  ;;  %v1452_v14 = vsel %vm270_vm6, %v3326_v56, %v5284_v46  ;;  %v1451_v3 = vsel %vm270_vm6, %v3257_v34, %v3326_v56 }
 0x2d8   :  { %v1415_v15 = vsel %vm233_vm5, %v3252_v57, %v3316_v29  ;;  %v1416_v51 = vsel %vm233_vm5, %v3316_v29, %v5285_v50  ;;  %2643 = vmatpush1.bf16.msra.mxu0 %v2642_v62  ;;  %v4822_v37 = vpop.permute.xlu0 %3339  ;;  %v3256_v57 = vunpack.i.l.bf16 %v4684_v23  ;;  %v2648_v62 = vpack.c.bf16 %v1452_v14, %v1448_v60  ;;  %v1221_v23 = vld [vmem:[%s5280_s5 + $0x8] sm:$0xff] }
 0x2d9   :  { %v2646_v33 = vpack.c.bf16 %v1415_v15, %v1411_v21  ;;  %v4824_v18 = vpop.permute.xlu1 %3329  ;;  %v2644_v45 = vpack.c.bf16 %v1416_v51, %v1412_v47  ;;  %v3261_v21 = vunpack.i.l.bf16 %v4698_v42  ;;  %v5291_v1 = vunpack.i.h.bf16 %v4822_v37 }
 0x2da   :  { %3624 = vrot.lane.b32.xlu0 %v4530_v22, %s3704_s14  ;;  %v5288_v48 = vunpack.i.h.bf16 %v4824_v18  ;;  %v3331_v29 = vunpack.i.l.bf16 %v4824_v18  ;;  %v1220_v22 = vld [vmem:[%s5280_s5] sm:$0xff]  ;;  %v1447_v56 = vsel %vm270_vm6, %v3256_v57, %v3321_v27 }
 0x2db   :  { %3619 = vrot.lane.b32.xlu1 %v4650_v17, %s3704_s14  ;;  %2645 = vmatprep.subr.bf16.mxu0 %v2644_v45  ;;  %v3262_v17 = vunpack.i.h.bf16 %v4698_v42  ;;  %v2650_v60 = vpack.c.bf16 %v1451_v3, %v1447_v56  ;;  %v3341_v42 = vunpack.i.l.bf16 %v4822_v37 }
 0x2dc   :  { %2647 = vmatpush1.bf16.msra.mxu0 %v2646_v33  ;;  %v4850_v15 = vpop.permute.xlu0 %3344  ;;  %v1483_v27 = vsel %vm307_vm7, %v3261_v21, %v3331_v29  ;;  %v1484_v57 = vsel %vm307_vm7, %v3331_v29, %v5288_v48 }
 0x2dd   :  { %v4852_v47 = vpop.permute.xlu1 %3334  ;;  %v5286_v51 = vunpack.i.h.bf16 %v4850_v15  ;;  %v3346_v45 = vunpack.i.l.bf16 %v4850_v15  ;;  %2649 = vmatprep.subr.bf16.mxu0 %v2648_v62  ;;  %v1520_v29 = vsel %vm5305_vm15, %v3341_v42, %v5291_v1 }
 0x2de   :  { %v5287_v14 = vunpack.i.h.bf16 %v4852_v47  ;;  %v3336_v34 = vunpack.i.l.bf16 %v4852_v47  ;;  %1542 = vperm.xlu0 %3186, %v1221_v23  }
 0x2df   :  { %1537 = vperm.xlu1 %3187, %v1220_v22   ;;  %v1524_v23 = vsel %vm5304_vm14, %v3346_v45, %v5286_v51  ;;  %v3267_v22 = vunpack.i.h.bf16 %v4696_v53  ;;  %vm3688_vm14 = vmpackc.low %vm4542_vm8, %vm4542_vm8 }
 0x2e0   :  { %v1487_v33 = vsel %vm307_vm7, %v3262_v17, %v3336_v34  ;;  %v1488_v46 = vsel %vm307_vm7, %v3336_v34, %v5287_v14  ;;  %2651 = vmatpush1.bf16.msra.mxu0 %v2650_v60  ;;  %v3350_v3 = vpop.permute.xlu0 %3349  ;;  %v3266_v17 = vunpack.i.l.bf16 %v4696_v53  ;;  %vm5315_vm8 = vmmov %vm5307_vm9 }
 0x2e1   :  { %v2654_v62 = vpack.c.bf16 %v1487_v33, %v1483_v27  ;;  %v3360_v56 = vpop.permute.xlu1 %3359  ;;  %v2652_v50 = vpack.c.bf16 %v1488_v46, %v1484_v57  ;;  %v3351_v21 = vunpack.i.l.bf16 %v3350_v3  ;;  %v1523_v34 = vsel %vm5306_vm11, %v3267_v22, %v3346_v45  ;;  %vm5316_vm15 = vmmov %vm5315_vm8 }
 0x2e2   :  { %v3352_v60 = vunpack.i.h.bf16 %v3350_v3  ;;  %v2656_v27 = vpack.c.bf16 %v1524_v23, %v1520_v29  ;;  %v1519_v46 = vsel %vm5307_vm9, %v3266_v17, %v3341_v42  ;;  %v3362_v33 = vunpack.i.h.bf16 %v3360_v56  ;;  %v4904_v23 = vld [vmem:[%s5279_s4 + $0x18] sm:$0xff]  ;;  %v4914_v17 = vld [vmem:[%s5279_s4 + $0x10] sm:$0xff]  ;;  %vm5318_vm11 = vmmov %vm5315_vm8 }
 0x2e3   :  { %2653 = vmatprep.subr.bf16.mxu0 %v2652_v50  ;;  %v3361_v57 = vunpack.i.l.bf16 %v3360_v56  ;;  %v2658_v50 = vpack.c.bf16 %v1523_v34, %v1519_v46  ;;  %v1269_v1 = vsel %vm85_vm1, %v3272_v20, %v3351_v21  ;;  %vm5320_vm9 = vmmov %vm5315_vm8 }
 0x2e4   :  { %2655 = vmatpush1.bf16.msra.mxu0 %v2654_v62  ;;  %v3355_v51 = vpop.permute.xlu0 %3354  ;;  %v1270_v42 = vsel %vm85_vm1, %v3351_v21, %v3352_v60 }
 0x2e5   :  { %v3365_v14 = vpop.permute.xlu1 %3364  ;;  %v3357_v48 = vunpack.i.h.bf16 %v3355_v51  ;;  %v3356_v54 = vunpack.i.l.bf16 %v3355_v51  ;;  %2657 = vmatprep.subr.bf16.mxu0 %v2656_v27  ;;  %v1305_v41 = vsel %vm122_vm2, %v3282_v59, %v3361_v57 }
 0x2e6   :  { %v3367_v53 = vunpack.i.h.bf16 %v3365_v14  ;;  %v3366_v44 = vunpack.i.l.bf16 %v3365_v14 }
 0x2e7   :  { %v1273_v45 = vsel %vm85_vm1, %v3277_v55, %v3356_v54  ;;  %v1274_v62 = vsel %vm85_vm1, %v3356_v54, %v3357_v48  ;;  %v3689_v55 = vpack.c.bf16 %v4566_v31, %v4551_v12  ;;  %v1306_v54 = vsel %vm122_vm2, %v3361_v57, %v3362_v33 }
 0x2e8   :  { %v1310_v3 = vsel %vm122_vm2, %v3366_v44, %v3367_v53  ;;  %v2666_v56 = vpack.c.bf16 %v1273_v45, %v1269_v1  ;;  %2659 = vmatpush1.bf16.msra.mxu0 %v2658_v50  ;;  %v3370_v51 = vpop.permute.xlu0 %3369  ;;  %v2664_v20 = vpack.c.bf16 %v1274_v62, %v1270_v42  ;;  %v1309_v19 = vsel %vm122_vm2, %v3287_v4, %v3366_v44 }
 0x2e9   :  { %v3380_v14 = vpop.permute.xlu1 %3379  ;;  %3690 = vmatprep.subr.msk.bf16.mxu0 %vm3688_vm14, %v3689_v55  ;;  %v3371_v1 = vunpack.i.l.bf16 %v3370_v51  ;;  %v2668_v48 = vpack.c.bf16 %v1310_v3, %v1306_v54  ;;  %v3372_v10 = vunpack.i.h.bf16 %v3370_v51  ;;  %v2670_v12 = vpack.c.bf16 %v1309_v19, %v1305_v41  ;;  %vm3691_vm14 = vmpackc.low %vm4568_vm13, %vm4568_vm13 }
 0x2ea   :  { %2665 = vmatprep.subr.bf16.mxu1 %v2664_v20  ;;  %v3382_v31 = vunpack.i.h.bf16 %v3380_v14  ;;  %v3381_v4 = vunpack.i.l.bf16 %v3380_v14  ;;  %v5308_v45 = vunpack.i.h.bf16 %v4736_v16  ;;  %v5309_v54 = vunpack.i.h.bf16 %v4780_v40 }
 0x2eb   :  { %1616 = vmatmul.mubr.f32.vlgmr.msra.gmra.mrb[8].mxu0 %v4890_v28  ;;  %2667 = vmatpush1.bf16.msra.mxu1 %v2666_v56  ;;  %v1341_v34 = vsel %vm159_vm3, %v3292_v32, %v3371_v1  ;;  %v1342_v60 = vsel %vm159_vm3, %v3371_v1, %v3372_v10  ;;  %v5310_v16 = vunpack.i.h.bf16 %v4802_v2 }
 0x2ec   :  { %2699 = vmatpush1.bf16.msra.mxu0 %v4524_v13  ;;  %v3375_v44 = vpop.permute.xlu0 %3374  ;;  %2669 = vmatprep.subr.bf16.mxu1 %v2668_v48  ;;  %v1378_v32 = vsel %vm196_vm4, %v3381_v4, %v3382_v31  ;;  %v1377_v42 = vsel %vm196_vm4, %v5308_v45, %v3381_v4 }
 0x2ed   :  { %v3385_v22 = vpop.permute.xlu1 %3384  ;;  %v3377_v61 = vunpack.i.h.bf16 %v3375_v44  ;;  %v3376_v21 = vunpack.i.l.bf16 %v3375_v44  ;;  %2449 = vmatprep.mubr.msk.f32.mxu0 %vm371_vm0, %v4904_v23 }
 0x2ee   :  { %v3387_v59 = vunpack.i.h.bf16 %v3385_v22  ;;  %v3386_v29 = vunpack.i.l.bf16 %v3385_v22 }
 0x2ef   :  { %v1345_v13 = vsel %vm159_vm3, %v3297_v5, %v3376_v21  ;;  %1622 = vmatmul.mubr.f32.gmra.mrb[10].mxu0 %v4914_v17  ;;  %2671 = vmatpush1.bf16.msra.mxu1 %v2670_v12  ;;  %v1346_v27 = vsel %vm159_vm3, %v3376_v21, %v3377_v61  ;;  %v5311_v61 = vunpack.i.h.bf16 %v4800_v58 }
 0x2f0   :  { %v2674_v46 = vpack.c.bf16 %v1345_v13, %v1341_v34  ;;  %v3390_v33 = vpop.permute.xlu0 %3389  ;;  %v2672_v53 = vpack.c.bf16 %v1346_v27, %v1342_v60  ;;  %v1382_v50 = vsel %vm196_vm4, %v3386_v29, %v3387_v59  ;;  %2458 = vmatprep.mubr.msk.f32.mxu0 %vm371_vm0, %v4596_v25  ;;  %v1381_v8 = vsel %vm196_vm4, %v3307_v43, %v3386_v29 }
 0x2f1   :  { %v3400_v57 = vpop.permute.xlu1 %3399  ;;  %v3391_v52 = vunpack.i.l.bf16 %v3390_v33  ;;  %v2676_v5 = vpack.c.bf16 %v1382_v50, %v1378_v32  ;;  %v3392_v62 = vunpack.i.h.bf16 %v3390_v33  ;;  %v2678_v3 = vpack.c.bf16 %v1381_v8, %v1377_v42 }
 0x2f2   :  { %2673 = vmatprep.subr.bf16.mxu1 %v2672_v53  ;;  %v3402_v56 = vunpack.i.h.bf16 %v3400_v57  ;;  %v3401_v51 = vunpack.i.l.bf16 %v3400_v57  ;;  %v5312_v29 = vunpack.i.h.bf16 %v4778_v39  ;;  %v5313_v32 = vunpack.i.h.bf16 %v4824_v18 }
 0x2f3   :  { %2675 = vmatpush1.bf16.msra.mxu1 %v2674_v46  ;;  %v1413_v1 = vsel %vm233_vm5, %v5309_v54, %v3391_v52  ;;  %v1414_v41 = vsel %vm233_vm5, %v3391_v52, %v3392_v62  ;;  %v5314_v39 = vunpack.i.h.bf16 %v4852_v47 }
 0x2f4   :  { %v3395_v14 = vpop.permute.xlu0 %3394  ;;  %2677 = vmatprep.subr.bf16.mxu1 %v2676_v5  ;;  %v1450_v21 = vsel %vm270_vm6, %v3401_v51, %v3402_v56  ;;  %v1449_v34 = vsel %vm270_vm6, %v5312_v29, %v3401_v51 }
 0x2f5   :  { %v3405_v20 = vpop.permute.xlu1 %3404  ;;  %v3397_v38 = vunpack.i.h.bf16 %v3395_v14  ;;  %v3396_v19 = vunpack.i.l.bf16 %v3395_v14 }
 0x2f6   :  { %v3407_v43 = vunpack.i.h.bf16 %v3405_v20  ;;  %v3406_v55 = vunpack.i.l.bf16 %v3405_v20  ;;  %v5317_v20 = vunpack.i.h.bf16 %v4850_v15  ;;  %v3695_v15 = vpack.c.bf16 %v4588_v24, %v4560_v7 }
 0x2f7   :  { %v1417_v48 = vsel %vm233_vm5, %v5310_v16, %v3396_v19  ;;  %2679 = vmatpush1.bf16.msra.mxu1 %v2678_v3  ;;  %v1418_v10 = vsel %vm233_vm5, %v3396_v19, %v3397_v38  ;;  %v5319_v19 = vunpack.i.h.bf16 %v4822_v37  ;;  %v3692_v37 = vpack.c.bf16 %v4591_v26, %v4576_v30 }
 0x2f8   :  { %v1454_v12 = vsel %vm270_vm6, %v3406_v55, %v3407_v43  ;;  %v2682_v31 = vpack.c.bf16 %v1417_v48, %v1413_v1  ;;  %v3410_v4 = vpop.permute.xlu0 %3409  ;;  %v2680_v22 = vpack.c.bf16 %v1418_v10, %v1414_v41  ;;  %v1453_v40 = vsel %vm270_vm6, %v5311_v61, %v3406_v55 }
 0x2f9   :  { %v3420_v44 = vpop.permute.xlu1 %3419  ;;  %v3411_v2 = vunpack.i.l.bf16 %v3410_v4  ;;  %v2684_v59 = vpack.c.bf16 %v1454_v12, %v1450_v21  ;;  %v3412_v13 = vunpack.i.h.bf16 %v3410_v4  ;;  %v2686_v60 = vpack.c.bf16 %v1453_v40, %v1449_v34 }
 0x2fa   :  { %2681 = vmatprep.subr.bf16.mxu1 %v2680_v22  ;;  %v3422_v27 = vunpack.i.h.bf16 %v3420_v44  ;;  %v3421_v46 = vunpack.i.l.bf16 %v3420_v44 }
 0x2fb   :  { %2683 = vmatpush1.bf16.msra.mxu1 %v2682_v31  ;;  %v1485_v52 = vsel %vm307_vm7, %v5313_v32, %v3411_v2  ;;  %v1486_v45 = vsel %vm307_vm7, %v3411_v2, %v3412_v13 }
 0x2fc   :  { %v3415_v33 = vpop.permute.xlu0 %3414  ;;  %2685 = vmatprep.subr.bf16.mxu1 %v2684_v59  ;;  %v1522_v18 = vsel %vm5316_vm15, %v3421_v46, %v3422_v27  ;;  %v1521_v43 = vsel %vm5320_vm9, %v5319_v19, %v3421_v46  ;;  %vm1823_vm15 = vcmask 1043608  }
 0x2fd   :  { %v3425_v57 = vpop.permute.xlu1 %3424  ;;  %v3417_v58 = vunpack.i.h.bf16 %v3415_v33  ;;  %v3416_v53 = vunpack.i.l.bf16 %v3415_v33 }
 0x2fe   :  { %v3427_v50 = vunpack.i.h.bf16 %v3425_v57  ;;  %v3426_v8 = vunpack.i.l.bf16 %v3425_v57 }
 0x2ff   :  { %v1489_v5 = vsel %vm307_vm7, %v5314_v39, %v3416_v53  ;;  %2687 = vmatpush1.bf16.msra.mxu1 %v2686_v60  ;;  %v1490_v42 = vsel %vm307_vm7, %v3416_v53, %v3417_v58 }
 0x300   :  { %v1526_v62 = vsel %vm5315_vm8, %v3426_v8, %v3427_v50  ;;  %v2690_v3 = vpack.c.bf16 %v1489_v5, %v1485_v52  ;;  %v4962_v56 = vpop.permute.xlu0 %3434  ;;  %v2688_v14 = vpack.c.bf16 %v1490_v42, %v1486_v45  ;;  %v1525_v47 = vsel %vm5318_vm11, %v5317_v20, %v3426_v8  ;;  %vm3694_vm8 = vmpackc.low %vm4555_vm12, %vm4555_vm12 }
 0x301   :  { %v3430_v51 = vpop.permute.xlu1 %3429  ;;  %v2692_v38 = vpack.c.bf16 %v1526_v62, %v1522_v18  ;;  %v2694_v1 = vpack.c.bf16 %v1525_v47, %v1521_v43  ;;  %v3437_v52 = vunpack.i.h.bf16 %v4962_v56  ;;  %v3436_v39 = vunpack.i.l.bf16 %v4962_v56 }
 0x302   :  { %2689 = vmatprep.subr.bf16.mxu1 %v2688_v14  ;;  %v3431_v22 = vunpack.i.l.bf16 %v3430_v51  ;;  %v3432_v2 = vunpack.i.h.bf16 %v3430_v51 }
 0x303   :  { %2691 = vmatpush1.bf16.msra.mxu1 %v2690_v3 }
 0x304   :  { %v4971_v55 = vpop.permute.xlu0 %3444  ;;  %2693 = vmatprep.subr.bf16.mxu1 %v2692_v38 }
 0x305   :  { %v4973_v54 = vpop.permute.xlu1 %3439 }
 0x307   :  { %2695 = vmatpush1.bf16.msra.mxu1 %v2694_v1 }
 0x308   :  { %v4975_v16 = vpop.permute.xlu0 %3454  ;;  %3693 = vmatprep.subr.msk.bf16.mxu1 %vm3691_vm14, %v3692_v37 }
 0x309   :  { %v4977_v48 = vpop.permute.xlu1 %3449 }
 0x30a   :  { %1693 = vmatmul.mubr.f32.vlgmr.msra.gmra.mrb[8].mxu1 %v4890_v28 }
 0x30b   :  { %3696 = vmatpush1.bf16.msk.msra.mxu1 %vm3694_vm8, %v3695_v15  ;;  %2451 = vmatprep.mubr.msk.f32.mxu1 %vm371_vm0, %v4904_v23 }
 0x30c   :  { %v3470_v35 = vpop.permute.xlu0 %3469 }
 0x30d   :  { %v4992_v41 = vpop.permute.xlu1 %3459  ;;  %v3472_v30 = vunpack.i.h.bf16 %v3470_v35  ;;  %v3471_v26 = vunpack.i.l.bf16 %v3470_v35 }
 0x30e   :  { %1699 = vmatmul.mubr.f32.gmra.mrb[10].mxu1 %v4914_v17 }
 0x30f   :  { %2460 = vmatprep.mubr.msk.f32.mxu1 %vm371_vm0, %v4596_v25  ;;  %v1893_v24 = vsel %vm85_vm1, %v3471_v26, %v3472_v30 }
 0x310   :  { %v3480_v9 = vpop.permute.xlu0 %3479 }
 0x311   :  { %v3465_v10 = vpop.permute.xlu1 %3464  ;;  %v3482_v12 = vunpack.i.h.bf16 %v3480_v9  ;;  %v3481_v31 = vunpack.i.l.bf16 %v3480_v9 }
 0x312   :  { %v3467_v4 = vunpack.i.h.bf16 %v3465_v10  ;;  %v3466_v7 = vunpack.i.l.bf16 %v3465_v10 }
 0x313   :  { %v1897_v44 = vsel %vm85_vm1, %v3481_v31, %v3482_v12 }
 0x314   :  { %v3485_v61 = vpop.permute.xlu0 %3484  ;;  %v2736_v21 = vpack.c.bf16 %v1897_v44, %v1893_v24  ;;  %v1892_v34 = vsel %vm85_vm1, %v3467_v4, %v3471_v26  ;;  %v1890_v25 = vsel %vm85_vm1, %v3431_v22, %v3466_v7  ;;  %v1891_v60 = vsel %vm85_vm1, %v3466_v7, %v3467_v4 }
 0x315   :  { %v3475_v40 = vpop.permute.xlu1 %3474  ;;  %v3487_v13 = vunpack.i.h.bf16 %v3485_v61  ;;  %v3486_v27 = vunpack.i.l.bf16 %v3485_v61 }
 0x316   :  { %v3477_v59 = vunpack.i.h.bf16 %v3475_v40  ;;  %v3476_v29 = vunpack.i.l.bf16 %v3475_v40  ;;  %2737 = vmatprep.subr.bf16.mxu1 %v2736_v21  ;;  %v3441_v40 = vunpack.i.l.bf16 %v4973_v54 }
 0x317   :  { %v1926_v3 = vsel %vm122_vm2, %v3436_v39, %v3486_v27  ;;  %v1927_v14 = vsel %vm122_vm2, %v3486_v27, %v3487_v13  ;;  %v3447_v39 = vunpack.i.h.bf16 %v4971_v55 }
 0x318   :  { %v1896_v46 = vsel %vm85_vm1, %v3477_v59, %v3481_v31  ;;  %v1894_v33 = vsel %vm85_vm1, %v3432_v2, %v3476_v29  ;;  %v1895_v57 = vsel %vm85_vm1, %v3476_v29, %v3477_v59  ;;  %v3495_v50 = vpop.permute.xlu0 %3494  ;;  %v3442_v29 = vunpack.i.h.bf16 %v4973_v54  ;;  %vm5321_vm1 = vmmov %vm5320_vm9 }
 0x319   :  { %v2702_v58 = vpack.c.bf16 %v1894_v33, %v1890_v25  ;;  %v2738_v53 = vpack.c.bf16 %v1896_v46, %v1892_v34  ;;  %v3490_v8 = vpop.permute.xlu1 %3489  ;;  %v2700_v32 = vpack.c.bf16 %v1895_v57, %v1891_v60  ;;  %v3497_v5 = vunpack.i.h.bf16 %v3495_v50  ;;  %vm5328_vm12 = vmmov %vm5321_vm1 }
 0x31a   :  { %v3496_v45 = vunpack.i.l.bf16 %v3495_v50  ;;  %v3492_v42 = vunpack.i.h.bf16 %v3490_v8  ;;  %v3491_v62 = vunpack.i.l.bf16 %v3490_v8  ;;  %vm1824_vm9 = vcmask 1047556  }
 0x31b   :  { %2701 = vmatprep.subr.bf16.mxu0 %v2700_v32  ;;  %2739 = vmatpush1.bf16.msra.mxu1 %v2738_v53  ;;  %vm5130_vm14 = vmor %vm1824_vm9, %vm1823_vm15 }
 0x31c   :  { %v1930_v51 = vsel %vm122_vm2, %v3437_v52, %v3496_v45  ;;  %2703 = vmatpush1.bf16.msra.mxu0 %v2702_v58  ;;  %v1931_v18 = vsel %vm122_vm2, %v3496_v45, %v3497_v5  ;;  %v3510_v47 = vpop.permute.xlu0 %3509  ;;  %v1928_v1 = vsel %vm122_vm2, %v3487_v13, %v3491_v62  ;;  %v1929_v37 = vsel %vm122_vm2, %v3491_v62, %v3492_v42 }
 0x31d   :  { %v2706_v20 = vpack.c.bf16 %v1930_v51, %v1926_v3  ;;  %v3500_v38 = vpop.permute.xlu1 %3499  ;;  %v2704_v19 = vpack.c.bf16 %v1931_v18, %v1927_v14  ;;  %v3512_v15 = vunpack.i.h.bf16 %v3510_v47  ;;  %v3511_v35 = vunpack.i.l.bf16 %v3510_v47 }
 0x31e   :  { %v3502_v56 = vunpack.i.h.bf16 %v3500_v38  ;;  %v3501_v43 = vunpack.i.l.bf16 %v3500_v38 }
 0x31f   :  { %2705 = vmatprep.subr.bf16.mxu0 %v2704_v19  ;;  %v1965_v22 = vsel %vm159_vm3, %v3511_v35, %v3512_v15 }
 0x320   :  { %v1932_v30 = vsel %vm122_vm2, %v3497_v5, %v3501_v43  ;;  %2707 = vmatpush1.bf16.msra.mxu0 %v2706_v20  ;;  %v1933_v26 = vsel %vm122_vm2, %v3501_v43, %v3502_v56  ;;  %v3520_v10 = vpop.permute.xlu0 %3519  ;;  %v3446_v5 = vunpack.i.l.bf16 %v4971_v55  ;;  %vm5322_vm2 = vmmov %vm5321_vm1 }
 0x321   :  { %v2742_v9 = vpack.c.bf16 %v1932_v30, %v1928_v1  ;;  %v3505_v12 = vpop.permute.xlu1 %3504  ;;  %v2740_v31 = vpack.c.bf16 %v1933_v26, %v1929_v37  ;;  %v3522_v4 = vunpack.i.h.bf16 %v3520_v10  ;;  %v3521_v7 = vunpack.i.l.bf16 %v3520_v10 }
 0x322   :  { %v3507_v24 = vunpack.i.h.bf16 %v3505_v12  ;;  %v3506_v44 = vunpack.i.l.bf16 %v3505_v12 }
 0x323   :  { %2741 = vmatprep.subr.bf16.mxu1 %v2740_v31  ;;  %v1969_v61 = vsel %vm159_vm3, %v3521_v7, %v3522_v4 }
 0x324   :  { %2743 = vmatpush1.bf16.msra.mxu1 %v2742_v9  ;;  %v3525_v21 = vpop.permute.xlu0 %3524  ;;  %v2744_v59 = vpack.c.bf16 %v1969_v61, %v1965_v22  ;;  %v1964_v13 = vsel %vm159_vm3, %v3507_v24, %v3511_v35  ;;  %v1962_v60 = vsel %vm159_vm3, %v3441_v40, %v3506_v44  ;;  %v1963_v46 = vsel %vm159_vm3, %v3506_v44, %v3507_v24 }
 0x325   :  { %v3515_v2 = vpop.permute.xlu1 %3514  ;;  %v3527_v27 = vunpack.i.h.bf16 %v3525_v21  ;;  %v3526_v33 = vunpack.i.l.bf16 %v3525_v21  ;;  %v3451_v40 = vunpack.i.l.bf16 %v4977_v48 }
 0x326   :  { %v3517_v34 = vunpack.i.h.bf16 %v3515_v2  ;;  %v3516_v25 = vunpack.i.l.bf16 %v3515_v2  ;;  %2745 = vmatprep.subr.bf16.mxu1 %v2744_v59 }
 0x327   :  { %v1998_v51 = vsel %vm196_vm4, %v3446_v5, %v3526_v33  ;;  %v1999_v18 = vsel %vm196_vm4, %v3526_v33, %v3527_v27 }
 0x328   :  { %v1968_v57 = vsel %vm159_vm3, %v3517_v34, %v3521_v7  ;;  %v1966_v58 = vsel %vm159_vm3, %v3442_v29, %v3516_v25  ;;  %v1967_v53 = vsel %vm159_vm3, %v3516_v25, %v3517_v34  ;;  %v3535_v54 = vpop.permute.xlu0 %3534  ;;  %v3452_v29 = vunpack.i.h.bf16 %v4977_v48  ;;  %vm5323_vm3 = vmmov %vm5321_vm1 }
 0x329   :  { %v2710_v50 = vpack.c.bf16 %v1966_v58, %v1962_v60  ;;  %v2746_v8 = vpack.c.bf16 %v1968_v57, %v1964_v13  ;;  %v3530_v32 = vpop.permute.xlu1 %3529  ;;  %v2708_v52 = vpack.c.bf16 %v1967_v53, %v1963_v46  ;;  %v3537_v45 = vunpack.i.h.bf16 %v3535_v54 }
 0x32a   :  { %v3536_v42 = vunpack.i.l.bf16 %v3535_v54  ;;  %v3532_v62 = vunpack.i.h.bf16 %v3530_v32  ;;  %v3531_v3 = vunpack.i.l.bf16 %v3530_v32 }
 0x32b   :  { %2709 = vmatprep.subr.bf16.mxu0 %v2708_v52  ;;  %2747 = vmatpush1.bf16.msra.mxu1 %v2746_v8  ;;  %v3457_v52 = vunpack.i.h.bf16 %v4975_v16 }
 0x32c   :  { %v2002_v14 = vsel %vm196_vm4, %v3447_v39, %v3536_v42  ;;  %2711 = vmatpush1.bf16.msra.mxu0 %v2710_v50  ;;  %v2003_v20 = vsel %vm196_vm4, %v3536_v42, %v3537_v45  ;;  %v3550_v38 = vpop.permute.xlu0 %3549  ;;  %v2000_v1 = vsel %vm196_vm4, %v3527_v27, %v3531_v3  ;;  %v2001_v37 = vsel %vm196_vm4, %v3531_v3, %v3532_v62 }
 0x32d   :  { %v2714_v47 = vpack.c.bf16 %v2002_v14, %v1998_v51  ;;  %v3540_v19 = vpop.permute.xlu1 %3539  ;;  %v2712_v56 = vpack.c.bf16 %v2003_v20, %v1999_v18  ;;  %v3552_v15 = vunpack.i.h.bf16 %v3550_v38  ;;  %v3551_v35 = vunpack.i.l.bf16 %v3550_v38 }
 0x32e   :  { %v3542_v55 = vunpack.i.h.bf16 %v3540_v19  ;;  %v3541_v43 = vunpack.i.l.bf16 %v3540_v19  ;;  %v3456_v39 = vunpack.i.l.bf16 %v4975_v16 }
 0x32f   :  { %2713 = vmatprep.subr.bf16.mxu0 %v2712_v56  ;;  %v2037_v22 = vsel %vm233_vm5, %v3551_v35, %v3552_v15 }
 0x330   :  { %v2004_v30 = vsel %vm196_vm4, %v3537_v45, %v3541_v43  ;;  %2715 = vmatpush1.bf16.msra.mxu0 %v2714_v47  ;;  %v2005_v26 = vsel %vm196_vm4, %v3541_v43, %v3542_v55  ;;  %v3560_v10 = vpop.permute.xlu0 %3559  ;;  %vm5324_vm4 = vmmov %vm5321_vm1 }
 0x331   :  { %v2750_v9 = vpack.c.bf16 %v2004_v30, %v2000_v1  ;;  %v3545_v12 = vpop.permute.xlu1 %3544  ;;  %v2748_v31 = vpack.c.bf16 %v2005_v26, %v2001_v37  ;;  %v3562_v4 = vunpack.i.h.bf16 %v3560_v10  ;;  %v3561_v7 = vunpack.i.l.bf16 %v3560_v10 }
 0x332   :  { %v3547_v24 = vunpack.i.h.bf16 %v3545_v12  ;;  %v3546_v44 = vunpack.i.l.bf16 %v3545_v12 }
 0x333   :  { %2749 = vmatprep.subr.bf16.mxu1 %v2748_v31  ;;  %v2041_v61 = vsel %vm233_vm5, %v3561_v7, %v3562_v4 }
 0x334   :  { %2751 = vmatpush1.bf16.msra.mxu1 %v2750_v9  ;;  %v3565_v21 = vpop.permute.xlu0 %3564  ;;  %v2752_v59 = vpack.c.bf16 %v2041_v61, %v2037_v22  ;;  %v2036_v13 = vsel %vm233_vm5, %v3547_v24, %v3551_v35  ;;  %v2034_v60 = vsel %vm233_vm5, %v3451_v40, %v3546_v44  ;;  %v2035_v46 = vsel %vm233_vm5, %v3546_v44, %v3547_v24 }
 0x335   :  { %v3555_v2 = vpop.permute.xlu1 %3554  ;;  %v3567_v27 = vunpack.i.h.bf16 %v3565_v21  ;;  %v3566_v33 = vunpack.i.l.bf16 %v3565_v21  ;;  %v3461_v22 = vunpack.i.l.bf16 %v4992_v41 }
 0x336   :  { %v3557_v34 = vunpack.i.h.bf16 %v3555_v2  ;;  %v3556_v25 = vunpack.i.l.bf16 %v3555_v2  ;;  %2753 = vmatprep.subr.bf16.mxu1 %v2752_v59  ;;  %v3462_v2 = vunpack.i.h.bf16 %v4992_v41 }
 0x337   :  { %v2070_v3 = vsel %vm270_vm6, %v3456_v39, %v3566_v33  ;;  %v2071_v14 = vsel %vm270_vm6, %v3566_v33, %v3567_v27 }
 0x338   :  { %v2040_v57 = vsel %vm233_vm5, %v3557_v34, %v3561_v7  ;;  %v2038_v58 = vsel %vm233_vm5, %v3452_v29, %v3556_v25  ;;  %v2039_v53 = vsel %vm233_vm5, %v3556_v25, %v3557_v34  ;;  %v3575_v48 = vpop.permute.xlu0 %3574  ;;  %vm5325_vm5 = vmmov %vm5321_vm1 }
 0x339   :  { %v2718_v50 = vpack.c.bf16 %v2038_v58, %v2034_v60  ;;  %v2754_v8 = vpack.c.bf16 %v2040_v57, %v2036_v13  ;;  %v3570_v54 = vpop.permute.xlu1 %3569  ;;  %v2716_v32 = vpack.c.bf16 %v2039_v53, %v2035_v46  ;;  %v3577_v5 = vunpack.i.h.bf16 %v3575_v48 }
 0x33a   :  { %v3576_v45 = vunpack.i.l.bf16 %v3575_v48  ;;  %v3572_v42 = vunpack.i.h.bf16 %v3570_v54  ;;  %v3571_v62 = vunpack.i.l.bf16 %v3570_v54 }
 0x33b   :  { %2717 = vmatprep.subr.bf16.mxu0 %v2716_v32  ;;  %2755 = vmatpush1.bf16.msra.mxu1 %v2754_v8 }
 0x33c   :  { %v2074_v51 = vsel %vm270_vm6, %v3457_v52, %v3576_v45  ;;  %2719 = vmatpush1.bf16.msra.mxu0 %v2718_v50  ;;  %v2075_v18 = vsel %vm270_vm6, %v3576_v45, %v3577_v5  ;;  %v3590_v47 = vpop.permute.xlu0 %3589  ;;  %v2072_v55 = vsel %vm270_vm6, %v3567_v27, %v3571_v62  ;;  %v2073_v43 = vsel %vm270_vm6, %v3571_v62, %v3572_v42 }
 0x33d   :  { %v2722_v20 = vpack.c.bf16 %v2074_v51, %v2070_v3  ;;  %v3580_v38 = vpop.permute.xlu1 %3579  ;;  %v2720_v19 = vpack.c.bf16 %v2075_v18, %v2071_v14  ;;  %v3592_v1 = vunpack.i.h.bf16 %v3590_v47  ;;  %v3591_v37 = vunpack.i.l.bf16 %v3590_v47 }
 0x33e   :  { %v3582_v16 = vunpack.i.h.bf16 %v3580_v38  ;;  %v3581_v56 = vunpack.i.l.bf16 %v3580_v38 }
 0x33f   :  { %2721 = vmatprep.subr.bf16.mxu0 %v2720_v19  ;;  %v2109_v24 = vsel %vm307_vm7, %v3591_v37, %v3592_v1 }
 0x340   :  { %v2076_v15 = vsel %vm270_vm6, %v3577_v5, %v3581_v56  ;;  %2723 = vmatpush1.bf16.msra.mxu0 %v2722_v20  ;;  %v2077_v35 = vsel %vm270_vm6, %v3581_v56, %v3582_v16  ;;  %v3600_v26 = vpop.permute.xlu0 %3599  ;;  %vm5326_vm6 = vmmov %vm5321_vm1 }
 0x341   :  { %v2758_v30 = vpack.c.bf16 %v2076_v15, %v2072_v55  ;;  %v3585_v9 = vpop.permute.xlu1 %3584  ;;  %v2756_v10 = vpack.c.bf16 %v2077_v35, %v2073_v43  ;;  %v3602_v12 = vunpack.i.h.bf16 %v3600_v26  ;;  %v3601_v31 = vunpack.i.l.bf16 %v3600_v26 }
 0x342   :  { %v3587_v4 = vunpack.i.h.bf16 %v3585_v9  ;;  %v3586_v7 = vunpack.i.l.bf16 %v3585_v9 }
 0x343   :  { %2757 = vmatprep.subr.bf16.mxu1 %v2756_v10  ;;  %v2113_v44 = vsel %vm307_vm7, %v3601_v31, %v3602_v12 }
 0x344   :  { %2759 = vmatpush1.bf16.msra.mxu1 %v2758_v30  ;;  %v3605_v61 = vpop.permute.xlu0 %3604  ;;  %v2760_v21 = vpack.c.bf16 %v2113_v44, %v2109_v24  ;;  %v2108_v34 = vsel %vm307_vm7, %v3587_v4, %v3591_v37  ;;  %v2106_v25 = vsel %vm307_vm7, %v3461_v22, %v3586_v7  ;;  %v2107_v60 = vsel %vm307_vm7, %v3586_v7, %v3587_v4 }
 0x345   :  { %v3595_v40 = vpop.permute.xlu1 %3594  ;;  %v3607_v13 = vunpack.i.h.bf16 %v3605_v61  ;;  %v3606_v27 = vunpack.i.l.bf16 %v3605_v61 }
 0x346   :  { %v3597_v59 = vunpack.i.h.bf16 %v3595_v40  ;;  %v3596_v29 = vunpack.i.l.bf16 %v3595_v40  ;;  %2761 = vmatprep.subr.bf16.mxu1 %v2760_v21 }
 0x347   :  { %v2143_v39 = vsel %vm5321_vm1, %v3606_v27, %v3607_v13 }
 0x348   :  { %v2112_v46 = vsel %vm307_vm7, %v3597_v59, %v3601_v31  ;;  %v2110_v33 = vsel %vm307_vm7, %v3462_v2, %v3596_v29  ;;  %v2111_v57 = vsel %vm307_vm7, %v3596_v29, %v3597_v59  ;;  %v3615_v41 = vpop.permute.xlu0 %3614  ;;  %vm5327_vm7 = vmmov %vm5321_vm1 }
 0x349   :  { %v2726_v58 = vpack.c.bf16 %v2110_v33, %v2106_v25  ;;  %v2762_v53 = vpack.c.bf16 %v2112_v46, %v2108_v34  ;;  %v3610_v50 = vpop.permute.xlu1 %3609  ;;  %v2724_v8 = vpack.c.bf16 %v2111_v57, %v2107_v60  ;;  %v3617_v48 = vunpack.i.h.bf16 %v3615_v41 }
 0x34a   :  { %v3616_v54 = vunpack.i.l.bf16 %v3615_v41  ;;  %v3612_v32 = vunpack.i.h.bf16 %v3610_v50  ;;  %v3611_v52 = vunpack.i.l.bf16 %v3610_v50 }
 0x34b   :  { %2725 = vmatprep.subr.bf16.mxu0 %v2724_v8  ;;  %2763 = vmatpush1.bf16.msra.mxu1 %v2762_v53 }
 0x34c   :  { %2727 = vmatpush1.bf16.msra.mxu0 %v2726_v58  ;;  %v2147_v5 = vsel %vm5322_vm2, %v3616_v54, %v3617_v48  ;;  %v3625_v45 = vpop.permute.xlu0 %3624  ;;  %v2144_v20 = vsel %vm5323_vm3, %v3607_v13, %v3611_v52  ;;  %v2145_v47 = vsel %vm5324_vm4, %v3611_v52, %v3612_v32  ;;  %v1713_v52 = vld [vmem:[%s5278_s1] sm:$0x1f]  ;;  %vm1828_vm3 = vcmask 150528  }
 0x34d   :  { %v3620_v42 = vpop.permute.xlu1 %3619  ;;  %v2728_v62 = vpack.c.bf16 %v2147_v5, %v2143_v39  ;;  %v3627_v3 = vunpack.i.h.bf16 %v3625_v45  ;;  %v3626_v51 = vunpack.i.l.bf16 %v3625_v45 }
 0x34e   :  { %v3622_v14 = vunpack.i.h.bf16 %v3620_v42  ;;  %v3621_v18 = vunpack.i.l.bf16 %v3620_v42 }
 0x34f   :  { %2729 = vmatprep.subr.bf16.mxu0 %v2728_v62  ;;  %v2142_v38 = vsel %vm5325_vm5, %v3626_v51, %v3606_v27  ;;  %v2146_v19 = vsel %vm5326_vm6, %v3627_v3, %v3616_v54 }
 0x350   :  { %v2148_v16 = vsel %vm5327_vm7, %v3617_v48, %v3621_v18  ;;  %v2149_v56 = vsel %vm5328_vm12, %v3621_v18, %v3622_v14  ;;  %v2730_v55 = vpack.c.bf16 %v2146_v19, %v2142_v38 }
 0x351   :  { %v2766_v43 = vpack.c.bf16 %v2148_v16, %v2144_v20  ;;  %v2764_v1 = vpack.c.bf16 %v2149_v56, %v2145_v47 }
 0x352   :  { %2731 = vmatpush1.bf16.msra.mxu0 %v2730_v55 }
 0x353   :  { %2765 = vmatprep.subr.bf16.mxu1 %v2764_v1 }
 0x354   :  { %2767 = vmatpush1.bf16.msra.mxu1 %v2766_v43 }
 0x355   :  { %2223 = vmatmul.mubr.f32.vlgmr.msra.gmra.mrb[12].mxu0 %v4890_v28 }
 0x356   :  { %2459 = vmatprep.mubr.msk.f32.mxu0 %vm371_vm0, %v4904_v23 }
 0x357   :  { %2300 = vmatmul.mubr.f32.vlgmr.msra.gmra.mrb[12].mxu1 %v4890_v28 }
 0x358   :  { %2461 = vmatprep.mubr.msk.f32.mxu1 %vm371_vm0, %v4904_v23  ;;  %vm1714_vm0 = vcmp.gt.f32.partialorder %v1713_v52, 0.5 }
 0x359   :  { %2229 = vmatmul.mubr.f32.gmra.mrb[14].mxu0 %v4914_v17  ;;  %v1715_v1 = vsel %vm1714_vm0, 1, %v4467_v6 }
 0x35b   :  { %2306 = vmatmul.mubr.f32.gmra.mrb[14].mxu1 %v4914_v17 }
 0x35d   :  { %v1543_v30 = vpop.permute.xlu0 %1542 }
 0x35e   :  { %v1538_v28 = vpop.permute.xlu1 %1537 }
 0x3be   :  { %v1617_v23 = vpop.f32.mrb[8].mxu0 }
 0x3bf   :  { %v1618_v17 = vadd.f32 %v1617_v23, %v1538_v28  ;;  %v1619_v37 = vpop.f32.mrb[9].mxu0 }
 0x3c0   :  { %v1620_v15 = vadd.f32 %v1619_v37, %v1538_v28  ;;  %v1723_v37 = vrot.slane %v1715_v1, %v4410_v0 }
 0x3c1   :  { %v1705_v35 = vmax.f32 %v1618_v17, 0.0  ;;  %v1719_v17 = vrot.slane %v1715_v1, %v4404_v49 }
 0x3c2   :  { %v1706_v26 = vmax.f32 %v1620_v15, 0.0  ;;  %v1623_v9 = vpop.f32.mrb[10].mxu0  ;;  %vm5123_vm11 = vcmp.eq.s32.totalorder %v1723_v37, 1 }
 0x3c3   :  { %v1624_v10 = vadd.f32 %v1623_v9, %v1543_v30  ;;  %v1625_v12 = vpop.f32.mrb[11].mxu0  ;;  %vm5119_vm13 = vcmp.eq.s32.totalorder %v1719_v17, 1 }
 0x3c4   :  { %v3628_v31 = vpack.i.bf16 %v1706_v26, %v1705_v35  ;;  %v1626_v4 = vadd.f32 %v1625_v12, %v1543_v30 }
 0x3c5   :  { %v1709_v7 = vmax.f32 %v1624_v10, 0.0 }
 0x3c6   :  { %v1710_v24 = vmax.f32 %v1626_v4, 0.0  ;;  %3629 = vrot.lane.b32.xlu1 %v3628_v31, %s3706_s2 }
 0x3c8   :  { %v3633_v44 = vpack.i.bf16 %v1710_v24, %v1709_v7 }
 0x3ca   :  { %3634 = vrot.lane.b32.xlu1 %v3633_v44, %s3706_s2 }
 0x3dd   :  { %v1694_v22 = vpop.f32.mrb[8].mxu1 }
 0x3de   :  { %v1695_v61 = vadd.f32 %v1694_v22, %v1538_v28  ;;  %v1696_v40 = vpop.f32.mrb[9].mxu1 }
 0x3df   :  { %v1697_v21 = vadd.f32 %v1696_v40, %v1538_v28 }
 0x3e0   :  { %v1707_v2 = vmax.f32 %v1695_v61, 0.0 }
 0x3e1   :  { %v1708_v59 = vmax.f32 %v1697_v21, 0.0  ;;  %v1700_v29 = vpop.f32.mrb[10].mxu1 }
 0x3e2   :  { %v1701_v34 = vadd.f32 %v1700_v29, %v1543_v30  ;;  %v1702_v25 = vpop.f32.mrb[11].mxu1  ;;  %v1727_v29 = vrot.slane %v1715_v1, %v4455_v36 }
 0x3e3   :  { %v3638_v13 = vpack.i.bf16 %v1708_v59, %v1707_v2  ;;  %v1703_v60 = vadd.f32 %v1702_v25, %v1543_v30  ;;  %v1735_v59 = vrot.slane %v1715_v1, %v4458_v11 }
 0x3e4   :  { %v1711_v27 = vmax.f32 %v1701_v34, 0.0  ;;  %v1731_v34 = vrot.slane %v1715_v1, %v4461_v63  ;;  %vm5158_vm1 = vcmp.eq.s32.totalorder %v1727_v29, 1 }
 0x3e5   :  { %v1712_v46 = vmax.f32 %v1703_v60, 0.0  ;;  %3639 = vrot.lane.b32.xlu0 %v3638_v13, %s3706_s2  ;;  %vm5154_vm8 = vcmp.eq.s32.totalorder %v1735_v59, 1 }
 0x3e6   :  { %vm5162_vm2 = vcmp.eq.s32.totalorder %v1731_v34, 1 }
 0x3e7   :  { %v3648_v33 = vpack.i.bf16 %v1712_v46, %v1711_v27 }
 0x3e9   :  { %3649 = vrot.lane.b32.xlu0 %v3648_v33, %s3706_s2 }
 0x428   :  { %v2224_v57 = vpop.f32.mrb[12].mxu0 }
 0x429   :  { %v2225_v58 = vadd.f32 %v2224_v57, %v1538_v28  ;;  %v2226_v53 = vpop.f32.mrb[13].mxu0 }
 0x42a   :  { %v2301_v41 = vpop.f32.mrb[12].mxu1  ;;  %v2227_v50 = vadd.f32 %v2226_v53, %v1538_v28 }
 0x42b   :  { %v2302_v8 = vadd.f32 %v2301_v41, %v1538_v28  ;;  %v2303_v48 = vpop.f32.mrb[13].mxu1  ;;  %v2312_v54 = vmax.f32 %v2225_v58, 0.0 }
 0x42c   :  { %v2304_v32 = vadd.f32 %v2303_v48, %v1538_v28  ;;  %v2313_v39 = vmax.f32 %v2227_v50, 0.0  ;;  %v2230_v45 = vpop.f32.mrb[14].mxu0 }
 0x42d   :  { %v2314_v5 = vmax.f32 %v2302_v8, 0.0  ;;  %v2231_v62 = vadd.f32 %v2230_v45, %v1543_v30  ;;  %v2232_v3 = vpop.f32.mrb[15].mxu0 }
 0x42e   :  { %v2315_v42 = vmax.f32 %v2304_v32, 0.0  ;;  %v2307_v51 = vpop.f32.mrb[14].mxu1  ;;  %v3643_v14 = vpack.i.bf16 %v2313_v39, %v2312_v54  ;;  %v2233_v18 = vadd.f32 %v2232_v3, %v1543_v30 }
 0x42f   :  { %v2308_v20 = vadd.f32 %v2307_v51, %v1543_v30  ;;  %v2309_v47 = vpop.f32.mrb[15].mxu1  ;;  %v2316_v19 = vmax.f32 %v2231_v62, 0.0 }
 0x430   :  { %v3653_v38 = vpack.i.bf16 %v2315_v42, %v2314_v5  ;;  %v2310_v16 = vadd.f32 %v2309_v47, %v1543_v30  ;;  %v2317_v56 = vmax.f32 %v2233_v18, 0.0  ;;  %3644 = vrot.lane.b32.xlu1 %v3643_v14, %s3706_s2  ;;  %v2320_v14 = vld [vmem:[%s5278_s1 + $0x4] sm:$0x1f] }
 0x431   :  { %v2318_v55 = vmax.f32 %v2308_v20, 0.0  ;;  %vm2321_vm4 = vcmp.gt.f32.partialorder %v2320_v14, 0.5 }
 0x432   :  { %v2319_v43 = vmax.f32 %v2310_v16, 0.0  ;;  %3654 = vrot.lane.b32.xlu0 %v3653_v38, %s3706_s2  ;;  %v3658_v28 = vpack.i.bf16 %v2317_v56, %v2316_v19  ;;  %v2322_v18 = vsel %vm2321_vm4, 1, %v4467_v6 }
 0x433   :  { %v2326_v20 = vrot.slane %v2322_v18, %v4404_v49  ;;  %v2330_v47 = vrot.slane %v2322_v18, %v4410_v0  ;;  %v2342_v38 = vrot.slane %v2322_v18, %v4458_v11  ;;  %v2334_v19 = vrot.slane %v2322_v18, %v4455_v36 }
 0x434   :  { %v3663_v23 = vpack.i.bf16 %v2319_v43, %v2318_v55  ;;  %3659 = vrot.lane.b32.xlu1 %v3658_v28, %s3706_s2  ;;  %v2338_v16 = vrot.slane %v2322_v18, %v4461_v63 }
 0x435   :  { %vm5205_vm5 = vcmp.eq.s32.totalorder %v2326_v20, 1  ;;  %vm5209_vm6 = vcmp.eq.s32.totalorder %v2330_v47, 1  ;;  %vm5213_vm7 = vcmp.eq.s32.totalorder %v2342_v38, 1  ;;  %vm5217_vm12 = vcmp.eq.s32.totalorder %v2334_v19, 1 }
 0x436   :  { %3664 = vrot.lane.b32.xlu0 %v3663_v23, %s3706_s2  ;;  %vm5224_vm0 = vcmp.eq.s32.totalorder %v2338_v16, 1 }
 0x438   :  { %v3630_v35 = vpop.permute.xlu1 %3629 }
 0x439   :  { %v3632_v26 = vunpack.i.h.bf16 %v3630_v35  ;;  %v3631_v9 = vunpack.i.l.bf16 %v3630_v35 }
 0x43b   :  { %v1765_v10 = vsel %vm592_vm10, %v3631_v9, %v3632_v26  ;;  %v1781_v12 = vsel %vm5119_vm13, %v3631_v9, 0.0 }
 0x43c   :  { %v1782_v4 = vsel %vm5123_vm11, %v1765_v10, 0.0  ;;  %v3635_v7 = vpop.permute.xlu1 %3634 }
 0x43d   :  { %v2468_v24 = vpack.c.bf16 %v1782_v4, %v1781_v12  ;;  %v3637_v44 = vunpack.i.h.bf16 %v3635_v7  ;;  %v3636_v22 = vunpack.i.l.bf16 %v3635_v7 }
 0x43f   :  { %1826 = vst.msk [vmem:[%s5281_s6] sm:$0xff] %vm5130_vm14, %v2468_v24  ;;  %v1768_v61 = vsel %vm592_vm10, %v3636_v22, %v3637_v44  ;;  %v1786_v40 = vsel %vm5119_vm13, %v3636_v22, 0.0 }
 0x440   :  { %v1787_v21 = vsel %vm5123_vm11, %v1768_v61, 0.0 }
 0x441   :  { %v2471_v2 = vpack.c.bf16 %v1787_v21, %v1786_v40 }
 0x443   :  { %1830 = vst.msk [vmem:[%s5281_s6 + $0x24] sm:$0xff] %vm5130_vm14, %v2471_v2 }
 0x457   :  { %v3640_v13 = vpop.permute.xlu0 %3639 }
 0x458   :  { %v3642_v46 = vunpack.i.h.bf16 %v3640_v13  ;;  %v3641_v33 = vunpack.i.l.bf16 %v3640_v13 }
 0x45a   :  { %v1785_v57 = vsel %vm5154_vm8, %v3642_v46, 0.0  ;;  %v1766_v58 = vsel %vm592_vm10, %v3632_v26, %v3641_v33  ;;  %v1767_v53 = vsel %vm592_vm10, %v3641_v33, %v3642_v46 }
 0x45b   :  { %v2470_v41 = vpack.c.bf16 %v1785_v57, %v1785_v57  ;;  %v1783_v50 = vsel %vm5158_vm1, %v1766_v58, 0.0  ;;  %v1784_v8 = vsel %vm5162_vm2, %v1767_v53, 0.0  ;;  %v3650_v48 = vpop.permute.xlu0 %3649 }
 0x45c   :  { %v2469_v54 = vpack.c.bf16 %v1784_v8, %v1783_v50  ;;  %v3652_v32 = vunpack.i.h.bf16 %v3650_v48  ;;  %v3651_v52 = vunpack.i.l.bf16 %v3650_v48 }
 0x45d   :  { %1829 = vst.msk [vmem:[%s5281_s6 + $0x10] sm:$0xf] %vm1828_vm3, %v2470_v41 }
 0x45e   :  { %1827 = vst [vmem:[%s5281_s6 + $0x8] sm:$0xff] %v2469_v54  ;;  %v1790_v39 = vsel %vm5154_vm8, %v3652_v32, 0.0  ;;  %v1769_v5 = vsel %vm592_vm10, %v3637_v44, %v3651_v52  ;;  %v1770_v45 = vsel %vm592_vm10, %v3651_v52, %v3652_v32 }
 0x45f   :  { %v2473_v42 = vpack.c.bf16 %v1790_v39, %v1790_v39  ;;  %v1788_v62 = vsel %vm5158_vm1, %v1769_v5, 0.0  ;;  %v1789_v3 = vsel %vm5162_vm2, %v1770_v45, 0.0 }
 0x460   :  { %v2472_v51 = vpack.c.bf16 %v1789_v3, %v1788_v62 }
 0x461   :  { %1832 = vst.msk [vmem:[%s5281_s6 + $0x34] sm:$0xf] %vm1828_vm3, %v2473_v42 }
 0x462   :  { %1831 = vst [vmem:[%s5281_s6 + $0x2c] sm:$0xff] %v2472_v51 }
 0x4a2   :  { %v3645_v56 = vpop.permute.xlu1 %3644 }
 0x4a3   :  { %v3647_v43 = vunpack.i.h.bf16 %v3645_v56  ;;  %v3646_v1 = vunpack.i.l.bf16 %v3645_v56 }
 0x4a4   :  { %v3655_v28 = vpop.permute.xlu0 %3654 }
 0x4a5   :  { %v3657_v0 = vunpack.i.h.bf16 %v3655_v28  ;;  %v3656_v36 = vunpack.i.l.bf16 %v3655_v28  ;;  %v2372_v63 = vsel %vm592_vm10, %v3646_v1, %v3647_v43  ;;  %v2388_v23 = vsel %vm5205_vm5, %v3646_v1, 0.0 }
 0x4a6   :  { %v3660_v35 = vpop.permute.xlu1 %3659  ;;  %v2389_v30 = vsel %vm5209_vm6, %v2372_v63, 0.0 }
 0x4a7   :  { %v2373_v37 = vsel %vm592_vm10, %v3647_v43, %v3656_v36  ;;  %v2374_v15 = vsel %vm592_vm10, %v3656_v36, %v3657_v0  ;;  %v2392_v26 = vsel %vm5213_vm7, %v3657_v0, 0.0  ;;  %v3662_v9 = vunpack.i.h.bf16 %v3660_v35 }
 0x4a8   :  { %v3661_v10 = vunpack.i.l.bf16 %v3660_v35  ;;  %v2474_v12 = vpack.c.bf16 %v2389_v30, %v2388_v23  ;;  %v3665_v4 = vpop.permute.xlu0 %3664  ;;  %v2390_v7 = vsel %vm5217_vm12, %v2373_v37, 0.0  ;;  %v2391_v22 = vsel %vm5224_vm0, %v2374_v15, 0.0 }
 0x4a9   :  { %v3667_v24 = vunpack.i.h.bf16 %v3665_v4  ;;  %v3666_v44 = vunpack.i.l.bf16 %v3665_v4  ;;  %v2476_v61 = vpack.c.bf16 %v2392_v26, %v2392_v26  ;;  %v2475_v2 = vpack.c.bf16 %v2391_v22, %v2390_v7 }
 0x4aa   :  { %v2375_v40 = vsel %vm592_vm10, %v3661_v10, %v3662_v9  ;;  %v2393_v21 = vsel %vm5205_vm5, %v3661_v10, 0.0  ;;  %2430 = vst.msk [vmem:[%s5281_s6 + $0x10] sm:$0xff] %vm5130_vm14, %v2474_v12 }
 0x4ab   :  { %v2394_v59 = vsel %vm5209_vm6, %v2375_v40, 0.0  ;;  %v2397_v29 = vsel %vm5213_vm7, %v3667_v24, 0.0  ;;  %v2376_v34 = vsel %vm592_vm10, %v3662_v9, %v3666_v44  ;;  %v2377_v25 = vsel %vm592_vm10, %v3666_v44, %v3667_v24  ;;  %2432 = vst.msk [vmem:[%s5281_s6 + $0x20] sm:$0xf] %vm1828_vm3, %v2476_v61  ;;  %2431 = vst [vmem:[%s5281_s6 + $0x18] sm:$0xff] %v2475_v2 }
 0x4ac   :  { %v2477_v13 = vpack.c.bf16 %v2394_v59, %v2393_v21  ;;  %v2479_v60 = vpack.c.bf16 %v2397_v29, %v2397_v29  ;;  %v2395_v27 = vsel %vm5217_vm12, %v2376_v34, 0.0  ;;  %v2396_v46 = vsel %vm5224_vm0, %v2377_v25, 0.0 }
 0x4ad   :  { %v2478_v33 = vpack.c.bf16 %v2396_v46, %v2395_v27 }
 0x4ae   :  { %2433 = vst.msk [vmem:[%s5281_s6 + $0x34] sm:$0xff] %vm5130_vm14, %v2477_v13 }
 0x4af   :  { %2435 = vst.msk [vmem:[%s5281_s6 + $0x44] sm:$0xf] %vm1828_vm3, %v2479_v60  ;;  %2434 = vst [vmem:[%s5281_s6 + $0x3c] sm:$0xff] %v2478_v33 }

// kernel: _lambda_.7
= control target key start
LH: loop header
LB: loop body
LE: loop exit
PB: predicated region body
PF: predicated region fallthrough
CT: control target
= control target key end

     0   :  { %s1845_s27 = smov 127   ;;  %s1847_s28 = smov 118   ;;  %vm251_vm0 = vcmask 130048   ;;  %v1853_v15 = vmov 0   ;;  %vm85_vm1 = vcmask 1039360   ;;  %vm106_vm2 = vcmask 1031168   ;;  %s2387_s0 = inlined_call_operand.vmem [shape: bf16[16,384], index: 0, kind: input, shape index: {}]   ;;  %s2388_s2 = inlined_call_operand.vmem [shape: f32[16,144], index: 2, kind: input, shape index: {}]   ;;  %s2389_s3 = inlined_call_operand.vmem [shape: f32[16,1], index: 3, kind: input, shape index: {}]   ;;  %s2390_s1 = inlined_call_operand.vmem [shape: f32[1,384], index: 1, kind: input, shape index: {}]   ;;  %s2391_s4 = inlined_call_operand.vmem [shape: f32[16,144], index: 4, kind: input, shape index: {}]   ;;  %s2392_s5 = inlined_call_operand.vmem [shape: f32[16,1], index: 5, kind: input, shape index: {}]   ;;  %s2393_s7 = inlined_call_operand.vmem [shape: f32[16,1], index: 7, kind: input, shape index: {}]   ;;  %s2394_s6 = inlined_call_operand.vmem [shape: f32[16,16], index: 6, kind: input, shape index: {}]   ;;  %s2395_s8 = inlined_call_operand.vmem [shape: f32[16,144], index: 8, kind: input, shape index: {}]   ;;  %s2396_s9 = inlined_call_operand.vmem [shape: f32[16,1], index: 9, kind: input, shape index: {}]   ;;  %s2397_s11 = inlined_call_operand.vmem [shape: f32[16,1], index: 11, kind: input, shape index: {}]   ;;  %s2398_s10 = inlined_call_operand.vmem [shape: f32[16,16], index: 10, kind: input, shape index: {}]   ;;  %s2399_s12 = inlined_call_operand.vmem [shape: bf16[16,384], index: 12, kind: output, shape index: {}]  }
   0x1   :  { %v57_v0 = vld [vmem:[%s2387_s0] sm:$0xff]  ;;  %v58_v1 = vld [vmem:[%s2387_s0 + $0x8] ss:$12 sps:$4 sm:$0xff]   ;;  %v59_v2 = vld [vmem:[%s2387_s0 + $0xc] sm:$0xff]  ;;  %s1846_s0 = smov 126   ;;  %s1848_s29 = smov 117   ;;  %1565 = vset.pattern.permute.xlu0 %v1853_v15  ;;  %1566 = vset.pattern.permute.xlu1 %v1853_v15  ;;  %829 = vst [vmem:[%s2399_s12] sm:$0xff] %v1853_v15 }
   0x2   :  { %v62_v3 = vunpack.c.h.bf16 %v57_v0  ;;  %v63_v4 = vunpack.c.l.bf16 %v58_v1  ;;  %v61_v5 = vunpack.c.l.bf16 %v57_v0  ;;  %v64_v6 = vunpack.c.l.bf16 %v59_v2  ;;  %s1849_s30 = smov 116   ;;  %s1850_s13 = smov 108   ;;  %v46_v14 = vld [vmem:[%s2388_s2 + $0x8] sm:$0xff]  ;;  %42 = vst [vmem:[#allocation2] sm:$0xff] %v1853_v15  ;;  %44 = vst [vmem:[#allocation2 + $0x10] sm:$0xff] %v1853_v15  ;;  %v49_v16 = vld [vmem:[%s2389_s3] sm:$0xff] }
   0x3   :  { %v65_v7 = vunpack.c.h.bf16 %v59_v2  ;;  %v66_v8 = vunpack.c.h.bf16 %v58_v1  ;;  %v1432_v9 = vcombine.high %v57_v0, %v59_v2  ;;  %v1433_v10 = vcombine.low %v57_v0, %v59_v2  ;;  %s1851_s14 = smov 107   ;;  %1298 = vmatprep.mubr.msk.f32.mxu0 %vm251_vm0, %v46_v14  ;;  %s1852_s17 = smov 106   ;;  %391 = vst [vmem:[#allocation3] sm:$0xff] %v1853_v15  ;;  %393 = vst [vmem:[#allocation3 + $0x10] sm:$0xff] %v1853_v15  ;;  %v50_v17 = vld [vmem:[%s2389_s3 + $0x8] sm:$0xff] }
   0x4   :  { %v1445_v11 = vpack.i.bf16 %v63_v4, %v62_v3  ;;  %v1455_v12 = vpack.i.bf16 %v64_v6, %v61_v5  ;;  %vm127_vm3 = vcmask 965632   ;;  %vm148_vm4 = vcmask 957440   ;;  %s1854_s15 = smov 11   ;;  %830 = vst [vmem:[%s2399_s12 + $0x8] sm:$0xf] %v1853_v15  ;;  %831 = vst [vmem:[%s2399_s12 + $0xc] sm:$0xff] %v1853_v15 }
   0x5   :  { %1317 = vmatprep.subr.bf16.mxu0 %v1432_v9  ;;  %v1450_v13 = vpack.i.bf16 %v66_v8, %v65_v7  ;;  %vm169_vm5 = vcmask 949248   ;;  %vm190_vm6 = vcmask 883712   ;;  %vm211_vm7 = vcmask 875520   ;;  %832 = vst [vmem:[%s2399_s12 + $0x14] sm:$0xf] %v1853_v15 }
   0x6   :  { %1446 = vrot.lane.b32.xlu0 %v1445_v11, %s1845_s27  ;;  %1456 = vrot.lane.b32.xlu1 %v1455_v12, %s1845_s27  ;;  %vm232_vm8 = vcmask 867328   ;;  %vm369_vm10 = vcmask 89088   ;;  %vm387_vm14 = vcmask 1047640  }
   0x7   :  { %1319 = vmatpush1.bf16.msra.mxu0 %v1433_v10 }
   0xa   :  { %1451 = vrot.lane.b32.xlu0 %v1450_v13, %s1845_s27  ;;  %1461 = vrot.lane.b32.xlu1 %v1445_v11, %s1846_s0 }
   0xe   :  { %1466 = vrot.lane.b32.xlu0 %v1450_v13, %s1846_s0  ;;  %1471 = vrot.lane.b32.xlu1 %v1455_v12, %s1846_s0 }
  0x12   :  { %1476 = vrot.lane.b32.xlu0 %v1445_v11, %s1847_s28  ;;  %1481 = vrot.lane.b32.xlu1 %v1450_v13, %s1847_s28 }
  0x16   :  { %1486 = vrot.lane.b32.xlu0 %v1455_v12, %s1847_s28  ;;  %1491 = vrot.lane.b32.xlu1 %v1445_v11, %s1848_s29 }
  0x1a   :  { %1496 = vrot.lane.b32.xlu0 %v1450_v13, %s1848_s29  ;;  %1501 = vrot.lane.b32.xlu1 %v1455_v12, %s1848_s29 }
  0x1e   :  { %1506 = vrot.lane.b32.xlu0 %v1445_v11, %s1849_s30  ;;  %1511 = vrot.lane.b32.xlu1 %v1450_v13, %s1849_s30 }
  0x22   :  { %1516 = vrot.lane.b32.xlu0 %v1455_v12, %s1849_s30  ;;  %1521 = vrot.lane.b32.xlu1 %v1445_v11, %s1850_s13 }
  0x26   :  { %1526 = vrot.lane.b32.xlu0 %v1450_v13, %s1850_s13  ;;  %1531 = vrot.lane.b32.xlu1 %v1455_v12, %s1850_s13 }
  0x2a   :  { %1536 = vrot.lane.b32.xlu0 %v1445_v11, %s1851_s14  ;;  %1541 = vrot.lane.b32.xlu1 %v1450_v13, %s1851_s14 }
  0x2e   :  { %1546 = vrot.lane.b32.xlu0 %v1455_v12, %s1851_s14  ;;  %1551 = vrot.lane.b32.xlu1 %v1445_v11, %s1852_s17 }
  0x32   :  { %1556 = vrot.lane.b32.xlu0 %v1450_v13, %s1852_s17  ;;  %1561 = vrot.lane.b32.xlu1 %v1455_v12, %s1852_s17 }
  0x36   :  { %243 = vperm.xlu0 %1565, %v49_v16   ;;  %248 = vperm.xlu1 %1566, %v50_v17  }
  0x78   :  { %v1447_v18 = vpop.permute.xlu0 %1446  ;;  %v1457_v19 = vpop.permute.xlu1 %1456 }
  0x79   :  { %v1449_v20 = vunpack.i.h.bf16 %v1447_v18  ;;  %v1448_v21 = vunpack.i.l.bf16 %v1447_v18  ;;  %v1458_v22 = vunpack.i.l.bf16 %v1457_v19  ;;  %v1459_v25 = vunpack.i.h.bf16 %v1457_v19 }
  0x7b   :  { %v87_v28 = vsel %vm85_vm1, %v1448_v21, %v1449_v20  ;;  %v86_v29 = vsel %vm85_vm1, %v1458_v22, %v1448_v21 }
  0x7c   :  { %v1452_v23 = vpop.permute.xlu0 %1451  ;;  %v1462_v24 = vpop.permute.xlu1 %1461 }
  0x7d   :  { %v1454_v26 = vunpack.i.h.bf16 %v1452_v23  ;;  %v1453_v27 = vunpack.i.l.bf16 %v1452_v23  ;;  %v1464_v30 = vunpack.i.h.bf16 %v1462_v24  ;;  %v1463_v31 = vunpack.i.l.bf16 %v1462_v24 }
  0x7f   :  { %v89_v32 = vsel %vm85_vm1, %v1453_v27, %v1454_v26  ;;  %v88_v33 = vsel %vm85_vm1, %v1459_v25, %v1453_v27  ;;  %v108_v42 = vsel %vm106_vm2, %v1463_v31, %v1464_v30 }
  0x80   :  { %v1467_v34 = vpop.permute.xlu0 %1466  ;;  %v1472_v35 = vpop.permute.xlu1 %1471  ;;  %v1320_v36 = vpack.c.bf16 %v89_v32, %v87_v28  ;;  %v1322_v37 = vpack.c.bf16 %v88_v33, %v86_v29 }
  0x81   :  { %v1469_v38 = vunpack.i.h.bf16 %v1467_v34  ;;  %v1468_v39 = vunpack.i.l.bf16 %v1467_v34  ;;  %v1474_v40 = vunpack.i.h.bf16 %v1472_v35  ;;  %v1473_v41 = vunpack.i.l.bf16 %v1472_v35 }
  0x82   :  { %1321 = vmatprep.subr.bf16.mxu0 %v1320_v36 }
  0x83   :  { %1323 = vmatpush1.bf16.msra.mxu0 %v1322_v37  ;;  %v110_v43 = vsel %vm106_vm2, %v1468_v39, %v1469_v38  ;;  %v107_v44 = vsel %vm106_vm2, %v1473_v41, %v1463_v31  ;;  %v109_v45 = vsel %vm106_vm2, %v1474_v40, %v1468_v39 }
  0x84   :  { %v1477_v46 = vpop.permute.xlu0 %1476  ;;  %v1482_v47 = vpop.permute.xlu1 %1481  ;;  %v1324_v48 = vpack.c.bf16 %v110_v43, %v108_v42  ;;  %v1326_v49 = vpack.c.bf16 %v109_v45, %v107_v44 }
  0x85   :  { %v1479_v50 = vunpack.i.h.bf16 %v1477_v46  ;;  %v1478_v51 = vunpack.i.l.bf16 %v1477_v46  ;;  %v1484_v52 = vunpack.i.h.bf16 %v1482_v47  ;;  %v1483_v53 = vunpack.i.l.bf16 %v1482_v47 }
  0x86   :  { %1325 = vmatprep.subr.bf16.mxu0 %v1324_v48 }
  0x87   :  { %1327 = vmatpush1.bf16.msra.mxu0 %v1326_v49  ;;  %v129_v54 = vsel %vm127_vm3, %v1478_v51, %v1479_v50  ;;  %v131_v55 = vsel %vm127_vm3, %v1483_v53, %v1484_v52 }
  0x88   :  { %v1487_v56 = vpop.permute.xlu0 %1486  ;;  %v1492_v57 = vpop.permute.xlu1 %1491  ;;  %v1328_v58 = vpack.c.bf16 %v131_v55, %v129_v54 }
  0x89   :  { %v1489_v59 = vunpack.i.h.bf16 %v1487_v56  ;;  %v1488_v60 = vunpack.i.l.bf16 %v1487_v56  ;;  %v1494_v61 = vunpack.i.h.bf16 %v1492_v57  ;;  %v1493_v62 = vunpack.i.l.bf16 %v1492_v57 }
  0x8a   :  { %1329 = vmatprep.subr.bf16.mxu0 %v1328_v58 }
  0x8b   :  { %v128_v63 = vsel %vm127_vm3, %v1488_v60, %v1478_v51  ;;  %v130_v0 = vsel %vm127_vm3, %v1489_v59, %v1483_v53  ;;  %v150_v8 = vsel %vm148_vm4, %v1493_v62, %v1494_v61 }
  0x8c   :  { %v1497_v1 = vpop.permute.xlu0 %1496  ;;  %v1502_v2 = vpop.permute.xlu1 %1501  ;;  %v1330_v3 = vpack.c.bf16 %v130_v0, %v128_v63 }
  0x8d   :  { %v1499_v4 = vunpack.i.h.bf16 %v1497_v1  ;;  %v1498_v5 = vunpack.i.l.bf16 %v1497_v1  ;;  %v1504_v6 = vunpack.i.h.bf16 %v1502_v2  ;;  %v1503_v7 = vunpack.i.l.bf16 %v1502_v2 }
  0x8e   :  { %1331 = vmatpush1.bf16.msra.mxu0 %v1330_v3 }
  0x8f   :  { %v152_v9 = vsel %vm148_vm4, %v1498_v5, %v1499_v4  ;;  %v149_v10 = vsel %vm148_vm4, %v1503_v7, %v1493_v62  ;;  %v151_v11 = vsel %vm148_vm4, %v1504_v6, %v1498_v5 }
  0x90   :  { %v1507_v12 = vpop.permute.xlu0 %1506  ;;  %v1512_v13 = vpop.permute.xlu1 %1511  ;;  %v1332_v14 = vpack.c.bf16 %v152_v9, %v150_v8  ;;  %v1334_v16 = vpack.c.bf16 %v151_v11, %v149_v10  ;;  %v45_v11 = vld [vmem:[%s2388_s2] sm:$0xff] }
  0x91   :  { %v1509_v17 = vunpack.i.h.bf16 %v1507_v12  ;;  %v1508_v18 = vunpack.i.l.bf16 %v1507_v12  ;;  %v1514_v19 = vunpack.i.h.bf16 %v1512_v13  ;;  %v1513_v20 = vunpack.i.l.bf16 %v1512_v13  ;;  %v48_v12 = vld [vmem:[%s2388_s2 + $0x18] sm:$0xff]  ;;  %v47_v13 = vld [vmem:[%s2388_s2 + $0x10] sm:$0xff] }
  0x92   :  { %1333 = vmatprep.subr.bf16.mxu0 %v1332_v14 }
  0x93   :  { %1335 = vmatpush1.bf16.msra.mxu0 %v1334_v16  ;;  %v171_v21 = vsel %vm169_vm5, %v1508_v18, %v1509_v17  ;;  %v173_v22 = vsel %vm169_vm5, %v1513_v20, %v1514_v19 }
  0x94   :  { %v1517_v23 = vpop.permute.xlu0 %1516  ;;  %v1522_v24 = vpop.permute.xlu1 %1521  ;;  %v1336_v25 = vpack.c.bf16 %v173_v22, %v171_v21 }
  0x95   :  { %v1519_v26 = vunpack.i.h.bf16 %v1517_v23  ;;  %v1518_v27 = vunpack.i.l.bf16 %v1517_v23  ;;  %v1524_v28 = vunpack.i.h.bf16 %v1522_v24  ;;  %v1523_v29 = vunpack.i.l.bf16 %v1522_v24 }
  0x96   :  { %1337 = vmatprep.subr.bf16.mxu0 %v1336_v25 }
  0x97   :  { %v170_v30 = vsel %vm169_vm5, %v1518_v27, %v1508_v18  ;;  %v172_v31 = vsel %vm169_vm5, %v1519_v26, %v1513_v20  ;;  %v192_v39 = vsel %vm190_vm6, %v1523_v29, %v1524_v28 }
  0x98   :  { %v1527_v32 = vpop.permute.xlu0 %1526  ;;  %v1532_v33 = vpop.permute.xlu1 %1531  ;;  %v1338_v34 = vpack.c.bf16 %v172_v31, %v170_v30  ;;  %v342_v31 = vlaneseq }
  0x99   :  { %v1529_v35 = vunpack.i.h.bf16 %v1527_v32  ;;  %v1528_v36 = vunpack.i.l.bf16 %v1527_v32  ;;  %v1534_v37 = vunpack.i.h.bf16 %v1532_v33  ;;  %v1533_v38 = vunpack.i.l.bf16 %v1532_v33  ;;  %v339_v32 = vld [vmem:[%s2390_s1] sm:$0x7] }
  0x9a   :  { %1339 = vmatpush1.bf16.msra.mxu0 %v1338_v34  ;;  %v343_v33 = vshrl.u32 %v342_v31, 7  ;;  %vm340_vm9 = vcmp.gt.f32.partialorder %v339_v32, 0.5 }
  0x9b   :  { %v194_v40 = vsel %vm190_vm6, %v1528_v36, %v1529_v35  ;;  %v191_v41 = vsel %vm190_vm6, %v1533_v38, %v1523_v29  ;;  %v193_v42 = vsel %vm190_vm6, %v1534_v37, %v1528_v36  ;;  %v341_v35 = vsel %vm340_vm9, 1, %v1853_v15 }
  0x9c   :  { %v1537_v43 = vpop.permute.xlu0 %1536  ;;  %v1542_v44 = vpop.permute.xlu1 %1541  ;;  %v1340_v45 = vpack.c.bf16 %v194_v40, %v192_v39  ;;  %v1342_v46 = vpack.c.bf16 %v193_v42, %v191_v41  ;;  %v2017_v34 = vsub.s32 2, %v343_v33  ;;  %v2020_v36 = vsub.s32 0, %v343_v33 }
  0x9d   :  { %v1539_v47 = vunpack.i.h.bf16 %v1537_v43  ;;  %v1538_v48 = vunpack.i.l.bf16 %v1537_v43  ;;  %v1544_v49 = vunpack.i.h.bf16 %v1542_v44  ;;  %v1543_v50 = vunpack.i.l.bf16 %v1542_v44 }
  0x9e   :  { %1341 = vmatprep.subr.bf16.mxu0 %v1340_v45  ;;  %v2022_v37 = vsub.s32 1, %v343_v33  ;;  %v353_v38 = vrot.slane %v341_v35, %v2017_v34  ;;  %v345_v39 = vrot.slane %v341_v35, %v2020_v36 }
  0x9f   :  { %1343 = vmatpush1.bf16.msra.mxu0 %v1342_v46  ;;  %v213_v51 = vsel %vm211_vm7, %v1538_v48, %v1539_v47  ;;  %v215_v52 = vsel %vm211_vm7, %v1543_v50, %v1544_v49 }
  0xa0   :  { %v1547_v53 = vpop.permute.xlu0 %1546  ;;  %v1552_v54 = vpop.permute.xlu1 %1551  ;;  %v1344_v55 = vpack.c.bf16 %v215_v52, %v213_v51  ;;  %v349_v41 = vrot.slane %v341_v35, %v2022_v37  ;;  %vm356_vm11 = vcmp.eq.s32.totalorder %v353_v38, 1  ;;  %vm354_vm12 = vcmp.eq.s32.totalorder %v345_v39, 1 }
  0xa1   :  { %v1549_v56 = vunpack.i.h.bf16 %v1547_v53  ;;  %v1548_v57 = vunpack.i.l.bf16 %v1547_v53  ;;  %v1554_v58 = vunpack.i.h.bf16 %v1552_v54  ;;  %v1553_v59 = vunpack.i.l.bf16 %v1552_v54 }
  0xa2   :  { %1345 = vmatprep.subr.bf16.mxu0 %v1344_v55  ;;  %vm2027_vm13 = vcmp.eq.s32.totalorder %v349_v41, 1 }
  0xa3   :  { %v212_v60 = vsel %vm211_vm7, %v1548_v57, %v1538_v48  ;;  %v214_v61 = vsel %vm211_vm7, %v1549_v56, %v1543_v50  ;;  %v234_v5 = vsel %vm232_vm8, %v1553_v59, %v1554_v58  ;;  %vm1839_vm15 = vmpackc.low %vm2027_vm13, %vm2027_vm13 }
  0xa4   :  { %v1557_v62 = vpop.permute.xlu0 %1556  ;;  %v1562_v63 = vpop.permute.xlu1 %1561  ;;  %v1346_v0 = vpack.c.bf16 %v214_v61, %v212_v60 }
  0xa5   :  { %v1559_v1 = vunpack.i.h.bf16 %v1557_v62  ;;  %v1558_v2 = vunpack.i.l.bf16 %v1557_v62  ;;  %v1564_v3 = vunpack.i.h.bf16 %v1562_v63  ;;  %v1563_v4 = vunpack.i.l.bf16 %v1562_v63 }
  0xa6   :  { %1347 = vmatpush1.bf16.msra.mxu0 %v1346_v0 }
  0xa7   :  { %v236_v6 = vsel %vm232_vm8, %v1558_v2, %v1559_v1  ;;  %v233_v7 = vsel %vm232_vm8, %v1563_v4, %v1553_v59  ;;  %v235_v8 = vsel %vm232_vm8, %v1564_v3, %v1558_v2  ;;  %v395_v4 = vld [vmem:[%s2391_s4 + $0x8] sm:$0xff] }
  0xa8   :  { %v1348_v9 = vpack.c.bf16 %v236_v6, %v234_v5  ;;  %v1350_v10 = vpack.c.bf16 %v235_v8, %v233_v7  ;;  %1300 = vmatprep.mubr.msk.f32.mxu1 %vm251_vm0, %v395_v4  ;;  %v399_v5 = vld [vmem:[%s2392_s5 + $0x8] sm:$0xff]  ;;  %v398_v6 = vld [vmem:[%s2392_s5] sm:$0xff] }
  0xa9   :  { %v403_v7 = vld [vmem:[%s2393_s7 + $0x8] sm:$0xff]  ;;  %v402_v8 = vld [vmem:[%s2393_s7] sm:$0xff] }
  0xaa   :  { %1349 = vmatprep.subr.bf16.mxu0 %v1348_v9 }
  0xab   :  { %1351 = vmatpush1.bf16.msra.mxu0 %v1350_v10 }
  0xae   :  { %323 = vmatmul.mubr.f32.vlgmr.msra.gmra.mrb[0].mxu0 %v45_v11 }
  0xaf   :  { %1299 = vmatprep.mubr.msk.f32.mxu0 %vm251_vm0, %v48_v12 }
  0xb2   :  { %329 = vmatmul.mubr.f32.gmra.mrb[2].mxu0 %v47_v13 }
  0xb5   :  { %v244_v14 = vpop.permute.xlu0 %243  ;;  %v249_v20 = vpop.permute.xlu1 %248 }
 0x181   :  { %v324_v16 = vpop.f32.mrb[0].mxu0 }
 0x182   :  { %v325_v17 = vadd.f32 %v324_v16, %v244_v14  ;;  %v326_v18 = vpop.f32.mrb[1].mxu0 }
 0x183   :  { %v327_v19 = vadd.f32 %v326_v18, %v244_v14 }
 0x184   :  { %v335_v21 = vmax.f32 %v325_v17, 0.0 }
 0x185   :  { %v336_v22 = vmax.f32 %v327_v19, 0.0  ;;  %v330_v23 = vpop.f32.mrb[2].mxu0 }
 0x186   :  { %v331_v24 = vadd.f32 %v330_v23, %v249_v20  ;;  %v332_v25 = vpop.f32.mrb[3].mxu0 }
 0x187   :  { %v1567_v26 = vpack.i.bf16 %v336_v22, %v335_v21  ;;  %v333_v27 = vadd.f32 %v332_v25, %v249_v20 }
 0x188   :  { %v337_v28 = vmax.f32 %v331_v24, 0.0 }
 0x189   :  { %v338_v29 = vmax.f32 %v333_v27, 0.0  ;;  %1568 = vrot.lane.b32.xlu1 %v1567_v26, %s1854_s15 }
 0x18b   :  { %v1572_v30 = vpack.i.bf16 %v338_v29, %v337_v28 }
 0x18d   :  { %1573 = vrot.lane.b32.xlu0 %v1572_v30, %s1854_s15 }
 0x1fb   :  { %v1569_v40 = vpop.permute.xlu1 %1568 }
 0x1fc   :  { %v1571_v42 = vunpack.i.h.bf16 %v1569_v40  ;;  %v1570_v43 = vunpack.i.l.bf16 %v1569_v40 }
 0x1fe   :  { %v370_v46 = vsel %vm369_vm10, %v1570_v43, %v1571_v42  ;;  %v380_v49 = vsel %vm356_vm11, %v1571_v42, 0.0  ;;  %v378_v50 = vsel %vm354_vm12, %v1570_v43, 0.0 }
 0x1ff   :  { %v1574_v44 = vpop.permute.xlu0 %1573  ;;  %v379_v54 = vsel %vm2027_vm13, %v370_v46, 0.0 }
 0x200   :  { %v1576_v47 = vunpack.i.h.bf16 %v1574_v44  ;;  %v1575_v48 = vunpack.i.l.bf16 %v1574_v44 }
 0x202   :  { %v383_v51 = vsel %vm356_vm11, %v1576_v47, 0.0  ;;  %v371_v52 = vsel %vm369_vm10, %v1575_v48, %v1576_v47  ;;  %v381_v53 = vsel %vm354_vm12, %v1575_v48, 0.0 }
 0x203   :  { %v382_v55 = vsel %vm2027_vm13, %v371_v52, 0.0  ;;  %v384_v56 = vpack.c.bf16 %v381_v53, %v378_v50  ;;  %v386_v57 = vpack.c.bf16 %v383_v51, %v380_v49  ;;  %v1840_v58 = vpack.c.bf16 %v371_v52, %v370_v46 }
 0x205   :  { %388 = vst.msk [vmem:[#allocation2] sm:$0xff] %vm387_vm14, %v384_v56  ;;  %1841 = vmatprep.subr.msk.bf16.mxu1 %vm1839_vm15, %v1840_v58 }
 0x206   :  { %390 = vst.msk [vmem:[#allocation2 + $0x10] sm:$0xff] %vm369_vm10, %v386_v57 }
 0x20c   :  { %v404_v59 = vld [vmem:[#allocation2] sm:$0xff] }
 0x20d   :  { %1355 = vmatpush1.bf16.msra.mxu1 %v404_v59  ;;  %v413_v60 = vunpack.c.l.bf16 %v404_v59  ;;  %v416_v61 = vunpack.c.h.bf16 %v404_v59  ;;  %v412_v63 = vld [vmem:[#allocation2 + $0x10] sm:$0xff] }
 0x20e   :  { %v418_v0 = vunpack.c.h.bf16 %v412_v63  ;;  %v415_v2 = vunpack.c.l.bf16 %v412_v63 }
 0x20f   :  { %v1582_v62 = vpack.i.bf16 %v416_v61, %v413_v60 }
 0x210   :  { %v1617_v1 = vpack.i.bf16 %v418_v0, %v382_v55  ;;  %v1622_v3 = vpack.i.bf16 %v415_v2, %v379_v54 }
 0x211   :  { %1583 = vrot.lane.b32.xlu0 %v1582_v62, %s1846_s0  ;;  %1578 = vrot.lane.b32.xlu1 %v1582_v62, %s1845_s27 }
 0x215   :  { %1593 = vrot.lane.b32.xlu0 %v1582_v62, %s1848_s29  ;;  %1588 = vrot.lane.b32.xlu1 %v1582_v62, %s1847_s28 }
 0x219   :  { %1603 = vrot.lane.b32.xlu0 %v1582_v62, %s1850_s13  ;;  %1598 = vrot.lane.b32.xlu1 %v1582_v62, %s1849_s30 }
 0x21d   :  { %1608 = vrot.lane.b32.xlu1 %v1582_v62, %s1851_s14  ;;  %1618 = vrot.lane.b32.xlu0 %v1617_v1, %s1845_s27 }
 0x221   :  { %1623 = vrot.lane.b32.xlu0 %v1622_v3, %s1846_s0  ;;  %1613 = vrot.lane.b32.xlu1 %v1622_v3, %s1845_s27 }
 0x225   :  { %1638 = vrot.lane.b32.xlu0 %v1617_v1, %s1847_s28  ;;  %1628 = vrot.lane.b32.xlu1 %v1617_v1, %s1846_s0 }
 0x229   :  { %1643 = vrot.lane.b32.xlu0 %v1622_v3, %s1848_s29  ;;  %1633 = vrot.lane.b32.xlu1 %v1622_v3, %s1847_s28 }
 0x22d   :  { %1658 = vrot.lane.b32.xlu0 %v1617_v1, %s1849_s30  ;;  %1648 = vrot.lane.b32.xlu1 %v1617_v1, %s1848_s29 }
 0x231   :  { %1663 = vrot.lane.b32.xlu0 %v1622_v3, %s1850_s13  ;;  %1653 = vrot.lane.b32.xlu1 %v1622_v3, %s1849_s30 }
 0x235   :  { %1678 = vrot.lane.b32.xlu0 %v1617_v1, %s1851_s14  ;;  %1668 = vrot.lane.b32.xlu1 %v1617_v1, %s1850_s13 }
 0x239   :  { %1683 = vrot.lane.b32.xlu0 %v1622_v3, %s1852_s17  ;;  %1673 = vrot.lane.b32.xlu1 %v1622_v3, %s1851_s14 }
 0x23d   :  { %1693 = vrot.lane.b32.xlu0 %v1582_v62, %s1852_s17  ;;  %1688 = vrot.lane.b32.xlu1 %v1617_v1, %s1852_s17 }
 0x241   :  { %592 = vperm.xlu0 %1565, %v399_v5   ;;  %587 = vperm.xlu1 %1566, %v398_v6  }
 0x245   :  { %689 = vperm.xlu0 %1565, %v403_v7   ;;  %684 = vperm.xlu1 %1566, %v402_v8  }
 0x283   :  { %v1584_v9 = vpop.permute.xlu0 %1583  ;;  %v1579_v10 = vpop.permute.xlu1 %1578 }
 0x284   :  { %v1581_v20 = vunpack.i.h.bf16 %v1579_v10  ;;  %v1580_v23 = vunpack.i.l.bf16 %v1579_v10  ;;  %v1586_v39 = vunpack.i.h.bf16 %v1584_v9  ;;  %v1585_v40 = vunpack.i.l.bf16 %v1584_v9 }
 0x287   :  { %v2082_v11 = vpop.permute.xlu0 %1593  ;;  %v1589_v12 = vpop.permute.xlu1 %1588 }
 0x288   :  { %v1591_v49 = vunpack.i.h.bf16 %v1589_v12  ;;  %v1590_v54 = vunpack.i.l.bf16 %v1589_v12  ;;  %v1596_v3 = vunpack.i.h.bf16 %v2082_v11  ;;  %v1595_v4 = vunpack.i.l.bf16 %v2082_v11 }
 0x28b   :  { %v2084_v13 = vpop.permute.xlu0 %1603  ;;  %v2086_v14 = vpop.permute.xlu1 %1598 }
 0x28c   :  { %v1601_v11 = vunpack.i.h.bf16 %v2086_v14 }
 0x28f   :  { %v2088_v16 = vpop.permute.xlu1 %1608  ;;  %v1619_v17 = vpop.permute.xlu0 %1618 }
 0x290   :  { %v1621_v18 = vunpack.i.h.bf16 %v1619_v17  ;;  %v1620_v19 = vunpack.i.l.bf16 %v1619_v17 }
 0x292   :  { %v440_v26 = vsel %vm85_vm1, %v1620_v19, %v1621_v18  ;;  %v439_v27 = vsel %vm85_vm1, %v1581_v20, %v1620_v19 }
 0x293   :  { %v1624_v21 = vpop.permute.xlu0 %1623  ;;  %v1614_v22 = vpop.permute.xlu1 %1613 }
 0x294   :  { %v1616_v24 = vunpack.i.h.bf16 %v1614_v22  ;;  %v1615_v25 = vunpack.i.l.bf16 %v1614_v22  ;;  %v1626_v28 = vunpack.i.h.bf16 %v1624_v21  ;;  %v1625_v29 = vunpack.i.l.bf16 %v1624_v21 }
 0x295   :  { %v1600_v22 = vunpack.i.l.bf16 %v2086_v14  ;;  %v1606_v14 = vunpack.i.h.bf16 %v2084_v13 }
 0x296   :  { %v438_v30 = vsel %vm85_vm1, %v1615_v25, %v1616_v24  ;;  %v437_v31 = vsel %vm85_vm1, %v1580_v23, %v1615_v25  ;;  %v458_v45 = vsel %vm106_vm2, %v1625_v29, %v1626_v28  ;;  %v457_v47 = vsel %vm106_vm2, %v1585_v40, %v1625_v29 }
 0x297   :  { %v1639_v32 = vpop.permute.xlu0 %1638  ;;  %v1629_v33 = vpop.permute.xlu1 %1628  ;;  %v1356_v35 = vpack.c.bf16 %v440_v26, %v438_v30  ;;  %v1358_v38 = vpack.c.bf16 %v439_v27, %v437_v31 }
 0x298   :  { %v1631_v41 = vunpack.i.h.bf16 %v1629_v33  ;;  %v1630_v42 = vunpack.i.l.bf16 %v1629_v33  ;;  %v1641_v43 = vunpack.i.h.bf16 %v1639_v32  ;;  %v1640_v44 = vunpack.i.l.bf16 %v1639_v32 }
 0x299   :  { %1357 = vmatprep.subr.bf16.mxu1 %v1356_v35 }
 0x29a   :  { %1359 = vmatpush1.bf16.msra.mxu1 %v1358_v38  ;;  %v460_v46 = vsel %vm106_vm2, %v1630_v42, %v1631_v41  ;;  %v459_v48 = vsel %vm106_vm2, %v1586_v39, %v1630_v42  ;;  %v480_v57 = vsel %vm127_vm3, %v1640_v44, %v1641_v43  ;;  %v479_v58 = vsel %vm127_vm3, %v1591_v49, %v1640_v44 }
 0x29b   :  { %v1644_v50 = vpop.permute.xlu0 %1643  ;;  %v1634_v51 = vpop.permute.xlu1 %1633  ;;  %v1360_v52 = vpack.c.bf16 %v460_v46, %v458_v45  ;;  %v1362_v53 = vpack.c.bf16 %v459_v48, %v457_v47  ;;  %v1605_v38 = vunpack.i.l.bf16 %v2084_v13  ;;  %v1611_v47 = vunpack.i.h.bf16 %v2088_v16 }
 0x29c   :  { %v1636_v55 = vunpack.i.h.bf16 %v1634_v51  ;;  %v1635_v56 = vunpack.i.l.bf16 %v1634_v51  ;;  %v1646_v59 = vunpack.i.h.bf16 %v1644_v50  ;;  %v1645_v60 = vunpack.i.l.bf16 %v1644_v50 }
 0x29d   :  { %1361 = vmatprep.subr.bf16.mxu1 %v1360_v52  ;;  %v1610_v51 = vunpack.i.l.bf16 %v2088_v16 }
 0x29e   :  { %1363 = vmatpush1.bf16.msra.mxu1 %v1362_v53  ;;  %v478_v61 = vsel %vm127_vm3, %v1635_v56, %v1636_v55  ;;  %v477_v62 = vsel %vm127_vm3, %v1590_v54, %v1635_v56  ;;  %v2105_v9 = vsel %vm148_vm4, %v1645_v60, %v1646_v59  ;;  %v2111_v12 = vsel %vm148_vm4, %v1595_v4, %v1645_v60 }
 0x29f   :  { %v1659_v63 = vpop.permute.xlu0 %1658  ;;  %v1649_v0 = vpop.permute.xlu1 %1648  ;;  %v1364_v1 = vpack.c.bf16 %v480_v57, %v478_v61  ;;  %v1366_v2 = vpack.c.bf16 %v479_v58, %v477_v62 }
 0x2a0   :  { %v1651_v5 = vunpack.i.h.bf16 %v1649_v0  ;;  %v1650_v6 = vunpack.i.l.bf16 %v1649_v0  ;;  %v1661_v7 = vunpack.i.h.bf16 %v1659_v63  ;;  %v1660_v8 = vunpack.i.l.bf16 %v1659_v63 }
 0x2a1   :  { %1365 = vmatprep.subr.bf16.mxu1 %v1364_v1 }
 0x2a2   :  { %1367 = vmatpush1.bf16.msra.mxu1 %v1366_v2  ;;  %v2108_v10 = vsel %vm148_vm4, %v1650_v6, %v1651_v5  ;;  %v2114_v17 = vsel %vm148_vm4, %v1596_v3, %v1650_v6  ;;  %v520_v25 = vsel %vm169_vm5, %v1660_v8, %v1661_v7  ;;  %v519_v26 = vsel %vm169_vm5, %v1601_v11, %v1660_v8  ;;  %v394_v11 = vld [vmem:[%s2391_s4] sm:$0xff] }
 0x2a3   :  { %v1664_v18 = vpop.permute.xlu0 %1663  ;;  %v1654_v19 = vpop.permute.xlu1 %1653  ;;  %v1368_v20 = vpack.c.bf16 %v2108_v10, %v2105_v9  ;;  %v1370_v21 = vpack.c.bf16 %v2114_v17, %v2111_v12 }
 0x2a4   :  { %v1656_v23 = vunpack.i.h.bf16 %v1654_v19  ;;  %v1655_v24 = vunpack.i.l.bf16 %v1654_v19  ;;  %v1666_v27 = vunpack.i.h.bf16 %v1664_v18  ;;  %v1665_v28 = vunpack.i.l.bf16 %v1664_v18  ;;  %v397_v18 = vld [vmem:[%s2391_s4 + $0x18] sm:$0xff]  ;;  %v396_v19 = vld [vmem:[%s2391_s4 + $0x10] sm:$0xff] }
 0x2a5   :  { %1369 = vmatprep.subr.bf16.mxu1 %v1368_v20  ;;  %v1855_v20 = vmov 0.0  }
 0x2a6   :  { %1371 = vmatpush1.bf16.msra.mxu1 %v1370_v21  ;;  %v518_v29 = vsel %vm169_vm5, %v1655_v24, %v1656_v23  ;;  %v517_v30 = vsel %vm169_vm5, %v1600_v22, %v1655_v24  ;;  %v538_v43 = vsel %vm190_vm6, %v1665_v28, %v1666_v27  ;;  %v537_v45 = vsel %vm190_vm6, %v1605_v38, %v1665_v28 }
 0x2a7   :  { %v1679_v31 = vpop.permute.xlu0 %1678  ;;  %v1669_v32 = vpop.permute.xlu1 %1668  ;;  %v1372_v33 = vpack.c.bf16 %v520_v25, %v518_v29  ;;  %v1374_v35 = vpack.c.bf16 %v519_v26, %v517_v30  ;;  %762 = vmatprep.mubr.f32.mxu0 %v1855_v20 }
 0x2a8   :  { %v1671_v39 = vunpack.i.h.bf16 %v1669_v32  ;;  %v1670_v40 = vunpack.i.l.bf16 %v1669_v32  ;;  %v1681_v41 = vunpack.i.h.bf16 %v1679_v31  ;;  %v1680_v42 = vunpack.i.l.bf16 %v1679_v31 }
 0x2a9   :  { %1373 = vmatprep.subr.bf16.mxu1 %v1372_v33 }
 0x2aa   :  { %1375 = vmatpush1.bf16.msra.mxu1 %v1374_v35  ;;  %v540_v44 = vsel %vm190_vm6, %v1670_v40, %v1671_v39  ;;  %v539_v46 = vsel %vm190_vm6, %v1606_v14, %v1670_v40  ;;  %v560_v54 = vsel %vm211_vm7, %v1680_v42, %v1681_v41  ;;  %v559_v55 = vsel %vm211_vm7, %v1611_v47, %v1680_v42  ;;  %v400_v39 = vld [vmem:[%s2394_s6] sm:$0xff]  ;;  %v401_v40 = vld [vmem:[%s2394_s6 + $0x8] sm:$0xff] }
 0x2ab   :  { %v1684_v48 = vpop.permute.xlu0 %1683  ;;  %v1674_v49 = vpop.permute.xlu1 %1673  ;;  %v1376_v50 = vpack.c.bf16 %v540_v44, %v538_v43  ;;  %v1378_v13 = vpack.c.bf16 %v539_v46, %v537_v45 }
 0x2ac   :  { %v1676_v52 = vunpack.i.h.bf16 %v1674_v49  ;;  %v1675_v53 = vunpack.i.l.bf16 %v1674_v49  ;;  %v1686_v56 = vunpack.i.h.bf16 %v1684_v48  ;;  %v1685_v57 = vunpack.i.l.bf16 %v1684_v48 }
 0x2ad   :  { %1377 = vmatprep.subr.bf16.mxu1 %v1376_v50 }
 0x2ae   :  { %1379 = vmatpush1.bf16.msra.mxu1 %v1378_v13  ;;  %v558_v58 = vsel %vm211_vm7, %v1675_v53, %v1676_v52  ;;  %v557_v59 = vsel %vm211_vm7, %v1610_v51, %v1675_v53  ;;  %v578_v3 = vsel %vm232_vm8, %v1685_v57, %v1686_v56 }
 0x2af   :  { %v1694_v60 = vpop.permute.xlu0 %1693  ;;  %v1689_v61 = vpop.permute.xlu1 %1688  ;;  %v1380_v62 = vpack.c.bf16 %v560_v54, %v558_v58  ;;  %v1382_v63 = vpack.c.bf16 %v559_v55, %v557_v59 }
 0x2b0   :  { %v1696_v0 = vunpack.i.h.bf16 %v1694_v60  ;;  %v1695_v16 = vunpack.i.l.bf16 %v1694_v60  ;;  %v1691_v1 = vunpack.i.h.bf16 %v1689_v61  ;;  %v1690_v2 = vunpack.i.l.bf16 %v1689_v61 }
 0x2b1   :  { %1381 = vmatprep.subr.bf16.mxu1 %v1380_v62 }
 0x2b2   :  { %1383 = vmatpush1.bf16.msra.mxu1 %v1382_v63  ;;  %v580_v4 = vsel %vm232_vm8, %v1690_v2, %v1691_v1  ;;  %v577_v5 = vsel %vm232_vm8, %v1695_v16, %v1685_v57  ;;  %v579_v6 = vsel %vm232_vm8, %v1696_v0, %v1690_v2 }
 0x2b3   :  { %v1384_v7 = vpack.c.bf16 %v580_v4, %v578_v3  ;;  %v1386_v8 = vpack.c.bf16 %v579_v6, %v577_v5 }
 0x2b5   :  { %1385 = vmatprep.subr.bf16.mxu1 %v1384_v7 }
 0x2b6   :  { %1387 = vmatpush1.bf16.msra.mxu1 %v1386_v8 }
 0x2b9   :  { %666 = vmatmul.mubr.f32.vlgmr.msra.gmra.mrb[0].mxu1 %v394_v11 }
 0x2ba   :  { %1301 = vmatprep.mubr.msk.f32.mxu1 %vm251_vm0, %v397_v18 }
 0x2bd   :  { %672 = vmatmul.mubr.f32.gmra.mrb[2].mxu1 %v396_v19 }
 0x2c0   :  { %v588_v23 = vpop.permute.xlu1 %587  ;;  %v593_v25 = vpop.permute.xlu0 %592 }
 0x2c4   :  { %v685_v41 = vpop.permute.xlu1 %684  ;;  %v690_v47 = vpop.permute.xlu0 %689 }
 0x38c   :  { %v667_v21 = vpop.f32.mrb[0].mxu1 }
 0x38d   :  { %v669_v22 = vpop.f32.mrb[1].mxu1  ;;  %v668_v24 = vadd.f32 %v667_v21, %v588_v23 }
 0x38e   :  { %v670_v26 = vadd.f32 %v669_v22, %v588_v23 }
 0x38f   :  { %v678_v31 = vmax.f32 %v668_v24, 0.0 }
 0x390   :  { %v673_v27 = vpop.f32.mrb[2].mxu1  ;;  %v679_v33 = vmax.f32 %v670_v26, 0.0 }
 0x391   :  { %v674_v28 = vadd.f32 %v673_v27, %v593_v25  ;;  %v675_v29 = vpop.f32.mrb[3].mxu1 }
 0x392   :  { %v676_v30 = vadd.f32 %v675_v29, %v593_v25  ;;  %v838_v29 = vld [vmem:[%s2396_s9 + $0x8] sm:$0xff] }
 0x393   :  { %v680_v32 = vmax.f32 %v674_v28, 0.0  ;;  %v834_v28 = vld [vmem:[%s2395_s8 + $0x8] sm:$0xff] }
 0x394   :  { %v681_v35 = vmax.f32 %v676_v30, 0.0  ;;  %1304 = vmatprep.mubr.msk.f32.mxu1 %vm251_vm0, %v834_v28  ;;  %v837_v30 = vld [vmem:[%s2396_s9] sm:$0xff] }
 0x395   :  { %v1390_v14 = vpack.c.bf16 %v680_v32, %v678_v31  ;;  %v842_v31 = vld [vmem:[%s2397_s11 + $0x8] sm:$0xff]  ;;  %v841_v32 = vld [vmem:[%s2397_s11] sm:$0xff] }
 0x396   :  { %v1388_v38 = vpack.c.bf16 %v681_v35, %v679_v33 }
 0x398   :  { %1389 = vmatprep.subr.bf16.mxu0 %v1388_v38 }
 0x399   :  { %1391 = vmatpush1.bf16.msra.mxu0 %v1390_v14 }
 0x39c   :  { %1302 = vmatmul.mubr.msk.f32.vlgmr.msra.gmra.mrb[4].mxu0 %vm251_vm0, %v400_v39 }
 0x39d   :  { %768 = vmatprep.mubr.f32.mxu0 %v1855_v20 }
 0x3a0   :  { %1303 = vmatmul.mubr.msk.f32.gmra.mrb[6].mxu0 %vm251_vm0, %v401_v40 }
 0x3a1   :  { %1201 = vmatprep.mubr.f32.mxu0 %v1855_v20 }
 0x46f   :  { %v764_v42 = vpop.f32.mrb[4].mxu0 }
 0x470   :  { %v765_v43 = vadd.f32 %v764_v42, %v685_v41  ;;  %v766_v44 = vpop.f32.mrb[5].mxu0 }
 0x471   :  { %v767_v45 = vadd.f32 %v766_v44, %v685_v41 }
 0x472   :  { %v775_v46 = vadd.f32 %v765_v43, %v2111_v12  ;;  %v779_v12 = vld [vmem:[%s2390_s1] sm:$0x7] }
 0x473   :  { %v776_v48 = vadd.f32 %v767_v45, %v2105_v9  ;;  %v770_v49 = vpop.f32.mrb[6].mxu0  ;;  %vm780_vm9 = vcmp.gt.f32.partialorder %v779_v12, 0.5 }
 0x474   :  { %v771_v50 = vadd.f32 %v770_v49, %v690_v47  ;;  %v772_v13 = vpop.f32.mrb[7].mxu0  ;;  %v781_v9 = vsel %vm780_vm9, 1, %v1853_v15 }
 0x475   :  { %v773_v51 = vadd.f32 %v772_v13, %v690_v47  ;;  %v1697_v52 = vpack.i.bf16 %v776_v48, %v775_v46  ;;  %v793_v56 = vrot.slane %v781_v9, %v2017_v34  ;;  %v785_v57 = vrot.slane %v781_v9, %v2020_v36 }
 0x476   :  { %v777_v53 = vadd.f32 %v771_v50, %v2114_v17  ;;  %v789_v17 = vrot.slane %v781_v9, %v2022_v37 }
 0x477   :  { %v778_v54 = vadd.f32 %v773_v51, %v2108_v10  ;;  %1698 = vrot.lane.b32.xlu1 %v1697_v52, %s1854_s15  ;;  %vm796_vm11 = vcmp.eq.s32.totalorder %v793_v56, 1  ;;  %vm794_vm12 = vcmp.eq.s32.totalorder %v785_v57, 1 }
 0x478   :  { %vm2176_vm13 = vcmp.eq.s32.totalorder %v789_v17, 1 }
 0x479   :  { %v1702_v55 = vpack.i.bf16 %v778_v54, %v777_v53  ;;  %vm1842_vm15 = vmpackc.low %vm2176_vm13, %vm2176_vm13 }
 0x47b   :  { %1703 = vrot.lane.b32.xlu0 %v1702_v55, %s1854_s15 }
 0x4e9   :  { %v1699_v58 = vpop.permute.xlu1 %1698 }
 0x4ea   :  { %v1701_v10 = vunpack.i.h.bf16 %v1699_v58  ;;  %v1700_v59 = vunpack.i.l.bf16 %v1699_v58 }
 0x4ec   :  { %v809_v62 = vsel %vm369_vm10, %v1700_v59, %v1701_v10  ;;  %v819_v16 = vsel %vm796_vm11, %v1701_v10, 0.0  ;;  %v817_v1 = vsel %vm794_vm12, %v1700_v59, 0.0 }
 0x4ed   :  { %v1704_v60 = vpop.permute.xlu0 %1703  ;;  %v818_v5 = vsel %vm2176_vm13, %v809_v62, 0.0 }
 0x4ee   :  { %v1706_v63 = vunpack.i.h.bf16 %v1704_v60  ;;  %v1705_v0 = vunpack.i.l.bf16 %v1704_v60 }
 0x4f0   :  { %v822_v2 = vsel %vm796_vm11, %v1706_v63, 0.0  ;;  %v810_v3 = vsel %vm369_vm10, %v1705_v0, %v1706_v63  ;;  %v820_v4 = vsel %vm794_vm12, %v1705_v0, 0.0 }
 0x4f1   :  { %v821_v6 = vsel %vm2176_vm13, %v810_v3, 0.0  ;;  %v823_v7 = vpack.c.bf16 %v820_v4, %v817_v1  ;;  %v825_v8 = vpack.c.bf16 %v822_v2, %v819_v16  ;;  %v1843_v11 = vpack.c.bf16 %v810_v3, %v809_v62 }
 0x4f3   :  { %826 = vst.msk [vmem:[#allocation3] sm:$0xff] %vm387_vm14, %v823_v7  ;;  %1844 = vmatprep.subr.msk.bf16.mxu1 %vm1842_vm15, %v1843_v11 }
 0x4f4   :  { %828 = vst.msk [vmem:[#allocation3 + $0x10] sm:$0xff] %vm369_vm10, %v825_v8 }
 0x4fa   :  { %v843_v18 = vld [vmem:[#allocation3] sm:$0xff] }
 0x4fb   :  { %1395 = vmatpush1.bf16.msra.mxu1 %v843_v18  ;;  %v852_v19 = vunpack.c.l.bf16 %v843_v18  ;;  %v855_v21 = vunpack.c.h.bf16 %v843_v18  ;;  %v851_v23 = vld [vmem:[#allocation3 + $0x10] sm:$0xff] }
 0x4fc   :  { %v857_v24 = vunpack.c.h.bf16 %v851_v23  ;;  %v854_v26 = vunpack.c.l.bf16 %v851_v23 }
 0x4fd   :  { %v1712_v22 = vpack.i.bf16 %v855_v21, %v852_v19 }
 0x4fe   :  { %v1747_v25 = vpack.i.bf16 %v857_v24, %v821_v6  ;;  %v1752_v27 = vpack.i.bf16 %v854_v26, %v818_v5 }
 0x4ff   :  { %1713 = vrot.lane.b32.xlu0 %v1712_v22, %s1846_s0  ;;  %1708 = vrot.lane.b32.xlu1 %v1712_v22, %s1845_s27 }
 0x503   :  { %1723 = vrot.lane.b32.xlu0 %v1712_v22, %s1848_s29  ;;  %1718 = vrot.lane.b32.xlu1 %v1712_v22, %s1847_s28 }
 0x507   :  { %1733 = vrot.lane.b32.xlu0 %v1712_v22, %s1850_s13  ;;  %1728 = vrot.lane.b32.xlu1 %v1712_v22, %s1849_s30 }
 0x50b   :  { %1738 = vrot.lane.b32.xlu1 %v1712_v22, %s1851_s14  ;;  %1748 = vrot.lane.b32.xlu0 %v1747_v25, %s1845_s27 }
 0x50f   :  { %1753 = vrot.lane.b32.xlu0 %v1752_v27, %s1846_s0  ;;  %1743 = vrot.lane.b32.xlu1 %v1752_v27, %s1845_s27 }
 0x513   :  { %1768 = vrot.lane.b32.xlu0 %v1747_v25, %s1847_s28  ;;  %1758 = vrot.lane.b32.xlu1 %v1747_v25, %s1846_s0 }
 0x517   :  { %1773 = vrot.lane.b32.xlu0 %v1752_v27, %s1848_s29  ;;  %1763 = vrot.lane.b32.xlu1 %v1752_v27, %s1847_s28 }
 0x51b   :  { %1788 = vrot.lane.b32.xlu0 %v1747_v25, %s1849_s30  ;;  %1778 = vrot.lane.b32.xlu1 %v1747_v25, %s1848_s29 }
 0x51f   :  { %1793 = vrot.lane.b32.xlu0 %v1752_v27, %s1850_s13  ;;  %1783 = vrot.lane.b32.xlu1 %v1752_v27, %s1849_s30 }
 0x523   :  { %1808 = vrot.lane.b32.xlu0 %v1747_v25, %s1851_s14  ;;  %1798 = vrot.lane.b32.xlu1 %v1747_v25, %s1850_s13 }
 0x527   :  { %1813 = vrot.lane.b32.xlu0 %v1752_v27, %s1852_s17  ;;  %1803 = vrot.lane.b32.xlu1 %v1752_v27, %s1851_s14 }
 0x52b   :  { %1823 = vrot.lane.b32.xlu0 %v1712_v22, %s1852_s17  ;;  %1818 = vrot.lane.b32.xlu1 %v1747_v25, %s1852_s17 }
 0x52f   :  { %1031 = vperm.xlu0 %1565, %v838_v29   ;;  %1026 = vperm.xlu1 %1566, %v837_v30  }
 0x533   :  { %1128 = vperm.xlu0 %1565, %v842_v31   ;;  %1123 = vperm.xlu1 %1566, %v841_v32  }
 0x571   :  { %v1714_v33 = vpop.permute.xlu0 %1713  ;;  %v1709_v35 = vpop.permute.xlu1 %1708 }
 0x572   :  { %v1711_v45 = vunpack.i.h.bf16 %v1709_v35  ;;  %v1710_v48 = vunpack.i.l.bf16 %v1709_v35  ;;  %v1716_v58 = vunpack.i.h.bf16 %v1714_v33  ;;  %v1715_v17 = vunpack.i.l.bf16 %v1714_v33 }
 0x575   :  { %v2231_v14 = vpop.permute.xlu0 %1723  ;;  %v1719_v38 = vpop.permute.xlu1 %1718 }
 0x576   :  { %v1721_v1 = vunpack.i.h.bf16 %v1719_v38  ;;  %v1720_v6 = vunpack.i.l.bf16 %v1719_v38  ;;  %v1726_v28 = vunpack.i.h.bf16 %v2231_v14  ;;  %v1725_v29 = vunpack.i.l.bf16 %v2231_v14 }
 0x579   :  { %v2233_v39 = vpop.permute.xlu0 %1733  ;;  %v2235_v40 = vpop.permute.xlu1 %1728 }
 0x57a   :  { %v1731_v14 = vunpack.i.h.bf16 %v2235_v40 }
 0x57d   :  { %v2237_v41 = vpop.permute.xlu1 %1738  ;;  %v1749_v42 = vpop.permute.xlu0 %1748 }
 0x57e   :  { %v1751_v43 = vunpack.i.h.bf16 %v1749_v42  ;;  %v1750_v44 = vunpack.i.l.bf16 %v1749_v42 }
 0x580   :  { %v878_v13 = vsel %vm85_vm1, %v1711_v45, %v1750_v44  ;;  %v879_v51 = vsel %vm85_vm1, %v1750_v44, %v1751_v43 }
 0x581   :  { %v1754_v46 = vpop.permute.xlu0 %1753  ;;  %v1744_v47 = vpop.permute.xlu1 %1743 }
 0x582   :  { %v1746_v49 = vunpack.i.h.bf16 %v1744_v47  ;;  %v1745_v50 = vunpack.i.l.bf16 %v1744_v47  ;;  %v1756_v52 = vunpack.i.h.bf16 %v1754_v46  ;;  %v1755_v53 = vunpack.i.l.bf16 %v1754_v46 }
 0x584   :  { %v876_v54 = vsel %vm85_vm1, %v1710_v48, %v1745_v50  ;;  %v877_v55 = vsel %vm85_vm1, %v1745_v50, %v1746_v49  ;;  %v896_v62 = vsel %vm106_vm2, %v1715_v17, %v1755_v53  ;;  %v897_v0 = vsel %vm106_vm2, %v1755_v53, %v1756_v52 }
 0x585   :  { %v1398_v12 = vpack.c.bf16 %v878_v13, %v876_v54  ;;  %v1769_v9 = vpop.permute.xlu0 %1768  ;;  %v1759_v56 = vpop.permute.xlu1 %1758  ;;  %v1396_v57 = vpack.c.bf16 %v879_v51, %v877_v55  ;;  %v1730_v48 = vunpack.i.l.bf16 %v2235_v40  ;;  %v1736_v40 = vunpack.i.h.bf16 %v2233_v39 }
 0x586   :  { %v1761_v10 = vunpack.i.h.bf16 %v1759_v56  ;;  %v1760_v59 = vunpack.i.l.bf16 %v1759_v56  ;;  %v1771_v60 = vunpack.i.h.bf16 %v1769_v9  ;;  %v1770_v61 = vunpack.i.l.bf16 %v1769_v9 }
 0x587   :  { %1397 = vmatprep.subr.bf16.mxu1 %v1396_v57 }
 0x588   :  { %v898_v63 = vsel %vm106_vm2, %v1716_v58, %v1760_v59  ;;  %1399 = vmatpush1.bf16.msra.mxu1 %v1398_v12  ;;  %v899_v16 = vsel %vm106_vm2, %v1760_v59, %v1761_v10  ;;  %v918_v11 = vsel %vm127_vm3, %v1721_v1, %v1770_v61  ;;  %v919_v18 = vsel %vm127_vm3, %v1770_v61, %v1771_v60 }
 0x589   :  { %v1402_v2 = vpack.c.bf16 %v898_v63, %v896_v62  ;;  %v1774_v3 = vpop.permute.xlu0 %1773  ;;  %v1764_v4 = vpop.permute.xlu1 %1763  ;;  %v1400_v5 = vpack.c.bf16 %v899_v16, %v897_v0  ;;  %v1735_v58 = vunpack.i.l.bf16 %v2233_v39  ;;  %v1741_v16 = vunpack.i.h.bf16 %v2237_v41 }
 0x58a   :  { %v1766_v7 = vunpack.i.h.bf16 %v1764_v4  ;;  %v1765_v8 = vunpack.i.l.bf16 %v1764_v4  ;;  %v1776_v19 = vunpack.i.h.bf16 %v1774_v3  ;;  %v1775_v21 = vunpack.i.l.bf16 %v1774_v3 }
 0x58b   :  { %1401 = vmatprep.subr.bf16.mxu1 %v1400_v5  ;;  %v1740_v4 = vunpack.i.l.bf16 %v2237_v41 }
 0x58c   :  { %v916_v22 = vsel %vm127_vm3, %v1720_v6, %v1765_v8  ;;  %1403 = vmatpush1.bf16.msra.mxu1 %v1402_v2  ;;  %v917_v23 = vsel %vm127_vm3, %v1765_v8, %v1766_v7  ;;  %v2254_v35 = vsel %vm148_vm4, %v1725_v29, %v1775_v21  ;;  %v2260_v42 = vsel %vm148_vm4, %v1775_v21, %v1776_v19 }
 0x58d   :  { %v1406_v24 = vpack.c.bf16 %v918_v11, %v916_v22  ;;  %v1789_v25 = vpop.permute.xlu0 %1788  ;;  %v1779_v26 = vpop.permute.xlu1 %1778  ;;  %v1404_v27 = vpack.c.bf16 %v919_v18, %v917_v23  ;;  %vm1286_vm3 = vcmask 1043544  }
 0x58e   :  { %v1781_v30 = vunpack.i.h.bf16 %v1779_v26  ;;  %v1780_v31 = vunpack.i.l.bf16 %v1779_v26  ;;  %v1791_v32 = vunpack.i.h.bf16 %v1789_v25  ;;  %v1790_v33 = vunpack.i.l.bf16 %v1789_v25 }
 0x58f   :  { %1405 = vmatprep.subr.bf16.mxu1 %v1404_v27 }
 0x590   :  { %v2257_v38 = vsel %vm148_vm4, %v1726_v28, %v1780_v31  ;;  %1407 = vmatpush1.bf16.msra.mxu1 %v1406_v24  ;;  %v2263_v43 = vsel %vm148_vm4, %v1780_v31, %v1781_v30  ;;  %v958_v13 = vsel %vm169_vm5, %v1731_v14, %v1790_v33  ;;  %v959_v51 = vsel %vm169_vm5, %v1790_v33, %v1791_v32 }
 0x591   :  { %v1410_v44 = vpack.c.bf16 %v2257_v38, %v2254_v35  ;;  %v1794_v45 = vpop.permute.xlu0 %1793  ;;  %v1784_v46 = vpop.permute.xlu1 %1783  ;;  %v1408_v47 = vpack.c.bf16 %v2263_v43, %v2260_v42 }
 0x592   :  { %v1786_v49 = vunpack.i.h.bf16 %v1784_v46  ;;  %v1785_v50 = vunpack.i.l.bf16 %v1784_v46  ;;  %v1796_v52 = vunpack.i.h.bf16 %v1794_v45  ;;  %v1795_v53 = vunpack.i.l.bf16 %v1794_v45  ;;  %v836_v45 = vld [vmem:[%s2395_s8 + $0x18] sm:$0xff]  ;;  %v835_v46 = vld [vmem:[%s2395_s8 + $0x10] sm:$0xff] }
 0x593   :  { %1409 = vmatprep.subr.bf16.mxu1 %v1408_v47 }
 0x594   :  { %v956_v54 = vsel %vm169_vm5, %v1730_v48, %v1785_v50  ;;  %1411 = vmatpush1.bf16.msra.mxu1 %v1410_v44  ;;  %v957_v55 = vsel %vm169_vm5, %v1785_v50, %v1786_v49  ;;  %v976_v61 = vsel %vm190_vm6, %v1735_v58, %v1795_v53  ;;  %v977_v63 = vsel %vm190_vm6, %v1795_v53, %v1796_v52  ;;  %v833_v44 = vld [vmem:[%s2395_s8] sm:$0xff] }
 0x595   :  { %v1414_v12 = vpack.c.bf16 %v958_v13, %v956_v54  ;;  %v1809_v9 = vpop.permute.xlu0 %1808  ;;  %v1799_v56 = vpop.permute.xlu1 %1798  ;;  %v1412_v57 = vpack.c.bf16 %v959_v51, %v957_v55  ;;  %vm1287_vm5 = vcmask 1047556  }
 0x596   :  { %v1801_v17 = vunpack.i.h.bf16 %v1799_v56  ;;  %v1800_v10 = vunpack.i.l.bf16 %v1799_v56  ;;  %v1811_v59 = vunpack.i.h.bf16 %v1809_v9  ;;  %v1810_v60 = vunpack.i.l.bf16 %v1809_v9 }
 0x597   :  { %1413 = vmatprep.subr.bf16.mxu1 %v1412_v57 }
 0x598   :  { %v978_v62 = vsel %vm190_vm6, %v1736_v40, %v1800_v10  ;;  %1415 = vmatpush1.bf16.msra.mxu1 %v1414_v12  ;;  %v979_v0 = vsel %vm190_vm6, %v1800_v10, %v1801_v17  ;;  %v998_v7 = vsel %vm211_vm7, %v1741_v16, %v1810_v60  ;;  %v999_v8 = vsel %vm211_vm7, %v1810_v60, %v1811_v59  ;;  %v839_v17 = vld [vmem:[%s2398_s10] sm:$0xff]  ;;  %v840_v10 = vld [vmem:[%s2398_s10 + $0x8] sm:$0xff] }
 0x599   :  { %v1418_v1 = vpack.c.bf16 %v978_v62, %v976_v61  ;;  %v1814_v2 = vpop.permute.xlu0 %1813  ;;  %v1804_v3 = vpop.permute.xlu1 %1803  ;;  %v1416_v39 = vpack.c.bf16 %v979_v0, %v977_v63  ;;  %vm1290_vm6 = vcmask 84992  }
 0x59a   :  { %v1806_v5 = vunpack.i.h.bf16 %v1804_v3  ;;  %v1805_v6 = vunpack.i.l.bf16 %v1804_v3  ;;  %v1816_v11 = vunpack.i.h.bf16 %v1814_v2  ;;  %v1815_v18 = vunpack.i.l.bf16 %v1814_v2 }
 0x59b   :  { %1417 = vmatprep.subr.bf16.mxu1 %v1416_v39 }
 0x59c   :  { %v996_v19 = vsel %vm211_vm7, %v1740_v4, %v1805_v6  ;;  %1419 = vmatpush1.bf16.msra.mxu1 %v1418_v1  ;;  %v997_v21 = vsel %vm211_vm7, %v1805_v6, %v1806_v5  ;;  %v1017_v31 = vsel %vm232_vm8, %v1815_v18, %v1816_v11  ;;  %vm2356_vm7 = vmor %vm1287_vm5, %vm1286_vm3 }
 0x59d   :  { %v1422_v22 = vpack.c.bf16 %v998_v7, %v996_v19  ;;  %v1824_v23 = vpop.permute.xlu0 %1823  ;;  %v1819_v24 = vpop.permute.xlu1 %1818  ;;  %v1420_v25 = vpack.c.bf16 %v999_v8, %v997_v21 }
 0x59e   :  { %v1826_v26 = vunpack.i.h.bf16 %v1824_v23  ;;  %v1825_v41 = vunpack.i.l.bf16 %v1824_v23  ;;  %v1821_v27 = vunpack.i.h.bf16 %v1819_v24  ;;  %v1820_v28 = vunpack.i.l.bf16 %v1819_v24 }
 0x59f   :  { %1421 = vmatprep.subr.bf16.mxu1 %v1420_v25 }
 0x5a0   :  { %v1016_v29 = vsel %vm232_vm8, %v1825_v41, %v1815_v18  ;;  %v1018_v30 = vsel %vm232_vm8, %v1826_v26, %v1820_v28  ;;  %1423 = vmatpush1.bf16.msra.mxu1 %v1422_v22  ;;  %v1019_v32 = vsel %vm232_vm8, %v1820_v28, %v1821_v27 }
 0x5a1   :  { %v1426_v33 = vpack.c.bf16 %v1018_v30, %v1016_v29  ;;  %v1424_v14 = vpack.c.bf16 %v1019_v32, %v1017_v31 }
 0x5a3   :  { %1425 = vmatprep.subr.bf16.mxu1 %v1424_v14 }
 0x5a4   :  { %1427 = vmatpush1.bf16.msra.mxu1 %v1426_v33 }
 0x5a7   :  { %1105 = vmatmul.mubr.f32.vlgmr.msra.gmra.mrb[4].mxu1 %v833_v44 }
 0x5a8   :  { %1305 = vmatprep.mubr.msk.f32.mxu1 %vm251_vm0, %v836_v45 }
 0x5ab   :  { %1111 = vmatmul.mubr.f32.gmra.mrb[6].mxu1 %v835_v46 }
 0x5ae   :  { %v1027_v49 = vpop.permute.xlu1 %1026  ;;  %v1032_v13 = vpop.permute.xlu0 %1031 }
 0x5b2   :  { %v1129_v0 = vpop.permute.xlu0 %1128 }
 0x67a   :  { %v1106_v47 = vpop.f32.mrb[4].mxu1 }
 0x67b   :  { %v1108_v48 = vpop.f32.mrb[5].mxu1  ;;  %v1107_v50 = vadd.f32 %v1106_v47, %v1027_v49 }
 0x67c   :  { %v1109_v51 = vadd.f32 %v1108_v48, %v1027_v49 }
 0x67d   :  { %v1117_v12 = vmax.f32 %v1107_v50, 0.0 }
 0x67e   :  { %v1112_v52 = vpop.f32.mrb[6].mxu1  ;;  %v1118_v56 = vmax.f32 %v1109_v51, 0.0 }
 0x67f   :  { %v1113_v53 = vadd.f32 %v1112_v52, %v1032_v13  ;;  %v1114_v54 = vpop.f32.mrb[7].mxu1 }
 0x680   :  { %v1115_v55 = vadd.f32 %v1114_v54, %v1032_v13 }
 0x681   :  { %v1119_v9 = vmax.f32 %v1113_v53, 0.0 }
 0x682   :  { %v1120_v57 = vmax.f32 %v1115_v55, 0.0 }
 0x683   :  { %v1430_v40 = vpack.c.bf16 %v1119_v9, %v1117_v12 }
 0x684   :  { %v1428_v58 = vpack.c.bf16 %v1120_v57, %v1118_v56 }
 0x686   :  { %1429 = vmatprep.subr.bf16.mxu0 %v1428_v58 }
 0x687   :  { %1431 = vmatpush1.bf16.msra.mxu0 %v1430_v40 }
 0x68a   :  { %1306 = vmatmul.mubr.msk.f32.vlgmr.msra.gmra.mrb[8].mxu0 %vm251_vm0, %v839_v17 }
 0x68b   :  { %1207 = vmatprep.mubr.f32.mxu0 %v1855_v20  ;;  %v1124_v20 = vpop.permute.xlu1 %1123 }
 0x68e   :  { %1307 = vmatmul.mubr.msk.f32.gmra.mrb[10].mxu0 %vm251_vm0, %v840_v10 }
 0x75d   :  { %v1203_v59 = vpop.f32.mrb[8].mxu0 }
 0x75e   :  { %v1204_v60 = vadd.f32 %v1203_v59, %v1124_v20  ;;  %v1205_v61 = vpop.f32.mrb[9].mxu0 }
 0x75f   :  { %v1206_v62 = vadd.f32 %v1205_v61, %v1124_v20 }
 0x760   :  { %v1214_v63 = vadd.f32 %v1204_v60, %v2254_v35  ;;  %v1222_v35 = vld [vmem:[%s2390_s1] sm:$0x7] }
 0x761   :  { %v1215_v16 = vadd.f32 %v1206_v62, %v2260_v42  ;;  %v1209_v1 = vpop.f32.mrb[10].mxu0  ;;  %vm1223_vm0 = vcmp.gt.f32.partialorder %v1222_v35, 0.5 }
 0x762   :  { %v1218_v2 = vmax.f32 %v1214_v63, 0.0  ;;  %v1210_v3 = vadd.f32 %v1209_v1, %v1129_v0  ;;  %v1211_v39 = vpop.f32.mrb[11].mxu0  ;;  %v1224_v42 = vsel %vm1223_vm0, 1, %v1853_v15 }
 0x763   :  { %v1219_v4 = vmax.f32 %v1215_v16, 0.0  ;;  %v1212_v5 = vadd.f32 %v1211_v39, %v1129_v0  ;;  %v1228_v21 = vrot.slane %v1224_v42, %v2020_v36 }
 0x764   :  { %v1216_v6 = vadd.f32 %v1210_v3, %v2257_v38  ;;  %v1236_v38 = vrot.slane %v1224_v42, %v2017_v34 }
 0x765   :  { %v1217_v7 = vadd.f32 %v1212_v5, %v2263_v43  ;;  %v1827_v8 = vpack.i.bf16 %v1219_v4, %v1218_v2  ;;  %v1232_v43 = vrot.slane %v1224_v42, %v2022_v37  ;;  %vm2339_vm1 = vcmp.eq.s32.totalorder %v1228_v21, 1 }
 0x766   :  { %v1220_v11 = vmax.f32 %v1216_v6, 0.0  ;;  %vm2343_vm2 = vcmp.eq.s32.totalorder %v1236_v38, 1 }
 0x767   :  { %v1221_v18 = vmax.f32 %v1217_v7, 0.0  ;;  %1828 = vrot.lane.b32.xlu1 %v1827_v8, %s1854_s15  ;;  %vm2347_vm4 = vcmp.eq.s32.totalorder %v1232_v43, 1 }
 0x769   :  { %v1832_v19 = vpack.i.bf16 %v1221_v18, %v1220_v11 }
 0x76b   :  { %1833 = vrot.lane.b32.xlu0 %v1832_v19, %s1854_s15 }
 0x7d9   :  { %v1829_v24 = vpop.permute.xlu1 %1828 }
 0x7da   :  { %v1831_v15 = vunpack.i.h.bf16 %v1829_v24  ;;  %v1830_v36 = vunpack.i.l.bf16 %v1829_v24 }
 0x7dc   :  { %v1262_v34 = vsel %vm2343_vm2, %v1831_v15, 0.0  ;;  %v1252_v37 = vsel %vm369_vm10, %v1830_v36, %v1831_v15  ;;  %v1260_v26 = vsel %vm2339_vm1, %v1830_v36, 0.0 }
 0x7dd   :  { %v1313_v27 = vpack.c.bf16 %v1262_v34, %v1262_v34  ;;  %v1261_v28 = vsel %vm2347_vm4, %v1252_v37, 0.0  ;;  %v1834_v29 = vpop.permute.xlu0 %1833 }
 0x7de   :  { %v1312_v30 = vpack.c.bf16 %v1261_v28, %v1260_v26  ;;  %v1836_v31 = vunpack.i.h.bf16 %v1834_v29  ;;  %v1835_v32 = vunpack.i.l.bf16 %v1834_v29 }
 0x7df   :  { %1291 = vst.msk [vmem:[%s2399_s12 + $0x8] sm:$0xf] %vm1290_vm6, %v1313_v27 }
 0x7e0   :  { %1289 = vst.msk [vmem:[%s2399_s12] sm:$0xff] %vm2356_vm7, %v1312_v30  ;;  %v1265_v33 = vsel %vm2343_vm2, %v1836_v31, 0.0  ;;  %v1253_v14 = vsel %vm369_vm10, %v1835_v32, %v1836_v31  ;;  %v1263_v44 = vsel %vm2339_vm1, %v1835_v32, 0.0 }
 0x7e1   :  { %v1315_v45 = vpack.c.bf16 %v1265_v33, %v1265_v33  ;;  %v1264_v46 = vsel %vm2347_vm4, %v1253_v14, 0.0 }
 0x7e2   :  { %v1314_v47 = vpack.c.bf16 %v1264_v46, %v1263_v44 }
 0x7e3   :  { %1293 = vst.msk [vmem:[%s2399_s12 + $0x14] sm:$0xf] %vm1290_vm6, %v1315_v45 }
 0x7e4   :  { %1292 = vst.msk [vmem:[%s2399_s12 + $0xc] sm:$0xff] %vm2356_vm7, %v1314_v47 }

// kernel: _lambda_.8
= control target key start
LH: loop header
LB: loop body
LE: loop exit
PB: predicated region body
PF: predicated region fallthrough
CT: control target
= control target key end

     0   :  { %s568_s20 = smov 123   ;;  %s569_s21 = smov 122   ;;  %v571_v34 = vmov 0   ;;  %vm136_vm0 = vcmask 1006592   ;;  %vm161_vm1 = vcmask 998400   ;;  %vm75_vm2 = vcmask 1039360   ;;  %s697_s0 = inlined_call_operand.vmem [shape: bf16[4,16,256], index: 0, kind: input, shape index: {}]   ;;  %s698_s1 = inlined_call_operand.vmem [shape: f32[16,256], index: 1, kind: input, shape index: {}]   ;;  %s699_s2 = inlined_call_operand.vmem [shape: f32[16,1], index: 2, kind: input, shape index: {}]   ;;  %s700_s3 = inlined_call_operand.vmem [shape: bf16[16,128], index: 3, kind: output, shape index: {}]  }
   0x1   :  { %v329_v0 = vld [vmem:[%s697_s0 + $0x10] sm:$0xff]  ;;  %v29_v1 = vld [vmem:[%s697_s0] sm:$0xff]  ;;  %v330_v2 = vld [vmem:[%s697_s0 + $0x18] sm:$0xff]  ;;  %s570_s22 = smov 127   ;;  %563 = vset.pattern.permute.xlu1 %v571_v34  ;;  %562 = vset.pattern.permute.xlu0 %v571_v34 }
   0x2   :  { %v37_v3 = vunpack.c.l.bf16 %v329_v0  ;;  %v38_v4 = vunpack.c.h.bf16 %v329_v0  ;;  %v31_v5 = vunpack.c.l.bf16 %v29_v1  ;;  %v32_v6 = vunpack.c.h.bf16 %v29_v1  ;;  %v30_v7 = vld [vmem:[%s697_s0 + $0x8] sm:$0xff]  ;;  %v335_v17 = vld [vmem:[%s697_s0 + $0x20] sm:$0xff]  ;;  %v338_v22 = vld [vmem:[%s697_s0 + $0x38] sm:$0xff] }
   0x3   :  { %v39_v8 = vunpack.c.l.bf16 %v330_v2  ;;  %v40_v9 = vunpack.c.h.bf16 %v330_v2  ;;  %v33_v10 = vunpack.c.l.bf16 %v30_v7  ;;  %v34_v11 = vunpack.c.h.bf16 %v30_v7  ;;  %v336_v16 = vld [vmem:[%s697_s0 + $0x28] sm:$0xff]  ;;  %v337_v23 = vld [vmem:[%s697_s0 + $0x30] sm:$0xff]  ;;  %v17_v33 = vld [vmem:[%s698_s1 + $0x18] sm:$0xff] }
   0x4   :  { %v452_v12 = vpack.i.bf16 %v38_v4, %v37_v3  ;;  %v442_v13 = vpack.i.bf16 %v32_v6, %v31_v5  ;;  %v55_v18 = vunpack.c.l.bf16 %v336_v16  ;;  %v56_v19 = vunpack.c.h.bf16 %v336_v16  ;;  %v15_v32 = vld [vmem:[%s698_s1 + $0x8] sm:$0xff]  ;;  %305 = vmatprep.mubr.f32.mxu1 %v17_v33  ;;  %v18_v36 = vld [vmem:[%s699_s2] sm:$0xff]  ;;  %v565_v62 = vld [vmem:[%s697_s0 + $0x10] ss:$8 sps:$4 sm:$0xff]  }
   0x5   :  { %v457_v14 = vpack.i.bf16 %v40_v9, %v39_v8  ;;  %v447_v15 = vpack.i.bf16 %v34_v11, %v33_v10  ;;  %v53_v20 = vunpack.c.l.bf16 %v335_v17  ;;  %v54_v21 = vunpack.c.h.bf16 %v335_v17  ;;  %300 = vmatprep.mubr.f32.mxu0 %v15_v32  ;;  %v19_v35 = vld [vmem:[%s699_s2 + $0x8] sm:$0xff] }
   0x6   :  { %453 = vrot.lane.b32.xlu1 %v452_v12, %s568_s20  ;;  %443 = vrot.lane.b32.xlu0 %v442_v13, %s568_s20  ;;  %v61_v24 = vunpack.c.l.bf16 %v338_v22  ;;  %v62_v25 = vunpack.c.h.bf16 %v338_v22  ;;  %v507_v26 = vpack.i.bf16 %v56_v19, %v55_v18  ;;  %v59_v28 = vunpack.c.l.bf16 %v337_v23  ;;  %v564_v51 = vld [vmem:[%s697_s0] ss:$8 sps:$4 sm:$0xff]  }
   0x7   :  { %v502_v27 = vpack.i.bf16 %v54_v21, %v53_v20  ;;  %v60_v29 = vunpack.c.h.bf16 %v337_v23 }
   0x8   :  { %v517_v30 = vpack.i.bf16 %v62_v25, %v61_v24 }
   0x9   :  { %v512_v31 = vpack.i.bf16 %v60_v29, %v59_v28 }
   0xa   :  { %458 = vrot.lane.b32.xlu1 %v457_v14, %s568_s20  ;;  %448 = vrot.lane.b32.xlu0 %v447_v15, %s568_s20 }
   0xe   :  { %468 = vrot.lane.b32.xlu1 %v447_v15, %s569_s21  ;;  %463 = vrot.lane.b32.xlu0 %v442_v13, %s569_s21 }
  0x12   :  { %478 = vrot.lane.b32.xlu1 %v447_v15, %s570_s22  ;;  %473 = vrot.lane.b32.xlu0 %v442_v13, %s570_s22 }
  0x16   :  { %488 = vrot.lane.b32.xlu1 %v457_v14, %s569_s21  ;;  %483 = vrot.lane.b32.xlu0 %v452_v12, %s569_s21 }
  0x1a   :  { %498 = vrot.lane.b32.xlu1 %v457_v14, %s570_s22  ;;  %493 = vrot.lane.b32.xlu0 %v452_v12, %s570_s22 }
  0x1e   :  { %508 = vrot.lane.b32.xlu1 %v507_v26, %s568_s20  ;;  %503 = vrot.lane.b32.xlu0 %v502_v27, %s568_s20 }
  0x22   :  { %518 = vrot.lane.b32.xlu1 %v517_v30, %s568_s20  ;;  %513 = vrot.lane.b32.xlu0 %v512_v31, %s568_s20 }
  0x26   :  { %528 = vrot.lane.b32.xlu1 %v507_v26, %s569_s21  ;;  %523 = vrot.lane.b32.xlu0 %v502_v27, %s569_s21 }
  0x2a   :  { %538 = vrot.lane.b32.xlu1 %v507_v26, %s570_s22  ;;  %533 = vrot.lane.b32.xlu0 %v502_v27, %s570_s22 }
  0x2e   :  { %548 = vrot.lane.b32.xlu1 %v517_v30, %s569_s21  ;;  %543 = vrot.lane.b32.xlu0 %v512_v31, %s569_s21 }
  0x32   :  { %558 = vrot.lane.b32.xlu1 %v517_v30, %s570_s22  ;;  %553 = vrot.lane.b32.xlu0 %v512_v31, %s570_s22 }
  0x36   :  { %233 = vperm.xlu1 %563, %v19_v35   ;;  %228 = vperm.xlu0 %562, %v18_v36  }
  0x78   :  { %v454_v37 = vpop.permute.xlu1 %453  ;;  %v444_v38 = vpop.permute.xlu0 %443 }
  0x79   :  { %v446_v39 = vunpack.i.h.bf16 %v444_v38  ;;  %v445_v40 = vunpack.i.l.bf16 %v444_v38  ;;  %v456_v41 = vunpack.i.h.bf16 %v454_v37  ;;  %v455_v42 = vunpack.i.l.bf16 %v454_v37  ;;  %v566_v37 = vld [vmem:[%s697_s0 + $0x20] ss:$8 sps:$4 sm:$0xff]  }
  0x7b   :  { %v137_v49 = vsel %vm136_vm0, %v445_v40, %v446_v39  ;;  %v149_v56 = vsel %vm136_vm0, %v455_v42, %v456_v41 }
  0x7c   :  { %v459_v43 = vpop.permute.xlu1 %458  ;;  %v449_v44 = vpop.permute.xlu0 %448 }
  0x7d   :  { %v461_v45 = vunpack.i.h.bf16 %v459_v43  ;;  %v460_v46 = vunpack.i.l.bf16 %v459_v43  ;;  %v451_v47 = vunpack.i.h.bf16 %v449_v44  ;;  %v450_v48 = vunpack.i.l.bf16 %v449_v44 }
  0x7f   :  { %v138_v50 = vsel %vm136_vm0, %v450_v48, %v451_v47  ;;  %v150_v52 = vsel %vm136_vm0, %v460_v46, %v461_v45  ;;  %v567_v47 = vld [vmem:[%s697_s0 + $0x30] ss:$8 sps:$4 sm:$0xff]  }
  0x80   :  { %v469_v53 = vpop.permute.xlu1 %468  ;;  %v464_v54 = vpop.permute.xlu0 %463  ;;  %v386_v55 = vpack.c.bf16 %v138_v50, %v137_v49  ;;  %v390_v61 = vpack.c.bf16 %v150_v52, %v149_v56 }
  0x81   :  { %v471_v57 = vunpack.i.h.bf16 %v469_v53  ;;  %v470_v58 = vunpack.i.l.bf16 %v469_v53  ;;  %v466_v59 = vunpack.i.h.bf16 %v464_v54  ;;  %v465_v60 = vunpack.i.l.bf16 %v464_v54 }
  0x82   :  { %387 = vmatprep.subr.bf16.mxu0 %v386_v55  ;;  %418 = vmatprep.subr.bf16.mxu1 %v386_v55 }
  0x83   :  { %389 = vmatpush3.bf16.msra.mxu0 %v564_v51  ;;  %426 = vmatpush3.bf16.msra.mxu1 %v564_v51  ;;  %v162_v63 = vsel %vm161_vm1, %v465_v60, %v466_v59  ;;  %v163_v0 = vsel %vm161_vm1, %v470_v58, %v471_v57 }
  0x84   :  { %v479_v1 = vpop.permute.xlu1 %478  ;;  %v474_v2 = vpop.permute.xlu0 %473  ;;  %391 = vmatprep.subr.bf16.mxu0 %v390_v61  ;;  %419 = vmatprep.subr.bf16.mxu1 %v390_v61  ;;  %v394_v7 = vpack.c.bf16 %v163_v0, %v162_v63 }
  0x85   :  { %v481_v3 = vunpack.i.h.bf16 %v479_v1  ;;  %v480_v4 = vunpack.i.l.bf16 %v479_v1  ;;  %v476_v5 = vunpack.i.h.bf16 %v474_v2  ;;  %v475_v6 = vunpack.i.l.bf16 %v474_v2 }
  0x87   :  { %393 = vmatpush3.bf16.msra.mxu0 %v565_v62  ;;  %427 = vmatpush3.bf16.msra.mxu1 %v565_v62  ;;  %v76_v8 = vsel %vm75_vm2, %v475_v6, %v476_v5  ;;  %v77_v9 = vsel %vm75_vm2, %v480_v4, %v481_v3 }
  0x88   :  { %v489_v10 = vpop.permute.xlu1 %488  ;;  %v484_v11 = vpop.permute.xlu0 %483  ;;  %395 = vmatprep.subr.bf16.mxu0 %v394_v7  ;;  %420 = vmatprep.subr.bf16.mxu1 %v394_v7  ;;  %v396_v12 = vpack.c.bf16 %v77_v9, %v76_v8 }
  0x89   :  { %v491_v13 = vunpack.i.h.bf16 %v489_v10  ;;  %v490_v14 = vunpack.i.l.bf16 %v489_v10  ;;  %v486_v15 = vunpack.i.h.bf16 %v484_v11  ;;  %v485_v16 = vunpack.i.l.bf16 %v484_v11 }
  0x8b   :  { %397 = vmatpush3.bf16.msra.mxu0 %v396_v12  ;;  %428 = vmatpush3.bf16.msra.mxu1 %v396_v12  ;;  %v174_v17 = vsel %vm161_vm1, %v485_v16, %v486_v15  ;;  %v175_v18 = vsel %vm161_vm1, %v490_v14, %v491_v13 }
  0x8c   :  { %v499_v19 = vpop.permute.xlu1 %498  ;;  %v494_v20 = vpop.permute.xlu0 %493  ;;  %v398_v21 = vpack.c.bf16 %v175_v18, %v174_v17 }
  0x8d   :  { %v501_v22 = vunpack.i.h.bf16 %v499_v19  ;;  %v500_v23 = vunpack.i.l.bf16 %v499_v19  ;;  %v496_v24 = vunpack.i.h.bf16 %v494_v20  ;;  %v495_v25 = vunpack.i.l.bf16 %v494_v20 }
  0x8e   :  { %399 = vmatprep.subr.bf16.mxu0 %v398_v21  ;;  %421 = vmatprep.subr.bf16.mxu1 %v398_v21  ;;  %v14_v21 = vld [vmem:[%s698_s1] sm:$0xff] }
  0x8f   :  { %v92_v26 = vsel %vm75_vm2, %v495_v25, %v496_v24  ;;  %v93_v27 = vsel %vm75_vm2, %v500_v23, %v501_v22  ;;  %v16_v22 = vld [vmem:[%s698_s1 + $0x10] sm:$0xff] }
  0x90   :  { %v509_v28 = vpop.permute.xlu1 %508  ;;  %v504_v29 = vpop.permute.xlu0 %503  ;;  %v400_v30 = vpack.c.bf16 %v93_v27, %v92_v26 }
  0x91   :  { %v511_v31 = vunpack.i.h.bf16 %v509_v28  ;;  %v510_v32 = vunpack.i.l.bf16 %v509_v28  ;;  %v506_v33 = vunpack.i.h.bf16 %v504_v29  ;;  %v505_v34 = vunpack.i.l.bf16 %v504_v29 }
  0x92   :  { %401 = vmatpush3.bf16.msra.mxu0 %v400_v30  ;;  %429 = vmatpush3.bf16.msra.mxu1 %v400_v30 }
  0x93   :  { %v186_v35 = vsel %vm136_vm0, %v505_v34, %v506_v33  ;;  %v187_v36 = vsel %vm136_vm0, %v510_v32, %v511_v31 }
  0x94   :  { %v519_v38 = vpop.permute.xlu1 %518  ;;  %v514_v39 = vpop.permute.xlu0 %513  ;;  %v402_v40 = vpack.c.bf16 %v187_v36, %v186_v35 }
  0x95   :  { %v521_v41 = vunpack.i.h.bf16 %v519_v38  ;;  %v520_v42 = vunpack.i.l.bf16 %v519_v38  ;;  %v516_v43 = vunpack.i.h.bf16 %v514_v39  ;;  %v515_v44 = vunpack.i.l.bf16 %v514_v39 }
  0x96   :  { %403 = vmatprep.subr.bf16.mxu0 %v402_v40  ;;  %422 = vmatprep.subr.bf16.mxu1 %v402_v40 }
  0x97   :  { %405 = vmatpush3.bf16.msra.mxu0 %v566_v37  ;;  %430 = vmatpush3.bf16.msra.mxu1 %v566_v37  ;;  %v198_v45 = vsel %vm136_vm0, %v515_v44, %v516_v43  ;;  %v199_v46 = vsel %vm136_vm0, %v520_v42, %v521_v41 }
  0x98   :  { %v529_v48 = vpop.permute.xlu1 %528  ;;  %v524_v49 = vpop.permute.xlu0 %523  ;;  %v406_v50 = vpack.c.bf16 %v199_v46, %v198_v45 }
  0x99   :  { %v531_v51 = vunpack.i.h.bf16 %v529_v48  ;;  %v530_v52 = vunpack.i.l.bf16 %v529_v48  ;;  %v526_v53 = vunpack.i.h.bf16 %v524_v49  ;;  %v525_v54 = vunpack.i.l.bf16 %v524_v49 }
  0x9a   :  { %407 = vmatprep.subr.bf16.mxu0 %v406_v50  ;;  %423 = vmatprep.subr.bf16.mxu1 %v406_v50 }
  0x9b   :  { %409 = vmatpush3.bf16.msra.mxu0 %v567_v47  ;;  %431 = vmatpush3.bf16.msra.mxu1 %v567_v47  ;;  %v210_v55 = vsel %vm161_vm1, %v525_v54, %v526_v53  ;;  %v211_v56 = vsel %vm161_vm1, %v530_v52, %v531_v51 }
  0x9c   :  { %v539_v57 = vpop.permute.xlu1 %538  ;;  %v534_v58 = vpop.permute.xlu0 %533  ;;  %v410_v59 = vpack.c.bf16 %v211_v56, %v210_v55 }
  0x9d   :  { %v541_v60 = vunpack.i.h.bf16 %v539_v57  ;;  %v540_v61 = vunpack.i.l.bf16 %v539_v57  ;;  %v536_v62 = vunpack.i.h.bf16 %v534_v58  ;;  %v535_v63 = vunpack.i.l.bf16 %v534_v58 }
  0x9e   :  { %411 = vmatprep.subr.bf16.mxu0 %v410_v59  ;;  %424 = vmatprep.subr.bf16.mxu1 %v410_v59 }
  0x9f   :  { %v108_v0 = vsel %vm75_vm2, %v535_v63, %v536_v62  ;;  %v109_v1 = vsel %vm75_vm2, %v540_v61, %v541_v60 }
  0xa0   :  { %v549_v2 = vpop.permute.xlu1 %548  ;;  %v544_v3 = vpop.permute.xlu0 %543  ;;  %v412_v4 = vpack.c.bf16 %v109_v1, %v108_v0 }
  0xa1   :  { %v551_v5 = vunpack.i.h.bf16 %v549_v2  ;;  %v550_v6 = vunpack.i.l.bf16 %v549_v2  ;;  %v546_v7 = vunpack.i.h.bf16 %v544_v3  ;;  %v545_v8 = vunpack.i.l.bf16 %v544_v3 }
  0xa2   :  { %413 = vmatpush3.bf16.msra.mxu0 %v412_v4  ;;  %432 = vmatpush3.bf16.msra.mxu1 %v412_v4 }
  0xa3   :  { %v222_v9 = vsel %vm161_vm1, %v545_v8, %v546_v7  ;;  %v223_v10 = vsel %vm161_vm1, %v550_v6, %v551_v5 }
  0xa4   :  { %v559_v11 = vpop.permute.xlu1 %558  ;;  %v554_v12 = vpop.permute.xlu0 %553  ;;  %v414_v13 = vpack.c.bf16 %v223_v10, %v222_v9 }
  0xa5   :  { %v561_v14 = vunpack.i.h.bf16 %v559_v11  ;;  %v560_v15 = vunpack.i.l.bf16 %v559_v11  ;;  %v556_v16 = vunpack.i.h.bf16 %v554_v12  ;;  %v555_v17 = vunpack.i.l.bf16 %v554_v12 }
  0xa6   :  { %415 = vmatprep.subr.bf16.mxu0 %v414_v13  ;;  %425 = vmatprep.subr.bf16.mxu1 %v414_v13 }
  0xa7   :  { %v124_v18 = vsel %vm75_vm2, %v555_v17, %v556_v16  ;;  %v125_v19 = vsel %vm75_vm2, %v560_v15, %v561_v14 }
  0xa8   :  { %v416_v20 = vpack.c.bf16 %v125_v19, %v124_v18 }
  0xaa   :  { %417 = vmatpush3.bf16.msra.mxu0 %v416_v20  ;;  %433 = vmatpush3.bf16.msra.mxu1 %v416_v20 }
  0xad   :  { %301 = vmatmul.mubr.f32.vlgmr.msra.gmra.mrb[0].mxu0 %v14_v21  ;;  %306 = vmatmul.mubr.f32.vlgmr.msra.gmra.mrb[0].mxu1 %v16_v22 }
  0xb5   :  { %v234_v23 = vpop.permute.xlu1 %233  ;;  %v229_v24 = vpop.permute.xlu0 %228 }
 0x180   :  { %v380_v25 = vpop.f32.mrb[0].mxu0  ;;  %v383_v26 = vpop.f32.mrb[0].mxu1 }
 0x181   :  { %v381_v27 = vpop.f32.mrb[1].mxu0  ;;  %v384_v28 = vpop.f32.mrb[1].mxu1 }
 0x182   :  { %v382_v29 = vadd.f32 %v381_v27, %v380_v25  ;;  %v385_v30 = vadd.f32 %v384_v28, %v383_v26 }
 0x184   :  { %v308_v31 = vadd.f32 %v385_v30, %v234_v23  ;;  %v303_v32 = vadd.f32 %v382_v29, %v229_v24 }
 0x186   :  { %v312_v33 = vmax.f32 %v308_v31, 0.0  ;;  %v311_v34 = vmax.f32 %v303_v32, 0.0 }
 0x188   :  { %v346_v35 = vpack.c.bf16 %v312_v33, %v311_v34 }
 0x18a   :  { %347 = vst [vmem:[%s700_s3] sm:$0xff] %v346_v35  }

// kernel: _lambda_.9
= control target key start
LH: loop header
LB: loop body
LE: loop exit
PB: predicated region body
PF: predicated region fallthrough
CT: control target
= control target key end

     0   :  { %v3057_v2 = vmov 0.0|0.0   ;;  %s3850_s30 = smov 122   ;;  %s3844_s25 = smov 120   ;;  %vm214_vm0 = vcmask 130048   ;;  %v3066_v11 = vmov 0   ;;  %vm108_vm1 = vcmask 1039360   ;;  %s3810_s0 = inlined_call_operand.vmem [shape: bf16[16,256], index: 0, kind: input, shape index: {}]   ;;  %s3811_s2 = inlined_call_operand.vmem [shape: f32[16,144], index: 2, kind: input, shape index: {}]   ;;  %s3812_s3 = inlined_call_operand.vmem [shape: f32[16,1], index: 3, kind: input, shape index: {}]   ;;  %s3813_s1 = inlined_call_operand.vmem [shape: f32[1,256], index: 1, kind: input, shape index: {}]   ;;  %s3814_s4 = inlined_call_operand.vmem [shape: f32[16,144], index: 4, kind: input, shape index: {}]   ;;  %s3815_s5 = inlined_call_operand.vmem [shape: f32[16,1], index: 5, kind: input, shape index: {}]   ;;  %s3816_s7 = inlined_call_operand.vmem [shape: f32[16,1], index: 7, kind: input, shape index: {}]   ;;  %s3817_s6 = inlined_call_operand.vmem [shape: f32[16,16], index: 6, kind: input, shape index: {}]   ;;  %s3818_s8 = inlined_call_operand.vmem [shape: f32[16,144], index: 8, kind: input, shape index: {}]   ;;  %s3819_s9 = inlined_call_operand.vmem [shape: f32[16,1], index: 9, kind: input, shape index: {}]   ;;  %s3820_s11 = inlined_call_operand.vmem [shape: f32[16,1], index: 11, kind: input, shape index: {}]   ;;  %s3821_s10 = inlined_call_operand.vmem [shape: f32[16,16], index: 10, kind: input, shape index: {}]   ;;  %s3822_s12 = inlined_call_operand.vmem [shape: f32[16,144], index: 12, kind: input, shape index: {}]   ;;  %s3823_s13 = inlined_call_operand.vmem [shape: f32[16,1], index: 13, kind: input, shape index: {}]   ;;  %s3824_s15 = inlined_call_operand.vmem [shape: f32[16,1], index: 15, kind: input, shape index: {}]   ;;  %s3825_s14 = inlined_call_operand.vmem [shape: f32[16,16], index: 14, kind: input, shape index: {}]   ;;  %s3826_s16 = inlined_call_operand.vmem [shape: f32[16,144], index: 16, kind: input, shape index: {}]   ;;  %s3827_s17 = inlined_call_operand.vmem [shape: f32[16,1], index: 17, kind: input, shape index: {}]   ;;  %s3828_s19 = inlined_call_operand.vmem [shape: f32[16,1], index: 19, kind: input, shape index: {}]   ;;  %s3829_s18 = inlined_call_operand.vmem [shape: f32[16,16], index: 18, kind: input, shape index: {}]   ;;  %s3830_s20 = inlined_call_operand.vmem [shape: f32[16,144], index: 20, kind: input, shape index: {}]   ;;  %s3831_s21 = inlined_call_operand.vmem [shape: f32[16,1], index: 21, kind: input, shape index: {}]   ;;  %s3832_s22 = inlined_call_operand.vmem [shape: f32[16,144], index: 22, kind: input, shape index: {}]   ;;  %s3833_s23 = inlined_call_operand.vmem [shape: f32[16,1], index: 23, kind: input, shape index: {}]   ;;  %s3834_s24 = inlined_call_operand.vmem [shape: bf16[16,256], index: 24, kind: output, shape index: {}]  }
   0x1   :  { %3862 = sst [smem:[#allocation4_spill]] %s3810_s0  ;;  %2242 = vmatprep.subr.bf16.mxu0 %v3057_v2  ;;  %2269 = vmatprep.subr.bf16.mxu1 %v3057_v2  ;;  %s3852_s0 = smov 126   ;;  %78 = vst [vmem:[#allocation2] sm:$0xff] %v3066_v11  ;;  %79 = vst [vmem:[#allocation2 + $0x8] sm:$0xff] %v3066_v11  ;;  %vm121_vm2 = vcmask 1031168   ;;  %vm134_vm3 = vcmask 998400  }
   0x2   :  { %3863 = sst [smem:[#allocation5_spill]] %s3811_s2  ;;  %s3873_s27 = sld [smem:[#allocation4_spill]]  ;;  %2539 = vset.pattern.permute.xlu0 %v3066_v11  ;;  %329 = vst [vmem:[#allocation3] sm:$0xff] %v3066_v11  ;;  %330 = vst [vmem:[#allocation3 + $0x8] sm:$0xff] %v3066_v11  ;;  %2540 = vset.pattern.permute.xlu1 %v3066_v11  ;;  %vm147_vm4 = vcmask 990208   ;;  %vm160_vm5 = vcmask 982016  }
   0x3   :  { %3864 = sst [smem:[#allocation6_spill]] %s3812_s3  ;;  %s3874_s26 = sld [smem:[#allocation5_spill]]  ;;  %vm173_vm6 = vcmask 949248   ;;  %vm186_vm7 = vcmask 941056   ;;  %vm199_vm8 = vcmask 932864   ;;  %vm327_vm12 = vcmask 56320  }
   0x4   :  { %3865 = sst [smem:[#allocation7_spill]] %s3813_s1  ;;  %s3846_s1 = smov 121   ;;  %vm325_vm13 = vcmask 1047608  }
   0x5   :  { %3866 = sst [smem:[#allocation8_spill]] %s3814_s4  ;;  %s3854_s4 = smov 115  }
   0x6   :  { %3867 = sst [smem:[#allocation9_spill]] %s3815_s5  ;;  %s3875_s3 = sld [smem:[#allocation6_spill]] }
   0x7   :  { %3868 = sst [smem:[#allocation10_spill]] %s3816_s7  ;;  %s3858_s5 = smov 7  }
   0x8   :  { %3869 = sst [smem:[#allocation11_spill]] %s3817_s6  ;;  %v90_v0 = vld [vmem:[%s3873_s27] sm:$0xff]  ;;  %v91_v1 = vld [vmem:[%s3873_s27 + $0x8] sm:$0xff]  ;;  %s3856_s6 = smov 127  }
   0x9   :  { %3870 = sst [smem:[#allocation12_spill]] %s3818_s8  ;;  %v92_v3 = vunpack.c.l.bf16 %v90_v0  ;;  %v93_v4 = vunpack.c.h.bf16 %v90_v0  ;;  %v94_v5 = vunpack.c.l.bf16 %v91_v1  ;;  %v95_v6 = vunpack.c.h.bf16 %v91_v1  ;;  %v3056_v7 = vld [vmem:[%s3873_s27] ss:$8 sps:$4 sm:$0xff]   ;;  %s3848_s8 = smov 116  }
   0xa   :  { %3871 = sst [smem:[#allocation13_spill]] %s3833_s23  ;;  %2244 = vmatpush1.bf16.msra.mxu0 %v3056_v7  ;;  %v81_v10 = vld [vmem:[%s3874_s26 + $0x8] sm:$0xff]  ;;  %s3065_s27 = smov 114  }
   0xb   :  { %3872 = sst [smem:[#allocation14_spill]] %s3834_s24  ;;  %v2469_v8 = vpack.i.bf16 %v93_v4, %v92_v3  ;;  %2245 = vmatprep.subr.bf16.mxu0 %v3057_v2  ;;  %v2474_v9 = vpack.i.bf16 %v95_v6, %v94_v5  ;;  %2172 = vmatprep.mubr.msk.f32.mxu0 %vm214_vm0, %v81_v10  ;;  %s3877_s2 = sld [smem:[#allocation8_spill]] }
   0xc   :  { %v84_v12 = vld [vmem:[%s3875_s3] sm:$0xff]  ;;  %v85_v13 = vld [vmem:[%s3875_s3 + $0x8] sm:$0xff]  ;;  %s3876_s3 = sld [smem:[#allocation7_spill]]  ;;  %s3885_s28 = smov 116  }
   0xd   :  { %2470 = vrot.lane.b32.xlu1 %v2469_v8, %s3852_s0  ;;  %2460 = vrot.lane.b32.xlu0 %v2469_v8, %s3856_s6  ;;  %s3887_s29 = smov 115   ;;  %s3891_s24 = sld [smem:[#allocation14_spill]] }
  0x11   :  { %2475 = vrot.lane.b32.xlu1 %v2474_v9, %s3852_s0  ;;  %2465 = vrot.lane.b32.xlu0 %v2474_v9, %s3856_s6 }
  0x13   :  { %1916 = vst [vmem:[%s3891_s24] sm:$0xff] %v3066_v11  ;;  %1917 = vst [vmem:[%s3891_s24 + $0x8] sm:$0xff] %v3066_v11 }
  0x15   :  { %2485 = vrot.lane.b32.xlu1 %v2474_v9, %s3850_s30  ;;  %2480 = vrot.lane.b32.xlu0 %v2469_v8, %s3850_s30 }
  0x19   :  { %2495 = vrot.lane.b32.xlu1 %v2474_v9, %s3846_s1  ;;  %2490 = vrot.lane.b32.xlu0 %v2469_v8, %s3846_s1 }
  0x1d   :  { %2505 = vrot.lane.b32.xlu1 %v2474_v9, %s3844_s25  ;;  %2500 = vrot.lane.b32.xlu0 %v2469_v8, %s3844_s25 }
  0x21   :  { %2515 = vrot.lane.b32.xlu1 %v2474_v9, %s3848_s8  ;;  %2510 = vrot.lane.b32.xlu0 %v2469_v8, %s3848_s8 }
  0x25   :  { %2525 = vrot.lane.b32.xlu1 %v2474_v9, %s3854_s4  ;;  %2520 = vrot.lane.b32.xlu0 %v2469_v8, %s3854_s4 }
  0x29   :  { %2535 = vrot.lane.b32.xlu1 %v2474_v9, %s3065_s27  ;;  %2530 = vrot.lane.b32.xlu0 %v2469_v8, %s3065_s27 }
  0x2d   :  { %206 = vperm.xlu0 %2539, %v84_v12   ;;  %211 = vperm.xlu1 %2540, %v85_v13  }
  0x7f   :  { %v2471_v14 = vpop.permute.xlu1 %2470  ;;  %v2461_v15 = vpop.permute.xlu0 %2460 }
  0x80   :  { %v2463_v16 = vunpack.i.h.bf16 %v2461_v15  ;;  %v2462_v17 = vunpack.i.l.bf16 %v2461_v15  ;;  %v2473_v18 = vunpack.i.h.bf16 %v2471_v14  ;;  %v2472_v19 = vunpack.i.l.bf16 %v2471_v14 }
  0x82   :  { %v109_v26 = vsel %vm108_vm1, %v2462_v17, %v2463_v16  ;;  %v122_v31 = vsel %vm121_vm2, %v2472_v19, %v2473_v18 }
  0x83   :  { %v2476_v20 = vpop.permute.xlu1 %2475  ;;  %v2466_v21 = vpop.permute.xlu0 %2465 }
  0x84   :  { %v2478_v22 = vunpack.i.h.bf16 %v2476_v20  ;;  %v2477_v23 = vunpack.i.l.bf16 %v2476_v20  ;;  %v2468_v24 = vunpack.i.h.bf16 %v2466_v21  ;;  %v2467_v25 = vunpack.i.l.bf16 %v2466_v21 }
  0x86   :  { %v110_v27 = vsel %vm108_vm1, %v2467_v25, %v2468_v24  ;;  %v123_v32 = vsel %vm121_vm2, %v2477_v23, %v2478_v22  ;;  %v80_v24 = vld [vmem:[%s3874_s26] sm:$0xff]  ;;  %v83_v25 = vld [vmem:[%s3874_s26 + $0x18] sm:$0xff] }
  0x87   :  { %v2246_v28 = vpack.c.bf16 %v110_v27, %v109_v26  ;;  %v2486_v29 = vpop.permute.xlu1 %2485  ;;  %v2481_v30 = vpop.permute.xlu0 %2480  ;;  %v2249_v39 = vpack.c.bf16 %v123_v32, %v122_v31  ;;  %v82_v26 = vld [vmem:[%s3874_s26 + $0x10] sm:$0xff]  ;;  %s3880_s26 = sld [smem:[#allocation11_spill]] }
  0x88   :  { %v2488_v33 = vunpack.i.h.bf16 %v2486_v29  ;;  %v2487_v34 = vunpack.i.l.bf16 %v2486_v29  ;;  %v2483_v35 = vunpack.i.h.bf16 %v2481_v30  ;;  %v2482_v36 = vunpack.i.l.bf16 %v2481_v30 }
  0x89   :  { %2247 = vmatpush1.bf16.msra.mxu0 %v2246_v28 }
  0x8a   :  { %2248 = vmatprep.subr.bf16.mxu0 %v3057_v2  ;;  %v135_v37 = vsel %vm134_vm3, %v2482_v36, %v2483_v35  ;;  %v136_v38 = vsel %vm134_vm3, %v2487_v34, %v2488_v33 }
  0x8b   :  { %v2496_v40 = vpop.permute.xlu1 %2495  ;;  %v2491_v41 = vpop.permute.xlu0 %2490  ;;  %v2252_v46 = vpack.c.bf16 %v136_v38, %v135_v37  ;;  %v301_v38 = vlaneseq }
  0x8c   :  { %v2498_v42 = vunpack.i.h.bf16 %v2496_v40  ;;  %v2497_v43 = vunpack.i.l.bf16 %v2496_v40  ;;  %v2493_v44 = vunpack.i.h.bf16 %v2491_v41  ;;  %v2492_v45 = vunpack.i.l.bf16 %v2491_v41 }
  0x8d   :  { %2250 = vmatpush1.bf16.msra.mxu0 %v2249_v39  ;;  %v298_v39 = vld [vmem:[%s3876_s3] sm:$0x3]  ;;  %v302_v40 = vshrl.u32 %v301_v38, 7 }
  0x8e   :  { %2251 = vmatprep.subr.bf16.mxu0 %v3057_v2  ;;  %v148_v47 = vsel %vm147_vm4, %v2492_v45, %v2493_v44  ;;  %v149_v48 = vsel %vm147_vm4, %v2497_v43, %v2498_v42  ;;  %vm299_vm9 = vcmp.gt.f32.partialorder %v298_v39, 0.5 }
  0x8f   :  { %v2506_v49 = vpop.permute.xlu1 %2505  ;;  %v2501_v50 = vpop.permute.xlu0 %2500  ;;  %v2255_v55 = vpack.c.bf16 %v149_v48, %v148_v47  ;;  %v3274_v41 = vsub.s32 0, %v302_v40  ;;  %v3276_v42 = vsub.s32 1, %v302_v40  ;;  %v300_v43 = vsel %vm299_vm9, 1, %v3066_v11 }
  0x90   :  { %v2508_v51 = vunpack.i.h.bf16 %v2506_v49  ;;  %v2507_v52 = vunpack.i.l.bf16 %v2506_v49  ;;  %v2503_v53 = vunpack.i.h.bf16 %v2501_v50  ;;  %v2502_v54 = vunpack.i.l.bf16 %v2501_v50 }
  0x91   :  { %2253 = vmatpush1.bf16.msra.mxu0 %v2252_v46  ;;  %v304_v44 = vrot.slane %v300_v43, %v3274_v41  ;;  %v308_v45 = vrot.slane %v300_v43, %v3276_v42 }
  0x92   :  { %2254 = vmatprep.subr.bf16.mxu0 %v3057_v2  ;;  %v161_v56 = vsel %vm160_vm5, %v2502_v54, %v2503_v53  ;;  %v162_v57 = vsel %vm160_vm5, %v2507_v52, %v2508_v51 }
  0x93   :  { %v2516_v58 = vpop.permute.xlu1 %2515  ;;  %v2511_v59 = vpop.permute.xlu0 %2510  ;;  %v2258_v0 = vpack.c.bf16 %v162_v57, %v161_v56  ;;  %vm309_vm10 = vcmp.eq.s32.totalorder %v304_v44, 1  ;;  %vm310_vm11 = vcmp.eq.s32.totalorder %v308_v45, 1 }
  0x94   :  { %v2518_v60 = vunpack.i.h.bf16 %v2516_v58  ;;  %v2517_v61 = vunpack.i.l.bf16 %v2516_v58  ;;  %v2513_v62 = vunpack.i.h.bf16 %v2511_v59  ;;  %v2512_v63 = vunpack.i.l.bf16 %v2511_v59 }
  0x95   :  { %2256 = vmatpush1.bf16.msra.mxu0 %v2255_v55 }
  0x96   :  { %2257 = vmatprep.subr.bf16.mxu0 %v3057_v2  ;;  %v174_v1 = vsel %vm173_vm6, %v2512_v63, %v2513_v62  ;;  %v175_v3 = vsel %vm173_vm6, %v2517_v61, %v2518_v60  ;;  %v332_v63 = vld [vmem:[%s3877_s2 + $0x8] sm:$0xff] }
  0x97   :  { %v2526_v4 = vpop.permute.xlu1 %2525  ;;  %v2521_v5 = vpop.permute.xlu0 %2520  ;;  %v2261_v10 = vpack.c.bf16 %v175_v3, %v174_v1  ;;  %2174 = vmatprep.mubr.msk.f32.mxu1 %vm214_vm0, %v332_v63 }
  0x98   :  { %v2528_v6 = vunpack.i.h.bf16 %v2526_v4  ;;  %v2527_v7 = vunpack.i.l.bf16 %v2526_v4  ;;  %v2523_v8 = vunpack.i.h.bf16 %v2521_v5  ;;  %v2522_v9 = vunpack.i.l.bf16 %v2521_v5 }
  0x99   :  { %2259 = vmatpush1.bf16.msra.mxu0 %v2258_v0 }
  0x9a   :  { %2260 = vmatprep.subr.bf16.mxu0 %v3057_v2  ;;  %v187_v12 = vsel %vm186_vm7, %v2522_v9, %v2523_v8  ;;  %v188_v13 = vsel %vm186_vm7, %v2527_v7, %v2528_v6 }
  0x9b   :  { %v2536_v14 = vpop.permute.xlu1 %2535  ;;  %v2531_v15 = vpop.permute.xlu0 %2530  ;;  %v2264_v20 = vpack.c.bf16 %v188_v13, %v187_v12 }
  0x9c   :  { %v2538_v16 = vunpack.i.h.bf16 %v2536_v14  ;;  %v2537_v17 = vunpack.i.l.bf16 %v2536_v14  ;;  %v2533_v18 = vunpack.i.h.bf16 %v2531_v15  ;;  %v2532_v19 = vunpack.i.l.bf16 %v2531_v15 }
  0x9d   :  { %2262 = vmatpush1.bf16.msra.mxu0 %v2261_v10 }
  0x9e   :  { %2263 = vmatprep.subr.bf16.mxu0 %v3057_v2  ;;  %v200_v21 = vsel %vm199_vm8, %v2532_v19, %v2533_v18  ;;  %v201_v22 = vsel %vm199_vm8, %v2537_v17, %v2538_v16 }
  0x9f   :  { %v2267_v23 = vpack.c.bf16 %v201_v22, %v200_v21 }
  0xa1   :  { %2265 = vmatpush1.bf16.msra.mxu0 %v2264_v20 }
  0xa2   :  { %2266 = vmatprep.subr.bf16.mxu0 %v3057_v2 }
  0xa5   :  { %2268 = vmatpush1.bf16.msra.mxu0 %v2267_v23 }
  0xa8   :  { %286 = vmatmul.mubr.f32.vlgmr.msra.gmra.mrb[0].mxu0 %v80_v24 }
  0xa9   :  { %2173 = vmatprep.mubr.msk.f32.mxu0 %vm214_vm0, %v83_v25 }
  0xac   :  { %291 = vmatmul.mubr.f32.gmra.mrb[2].mxu0 %v82_v26  ;;  %v207_v27 = vpop.permute.xlu0 %206  ;;  %v212_v30 = vpop.permute.xlu1 %211 }
 0x17b   :  { %v287_v28 = vpop.f32.mrb[0].mxu0 }
 0x17c   :  { %v289_v29 = vpop.f32.mrb[1].mxu0  ;;  %v288_v31 = vadd.f32 %v287_v28, %v207_v27 }
 0x17e   :  { %v296_v35 = vmax.f32 %v288_v31, 0.0 }
 0x17f   :  { %v292_v32 = vpop.f32.mrb[2].mxu0 }
 0x180   :  { %v293_v33 = vadd.f32 %v292_v32, %v212_v30  ;;  %v294_v34 = vpop.f32.mrb[3].mxu0 }
 0x182   :  { %v297_v36 = vmax.f32 %v293_v33, 0.0 }
 0x184   :  { %v2541_v37 = vpack.i.bf16 %v297_v36, %v296_v35 }
 0x186   :  { %2542 = vrot.lane.b32.xlu1 %v2541_v37, %s3858_s5 }
 0x1f8   :  { %v2543_v46 = vpop.permute.xlu1 %2542 }
 0x1f9   :  { %v2545_v47 = vunpack.i.h.bf16 %v2543_v46  ;;  %v2544_v48 = vunpack.i.l.bf16 %v2543_v46 }
 0x1fb   :  { %v321_v49 = vsel %vm309_vm10, %v2545_v47, 0.0  ;;  %v322_v50 = vsel %vm310_vm11, %v2545_v47, 0.0  ;;  %v319_v51 = vsel %vm309_vm10, %v2544_v48, 0.0  ;;  %v320_v52 = vsel %vm310_vm11, %v2544_v48, 0.0 }
 0x1fc   :  { %v323_v53 = vpack.c.bf16 %v321_v49, %v319_v51  ;;  %v324_v54 = vpack.c.bf16 %v322_v50, %v320_v52 }
 0x1fe   :  { %328 = vst.msk [vmem:[#allocation2 + $0x8] sm:$0xff] %vm327_vm12, %v324_v54 }
 0x1ff   :  { %326 = vst.msk [vmem:[#allocation2] sm:$0xff] %vm325_vm13, %v323_v53 }
 0x205   :  { %v345_v56 = vld [vmem:[#allocation2 + $0x8] sm:$0xff] }
 0x206   :  { %v341_v55 = vld [vmem:[#allocation2] sm:$0xff]  ;;  %v349_v59 = vunpack.c.h.bf16 %v345_v56  ;;  %666 = vst [vmem:[#allocation2 + $0x8] sm:$0xff] %v3066_v11  ;;  %v347_v60 = vunpack.c.l.bf16 %v345_v56 }
 0x207   :  { %v346_v57 = vunpack.c.l.bf16 %v341_v55  ;;  %v348_v58 = vunpack.c.h.bf16 %v341_v55  ;;  %2271 = vmatpush1.bf16.msra.mxu1 %v341_v55  ;;  %665 = vst [vmem:[#allocation2] sm:$0xff] %v3066_v11 }
 0x208   :  { %2272 = vmatprep.subr.bf16.mxu1 %v3057_v2 }
 0x209   :  { %v2551_v61 = vpack.i.bf16 %v349_v59, %v348_v58  ;;  %v2546_v62 = vpack.i.bf16 %v347_v60, %v346_v57 }
 0x20b   :  { %2552 = vrot.lane.b32.xlu1 %v2551_v61, %s3856_s6  ;;  %2547 = vrot.lane.b32.xlu0 %v2546_v62, %s3856_s6 }
 0x20f   :  { %2562 = vrot.lane.b32.xlu1 %v2551_v61, %s3852_s0  ;;  %2557 = vrot.lane.b32.xlu0 %v2546_v62, %s3852_s0 }
 0x213   :  { %2572 = vrot.lane.b32.xlu1 %v2551_v61, %s3850_s30  ;;  %2567 = vrot.lane.b32.xlu0 %v2546_v62, %s3850_s30  ;;  %s3879_s30 = sld [smem:[#allocation10_spill]] }
 0x217   :  { %2582 = vrot.lane.b32.xlu1 %v2551_v61, %s3846_s1  ;;  %2577 = vrot.lane.b32.xlu0 %v2546_v62, %s3846_s1  ;;  %s3881_s1 = smov 126  }
 0x219   :  { %v340_v3 = vld [vmem:[%s3879_s30 + $0x8] sm:$0xff]  ;;  %v339_v4 = vld [vmem:[%s3879_s30] sm:$0xff] }
 0x21b   :  { %2592 = vrot.lane.b32.xlu1 %v2551_v61, %s3844_s25  ;;  %2587 = vrot.lane.b32.xlu0 %v2546_v62, %s3844_s25  ;;  %s3878_s25 = sld [smem:[#allocation9_spill]] }
 0x21f   :  { %2602 = vrot.lane.b32.xlu1 %v2551_v61, %s3848_s8  ;;  %2597 = vrot.lane.b32.xlu0 %v2546_v62, %s3848_s8  ;;  %s3883_s8 = smov 121  }
 0x221   :  { %v336_v0 = vld [vmem:[%s3878_s25 + $0x8] sm:$0xff]  ;;  %v335_v1 = vld [vmem:[%s3878_s25] sm:$0xff]  ;;  %s3882_s25 = smov 122  }
 0x223   :  { %2612 = vrot.lane.b32.xlu1 %v2551_v61, %s3854_s4  ;;  %2607 = vrot.lane.b32.xlu0 %v2546_v62, %s3854_s4  ;;  %s3884_s4 = smov 120  }
 0x227   :  { %2622 = vrot.lane.b32.xlu1 %v2551_v61, %s3065_s27  ;;  %2617 = vrot.lane.b32.xlu0 %v2546_v62, %s3065_s27 }
 0x22b   :  { %457 = vperm.xlu1 %2540, %v336_v0   ;;  %452 = vperm.xlu0 %2539, %v335_v1  }
 0x22f   :  { %550 = vperm.xlu1 %2540, %v340_v3   ;;  %545 = vperm.xlu0 %2539, %v339_v4  }
 0x27d   :  { %v2553_v5 = vpop.permute.xlu1 %2552  ;;  %v2548_v6 = vpop.permute.xlu0 %2547 }
 0x27e   :  { %v2555_v7 = vunpack.i.h.bf16 %v2553_v5  ;;  %v2554_v8 = vunpack.i.l.bf16 %v2553_v5  ;;  %v2550_v9 = vunpack.i.h.bf16 %v2548_v6  ;;  %v2549_v10 = vunpack.i.l.bf16 %v2548_v6 }
 0x280   :  { %v362_v12 = vsel %vm108_vm1, %v2549_v10, %v2550_v9  ;;  %v363_v13 = vsel %vm108_vm1, %v2554_v8, %v2555_v7 }
 0x281   :  { %v2563_v14 = vpop.permute.xlu1 %2562  ;;  %v2558_v15 = vpop.permute.xlu0 %2557  ;;  %v2273_v16 = vpack.c.bf16 %v363_v13, %v362_v12 }
 0x282   :  { %v2565_v17 = vunpack.i.h.bf16 %v2563_v14  ;;  %v2564_v18 = vunpack.i.l.bf16 %v2563_v14  ;;  %v2560_v19 = vunpack.i.h.bf16 %v2558_v15  ;;  %v2559_v20 = vunpack.i.l.bf16 %v2558_v15 }
 0x283   :  { %2274 = vmatpush1.bf16.msra.mxu1 %v2273_v16 }
 0x284   :  { %2275 = vmatprep.subr.bf16.mxu1 %v3057_v2  ;;  %v374_v21 = vsel %vm121_vm2, %v2559_v20, %v2560_v19  ;;  %v375_v22 = vsel %vm121_vm2, %v2564_v18, %v2565_v17  ;;  %v331_v18 = vld [vmem:[%s3877_s2] sm:$0xff]  ;;  %v334_v19 = vld [vmem:[%s3877_s2 + $0x18] sm:$0xff]  ;;  %v333_v20 = vld [vmem:[%s3877_s2 + $0x10] sm:$0xff]  ;;  %s3886_s2 = sld [smem:[#allocation12_spill]] }
 0x285   :  { %v2573_v23 = vpop.permute.xlu1 %2572  ;;  %v2568_v24 = vpop.permute.xlu0 %2567  ;;  %v2276_v25 = vpack.c.bf16 %v375_v22, %v374_v21  ;;  %v337_v21 = vld [vmem:[%s3880_s26] sm:$0xff] }
 0x286   :  { %v2575_v26 = vunpack.i.h.bf16 %v2573_v23  ;;  %v2574_v27 = vunpack.i.l.bf16 %v2573_v23  ;;  %v2570_v28 = vunpack.i.h.bf16 %v2568_v24  ;;  %v2569_v29 = vunpack.i.l.bf16 %v2568_v24  ;;  %2218 = vmatprep.mubr.msk.f32.mxu0 %vm214_vm0, %v337_v21 }
 0x287   :  { %2277 = vmatpush1.bf16.msra.mxu1 %v2276_v25 }
 0x288   :  { %2278 = vmatprep.subr.bf16.mxu1 %v3057_v2  ;;  %v386_v30 = vsel %vm134_vm3, %v2569_v29, %v2570_v28  ;;  %v387_v31 = vsel %vm134_vm3, %v2574_v27, %v2575_v26 }
 0x289   :  { %v2583_v32 = vpop.permute.xlu1 %2582  ;;  %v2578_v33 = vpop.permute.xlu0 %2577  ;;  %v2279_v34 = vpack.c.bf16 %v387_v31, %v386_v30 }
 0x28a   :  { %v2585_v35 = vunpack.i.h.bf16 %v2583_v32  ;;  %v2584_v36 = vunpack.i.l.bf16 %v2583_v32  ;;  %v2580_v37 = vunpack.i.h.bf16 %v2578_v33  ;;  %v2579_v38 = vunpack.i.l.bf16 %v2578_v33  ;;  %v338_v33 = vld [vmem:[%s3880_s26 + $0x8] sm:$0xff]  ;;  %s3888_s26 = smov 7  }
 0x28b   :  { %2280 = vmatpush1.bf16.msra.mxu1 %v2279_v34 }
 0x28c   :  { %2281 = vmatprep.subr.bf16.mxu1 %v3057_v2  ;;  %v3328_v39 = vsel %vm147_vm4, %v2579_v38, %v2580_v37  ;;  %v3331_v40 = vsel %vm147_vm4, %v2584_v36, %v2585_v35 }
 0x28d   :  { %v2593_v43 = vpop.permute.xlu1 %2592  ;;  %v2588_v44 = vpop.permute.xlu0 %2587  ;;  %v2282_v45 = vpack.c.bf16 %v3331_v40, %v3328_v39 }
 0x28e   :  { %v2595_v46 = vunpack.i.h.bf16 %v2593_v43  ;;  %v2594_v47 = vunpack.i.l.bf16 %v2593_v43  ;;  %v2590_v48 = vunpack.i.h.bf16 %v2588_v44  ;;  %v2589_v49 = vunpack.i.l.bf16 %v2588_v44 }
 0x28f   :  { %2283 = vmatpush1.bf16.msra.mxu1 %v2282_v45 }
 0x290   :  { %2284 = vmatprep.subr.bf16.mxu1 %v3057_v2  ;;  %v410_v50 = vsel %vm160_vm5, %v2589_v49, %v2590_v48  ;;  %v411_v51 = vsel %vm160_vm5, %v2594_v47, %v2595_v46  ;;  %v636_v47 = vld [vmem:[%s3876_s3] sm:$0x3] }
 0x291   :  { %v2603_v52 = vpop.permute.xlu1 %2602  ;;  %v2598_v53 = vpop.permute.xlu0 %2597  ;;  %v2285_v54 = vpack.c.bf16 %v411_v51, %v410_v50  ;;  %vm637_vm14 = vcmp.gt.f32.partialorder %v636_v47, 0.5 }
 0x292   :  { %v2605_v55 = vunpack.i.h.bf16 %v2603_v52  ;;  %v2604_v56 = vunpack.i.l.bf16 %v2603_v52  ;;  %v2600_v57 = vunpack.i.h.bf16 %v2598_v53  ;;  %v2599_v58 = vunpack.i.l.bf16 %v2598_v53 }
 0x293   :  { %2286 = vmatpush1.bf16.msra.mxu1 %v2285_v54  ;;  %v638_v48 = vsel %vm637_vm14, 1, %v3066_v11 }
 0x294   :  { %2287 = vmatprep.subr.bf16.mxu1 %v3057_v2  ;;  %v422_v59 = vsel %vm173_vm6, %v2599_v58, %v2600_v57  ;;  %v423_v60 = vsel %vm173_vm6, %v2604_v56, %v2605_v55  ;;  %v642_v49 = vrot.slane %v638_v48, %v3274_v41  ;;  %v646_v50 = vrot.slane %v638_v48, %v3276_v42 }
 0x295   :  { %v2613_v61 = vpop.permute.xlu1 %2612  ;;  %v2608_v62 = vpop.permute.xlu0 %2607  ;;  %v2288_v63 = vpack.c.bf16 %v423_v60, %v422_v59 }
 0x296   :  { %v2615_v0 = vunpack.i.h.bf16 %v2613_v61  ;;  %v2614_v1 = vunpack.i.l.bf16 %v2613_v61  ;;  %v2610_v3 = vunpack.i.h.bf16 %v2608_v62  ;;  %v2609_v4 = vunpack.i.l.bf16 %v2608_v62 }
 0x297   :  { %2289 = vmatpush1.bf16.msra.mxu1 %v2288_v63  ;;  %vm647_vm15 = vcmp.eq.s32.totalorder %v642_v49, 1  ;;  %vm648_vm9 = vcmp.eq.s32.totalorder %v646_v50, 1 }
 0x298   :  { %2290 = vmatprep.subr.bf16.mxu1 %v3057_v2  ;;  %v434_v5 = vsel %vm186_vm7, %v2609_v4, %v2610_v3  ;;  %v435_v6 = vsel %vm186_vm7, %v2614_v1, %v2615_v0  ;;  %v668_v3 = vld [vmem:[%s3886_s2 + $0x8] sm:$0xff] }
 0x299   :  { %v2623_v7 = vpop.permute.xlu1 %2622  ;;  %v2618_v8 = vpop.permute.xlu0 %2617  ;;  %v2291_v9 = vpack.c.bf16 %v435_v6, %v434_v5  ;;  %v672_v4 = vld [vmem:[%s3819_s9 + $0x8] sm:$0xff]  ;;  %v671_v5 = vld [vmem:[%s3819_s9] sm:$0xff] }
 0x29a   :  { %v2625_v10 = vunpack.i.h.bf16 %v2623_v7  ;;  %v2624_v12 = vunpack.i.l.bf16 %v2623_v7  ;;  %v2620_v13 = vunpack.i.h.bf16 %v2618_v8  ;;  %v2619_v14 = vunpack.i.l.bf16 %v2618_v8  ;;  %v676_v6 = vld [vmem:[%s3820_s11 + $0x8] sm:$0xff]  ;;  %v675_v7 = vld [vmem:[%s3820_s11] sm:$0xff]  ;;  %s3889_s11 = smov 127  }
 0x29b   :  { %2292 = vmatpush1.bf16.msra.mxu1 %v2291_v9 }
 0x29c   :  { %2293 = vmatprep.subr.bf16.mxu1 %v3057_v2  ;;  %v446_v15 = vsel %vm199_vm8, %v2619_v14, %v2620_v13  ;;  %v447_v16 = vsel %vm199_vm8, %v2624_v12, %v2625_v10 }
 0x29d   :  { %v2294_v17 = vpack.c.bf16 %v447_v16, %v446_v15 }
 0x29f   :  { %2295 = vmatpush1.bf16.msra.mxu1 %v2294_v17 }
 0x2a0   :  { %2300 = vmatprep.subr.bf16.mxu1 %v3057_v2 }
 0x2a2   :  { %531 = vmatmul.mubr.f32.vlgmr.msra.gmra.mrb[0].mxu1 %v331_v18 }
 0x2a3   :  { %2175 = vmatprep.mubr.msk.f32.mxu1 %vm214_vm0, %v334_v19 }
 0x2a6   :  { %536 = vmatmul.mubr.f32.gmra.mrb[2].mxu1 %v333_v20 }
 0x2a7   :  { %2178 = vmatprep.mubr.msk.f32.mxu1 %vm214_vm0, %v668_v3 }
 0x2aa   :  { %v453_v24 = vpop.permute.xlu0 %452  ;;  %v458_v26 = vpop.permute.xlu1 %457 }
 0x2ae   :  { %v551_v34 = vpop.permute.xlu1 %550  ;;  %v546_v36 = vpop.permute.xlu0 %545 }
 0x375   :  { %v532_v22 = vpop.f32.mrb[0].mxu1 }
 0x376   :  { %v534_v23 = vpop.f32.mrb[1].mxu1  ;;  %v533_v25 = vadd.f32 %v532_v22, %v453_v24 }
 0x378   :  { %v541_v30 = vmax.f32 %v533_v25, 0.0 }
 0x379   :  { %v537_v27 = vpop.f32.mrb[2].mxu1 }
 0x37a   :  { %v538_v28 = vadd.f32 %v537_v27, %v458_v26  ;;  %v539_v29 = vpop.f32.mrb[3].mxu1 }
 0x37c   :  { %v542_v31 = vmax.f32 %v538_v28, 0.0 }
 0x37e   :  { %v2296_v32 = vpack.c.bf16 %v542_v31, %v541_v30 }
 0x380   :  { %2297 = vmatprep.subr.bf16.mxu0 %v2296_v32 }
 0x381   :  { %2299 = vmatpush3.bf16.msra.mxu0 %v2296_v32 }
 0x384   :  { %2219 = vmatmul.mubr.msk.f32.vlgmr.msra.gmra.mrb[4].mxu0 %vm214_vm0, %v338_v33 }
 0x457   :  { %v2220_v35 = vpop.f32.mrb[4].mxu0 }
 0x458   :  { %v631_v37 = vadd.f32 %v2220_v35, %v551_v34  ;;  %v625_v38 = vpop.f32.mrb[5].mxu0 }
 0x459   :  { %v626_v43 = vadd.f32 %v625_v38, %v546_v36 }
 0x45a   :  { %v635_v44 = vadd.f32 %v631_v37, %v3331_v40 }
 0x45b   :  { %v634_v45 = vadd.f32 %v626_v43, %v3328_v39 }
 0x45d   :  { %v2626_v46 = vpack.i.bf16 %v635_v44, %v634_v45 }
 0x45f   :  { %2627 = vrot.lane.b32.xlu0 %v2626_v46, %s3858_s5 }
 0x4d1   :  { %v2628_v51 = vpop.permute.xlu0 %2627 }
 0x4d2   :  { %v2630_v40 = vunpack.i.h.bf16 %v2628_v51  ;;  %v2629_v52 = vunpack.i.l.bf16 %v2628_v51 }
 0x4d4   :  { %v659_v39 = vsel %vm647_vm15, %v2630_v40, 0.0  ;;  %v660_v53 = vsel %vm648_vm9, %v2630_v40, 0.0  ;;  %v657_v54 = vsel %vm647_vm15, %v2629_v52, 0.0  ;;  %v658_v55 = vsel %vm648_vm9, %v2629_v52, 0.0 }
 0x4d5   :  { %v661_v56 = vpack.c.bf16 %v659_v39, %v657_v54  ;;  %v662_v57 = vpack.c.bf16 %v660_v53, %v658_v55 }
 0x4d7   :  { %663 = vst.msk [vmem:[#allocation3] sm:$0xff] %vm325_vm13, %v661_v56 }
 0x4d8   :  { %664 = vst.msk [vmem:[#allocation3 + $0x8] sm:$0xff] %vm327_vm12, %v662_v57 }
 0x4de   :  { %v677_v58 = vld [vmem:[#allocation3] sm:$0xff] }
 0x4df   :  { %v681_v59 = vld [vmem:[#allocation3 + $0x8] sm:$0xff]  ;;  %v682_v60 = vunpack.c.l.bf16 %v677_v58  ;;  %v684_v61 = vunpack.c.h.bf16 %v677_v58  ;;  %2302 = vmatpush1.bf16.msra.mxu1 %v677_v58  ;;  %1003 = vst [vmem:[#allocation3] sm:$0xff] %v3066_v11 }
 0x4e0   :  { %v685_v62 = vunpack.c.h.bf16 %v681_v59  ;;  %1004 = vst [vmem:[#allocation3 + $0x8] sm:$0xff] %v3066_v11  ;;  %v683_v63 = vunpack.c.l.bf16 %v681_v59  ;;  %2303 = vmatprep.subr.bf16.mxu1 %v3057_v2 }
 0x4e2   :  { %v2636_v0 = vpack.i.bf16 %v685_v62, %v684_v61  ;;  %v2631_v1 = vpack.i.bf16 %v683_v63, %v682_v60 }
 0x4e4   :  { %2637 = vrot.lane.b32.xlu0 %v2636_v0, %s3856_s6  ;;  %2632 = vrot.lane.b32.xlu1 %v2631_v1, %s3856_s6 }
 0x4e8   :  { %2647 = vrot.lane.b32.xlu0 %v2636_v0, %s3881_s1  ;;  %2642 = vrot.lane.b32.xlu1 %v2631_v1, %s3881_s1 }
 0x4ec   :  { %2657 = vrot.lane.b32.xlu0 %v2636_v0, %s3882_s25  ;;  %2652 = vrot.lane.b32.xlu1 %v2631_v1, %s3882_s25 }
 0x4f0   :  { %2667 = vrot.lane.b32.xlu0 %v2636_v0, %s3883_s8  ;;  %2662 = vrot.lane.b32.xlu1 %v2631_v1, %s3883_s8 }
 0x4f4   :  { %2677 = vrot.lane.b32.xlu0 %v2636_v0, %s3884_s4  ;;  %2672 = vrot.lane.b32.xlu1 %v2631_v1, %s3884_s4 }
 0x4f8   :  { %2687 = vrot.lane.b32.xlu0 %v2636_v0, %s3885_s28  ;;  %2682 = vrot.lane.b32.xlu1 %v2631_v1, %s3885_s28 }
 0x4fc   :  { %2697 = vrot.lane.b32.xlu0 %v2636_v0, %s3887_s29  ;;  %2692 = vrot.lane.b32.xlu1 %v2631_v1, %s3887_s29 }
 0x500   :  { %2707 = vrot.lane.b32.xlu0 %v2636_v0, %s3065_s27  ;;  %2702 = vrot.lane.b32.xlu1 %v2631_v1, %s3065_s27 }
 0x504   :  { %793 = vperm.xlu0 %2539, %v672_v4   ;;  %788 = vperm.xlu1 %2540, %v671_v5  }
 0x508   :  { %886 = vperm.xlu0 %2539, %v676_v6   ;;  %881 = vperm.xlu1 %2540, %v675_v7  }
 0x556   :  { %v2638_v8 = vpop.permute.xlu0 %2637  ;;  %v2633_v9 = vpop.permute.xlu1 %2632 }
 0x557   :  { %v2640_v10 = vunpack.i.h.bf16 %v2638_v8  ;;  %v2639_v12 = vunpack.i.l.bf16 %v2638_v8  ;;  %v2635_v13 = vunpack.i.h.bf16 %v2633_v9  ;;  %v2634_v14 = vunpack.i.l.bf16 %v2633_v9 }
 0x559   :  { %v699_v15 = vsel %vm108_vm1, %v2639_v12, %v2640_v10  ;;  %v698_v16 = vsel %vm108_vm1, %v2634_v14, %v2635_v13 }
 0x55a   :  { %v2648_v17 = vpop.permute.xlu0 %2647  ;;  %v2643_v18 = vpop.permute.xlu1 %2642  ;;  %v2304_v19 = vpack.c.bf16 %v699_v15, %v698_v16 }
 0x55b   :  { %v2650_v20 = vunpack.i.h.bf16 %v2648_v17  ;;  %v2649_v21 = vunpack.i.l.bf16 %v2648_v17  ;;  %v2645_v22 = vunpack.i.h.bf16 %v2643_v18  ;;  %v2644_v23 = vunpack.i.l.bf16 %v2643_v18 }
 0x55c   :  { %2305 = vmatpush1.bf16.msra.mxu1 %v2304_v19 }
 0x55d   :  { %v711_v24 = vsel %vm121_vm2, %v2649_v21, %v2650_v20  ;;  %v710_v25 = vsel %vm121_vm2, %v2644_v23, %v2645_v22  ;;  %2306 = vmatprep.subr.bf16.mxu1 %v3057_v2  ;;  %v667_v21 = vld [vmem:[%s3886_s2] sm:$0xff]  ;;  %v670_v22 = vld [vmem:[%s3886_s2 + $0x18] sm:$0xff]  ;;  %v669_v23 = vld [vmem:[%s3886_s2 + $0x10] sm:$0xff] }
 0x55e   :  { %v2658_v26 = vpop.permute.xlu0 %2657  ;;  %v2653_v27 = vpop.permute.xlu1 %2652  ;;  %v2307_v28 = vpack.c.bf16 %v711_v24, %v710_v25  ;;  %v673_v24 = vld [vmem:[%s3821_s10] sm:$0xff] }
 0x55f   :  { %v2660_v29 = vunpack.i.h.bf16 %v2658_v26  ;;  %v2659_v30 = vunpack.i.l.bf16 %v2658_v26  ;;  %v2655_v31 = vunpack.i.h.bf16 %v2653_v27  ;;  %v2654_v32 = vunpack.i.l.bf16 %v2653_v27  ;;  %2225 = vmatprep.mubr.msk.f32.mxu0 %vm214_vm0, %v673_v24 }
 0x560   :  { %2308 = vmatpush1.bf16.msra.mxu1 %v2307_v28 }
 0x561   :  { %v723_v33 = vsel %vm134_vm3, %v2659_v30, %v2660_v29  ;;  %v722_v34 = vsel %vm134_vm3, %v2654_v32, %v2655_v31  ;;  %2309 = vmatprep.subr.bf16.mxu1 %v3057_v2 }
 0x562   :  { %v2310_v35 = vpack.c.bf16 %v723_v33, %v722_v34  ;;  %v2668_v36 = vpop.permute.xlu0 %2667  ;;  %v2663_v37 = vpop.permute.xlu1 %2662 }
 0x563   :  { %v2670_v38 = vunpack.i.h.bf16 %v2668_v36  ;;  %v2669_v43 = vunpack.i.l.bf16 %v2668_v36  ;;  %v2665_v44 = vunpack.i.h.bf16 %v2663_v37  ;;  %v2664_v45 = vunpack.i.l.bf16 %v2663_v37  ;;  %v674_v36 = vld [vmem:[%s3821_s10 + $0x8] sm:$0xff] }
 0x564   :  { %2311 = vmatpush1.bf16.msra.mxu1 %v2310_v35 }
 0x565   :  { %v3421_v46 = vsel %vm147_vm4, %v2669_v43, %v2670_v38  ;;  %v3424_v47 = vsel %vm147_vm4, %v2664_v45, %v2665_v44  ;;  %2312 = vmatprep.subr.bf16.mxu1 %v3057_v2 }
 0x566   :  { %v2313_v48 = vpack.c.bf16 %v3421_v46, %v3424_v47  ;;  %v2678_v49 = vpop.permute.xlu0 %2677  ;;  %v2673_v50 = vpop.permute.xlu1 %2672 }
 0x567   :  { %v2680_v51 = vunpack.i.h.bf16 %v2678_v49  ;;  %v2679_v40 = vunpack.i.l.bf16 %v2678_v49  ;;  %v2675_v52 = vunpack.i.h.bf16 %v2673_v50  ;;  %v2674_v39 = vunpack.i.l.bf16 %v2673_v50 }
 0x568   :  { %2314 = vmatpush1.bf16.msra.mxu1 %v2313_v48 }
 0x569   :  { %v747_v53 = vsel %vm160_vm5, %v2679_v40, %v2680_v51  ;;  %v746_v54 = vsel %vm160_vm5, %v2674_v39, %v2675_v52  ;;  %2315 = vmatprep.subr.bf16.mxu1 %v3057_v2  ;;  %v974_v39 = vld [vmem:[%s3876_s3] sm:$0x3] }
 0x56a   :  { %v2316_v55 = vpack.c.bf16 %v747_v53, %v746_v54  ;;  %v2688_v56 = vpop.permute.xlu0 %2687  ;;  %v2683_v57 = vpop.permute.xlu1 %2682  ;;  %vm975_vm10 = vcmp.gt.f32.partialorder %v974_v39, 0.5 }
 0x56b   :  { %v2690_v58 = vunpack.i.h.bf16 %v2688_v56  ;;  %v2689_v59 = vunpack.i.l.bf16 %v2688_v56  ;;  %v2685_v60 = vunpack.i.h.bf16 %v2683_v57  ;;  %v2684_v61 = vunpack.i.l.bf16 %v2683_v57 }
 0x56c   :  { %2317 = vmatpush1.bf16.msra.mxu1 %v2316_v55  ;;  %v976_v53 = vsel %vm975_vm10, 1, %v3066_v11 }
 0x56d   :  { %v759_v62 = vsel %vm173_vm6, %v2689_v59, %v2690_v58  ;;  %v758_v63 = vsel %vm173_vm6, %v2684_v61, %v2685_v60  ;;  %2318 = vmatprep.subr.bf16.mxu1 %v3057_v2  ;;  %v980_v54 = vrot.slane %v976_v53, %v3274_v41  ;;  %v984_v55 = vrot.slane %v976_v53, %v3276_v42 }
 0x56e   :  { %v2319_v0 = vpack.c.bf16 %v759_v62, %v758_v63  ;;  %v2698_v1 = vpop.permute.xlu0 %2697  ;;  %v2693_v3 = vpop.permute.xlu1 %2692 }
 0x56f   :  { %v2700_v4 = vunpack.i.h.bf16 %v2698_v1  ;;  %v2699_v5 = vunpack.i.l.bf16 %v2698_v1  ;;  %v2695_v6 = vunpack.i.h.bf16 %v2693_v3  ;;  %v2694_v7 = vunpack.i.l.bf16 %v2693_v3 }
 0x570   :  { %2320 = vmatpush1.bf16.msra.mxu1 %v2319_v0  ;;  %vm985_vm11 = vcmp.eq.s32.totalorder %v980_v54, 1  ;;  %vm986_vm14 = vcmp.eq.s32.totalorder %v984_v55, 1 }
 0x571   :  { %v771_v8 = vsel %vm186_vm7, %v2699_v5, %v2700_v4  ;;  %v770_v9 = vsel %vm186_vm7, %v2694_v7, %v2695_v6  ;;  %2321 = vmatprep.subr.bf16.mxu1 %v3057_v2 }
 0x572   :  { %v2322_v10 = vpack.c.bf16 %v771_v8, %v770_v9  ;;  %v2708_v12 = vpop.permute.xlu0 %2707  ;;  %v2703_v13 = vpop.permute.xlu1 %2702  ;;  %v1006_v8 = vld [vmem:[%s3822_s12 + $0x8] sm:$0xff] }
 0x573   :  { %v2710_v14 = vunpack.i.h.bf16 %v2708_v12  ;;  %v2709_v15 = vunpack.i.l.bf16 %v2708_v12  ;;  %v2705_v16 = vunpack.i.h.bf16 %v2703_v13  ;;  %v2704_v17 = vunpack.i.l.bf16 %v2703_v13  ;;  %v1010_v9 = vld [vmem:[%s3823_s13 + $0x8] sm:$0xff]  ;;  %v1013_v13 = vld [vmem:[%s3824_s15] sm:$0xff] }
 0x574   :  { %2323 = vmatpush1.bf16.msra.mxu1 %v2322_v10  ;;  %v1009_v10 = vld [vmem:[%s3823_s13] sm:$0xff]  ;;  %v1014_v12 = vld [vmem:[%s3824_s15 + $0x8] sm:$0xff] }
 0x575   :  { %v783_v18 = vsel %vm199_vm8, %v2709_v15, %v2710_v14  ;;  %v782_v19 = vsel %vm199_vm8, %v2704_v17, %v2705_v16  ;;  %2324 = vmatprep.subr.bf16.mxu1 %v3057_v2 }
 0x576   :  { %v2325_v20 = vpack.c.bf16 %v783_v18, %v782_v19 }
 0x578   :  { %2326 = vmatpush1.bf16.msra.mxu1 %v2325_v20 }
 0x579   :  { %2362 = vmatprep.subr.bf16.mxu1 %v3057_v2 }
 0x57b   :  { %867 = vmatmul.mubr.f32.vlgmr.msra.gmra.mrb[4].mxu1 %v667_v21 }
 0x57c   :  { %2179 = vmatprep.mubr.msk.f32.mxu1 %vm214_vm0, %v670_v22 }
 0x57f   :  { %872 = vmatmul.mubr.f32.gmra.mrb[6].mxu1 %v669_v23 }
 0x583   :  { %v789_v27 = vpop.permute.xlu1 %788  ;;  %v794_v29 = vpop.permute.xlu0 %793 }
 0x587   :  { %v887_v37 = vpop.permute.xlu0 %886  ;;  %v882_v43 = vpop.permute.xlu1 %881 }
 0x64e   :  { %v868_v25 = vpop.f32.mrb[4].mxu1 }
 0x64f   :  { %v870_v26 = vpop.f32.mrb[5].mxu1  ;;  %v869_v28 = vadd.f32 %v868_v25, %v789_v27 }
 0x651   :  { %v877_v33 = vmax.f32 %v869_v28, 0.0 }
 0x652   :  { %v873_v30 = vpop.f32.mrb[6].mxu1 }
 0x653   :  { %v874_v31 = vadd.f32 %v873_v30, %v794_v29  ;;  %v875_v32 = vpop.f32.mrb[7].mxu1 }
 0x655   :  { %v878_v34 = vmax.f32 %v874_v31, 0.0 }
 0x657   :  { %v2327_v35 = vpack.c.bf16 %v878_v34, %v877_v33 }
 0x659   :  { %2328 = vmatprep.subr.bf16.mxu0 %v2327_v35 }
 0x65a   :  { %2330 = vmatpush3.bf16.msra.mxu0 %v2327_v35 }
 0x65b   :  { %2331 = vmatprep.subr.bf16.mxu0 %v3057_v2 }
 0x65d   :  { %2226 = vmatmul.mubr.msk.f32.vlgmr.msra.gmra.mrb[6].mxu0 %vm214_vm0, %v674_v36 }
 0x65e   :  { %2182 = vmatprep.mubr.msk.f32.mxu0 %vm214_vm0, %v1006_v8 }
 0x730   :  { %v2227_v38 = vpop.f32.mrb[6].mxu0 }
 0x731   :  { %v967_v44 = vadd.f32 %v2227_v38, %v887_v37  ;;  %v961_v45 = vpop.f32.mrb[7].mxu0 }
 0x732   :  { %v962_v48 = vadd.f32 %v961_v45, %v882_v43 }
 0x733   :  { %v971_v49 = vadd.f32 %v967_v44, %v3421_v46 }
 0x734   :  { %v970_v50 = vadd.f32 %v962_v48, %v3424_v47 }
 0x735   :  { %v973_v51 = vmax.f32 %v971_v49, 0.0 }
 0x736   :  { %v972_v40 = vmax.f32 %v970_v50, 0.0 }
 0x738   :  { %v2711_v52 = vpack.i.bf16 %v973_v51, %v972_v40 }
 0x73a   :  { %2712 = vrot.lane.b32.xlu1 %v2711_v52, %s3888_s26 }
 0x7ac   :  { %v2713_v46 = vpop.permute.xlu1 %2712 }
 0x7ad   :  { %v2715_v47 = vunpack.i.h.bf16 %v2713_v46  ;;  %v2714_v56 = vunpack.i.l.bf16 %v2713_v46 }
 0x7af   :  { %v997_v57 = vsel %vm985_vm11, %v2715_v47, 0.0  ;;  %v998_v58 = vsel %vm986_vm14, %v2715_v47, 0.0  ;;  %v995_v59 = vsel %vm985_vm11, %v2714_v56, 0.0  ;;  %v996_v60 = vsel %vm986_vm14, %v2714_v56, 0.0 }
 0x7b0   :  { %v999_v61 = vpack.c.bf16 %v997_v57, %v995_v59  ;;  %v1000_v62 = vpack.c.bf16 %v998_v58, %v996_v60 }
 0x7b2   :  { %1001 = vst.msk [vmem:[#allocation2] sm:$0xff] %vm325_vm13, %v999_v61 }
 0x7b3   :  { %1002 = vst.msk [vmem:[#allocation2 + $0x8] sm:$0xff] %vm327_vm12, %v1000_v62 }
 0x7b9   :  { %v1015_v63 = vld [vmem:[#allocation2] sm:$0xff] }
 0x7ba   :  { %v1019_v0 = vld [vmem:[#allocation2 + $0x8] sm:$0xff]  ;;  %v1020_v1 = vunpack.c.l.bf16 %v1015_v63  ;;  %v1022_v3 = vunpack.c.h.bf16 %v1015_v63  ;;  %2333 = vmatpush1.bf16.msra.mxu0 %v1015_v63  ;;  %1339 = vst [vmem:[#allocation2] sm:$0xff] %v3066_v11 }
 0x7bb   :  { %v1023_v4 = vunpack.c.h.bf16 %v1019_v0  ;;  %1340 = vst [vmem:[#allocation2 + $0x8] sm:$0xff] %v3066_v11  ;;  %v1021_v5 = vunpack.c.l.bf16 %v1019_v0  ;;  %2334 = vmatprep.subr.bf16.mxu0 %v3057_v2 }
 0x7bd   :  { %v2721_v6 = vpack.i.bf16 %v1023_v4, %v1022_v3  ;;  %v2716_v7 = vpack.i.bf16 %v1021_v5, %v1020_v1 }
 0x7bf   :  { %2722 = vrot.lane.b32.xlu1 %v2721_v6, %s3889_s11  ;;  %2717 = vrot.lane.b32.xlu0 %v2716_v7, %s3889_s11 }
 0x7c3   :  { %2732 = vrot.lane.b32.xlu1 %v2721_v6, %s3881_s1  ;;  %2727 = vrot.lane.b32.xlu0 %v2716_v7, %s3881_s1 }
 0x7c7   :  { %2742 = vrot.lane.b32.xlu1 %v2721_v6, %s3882_s25  ;;  %2737 = vrot.lane.b32.xlu0 %v2716_v7, %s3882_s25 }
 0x7cb   :  { %2752 = vrot.lane.b32.xlu1 %v2721_v6, %s3883_s8  ;;  %2747 = vrot.lane.b32.xlu0 %v2716_v7, %s3883_s8 }
 0x7cf   :  { %2762 = vrot.lane.b32.xlu1 %v2721_v6, %s3884_s4  ;;  %2757 = vrot.lane.b32.xlu0 %v2716_v7, %s3884_s4 }
 0x7d3   :  { %2772 = vrot.lane.b32.xlu1 %v2721_v6, %s3885_s28  ;;  %2767 = vrot.lane.b32.xlu0 %v2716_v7, %s3885_s28 }
 0x7d7   :  { %2782 = vrot.lane.b32.xlu1 %v2721_v6, %s3887_s29  ;;  %2777 = vrot.lane.b32.xlu0 %v2716_v7, %s3887_s29 }
 0x7db   :  { %2792 = vrot.lane.b32.xlu1 %v2721_v6, %s3065_s27  ;;  %2787 = vrot.lane.b32.xlu0 %v2716_v7, %s3065_s27 }
 0x7df   :  { %1131 = vperm.xlu1 %2540, %v1010_v9   ;;  %1126 = vperm.xlu0 %2539, %v1009_v10  }
 0x7e3   :  { %1224 = vperm.xlu1 %2540, %v1014_v12   ;;  %1219 = vperm.xlu0 %2539, %v1013_v13  }
 0x831   :  { %v2723_v14 = vpop.permute.xlu1 %2722  ;;  %v2718_v15 = vpop.permute.xlu0 %2717 }
 0x832   :  { %v2725_v16 = vunpack.i.h.bf16 %v2723_v14  ;;  %v2724_v17 = vunpack.i.l.bf16 %v2723_v14  ;;  %v2720_v18 = vunpack.i.h.bf16 %v2718_v15  ;;  %v2719_v19 = vunpack.i.l.bf16 %v2718_v15 }
 0x834   :  { %v1037_v20 = vsel %vm108_vm1, %v2724_v17, %v2725_v16  ;;  %v1036_v21 = vsel %vm108_vm1, %v2719_v19, %v2720_v18 }
 0x835   :  { %v2335_v22 = vpack.c.bf16 %v1037_v20, %v1036_v21  ;;  %v2733_v23 = vpop.permute.xlu1 %2732  ;;  %v2728_v24 = vpop.permute.xlu0 %2727 }
 0x836   :  { %v2735_v25 = vunpack.i.h.bf16 %v2733_v23  ;;  %v2734_v26 = vunpack.i.l.bf16 %v2733_v23  ;;  %v2730_v27 = vunpack.i.h.bf16 %v2728_v24  ;;  %v2729_v28 = vunpack.i.l.bf16 %v2728_v24 }
 0x837   :  { %2336 = vmatpush1.bf16.msra.mxu0 %v2335_v22 }
 0x838   :  { %v1049_v29 = vsel %vm121_vm2, %v2734_v26, %v2735_v25  ;;  %v1048_v30 = vsel %vm121_vm2, %v2729_v28, %v2730_v27  ;;  %2337 = vmatprep.subr.bf16.mxu0 %v3057_v2  ;;  %v1005_v26 = vld [vmem:[%s3822_s12] sm:$0xff]  ;;  %v1008_v27 = vld [vmem:[%s3822_s12 + $0x18] sm:$0xff]  ;;  %v1007_v28 = vld [vmem:[%s3822_s12 + $0x10] sm:$0xff] }
 0x839   :  { %v2338_v31 = vpack.c.bf16 %v1049_v29, %v1048_v30  ;;  %v2743_v32 = vpop.permute.xlu1 %2742  ;;  %v2738_v33 = vpop.permute.xlu0 %2737  ;;  %v1011_v29 = vld [vmem:[%s3825_s14] sm:$0xff] }
 0x83a   :  { %v2745_v34 = vunpack.i.h.bf16 %v2743_v32  ;;  %v2744_v35 = vunpack.i.l.bf16 %v2743_v32  ;;  %v2740_v36 = vunpack.i.h.bf16 %v2738_v33  ;;  %v2739_v37 = vunpack.i.l.bf16 %v2738_v33 }
 0x83b   :  { %2339 = vmatpush1.bf16.msra.mxu0 %v2338_v31 }
 0x83c   :  { %v1061_v38 = vsel %vm134_vm3, %v2744_v35, %v2745_v34  ;;  %v1060_v43 = vsel %vm134_vm3, %v2739_v37, %v2740_v36  ;;  %2340 = vmatprep.subr.bf16.mxu0 %v3057_v2 }
 0x83d   :  { %v2341_v44 = vpack.c.bf16 %v1061_v38, %v1060_v43  ;;  %v2753_v45 = vpop.permute.xlu1 %2752  ;;  %v2748_v48 = vpop.permute.xlu0 %2747 }
 0x83e   :  { %v2755_v49 = vunpack.i.h.bf16 %v2753_v45  ;;  %v2754_v50 = vunpack.i.l.bf16 %v2753_v45  ;;  %v2750_v51 = vunpack.i.h.bf16 %v2748_v48  ;;  %v2749_v40 = vunpack.i.l.bf16 %v2748_v48  ;;  %v1012_v45 = vld [vmem:[%s3825_s14 + $0x8] sm:$0xff] }
 0x83f   :  { %2342 = vmatpush1.bf16.msra.mxu0 %v2341_v44 }
 0x840   :  { %v3516_v52 = vsel %vm147_vm4, %v2754_v50, %v2755_v49  ;;  %v3519_v39 = vsel %vm147_vm4, %v2749_v40, %v2750_v51  ;;  %2343 = vmatprep.subr.bf16.mxu0 %v3057_v2 }
 0x841   :  { %v2344_v53 = vpack.c.bf16 %v3516_v52, %v3519_v39  ;;  %v2763_v54 = vpop.permute.xlu1 %2762  ;;  %v2758_v55 = vpop.permute.xlu0 %2757 }
 0x842   :  { %v2765_v46 = vunpack.i.h.bf16 %v2763_v54  ;;  %v2764_v47 = vunpack.i.l.bf16 %v2763_v54  ;;  %v2760_v56 = vunpack.i.h.bf16 %v2758_v55  ;;  %v2759_v57 = vunpack.i.l.bf16 %v2758_v55 }
 0x843   :  { %2345 = vmatpush1.bf16.msra.mxu0 %v2344_v53 }
 0x844   :  { %v1085_v58 = vsel %vm160_vm5, %v2764_v47, %v2765_v46  ;;  %v1084_v59 = vsel %vm160_vm5, %v2759_v57, %v2760_v56  ;;  %2346 = vmatprep.subr.bf16.mxu0 %v3057_v2  ;;  %v1310_v47 = vld [vmem:[%s3876_s3] sm:$0x3] }
 0x845   :  { %v2347_v60 = vpack.c.bf16 %v1085_v58, %v1084_v59  ;;  %v2773_v61 = vpop.permute.xlu1 %2772  ;;  %v2768_v62 = vpop.permute.xlu0 %2767  ;;  %vm1311_vm15 = vcmp.gt.f32.partialorder %v1310_v47, 0.5 }
 0x846   :  { %v2775_v63 = vunpack.i.h.bf16 %v2773_v61  ;;  %v2774_v0 = vunpack.i.l.bf16 %v2773_v61  ;;  %v2770_v1 = vunpack.i.h.bf16 %v2768_v62  ;;  %v2769_v3 = vunpack.i.l.bf16 %v2768_v62 }
 0x847   :  { %2348 = vmatpush1.bf16.msra.mxu0 %v2347_v60  ;;  %v1312_v56 = vsel %vm1311_vm15, 1, %v3066_v11 }
 0x848   :  { %v1097_v4 = vsel %vm173_vm6, %v2774_v0, %v2775_v63  ;;  %v1096_v5 = vsel %vm173_vm6, %v2769_v3, %v2770_v1  ;;  %2349 = vmatprep.subr.bf16.mxu0 %v3057_v2  ;;  %v1316_v57 = vrot.slane %v1312_v56, %v3274_v41  ;;  %v1320_v58 = vrot.slane %v1312_v56, %v3276_v42 }
 0x849   :  { %v2350_v6 = vpack.c.bf16 %v1097_v4, %v1096_v5  ;;  %v2783_v7 = vpop.permute.xlu1 %2782  ;;  %v2778_v8 = vpop.permute.xlu0 %2777 }
 0x84a   :  { %v2785_v9 = vunpack.i.h.bf16 %v2783_v7  ;;  %v2784_v10 = vunpack.i.l.bf16 %v2783_v7  ;;  %v2780_v12 = vunpack.i.h.bf16 %v2778_v8  ;;  %v2779_v13 = vunpack.i.l.bf16 %v2778_v8 }
 0x84b   :  { %2351 = vmatpush1.bf16.msra.mxu0 %v2350_v6  ;;  %vm1321_vm9 = vcmp.eq.s32.totalorder %v1316_v57, 1  ;;  %vm1322_vm10 = vcmp.eq.s32.totalorder %v1320_v58, 1 }
 0x84c   :  { %v1109_v14 = vsel %vm186_vm7, %v2784_v10, %v2785_v9  ;;  %v1108_v15 = vsel %vm186_vm7, %v2779_v13, %v2780_v12  ;;  %2352 = vmatprep.subr.bf16.mxu0 %v3057_v2  ;;  %v1342_v12 = vld [vmem:[%s3826_s16 + $0x8] sm:$0xff] }
 0x84d   :  { %v2353_v16 = vpack.c.bf16 %v1109_v14, %v1108_v15  ;;  %v2793_v17 = vpop.permute.xlu1 %2792  ;;  %v2788_v18 = vpop.permute.xlu0 %2787  ;;  %2186 = vmatprep.mubr.msk.f32.mxu1 %vm214_vm0, %v1342_v12  ;;  %v1346_v13 = vld [vmem:[%s3827_s17 + $0x8] sm:$0xff]  ;;  %v1345_v14 = vld [vmem:[%s3827_s17] sm:$0xff] }
 0x84e   :  { %v2795_v19 = vunpack.i.h.bf16 %v2793_v17  ;;  %v2794_v20 = vunpack.i.l.bf16 %v2793_v17  ;;  %v2790_v21 = vunpack.i.h.bf16 %v2788_v18  ;;  %v2789_v22 = vunpack.i.l.bf16 %v2788_v18  ;;  %v1350_v15 = vld [vmem:[%s3828_s19 + $0x8] sm:$0xff] }
 0x84f   :  { %2354 = vmatpush1.bf16.msra.mxu0 %v2353_v16  ;;  %v1349_v16 = vld [vmem:[%s3828_s19] sm:$0xff] }
 0x850   :  { %v1121_v23 = vsel %vm199_vm8, %v2794_v20, %v2795_v19  ;;  %v1120_v24 = vsel %vm199_vm8, %v2789_v22, %v2790_v21  ;;  %2355 = vmatprep.subr.bf16.mxu0 %v3057_v2 }
 0x851   :  { %v2356_v25 = vpack.c.bf16 %v1121_v23, %v1120_v24 }
 0x853   :  { %2357 = vmatpush1.bf16.msra.mxu0 %v2356_v25 }
 0x856   :  { %1205 = vmatmul.mubr.f32.vlgmr.msra.gmra.mrb[8].mxu0 %v1005_v26 }
 0x857   :  { %2183 = vmatprep.mubr.msk.f32.mxu0 %vm214_vm0, %v1008_v27 }
 0x85a   :  { %1210 = vmatmul.mubr.f32.gmra.mrb[10].mxu0 %v1007_v28 }
 0x85b   :  { %2232 = vmatprep.mubr.msk.f32.mxu0 %vm214_vm0, %v1011_v29 }
 0x85e   :  { %v1127_v32 = vpop.permute.xlu0 %1126  ;;  %v1132_v34 = vpop.permute.xlu1 %1131 }
 0x862   :  { %v1225_v48 = vpop.permute.xlu1 %1224  ;;  %v1220_v50 = vpop.permute.xlu0 %1219 }
 0x929   :  { %v1206_v30 = vpop.f32.mrb[8].mxu0 }
 0x92a   :  { %v1208_v31 = vpop.f32.mrb[9].mxu0  ;;  %v1207_v33 = vadd.f32 %v1206_v30, %v1127_v32 }
 0x92c   :  { %v1215_v38 = vmax.f32 %v1207_v33, 0.0 }
 0x92d   :  { %v1211_v35 = vpop.f32.mrb[10].mxu0 }
 0x92e   :  { %v1212_v36 = vadd.f32 %v1211_v35, %v1132_v34  ;;  %v1213_v37 = vpop.f32.mrb[11].mxu0 }
 0x930   :  { %v1216_v43 = vmax.f32 %v1212_v36, 0.0 }
 0x932   :  { %v2358_v44 = vpack.c.bf16 %v1216_v43, %v1215_v38 }
 0x934   :  { %2359 = vmatprep.subr.bf16.mxu0 %v2358_v44 }
 0x935   :  { %2361 = vmatpush3.bf16.msra.mxu0 %v2358_v44 }
 0x938   :  { %2233 = vmatmul.mubr.msk.f32.vlgmr.msra.gmra.mrb[12].mxu0 %vm214_vm0, %v1012_v45 }
 0xa0b   :  { %v2234_v49 = vpop.f32.mrb[12].mxu0 }
 0xa0c   :  { %v1305_v51 = vadd.f32 %v2234_v49, %v1225_v48  ;;  %v1299_v40 = vpop.f32.mrb[13].mxu0 }
 0xa0d   :  { %v1300_v53 = vadd.f32 %v1299_v40, %v1220_v50 }
 0xa0e   :  { %v1309_v54 = vadd.f32 %v1305_v51, %v3516_v52 }
 0xa0f   :  { %v1308_v55 = vadd.f32 %v1300_v53, %v3519_v39 }
 0xa11   :  { %v2796_v46 = vpack.i.bf16 %v1309_v54, %v1308_v55 }
 0xa13   :  { %2797 = vrot.lane.b32.xlu0 %v2796_v46, %s3888_s26 }
 0xa85   :  { %v2798_v59 = vpop.permute.xlu0 %2797 }
 0xa86   :  { %v2800_v52 = vunpack.i.h.bf16 %v2798_v59  ;;  %v2799_v60 = vunpack.i.l.bf16 %v2798_v59 }
 0xa88   :  { %v1333_v39 = vsel %vm1321_vm9, %v2800_v52, 0.0  ;;  %v1334_v61 = vsel %vm1322_vm10, %v2800_v52, 0.0  ;;  %v1331_v62 = vsel %vm1321_vm9, %v2799_v60, 0.0  ;;  %v1332_v63 = vsel %vm1322_vm10, %v2799_v60, 0.0 }
 0xa89   :  { %v1335_v0 = vpack.c.bf16 %v1333_v39, %v1331_v62  ;;  %v1336_v1 = vpack.c.bf16 %v1334_v61, %v1332_v63 }
 0xa8b   :  { %1337 = vst.msk [vmem:[#allocation3] sm:$0xff] %vm325_vm13, %v1335_v0 }
 0xa8c   :  { %1338 = vst.msk [vmem:[#allocation3 + $0x8] sm:$0xff] %vm327_vm12, %v1336_v1 }
 0xa92   :  { %v1351_v3 = vld [vmem:[#allocation3] sm:$0xff] }
 0xa93   :  { %v1355_v4 = vld [vmem:[#allocation3 + $0x8] sm:$0xff]  ;;  %v1356_v5 = vunpack.c.l.bf16 %v1351_v3  ;;  %v1358_v6 = vunpack.c.h.bf16 %v1351_v3  ;;  %2364 = vmatpush1.bf16.msra.mxu1 %v1351_v3  ;;  %1677 = vst [vmem:[#allocation3] sm:$0xff] %v3066_v11 }
 0xa94   :  { %v1359_v7 = vunpack.c.h.bf16 %v1355_v4  ;;  %1678 = vst [vmem:[#allocation3 + $0x8] sm:$0xff] %v3066_v11  ;;  %v1357_v8 = vunpack.c.l.bf16 %v1355_v4  ;;  %2365 = vmatprep.subr.bf16.mxu1 %v3057_v2 }
 0xa96   :  { %v2806_v9 = vpack.i.bf16 %v1359_v7, %v1358_v6  ;;  %v2801_v10 = vpack.i.bf16 %v1357_v8, %v1356_v5 }
 0xa98   :  { %2807 = vrot.lane.b32.xlu0 %v2806_v9, %s3889_s11  ;;  %2802 = vrot.lane.b32.xlu1 %v2801_v10, %s3889_s11 }
 0xa9c   :  { %2817 = vrot.lane.b32.xlu0 %v2806_v9, %s3881_s1  ;;  %2812 = vrot.lane.b32.xlu1 %v2801_v10, %s3881_s1 }
 0xaa0   :  { %2827 = vrot.lane.b32.xlu0 %v2806_v9, %s3882_s25  ;;  %2822 = vrot.lane.b32.xlu1 %v2801_v10, %s3882_s25 }
 0xaa4   :  { %2837 = vrot.lane.b32.xlu0 %v2806_v9, %s3883_s8  ;;  %2832 = vrot.lane.b32.xlu1 %v2801_v10, %s3883_s8 }
 0xaa8   :  { %2847 = vrot.lane.b32.xlu0 %v2806_v9, %s3884_s4  ;;  %2842 = vrot.lane.b32.xlu1 %v2801_v10, %s3884_s4 }
 0xaac   :  { %2857 = vrot.lane.b32.xlu0 %v2806_v9, %s3885_s28  ;;  %2852 = vrot.lane.b32.xlu1 %v2801_v10, %s3885_s28 }
 0xab0   :  { %2867 = vrot.lane.b32.xlu0 %v2806_v9, %s3887_s29  ;;  %2862 = vrot.lane.b32.xlu1 %v2801_v10, %s3887_s29 }
 0xab4   :  { %2877 = vrot.lane.b32.xlu0 %v2806_v9, %s3065_s27  ;;  %2872 = vrot.lane.b32.xlu1 %v2801_v10, %s3065_s27 }
 0xab8   :  { %1467 = vperm.xlu0 %2539, %v1346_v13   ;;  %1462 = vperm.xlu1 %2540, %v1345_v14  }
 0xabc   :  { %1560 = vperm.xlu0 %2539, %v1350_v15   ;;  %1555 = vperm.xlu1 %2540, %v1349_v16  }
 0xb0a   :  { %v2808_v17 = vpop.permute.xlu0 %2807  ;;  %v2803_v18 = vpop.permute.xlu1 %2802 }
 0xb0b   :  { %v2810_v19 = vunpack.i.h.bf16 %v2808_v17  ;;  %v2809_v20 = vunpack.i.l.bf16 %v2808_v17  ;;  %v2805_v21 = vunpack.i.h.bf16 %v2803_v18  ;;  %v2804_v22 = vunpack.i.l.bf16 %v2803_v18 }
 0xb0d   :  { %v1373_v23 = vsel %vm108_vm1, %v2809_v20, %v2810_v19  ;;  %v1372_v24 = vsel %vm108_vm1, %v2804_v22, %v2805_v21 }
 0xb0e   :  { %v2366_v25 = vpack.c.bf16 %v1373_v23, %v1372_v24  ;;  %v2818_v26 = vpop.permute.xlu0 %2817  ;;  %v2813_v27 = vpop.permute.xlu1 %2812 }
 0xb0f   :  { %v2820_v28 = vunpack.i.h.bf16 %v2818_v26  ;;  %v2819_v29 = vunpack.i.l.bf16 %v2818_v26  ;;  %v2815_v30 = vunpack.i.h.bf16 %v2813_v27  ;;  %v2814_v31 = vunpack.i.l.bf16 %v2813_v27 }
 0xb10   :  { %2367 = vmatpush1.bf16.msra.mxu1 %v2366_v25 }
 0xb11   :  { %v1385_v32 = vsel %vm121_vm2, %v2819_v29, %v2820_v28  ;;  %v1384_v33 = vsel %vm121_vm2, %v2814_v31, %v2815_v30  ;;  %2368 = vmatprep.subr.bf16.mxu1 %v3057_v2  ;;  %v1341_v29 = vld [vmem:[%s3826_s16] sm:$0xff]  ;;  %v1344_v30 = vld [vmem:[%s3826_s16 + $0x18] sm:$0xff]  ;;  %v1343_v31 = vld [vmem:[%s3826_s16 + $0x10] sm:$0xff] }
 0xb12   :  { %v2369_v34 = vpack.c.bf16 %v1385_v32, %v1384_v33  ;;  %v2828_v35 = vpop.permute.xlu0 %2827  ;;  %v2823_v36 = vpop.permute.xlu1 %2822  ;;  %v1347_v32 = vld [vmem:[%s3829_s18] sm:$0xff] }
 0xb13   :  { %v2830_v37 = vunpack.i.h.bf16 %v2828_v35  ;;  %v2829_v38 = vunpack.i.l.bf16 %v2828_v35  ;;  %v2825_v43 = vunpack.i.h.bf16 %v2823_v36  ;;  %v2824_v44 = vunpack.i.l.bf16 %v2823_v36  ;;  %2239 = vmatprep.mubr.msk.f32.mxu0 %vm214_vm0, %v1347_v32 }
 0xb14   :  { %2370 = vmatpush1.bf16.msra.mxu1 %v2369_v34 }
 0xb15   :  { %v1397_v45 = vsel %vm134_vm3, %v2829_v38, %v2830_v37  ;;  %v1396_v48 = vsel %vm134_vm3, %v2824_v44, %v2825_v43  ;;  %2371 = vmatprep.subr.bf16.mxu1 %v3057_v2 }
 0xb16   :  { %v2372_v49 = vpack.c.bf16 %v1397_v45, %v1396_v48  ;;  %v2838_v50 = vpop.permute.xlu0 %2837  ;;  %v2833_v51 = vpop.permute.xlu1 %2832 }
 0xb17   :  { %v2840_v40 = vunpack.i.h.bf16 %v2838_v50  ;;  %v2839_v53 = vunpack.i.l.bf16 %v2838_v50  ;;  %v2835_v54 = vunpack.i.h.bf16 %v2833_v51  ;;  %v2834_v55 = vunpack.i.l.bf16 %v2833_v51  ;;  %v1348_v50 = vld [vmem:[%s3829_s18 + $0x8] sm:$0xff] }
 0xb18   :  { %2373 = vmatpush1.bf16.msra.mxu1 %v2372_v49 }
 0xb19   :  { %v3609_v46 = vsel %vm147_vm4, %v2839_v53, %v2840_v40  ;;  %v3612_v47 = vsel %vm147_vm4, %v2834_v55, %v2835_v54  ;;  %2374 = vmatprep.subr.bf16.mxu1 %v3057_v2 }
 0xb1a   :  { %v2375_v56 = vpack.c.bf16 %v3609_v46, %v3612_v47  ;;  %v2848_v57 = vpop.permute.xlu0 %2847  ;;  %v2843_v58 = vpop.permute.xlu1 %2842 }
 0xb1b   :  { %v2850_v59 = vunpack.i.h.bf16 %v2848_v57  ;;  %v2849_v52 = vunpack.i.l.bf16 %v2848_v57  ;;  %v2845_v60 = vunpack.i.h.bf16 %v2843_v58  ;;  %v2844_v39 = vunpack.i.l.bf16 %v2843_v58 }
 0xb1c   :  { %2376 = vmatpush1.bf16.msra.mxu1 %v2375_v56 }
 0xb1d   :  { %v1421_v61 = vsel %vm160_vm5, %v2849_v52, %v2850_v59  ;;  %v1420_v62 = vsel %vm160_vm5, %v2844_v39, %v2845_v60  ;;  %2377 = vmatprep.subr.bf16.mxu1 %v3057_v2  ;;  %v1648_v39 = vld [vmem:[%s3876_s3] sm:$0x3] }
 0xb1e   :  { %v2378_v63 = vpack.c.bf16 %v1421_v61, %v1420_v62  ;;  %v2858_v0 = vpop.permute.xlu0 %2857  ;;  %v2853_v1 = vpop.permute.xlu1 %2852  ;;  %vm1649_vm11 = vcmp.gt.f32.partialorder %v1648_v39, 0.5 }
 0xb1f   :  { %v2860_v3 = vunpack.i.h.bf16 %v2858_v0  ;;  %v2859_v4 = vunpack.i.l.bf16 %v2858_v0  ;;  %v2855_v5 = vunpack.i.h.bf16 %v2853_v1  ;;  %v2854_v6 = vunpack.i.l.bf16 %v2853_v1 }
 0xb20   :  { %2379 = vmatpush1.bf16.msra.mxu1 %v2378_v63  ;;  %v1650_v61 = vsel %vm1649_vm11, 1, %v3066_v11 }
 0xb21   :  { %v1433_v7 = vsel %vm173_vm6, %v2859_v4, %v2860_v3  ;;  %v1432_v8 = vsel %vm173_vm6, %v2854_v6, %v2855_v5  ;;  %2380 = vmatprep.subr.bf16.mxu1 %v3057_v2  ;;  %v1654_v62 = vrot.slane %v1650_v61, %v3274_v41  ;;  %v1658_v63 = vrot.slane %v1650_v61, %v3276_v42 }
 0xb22   :  { %v2381_v9 = vpack.c.bf16 %v1433_v7, %v1432_v8  ;;  %v2868_v10 = vpop.permute.xlu0 %2867  ;;  %v2863_v12 = vpop.permute.xlu1 %2862 }
 0xb23   :  { %v2870_v13 = vunpack.i.h.bf16 %v2868_v10  ;;  %v2869_v14 = vunpack.i.l.bf16 %v2868_v10  ;;  %v2865_v15 = vunpack.i.h.bf16 %v2863_v12  ;;  %v2864_v16 = vunpack.i.l.bf16 %v2863_v12 }
 0xb24   :  { %2382 = vmatpush1.bf16.msra.mxu1 %v2381_v9  ;;  %vm1659_vm14 = vcmp.eq.s32.totalorder %v1654_v62, 1  ;;  %vm1660_vm15 = vcmp.eq.s32.totalorder %v1658_v63, 1 }
 0xb25   :  { %v1445_v17 = vsel %vm186_vm7, %v2869_v14, %v2870_v13  ;;  %v1444_v18 = vsel %vm186_vm7, %v2864_v16, %v2865_v15  ;;  %2383 = vmatprep.subr.bf16.mxu1 %v3057_v2 }
 0xb26   :  { %v2384_v19 = vpack.c.bf16 %v1445_v17, %v1444_v18  ;;  %v2878_v20 = vpop.permute.xlu0 %2877  ;;  %v2873_v21 = vpop.permute.xlu1 %2872  ;;  %v1680_v17 = vld [vmem:[%s3830_s20 + $0x8] sm:$0xff] }
 0xb27   :  { %v2880_v22 = vunpack.i.h.bf16 %v2878_v20  ;;  %v2879_v23 = vunpack.i.l.bf16 %v2878_v20  ;;  %v2875_v24 = vunpack.i.h.bf16 %v2873_v21  ;;  %v2874_v25 = vunpack.i.l.bf16 %v2873_v21  ;;  %v1684_v18 = vld [vmem:[%s3831_s21 + $0x8] sm:$0xff] }
 0xb28   :  { %2385 = vmatpush1.bf16.msra.mxu1 %v2384_v19  ;;  %v1683_v19 = vld [vmem:[%s3831_s21] sm:$0xff] }
 0xb29   :  { %v1457_v26 = vsel %vm199_vm8, %v2879_v23, %v2880_v22  ;;  %v1456_v27 = vsel %vm199_vm8, %v2874_v25, %v2875_v24  ;;  %2386 = vmatprep.subr.bf16.mxu1 %v3057_v2 }
 0xb2a   :  { %v2387_v28 = vpack.c.bf16 %v1457_v26, %v1456_v27 }
 0xb2c   :  { %2388 = vmatpush1.bf16.msra.mxu1 %v2387_v28 }
 0xb2d   :  { %2420 = vmatprep.subr.bf16.mxu1 %v3057_v2 }
 0xb2f   :  { %1541 = vmatmul.mubr.f32.vlgmr.msra.gmra.mrb[8].mxu1 %v1341_v29 }
 0xb30   :  { %2187 = vmatprep.mubr.msk.f32.mxu1 %vm214_vm0, %v1344_v30 }
 0xb33   :  { %1546 = vmatmul.mubr.f32.gmra.mrb[10].mxu1 %v1343_v31 }
 0xb37   :  { %v1463_v35 = vpop.permute.xlu1 %1462  ;;  %v1468_v37 = vpop.permute.xlu0 %1467 }
 0xb3b   :  { %v1561_v51 = vpop.permute.xlu0 %1560  ;;  %v1556_v53 = vpop.permute.xlu1 %1555 }
 0xc02   :  { %v1542_v33 = vpop.f32.mrb[8].mxu1 }
 0xc03   :  { %v1544_v34 = vpop.f32.mrb[9].mxu1  ;;  %v1543_v36 = vadd.f32 %v1542_v33, %v1463_v35 }
 0xc05   :  { %v1551_v45 = vmax.f32 %v1543_v36, 0.0 }
 0xc06   :  { %v1547_v38 = vpop.f32.mrb[10].mxu1 }
 0xc07   :  { %v1548_v43 = vadd.f32 %v1547_v38, %v1468_v37  ;;  %v1549_v44 = vpop.f32.mrb[11].mxu1 }
 0xc09   :  { %v1552_v48 = vmax.f32 %v1548_v43, 0.0 }
 0xc0b   :  { %v2389_v49 = vpack.c.bf16 %v1552_v48, %v1551_v45 }
 0xc0d   :  { %2390 = vmatprep.subr.bf16.mxu0 %v2389_v49 }
 0xc0e   :  { %2392 = vmatpush3.bf16.msra.mxu0 %v2389_v49 }
 0xc0f   :  { %2393 = vmatprep.subr.bf16.mxu0 %v3057_v2 }
 0xc11   :  { %2240 = vmatmul.mubr.msk.f32.vlgmr.msra.gmra.mrb[14].mxu0 %vm214_vm0, %v1348_v50 }
 0xc12   :  { %2190 = vmatprep.mubr.msk.f32.mxu0 %vm214_vm0, %v1680_v17 }
 0xce4   :  { %v2241_v40 = vpop.f32.mrb[14].mxu0 }
 0xce5   :  { %v1641_v54 = vadd.f32 %v2241_v40, %v1561_v51  ;;  %v1635_v55 = vpop.f32.mrb[15].mxu0 }
 0xce6   :  { %v1636_v56 = vadd.f32 %v1635_v55, %v1556_v53 }
 0xce7   :  { %v1645_v57 = vadd.f32 %v1641_v54, %v3609_v46 }
 0xce8   :  { %v1644_v58 = vadd.f32 %v1636_v56, %v3612_v47 }
 0xce9   :  { %v1647_v59 = vmax.f32 %v1645_v57, 0.0 }
 0xcea   :  { %v1646_v52 = vmax.f32 %v1644_v58, 0.0 }
 0xcec   :  { %v2881_v60 = vpack.i.bf16 %v1647_v59, %v1646_v52 }
 0xcee   :  { %2882 = vrot.lane.b32.xlu1 %v2881_v60, %s3888_s26 }
 0xd60   :  { %v2883_v46 = vpop.permute.xlu1 %2882 }
 0xd61   :  { %v2885_v47 = vunpack.i.h.bf16 %v2883_v46  ;;  %v2884_v0 = vunpack.i.l.bf16 %v2883_v46 }
 0xd63   :  { %v1671_v1 = vsel %vm1659_vm14, %v2885_v47, 0.0  ;;  %v1672_v3 = vsel %vm1660_vm15, %v2885_v47, 0.0  ;;  %v1669_v4 = vsel %vm1659_vm14, %v2884_v0, 0.0  ;;  %v1670_v5 = vsel %vm1660_vm15, %v2884_v0, 0.0 }
 0xd64   :  { %v1673_v6 = vpack.c.bf16 %v1671_v1, %v1669_v4  ;;  %v1674_v7 = vpack.c.bf16 %v1672_v3, %v1670_v5 }
 0xd66   :  { %1675 = vst.msk [vmem:[#allocation2] sm:$0xff] %vm325_vm13, %v1673_v6 }
 0xd67   :  { %1676 = vst.msk [vmem:[#allocation2 + $0x8] sm:$0xff] %vm327_vm12, %v1674_v7 }
 0xd6d   :  { %v1685_v8 = vld [vmem:[#allocation2] sm:$0xff] }
 0xd6e   :  { %v1689_v9 = vld [vmem:[#allocation2 + $0x8] sm:$0xff]  ;;  %2395 = vmatpush1.bf16.msra.mxu0 %v1685_v8  ;;  %v1692_v10 = vunpack.c.h.bf16 %v1685_v8  ;;  %v1690_v13 = vunpack.c.l.bf16 %v1685_v8 }
 0xd6f   :  { %v1693_v12 = vunpack.c.h.bf16 %v1689_v9  ;;  %v1691_v14 = vunpack.c.l.bf16 %v1689_v9  ;;  %2396 = vmatprep.subr.bf16.mxu0 %v3057_v2 }
 0xd71   :  { %v2891_v15 = vpack.i.bf16 %v1693_v12, %v1692_v10  ;;  %v2886_v16 = vpack.i.bf16 %v1691_v14, %v1690_v13 }
 0xd73   :  { %2892 = vrot.lane.b32.xlu1 %v2891_v15, %s3889_s11  ;;  %2887 = vrot.lane.b32.xlu0 %v2886_v16, %s3889_s11 }
 0xd77   :  { %2902 = vrot.lane.b32.xlu1 %v2891_v15, %s3881_s1  ;;  %2897 = vrot.lane.b32.xlu0 %v2886_v16, %s3881_s1 }
 0xd7b   :  { %2912 = vrot.lane.b32.xlu1 %v2891_v15, %s3882_s25  ;;  %2907 = vrot.lane.b32.xlu0 %v2886_v16, %s3882_s25 }
 0xd7f   :  { %2922 = vrot.lane.b32.xlu1 %v2891_v15, %s3883_s8  ;;  %2917 = vrot.lane.b32.xlu0 %v2886_v16, %s3883_s8 }
 0xd83   :  { %2932 = vrot.lane.b32.xlu1 %v2891_v15, %s3884_s4  ;;  %2927 = vrot.lane.b32.xlu0 %v2886_v16, %s3884_s4 }
 0xd87   :  { %2942 = vrot.lane.b32.xlu1 %v2891_v15, %s3885_s28  ;;  %2937 = vrot.lane.b32.xlu0 %v2886_v16, %s3885_s28 }
 0xd8b   :  { %2952 = vrot.lane.b32.xlu1 %v2891_v15, %s3887_s29  ;;  %2947 = vrot.lane.b32.xlu0 %v2886_v16, %s3887_s29 }
 0xd8f   :  { %2962 = vrot.lane.b32.xlu1 %v2891_v15, %s3065_s27  ;;  %2957 = vrot.lane.b32.xlu0 %v2886_v16, %s3065_s27 }
 0xd93   :  { %1801 = vperm.xlu1 %2540, %v1684_v18   ;;  %1796 = vperm.xlu0 %2539, %v1683_v19  }
 0xde5   :  { %v2893_v20 = vpop.permute.xlu1 %2892  ;;  %v2888_v21 = vpop.permute.xlu0 %2887 }
 0xde6   :  { %v2895_v22 = vunpack.i.h.bf16 %v2893_v20  ;;  %v2894_v23 = vunpack.i.l.bf16 %v2893_v20  ;;  %v2890_v24 = vunpack.i.h.bf16 %v2888_v21  ;;  %v2889_v25 = vunpack.i.l.bf16 %v2888_v21 }
 0xde8   :  { %v1707_v26 = vsel %vm108_vm1, %v2894_v23, %v2895_v22  ;;  %v1706_v27 = vsel %vm108_vm1, %v2889_v25, %v2890_v24 }
 0xde9   :  { %v2397_v28 = vpack.c.bf16 %v1707_v26, %v1706_v27  ;;  %v2903_v29 = vpop.permute.xlu1 %2902  ;;  %v2898_v30 = vpop.permute.xlu0 %2897 }
 0xdea   :  { %v2905_v31 = vunpack.i.h.bf16 %v2903_v29  ;;  %v2904_v32 = vunpack.i.l.bf16 %v2903_v29  ;;  %v2900_v33 = vunpack.i.h.bf16 %v2898_v30  ;;  %v2899_v34 = vunpack.i.l.bf16 %v2898_v30 }
 0xdeb   :  { %2398 = vmatpush1.bf16.msra.mxu0 %v2397_v28 }
 0xdec   :  { %v1719_v35 = vsel %vm121_vm2, %v2904_v32, %v2905_v31  ;;  %v1718_v36 = vsel %vm121_vm2, %v2899_v34, %v2900_v33  ;;  %2399 = vmatprep.subr.bf16.mxu0 %v3057_v2  ;;  %v1679_v32 = vld [vmem:[%s3830_s20] sm:$0xff]  ;;  %v1682_v33 = vld [vmem:[%s3830_s20 + $0x18] sm:$0xff]  ;;  %v1681_v34 = vld [vmem:[%s3830_s20 + $0x10] sm:$0xff] }
 0xded   :  { %v2400_v37 = vpack.c.bf16 %v1719_v35, %v1718_v36  ;;  %v2913_v38 = vpop.permute.xlu1 %2912  ;;  %v2908_v43 = vpop.permute.xlu0 %2907 }
 0xdee   :  { %v2915_v44 = vunpack.i.h.bf16 %v2913_v38  ;;  %v2914_v45 = vunpack.i.l.bf16 %v2913_v38  ;;  %v2910_v48 = vunpack.i.h.bf16 %v2908_v43  ;;  %v2909_v49 = vunpack.i.l.bf16 %v2908_v43 }
 0xdef   :  { %2401 = vmatpush1.bf16.msra.mxu0 %v2400_v37 }
 0xdf0   :  { %v1731_v50 = vsel %vm134_vm3, %v2914_v45, %v2915_v44  ;;  %v1730_v51 = vsel %vm134_vm3, %v2909_v49, %v2910_v48  ;;  %2402 = vmatprep.subr.bf16.mxu0 %v3057_v2 }
 0xdf1   :  { %v2403_v40 = vpack.c.bf16 %v1731_v50, %v1730_v51  ;;  %v2923_v53 = vpop.permute.xlu1 %2922  ;;  %v2918_v54 = vpop.permute.xlu0 %2917 }
 0xdf2   :  { %v2925_v55 = vunpack.i.h.bf16 %v2923_v53  ;;  %v2924_v56 = vunpack.i.l.bf16 %v2923_v53  ;;  %v2920_v57 = vunpack.i.h.bf16 %v2918_v54  ;;  %v2919_v58 = vunpack.i.l.bf16 %v2918_v54 }
 0xdf3   :  { %2404 = vmatpush1.bf16.msra.mxu0 %v2403_v40  ;;  %v1887_v40 = vld [vmem:[%s3876_s3] sm:$0x3] }
 0xdf4   :  { %v1743_v59 = vsel %vm147_vm4, %v2924_v56, %v2925_v55  ;;  %v1742_v52 = vsel %vm147_vm4, %v2919_v58, %v2920_v57  ;;  %2405 = vmatprep.subr.bf16.mxu0 %v3057_v2  ;;  %vm1888_vm9 = vcmp.gt.f32.partialorder %v1887_v40, 0.5 }
 0xdf5   :  { %v2406_v60 = vpack.c.bf16 %v1743_v59, %v1742_v52  ;;  %v2933_v39 = vpop.permute.xlu1 %2932  ;;  %v2928_v61 = vpop.permute.xlu0 %2927  ;;  %v1889_v53 = vsel %vm1888_vm9, 1, %v3066_v11 }
 0xdf6   :  { %v2935_v62 = vunpack.i.h.bf16 %v2933_v39  ;;  %v2934_v63 = vunpack.i.l.bf16 %v2933_v39  ;;  %v2930_v46 = vunpack.i.h.bf16 %v2928_v61  ;;  %v2929_v47 = vunpack.i.l.bf16 %v2928_v61 }
 0xdf7   :  { %2407 = vmatpush1.bf16.msra.mxu0 %v2406_v60  ;;  %v1893_v54 = vrot.slane %v1889_v53, %v3274_v41  ;;  %v1897_v55 = vrot.slane %v1889_v53, %v3276_v42 }
 0xdf8   :  { %v1755_v0 = vsel %vm160_vm5, %v2934_v63, %v2935_v62  ;;  %v1754_v1 = vsel %vm160_vm5, %v2929_v47, %v2930_v46  ;;  %2408 = vmatprep.subr.bf16.mxu0 %v3057_v2 }
 0xdf9   :  { %v2409_v3 = vpack.c.bf16 %v1755_v0, %v1754_v1  ;;  %v2943_v4 = vpop.permute.xlu1 %2942  ;;  %v2938_v5 = vpop.permute.xlu0 %2937  ;;  %vm1898_vm10 = vcmp.eq.s32.totalorder %v1893_v54, 1  ;;  %vm1899_vm11 = vcmp.eq.s32.totalorder %v1897_v55, 1 }
 0xdfa   :  { %v2945_v6 = vunpack.i.h.bf16 %v2943_v4  ;;  %v2944_v7 = vunpack.i.l.bf16 %v2943_v4  ;;  %v2940_v8 = vunpack.i.h.bf16 %v2938_v5  ;;  %v2939_v9 = vunpack.i.l.bf16 %v2938_v5 }
 0xdfb   :  { %2410 = vmatpush1.bf16.msra.mxu0 %v2409_v3 }
 0xdfc   :  { %v1767_v10 = vsel %vm173_vm6, %v2944_v7, %v2945_v6  ;;  %v1766_v12 = vsel %vm173_vm6, %v2939_v9, %v2940_v8  ;;  %2411 = vmatprep.subr.bf16.mxu0 %v3057_v2  ;;  %v1919_v6 = vld [vmem:[%s3832_s22 + $0x8] sm:$0xff] }
 0xdfd   :  { %v2412_v13 = vpack.c.bf16 %v1767_v10, %v1766_v12  ;;  %v2953_v14 = vpop.permute.xlu1 %2952  ;;  %v2948_v15 = vpop.permute.xlu0 %2947  ;;  %2192 = vmatprep.mubr.msk.f32.mxu1 %vm214_vm0, %v1919_v6 }
 0xdfe   :  { %v2955_v16 = vunpack.i.h.bf16 %v2953_v14  ;;  %v2954_v17 = vunpack.i.l.bf16 %v2953_v14  ;;  %v2950_v18 = vunpack.i.h.bf16 %v2948_v15  ;;  %v2949_v19 = vunpack.i.l.bf16 %v2948_v15 }
 0xdff   :  { %2413 = vmatpush1.bf16.msra.mxu0 %v2412_v13 }
 0xe00   :  { %v1779_v20 = vsel %vm186_vm7, %v2954_v17, %v2955_v16  ;;  %v1778_v21 = vsel %vm186_vm7, %v2949_v19, %v2950_v18  ;;  %2414 = vmatprep.subr.bf16.mxu0 %v3057_v2 }
 0xe01   :  { %v2415_v22 = vpack.c.bf16 %v1779_v20, %v1778_v21  ;;  %v2963_v23 = vpop.permute.xlu1 %2962  ;;  %v2958_v24 = vpop.permute.xlu0 %2957 }
 0xe02   :  { %v2965_v25 = vunpack.i.h.bf16 %v2963_v23  ;;  %v2964_v26 = vunpack.i.l.bf16 %v2963_v23  ;;  %v2960_v27 = vunpack.i.h.bf16 %v2958_v24  ;;  %v2959_v28 = vunpack.i.l.bf16 %v2958_v24 }
 0xe03   :  { %2416 = vmatpush1.bf16.msra.mxu0 %v2415_v22 }
 0xe04   :  { %v1791_v29 = vsel %vm199_vm8, %v2964_v26, %v2965_v25  ;;  %v1790_v30 = vsel %vm199_vm8, %v2959_v28, %v2960_v27  ;;  %2417 = vmatprep.subr.bf16.mxu0 %v3057_v2 }
 0xe05   :  { %v2418_v31 = vpack.c.bf16 %v1791_v29, %v1790_v30 }
 0xe07   :  { %2419 = vmatpush1.bf16.msra.mxu0 %v2418_v31 }
 0xe0a   :  { %1875 = vmatmul.mubr.f32.vlgmr.msra.gmra.mrb[16].mxu0 %v1679_v32 }
 0xe0b   :  { %2191 = vmatprep.mubr.msk.f32.mxu0 %vm214_vm0, %v1682_v33 }
 0xe0e   :  { %1880 = vmatmul.mubr.f32.gmra.mrb[18].mxu0 %v1681_v34 }
 0xe12   :  { %v1797_v37 = vpop.permute.xlu0 %1796  ;;  %v1802_v43 = vpop.permute.xlu1 %1801 }
 0xedd   :  { %v1876_v35 = vpop.f32.mrb[16].mxu0 }
 0xede   :  { %v1878_v36 = vpop.f32.mrb[17].mxu0  ;;  %v1877_v38 = vadd.f32 %v1876_v35, %v1797_v37 }
 0xee0   :  { %v1885_v49 = vmax.f32 %v1877_v38, 0.0 }
 0xee1   :  { %v1881_v44 = vpop.f32.mrb[18].mxu0 }
 0xee2   :  { %v1882_v45 = vadd.f32 %v1881_v44, %v1802_v43  ;;  %v1883_v48 = vpop.f32.mrb[19].mxu0 }
 0xee4   :  { %v1886_v50 = vmax.f32 %v1882_v45, 0.0 }
 0xee6   :  { %v2966_v51 = vpack.i.bf16 %v1886_v50, %v1885_v49 }
 0xee8   :  { %2967 = vrot.lane.b32.xlu0 %v2966_v51, %s3888_s26 }
 0xf5a   :  { %v2968_v56 = vpop.permute.xlu0 %2967 }
 0xf5b   :  { %v2970_v57 = vunpack.i.h.bf16 %v2968_v56  ;;  %v2969_v58 = vunpack.i.l.bf16 %v2968_v56 }
 0xf5d   :  { %v1910_v59 = vsel %vm1898_vm10, %v2970_v57, 0.0  ;;  %v1911_v52 = vsel %vm1899_vm11, %v2970_v57, 0.0  ;;  %v1908_v60 = vsel %vm1898_vm10, %v2969_v58, 0.0  ;;  %v1909_v39 = vsel %vm1899_vm11, %v2969_v58, 0.0 }
 0xf5e   :  { %v1912_v61 = vpack.c.bf16 %v1910_v59, %v1908_v60  ;;  %v1913_v62 = vpack.c.bf16 %v1911_v52, %v1909_v39 }
 0xf60   :  { %1914 = vst.msk [vmem:[#allocation3] sm:$0xff] %vm325_vm13, %v1912_v61 }
 0xf61   :  { %1915 = vst.msk [vmem:[#allocation3 + $0x8] sm:$0xff] %vm327_vm12, %v1913_v62 }
 0xf67   :  { %v1924_v63 = vld [vmem:[#allocation3] sm:$0xff] }
 0xf68   :  { %v1928_v46 = vld [vmem:[#allocation3 + $0x8] sm:$0xff]  ;;  %2422 = vmatpush1.bf16.msra.mxu1 %v1924_v63  ;;  %v1931_v47 = vunpack.c.h.bf16 %v1924_v63  ;;  %v1929_v1 = vunpack.c.l.bf16 %v1924_v63 }
 0xf69   :  { %v1932_v0 = vunpack.c.h.bf16 %v1928_v46  ;;  %v1930_v3 = vunpack.c.l.bf16 %v1928_v46  ;;  %2423 = vmatprep.subr.bf16.mxu1 %v3057_v2 }
 0xf6b   :  { %v2976_v4 = vpack.i.bf16 %v1932_v0, %v1931_v47  ;;  %v2971_v5 = vpack.i.bf16 %v1930_v3, %v1929_v1 }
 0xf6d   :  { %2977 = vrot.lane.b32.xlu0 %v2976_v4, %s3889_s11  ;;  %2972 = vrot.lane.b32.xlu1 %v2971_v5, %s3889_s11 }
 0xf71   :  { %2987 = vrot.lane.b32.xlu0 %v2976_v4, %s3881_s1  ;;  %2982 = vrot.lane.b32.xlu1 %v2971_v5, %s3881_s1 }
 0xf75   :  { %2997 = vrot.lane.b32.xlu0 %v2976_v4, %s3882_s25  ;;  %2992 = vrot.lane.b32.xlu1 %v2971_v5, %s3882_s25 }
 0xf79   :  { %3007 = vrot.lane.b32.xlu0 %v2976_v4, %s3883_s8  ;;  %3002 = vrot.lane.b32.xlu1 %v2971_v5, %s3883_s8  ;;  %s3890_s8 = sld [smem:[#allocation13_spill]] }
 0xf7d   :  { %3017 = vrot.lane.b32.xlu0 %v2976_v4, %s3884_s4  ;;  %3012 = vrot.lane.b32.xlu1 %v2971_v5, %s3884_s4 }
 0xf7f   :  { %v1923_v7 = vld [vmem:[%s3890_s8 + $0x8] sm:$0xff]  ;;  %v1922_v8 = vld [vmem:[%s3890_s8] sm:$0xff] }
 0xf81   :  { %3027 = vrot.lane.b32.xlu0 %v2976_v4, %s3885_s28  ;;  %3022 = vrot.lane.b32.xlu1 %v2971_v5, %s3885_s28 }
 0xf85   :  { %3037 = vrot.lane.b32.xlu0 %v2976_v4, %s3887_s29  ;;  %3032 = vrot.lane.b32.xlu1 %v2971_v5, %s3887_s29 }
 0xf89   :  { %3047 = vrot.lane.b32.xlu0 %v2976_v4, %s3065_s27  ;;  %3042 = vrot.lane.b32.xlu1 %v2971_v5, %s3065_s27 }
 0xf8d   :  { %2040 = vperm.xlu0 %2539, %v1923_v7   ;;  %2035 = vperm.xlu1 %2540, %v1922_v8  }
 0xfdf   :  { %v2978_v9 = vpop.permute.xlu0 %2977  ;;  %v2973_v10 = vpop.permute.xlu1 %2972 }
 0xfe0   :  { %v2980_v12 = vunpack.i.h.bf16 %v2978_v9  ;;  %v2979_v13 = vunpack.i.l.bf16 %v2978_v9  ;;  %v2975_v14 = vunpack.i.h.bf16 %v2973_v10  ;;  %v2974_v15 = vunpack.i.l.bf16 %v2973_v10 }
 0xfe2   :  { %v1946_v16 = vsel %vm108_vm1, %v2979_v13, %v2980_v12  ;;  %v1945_v17 = vsel %vm108_vm1, %v2974_v15, %v2975_v14 }
 0xfe3   :  { %v2424_v18 = vpack.c.bf16 %v1946_v16, %v1945_v17  ;;  %v2988_v19 = vpop.permute.xlu0 %2987  ;;  %v2983_v20 = vpop.permute.xlu1 %2982 }
 0xfe4   :  { %v2990_v21 = vunpack.i.h.bf16 %v2988_v19  ;;  %v2989_v22 = vunpack.i.l.bf16 %v2988_v19  ;;  %v2985_v23 = vunpack.i.h.bf16 %v2983_v20  ;;  %v2984_v24 = vunpack.i.l.bf16 %v2983_v20 }
 0xfe5   :  { %2425 = vmatpush1.bf16.msra.mxu1 %v2424_v18 }
 0xfe6   :  { %v1958_v25 = vsel %vm121_vm2, %v2989_v22, %v2990_v21  ;;  %v1957_v26 = vsel %vm121_vm2, %v2984_v24, %v2985_v23  ;;  %2426 = vmatprep.subr.bf16.mxu1 %v3057_v2  ;;  %v1918_v22 = vld [vmem:[%s3832_s22] sm:$0xff]  ;;  %v1921_v23 = vld [vmem:[%s3832_s22 + $0x18] sm:$0xff]  ;;  %v1920_v24 = vld [vmem:[%s3832_s22 + $0x10] sm:$0xff] }
 0xfe7   :  { %v2427_v27 = vpack.c.bf16 %v1958_v25, %v1957_v26  ;;  %v2998_v28 = vpop.permute.xlu0 %2997  ;;  %v2993_v29 = vpop.permute.xlu1 %2992 }
 0xfe8   :  { %v3000_v30 = vunpack.i.h.bf16 %v2998_v28  ;;  %v2999_v31 = vunpack.i.l.bf16 %v2998_v28  ;;  %v2995_v32 = vunpack.i.h.bf16 %v2993_v29  ;;  %v2994_v33 = vunpack.i.l.bf16 %v2993_v29 }
 0xfe9   :  { %2428 = vmatpush1.bf16.msra.mxu1 %v2427_v27 }
 0xfea   :  { %v1970_v34 = vsel %vm134_vm3, %v2999_v31, %v3000_v30  ;;  %v1969_v35 = vsel %vm134_vm3, %v2994_v33, %v2995_v32  ;;  %2429 = vmatprep.subr.bf16.mxu1 %v3057_v2  ;;  %vm2163_vm3 = vcmask 1043512  }
 0xfeb   :  { %v2430_v36 = vpack.c.bf16 %v1970_v34, %v1969_v35  ;;  %v3008_v37 = vpop.permute.xlu0 %3007  ;;  %v3003_v38 = vpop.permute.xlu1 %3002  ;;  %v2126_v35 = vld [vmem:[%s3876_s3] sm:$0x3] }
 0xfec   :  { %v3010_v43 = vunpack.i.h.bf16 %v3008_v37  ;;  %v3009_v44 = vunpack.i.l.bf16 %v3008_v37  ;;  %v3005_v45 = vunpack.i.h.bf16 %v3003_v38  ;;  %v3004_v48 = vunpack.i.l.bf16 %v3003_v38 }
 0xfed   :  { %2431 = vmatpush1.bf16.msra.mxu1 %v2430_v36 }
 0xfee   :  { %v1982_v49 = vsel %vm147_vm4, %v3009_v44, %v3010_v43  ;;  %v1981_v50 = vsel %vm147_vm4, %v3004_v48, %v3005_v45  ;;  %2432 = vmatprep.subr.bf16.mxu1 %v3057_v2  ;;  %vm2164_vm4 = vcmask 56324  }
 0xfef   :  { %v2433_v51 = vpack.c.bf16 %v1982_v49, %v1981_v50  ;;  %v3018_v40 = vpop.permute.xlu0 %3017  ;;  %v3013_v53 = vpop.permute.xlu1 %3012 }
 0xff0   :  { %v3020_v54 = vunpack.i.h.bf16 %v3018_v40  ;;  %v3019_v55 = vunpack.i.l.bf16 %v3018_v40  ;;  %v3015_v56 = vunpack.i.h.bf16 %v3013_v53  ;;  %v3014_v57 = vunpack.i.l.bf16 %v3013_v53 }
 0xff1   :  { %2434 = vmatpush1.bf16.msra.mxu1 %v2433_v51 }
 0xff2   :  { %v1994_v58 = vsel %vm160_vm5, %v3019_v55, %v3020_v54  ;;  %v1993_v59 = vsel %vm160_vm5, %v3014_v57, %v3015_v56  ;;  %2435 = vmatprep.subr.bf16.mxu1 %v3057_v2  ;;  %vm2165_vm5 = vmor %vm2164_vm4, %vm2163_vm3 }
 0xff3   :  { %v2436_v52 = vpack.c.bf16 %v1994_v58, %v1993_v59  ;;  %v3028_v60 = vpop.permute.xlu0 %3027  ;;  %v3023_v39 = vpop.permute.xlu1 %3022 }
 0xff4   :  { %v3030_v61 = vunpack.i.h.bf16 %v3028_v60  ;;  %v3029_v62 = vunpack.i.l.bf16 %v3028_v60  ;;  %v3025_v63 = vunpack.i.h.bf16 %v3023_v39  ;;  %v3024_v46 = vunpack.i.l.bf16 %v3023_v39 }
 0xff5   :  { %2437 = vmatpush1.bf16.msra.mxu1 %v2436_v52 }
 0xff6   :  { %v2006_v47 = vsel %vm173_vm6, %v3029_v62, %v3030_v61  ;;  %v2005_v0 = vsel %vm173_vm6, %v3024_v46, %v3025_v63  ;;  %2438 = vmatprep.subr.bf16.mxu1 %v3057_v2 }
 0xff7   :  { %v2439_v1 = vpack.c.bf16 %v2006_v47, %v2005_v0  ;;  %v3038_v3 = vpop.permute.xlu0 %3037  ;;  %v3033_v4 = vpop.permute.xlu1 %3032 }
 0xff8   :  { %v3040_v5 = vunpack.i.h.bf16 %v3038_v3  ;;  %v3039_v6 = vunpack.i.l.bf16 %v3038_v3  ;;  %v3035_v7 = vunpack.i.h.bf16 %v3033_v4  ;;  %v3034_v8 = vunpack.i.l.bf16 %v3033_v4 }
 0xff9   :  { %2440 = vmatpush1.bf16.msra.mxu1 %v2439_v1 }
 0xffa   :  { %v2018_v9 = vsel %vm186_vm7, %v3039_v6, %v3040_v5  ;;  %v2017_v10 = vsel %vm186_vm7, %v3034_v8, %v3035_v7  ;;  %2441 = vmatprep.subr.bf16.mxu1 %v3057_v2 }
 0xffb   :  { %v2442_v12 = vpack.c.bf16 %v2018_v9, %v2017_v10  ;;  %v3048_v13 = vpop.permute.xlu0 %3047  ;;  %v3043_v14 = vpop.permute.xlu1 %3042 }
 0xffc   :  { %v3050_v15 = vunpack.i.h.bf16 %v3048_v13  ;;  %v3049_v16 = vunpack.i.l.bf16 %v3048_v13  ;;  %v3045_v17 = vunpack.i.h.bf16 %v3043_v14  ;;  %v3044_v18 = vunpack.i.l.bf16 %v3043_v14 }
 0xffd   :  { %2443 = vmatpush1.bf16.msra.mxu1 %v2442_v12 }
 0xffe   :  { %v2030_v19 = vsel %vm199_vm8, %v3049_v16, %v3050_v15  ;;  %v2029_v20 = vsel %vm199_vm8, %v3044_v18, %v3045_v17  ;;  %2444 = vmatprep.subr.bf16.mxu1 %v3057_v2 }
 0xfff   :  { %v2445_v21 = vpack.c.bf16 %v2030_v19, %v2029_v20 }
0x1001   :  { %2446 = vmatpush1.bf16.msra.mxu1 %v2445_v21 }
0x1004   :  { %2114 = vmatmul.mubr.f32.vlgmr.msra.gmra.mrb[12].mxu1 %v1918_v22 }
0x1005   :  { %2193 = vmatprep.mubr.msk.f32.mxu1 %vm214_vm0, %v1921_v23  ;;  %vm2127_vm0 = vcmp.gt.f32.partialorder %v2126_v35, 0.5 }
0x1006   :  { %v2128_v36 = vsel %vm2127_vm0, 1, %v3066_v11 }
0x1007   :  { %v2132_v37 = vrot.slane %v2128_v36, %v3274_v41  ;;  %v2136_v38 = vrot.slane %v2128_v36, %v3276_v42 }
0x1008   :  { %2119 = vmatmul.mubr.f32.gmra.mrb[14].mxu1 %v1920_v24 }
0x1009   :  { %vm2137_vm1 = vcmp.eq.s32.totalorder %v2132_v37, 1  ;;  %vm2138_vm2 = vcmp.eq.s32.totalorder %v2136_v38, 1 }
0x100c   :  { %v2036_v26 = vpop.permute.xlu1 %2035  ;;  %v2041_v28 = vpop.permute.xlu0 %2040 }
0x10d7   :  { %v2115_v2 = vpop.f32.mrb[12].mxu1 }
0x10d8   :  { %v2117_v25 = vpop.f32.mrb[13].mxu1  ;;  %v2116_v27 = vadd.f32 %v2115_v2, %v2036_v26 }
0x10da   :  { %v2124_v32 = vmax.f32 %v2116_v27, 0.0 }
0x10db   :  { %v2120_v29 = vpop.f32.mrb[14].mxu1 }
0x10dc   :  { %v2121_v30 = vadd.f32 %v2120_v29, %v2041_v28  ;;  %v2122_v31 = vpop.f32.mrb[15].mxu1 }
0x10de   :  { %v2125_v33 = vmax.f32 %v2121_v30, 0.0 }
0x10e0   :  { %v3051_v34 = vpack.i.bf16 %v2125_v33, %v2124_v32 }
0x10e2   :  { %3052 = vrot.lane.b32.xlu1 %v3051_v34, %s3888_s26 }
0x1154   :  { %v3053_v43 = vpop.permute.xlu1 %3052 }
0x1155   :  { %v3055_v44 = vunpack.i.h.bf16 %v3053_v43  ;;  %v3054_v45 = vunpack.i.l.bf16 %v3053_v43 }
0x1157   :  { %v2149_v48 = vsel %vm2137_vm1, %v3055_v44, 0.0  ;;  %v2150_v49 = vsel %vm2138_vm2, %v3055_v44, 0.0  ;;  %v2147_v50 = vsel %vm2137_vm1, %v3054_v45, 0.0  ;;  %v2148_v51 = vsel %vm2138_vm2, %v3054_v45, 0.0 }
0x1158   :  { %v2197_v40 = vpack.c.bf16 %v2150_v49, %v2149_v48  ;;  %v2196_v53 = vpack.c.bf16 %v2148_v51, %v2147_v50 }
0x115a   :  { %2167 = vst.msk [vmem:[%s3891_s24 + $0x8] sm:$0xff] %vm2165_vm5, %v2197_v40  ;;  %2166 = vst.msk [vmem:[%s3891_s24] sm:$0xff] %vm2165_vm5, %v2196_v53 }

</bundles_post_ra>
